<compile_context>
chip_gen: v7x
topology: tpu7x:2x2x1
jax: 0.10.0
libtpu: 0.0.40
codegen_flags: <defaults>
</compile_context>

<pallas_src>
import jax
import jax.numpy as jnp
import numpy as np
from jax.experimental import pallas as pl
from jax.experimental.pallas import tpu as pltpu


# ---------------------------- fused Pallas kernel ----------------------------

def _disc_fused_kernel(x_ref, s1_ref, b1_ref, s2_ref, b2_ref,
                       wf1_ref, bf1_ref, wf2_ref, bf2_ref, o_ref):
    # x_ref  : (1, 28*TB, 28) f32   image rows ordered (h, t) for the TB images of this tile
    # s1_ref : (5, 28, 240)  bf16   banded conv1 weights, one (28, 24*10) matrix per kh
    # s2_ref : (5, 230, 160) bf16   banded conv2 weights; K padded (odd pool1 columns = zero rows)
    # wf1_ref: (4, 140, 50)  bf16   fc1 weights, one (140, 50) slab per pooled-height row
    # wf2_ref: (1, 50)       bf16   fc2 weight row
    # b*_ref : f32 row vectors;  o_ref: (1, 1, TB) f32
    TB = o_ref.shape[2]
    x2d = x_ref[0].astype(jnp.bfloat16)                      # (28*TB, 28), rows (h, t)

    # ---- conv1 (1->10 ch, 5x5, valid): shift-and-matmul over kh ----
    y = jnp.dot(x2d[0:24 * TB, :], s1_ref[0], preferred_element_type=jnp.float32)
    for kh in range(1, 5):
        y = y + jnp.dot(x2d[kh * TB:(kh + 24) * TB, :], s1_ref[kh],
                        preferred_element_type=jnp.float32)
    y = y + b1_ref[...]                                      # (24*TB, 240): rows (i,t), cols (j,co)

    # ---- max_pool2d(2) + relu on the 24x24x10 feature map ----
    rmax = jnp.concatenate(
        [jnp.maximum(y[(2 * p) * TB:(2 * p + 1) * TB, :],
                     y[(2 * p + 1) * TB:(2 * p + 2) * TB, :])
         for p in range(12)], axis=0)                        # (12*TB, 240)  height-pooled
    # width pool: compare with the 10-lane-shifted copy; the stale "odd" columns are killed
    # by the zero rows pre-padded into s2_ref, so no lane compaction is needed.
    wmax = jnp.maximum(rmax[:, 0:230], rmax[:, 10:240])
    p1 = jnp.maximum(wmax, 0.0).astype(jnp.bfloat16)         # (12*TB, 230): rows (q,t)

    # ---- conv2 (10->20 ch, 5x5, valid); Dropout2d is identity in eval mode ----
    c2 = jnp.dot(p1[0:8 * TB, :], s2_ref[0], preferred_element_type=jnp.float32)
    for kh in range(1, 5):
        c2 = c2 + jnp.dot(p1[kh * TB:(kh + 8) * TB, :], s2_ref[kh],
                          preferred_element_type=jnp.float32)
    c2 = c2 + b2_ref[...]                                    # (8*TB, 160): rows (u,t), cols (v,co)

    # ---- max_pool2d(2) + relu on the 8x8x20 feature map ----
    rmax2 = jnp.concatenate(
        [jnp.maximum(c2[(2 * p) * TB:(2 * p + 1) * TB, :],
                     c2[(2 * p + 1) * TB:(2 * p + 2) * TB, :])
         for p in range(4)], axis=0)                         # (4*TB, 160)
    wmax2 = jnp.maximum(rmax2[:, 0:140], rmax2[:, 20:160])
    f = jnp.maximum(wmax2, 0.0).astype(jnp.bfloat16)         # (4*TB, 140): rows (u',t)

    # ---- fc1 + relu: sum of 4 sublane-aligned dots (no lane flatten / concat) ----
    h1 = jnp.dot(f[0:TB, :], wf1_ref[0], preferred_element_type=jnp.float32)
    for u in range(1, 4):
        h1 = h1 + jnp.dot(f[u * TB:(u + 1) * TB, :], wf1_ref[u],
                          preferred_element_type=jnp.float32)
    h1 = jnp.maximum(h1 + bf1_ref[...], 0.0)                 # (TB, 50)

    # TODO(synk): Dropout2d / F.dropout are identity here (eval / inference mode);
    #             training-mode stochastic dropout is not implemented.
    # ---- fc2 + sigmoid; contracted "row @ activations^T" so the result is lane-major ----
    z2 = jax.lax.dot_general(wf2_ref[...], h1.astype(jnp.bfloat16),
                             dimension_numbers=(((1,), (1,)), ((), ())),
                             preferred_element_type=jnp.float32)      # (1, TB)
    o_ref[0] = jax.nn.sigmoid(z2 + bf2_ref[...])


# ------------------ wrapper: weight/layout prep (traceable) + pallas_call ------------------

def discriminator_forward(x, params, tb=32):
    W1, b1, W2, b2, Wf1, bf1, Wf2, bf2 = params
    B = x.shape[0]
    assert x.shape[1:] == (1, 28, 28)
    assert tb % 16 == 0  # keeps every in-kernel bf16/f32 sublane slice tile-aligned

    # ---- banded conv1 weights: S1[kh, w, j*10+co] = W1[co,0,kh,w-j] for 0 <= w-j < 5 ----
    G1 = np.zeros((28, 24, 5), np.float32)
    for j in range(24):
        for k in range(5):
            G1[j + k, j, k] = 1.0
    W1t = jnp.transpose(W1[:, 0], (1, 2, 0))                               # (kh, kw, co)
    S1 = jnp.einsum('wjk,hkc->hwjc', jnp.asarray(G1), W1t).reshape(5, 28, 240)
    S1 = S1.astype(jnp.bfloat16)
    b1row = jnp.tile(b1.reshape(1, 10), (1, 24))                           # (1, 240) f32

    # ---- banded conv2 weights, K padded to the un-compacted pool1 layout ----
    G2 = np.zeros((12, 8, 5), np.float32)
    for v in range(8):
        for k in range(5):
            G2[v + k, v, k] = 1.0
    W2t = jnp.transpose(W2, (2, 3, 1, 0))                                  # (kh, kw, ci, co)
    S2 = jnp.einsum('qvk,hkic->hqivc', jnp.asarray(G2), W2t).reshape(5, 120, 160)
    # rows q*10+ci -> rows q*20+ci; zero rows at q*20+10..q*20+19 (garbage pool columns)
    S2p = jnp.pad(S2.reshape(5, 12, 10, 160), ((0, 0), (0, 0), (0, 10), (0, 0)))
    S2p = S2p.reshape(5, 240, 160)[:, :230, :].astype(jnp.bfloat16)        # (5, 230, 160)
    b2row = jnp.tile(b2.reshape(1, 20), (1, 8))                            # (1, 160) f32

    # ---- fc1 weights: one slab per pooled-height row, lane order (width, channel), K padded ----
    idx = np.array([[[co * 16 + u * 4 + r for co in range(20)]
                     for r in range(4)] for u in range(4)], np.int32)      # (u, r, co)
    Wsel = Wf1[:, idx.reshape(-1)].T.reshape(4, 4, 20, 50)                 # (u, r, co, 50)
    Wf1p = jnp.pad(Wsel, ((0, 0), (0, 0), (0, 20), (0, 0)))                # zero garbage cols
    Wf1p = Wf1p.reshape(4, 160, 50)[:, :140, :].astype(jnp.bfloat16)       # (4, 140, 50)
    bf1row = bf1.reshape(1, 50)
    Wf2row = Wf2.reshape(1, 50).astype(jnp.bfloat16)
    bf2r = bf2.reshape(1, 1)

    # ---- batch tiling: pad to a multiple of tb; keep the grid even (when >= 2) for v7x ----
    pad = (-B) % tb
    G = (B + pad) // tb
    if G >= 2 and G % 2 == 1:
        pad += tb
        G += 1
    Bp = B + pad
    x2 = x[:, 0]                                                           # (B, 28, 28)
    if pad:
        x2 = jnp.concatenate([x2, jnp.zeros((pad, 28, 28), x2.dtype)], axis=0)
    # (h, t)-interleaved rows per tile; one extra XLA pass over x, negligible vs. the kernel work.
    xk = x2.reshape(G, tb, 28, 28).transpose(0, 2, 1, 3).reshape(G, 28 * tb, 28)

    def full(shape):
        return pl.BlockSpec(shape, lambda g: (0,) * len(shape))

    out = pl.pallas_call(
        _disc_fused_kernel,
        out_shape=jax.ShapeDtypeStruct((G, 1, tb), jnp.float32),
        grid=(G,),
        in_specs=[pl.BlockSpec((1, 28 * tb, 28), lambda g: (g, 0, 0)),
                  full((5, 28, 240)), full((1, 240)),
                  full((5, 230, 160)), full((1, 160)),
                  full((4, 140, 50)), full((1, 50)),
                  full((1, 50)), full((1, 1))],
        out_specs=pl.BlockSpec((1, 1, tb), lambda g: (g, 0, 0)),
        compiler_params=pltpu.CompilerParams(dimension_semantics=("parallel",)),
    )(xk, S1, b1row, S2p, b2row, Wf1p, bf1row, Wf2row, bf2r)

    return out.reshape(Bp)[:B].reshape(B, 1)


# ------------------------ pure-JAX reference (sanity check) ------------------------

def _reference_forward(x, params):
    W1, b1, W2, b2, Wf1, bf1, Wf2, bf2 = params
    dn = ("NCHW", "OIHW", "NCHW")
    neg_inf = jnp.array(-jnp.inf, jnp.float32)
    y = jax.lax.conv_general_dilated(x, W1, (1, 1), "VALID", dimension_numbers=dn)
    y = y + b1[None, :, None, None]
    y = jax.lax.reduce_window(y, neg_inf, jax.lax.max, (1, 1, 2, 2), (1, 1, 2, 2), "VALID")
    y = jnp.maximum(y, 0.0)
    y = jax.lax.conv_general_dilated(y, W2, (1, 1), "VALID", dimension_numbers=dn)
    y = y + b2[None, :, None, None]
    y = jax.lax.reduce_window(y, neg_inf, jax.lax.max, (1, 1, 2, 2), (1, 1, 2, 2), "VALID")
    y = jnp.maximum(y, 0.0)
    y = y.reshape(y.shape[0], 320)
    y = jnp.maximum(y @ Wf1.T + bf1, 0.0)
    y = y @ Wf2.T + bf2
    return jax.nn.sigmoid(y)


if __name__ == "__main__":
    key = jax.random.PRNGKey(0)
    ks = jax.random.split(key, 9)
    # Deterministic synthetic parameters with the shapes implied by the module's __init__.
    W1 = jax.random.normal(ks[0], (10, 1, 5, 5), jnp.float32) * 0.2    # conv1.weight
    b1 = jax.random.normal(ks[1], (10,), jnp.float32) * 0.1            # conv1.bias
    W2 = jax.random.normal(ks[2], (20, 10, 5, 5), jnp.float32) * 0.1   # conv2.weight
    b2 = jax.random.normal(ks[3], (20,), jnp.float32) * 0.1            # conv2.bias
    Wf1 = jax.random.normal(ks[4], (50, 320), jnp.float32) * 0.05      # fc1.weight
    bf1 = jax.random.normal(ks[5], (50,), jnp.float32) * 0.1           # fc1.bias
    Wf2 = jax.random.normal(ks[6], (1, 50), jnp.float32) * 0.1         # fc2.weight
    bf2 = jax.random.normal(ks[7], (1,), jnp.float32) * 0.1            # fc2.bias
    params = (W1, b1, W2, b2, Wf1, bf1, Wf2, bf2)

    # fc1 (320 = 20*4*4) fixes the spatial size at 28x28.  Batch 64 -> 2 grid steps of 32
    # images each (even grid so both TensorCores get work on v7x).
    x = jax.random.normal(ks[8], (64, 1, 28, 28), jnp.float32)

    y = jax.jit(discriminator_forward)(x, params)
    y = jax.block_until_ready(y)

    y_ref = _reference_forward(x, params)
    assert y.shape == (64, 1)
    assert bool(jnp.all(jnp.isfinite(y)))
    # bf16 MXU operands in the kernel vs. default-precision (bf16 MXU) XLA reference;
    # layout/ordering bugs would blow far past this tolerance.
    np.testing.assert_allclose(np.asarray(y), np.asarray(y_ref), atol=2e-2, rtol=2e-2)
    print("KERNEL_OK")
</pallas_src>

<mosaic_0001>
module attributes {stable_mosaic.version = 11 : i64} {
  func.func @_disc_fused_kernel(%arg0: i32, %arg1: memref<1x896x28xf32, #tpu.memory_space<vmem>>, %arg2: memref<5x28x240xbf16, #tpu.memory_space<vmem>>, %arg3: memref<1x240xf32, #tpu.memory_space<vmem>>, %arg4: memref<5x230x160xbf16, #tpu.memory_space<vmem>>, %arg5: memref<1x160xf32, #tpu.memory_space<vmem>>, %arg6: memref<4x140x50xbf16, #tpu.memory_space<vmem>>, %arg7: memref<1x50xf32, #tpu.memory_space<vmem>>, %arg8: memref<1x50xbf16, #tpu.memory_space<vmem>>, %arg9: memref<1x1xf32, #tpu.memory_space<vmem>>, %arg10: memref<1x1x32xf32, #tpu.memory_space<vmem>>) attributes {dimension_semantics = [#tpu.dimension_semantics<parallel>], iteration_bounds = array<i64: 2>, scalar_prefetch = 0 : i64, scratch_operands = 0 : i64, tpu.core_type = #tpu.core_type<tc>, window_params = [{transform_indices = @transform_0, window_bounds = array<i64: 1, 896, 28>}, {pipeline_mode = #tpu.pipeline_mode<synchronous>, transform_indices = @transform_1, window_bounds = array<i64: 5, 28, 240>}, {pipeline_mode = #tpu.pipeline_mode<synchronous>, transform_indices = @transform_2, window_bounds = array<i64: 1, 240>}, {pipeline_mode = #tpu.pipeline_mode<synchronous>, transform_indices = @transform_3, window_bounds = array<i64: 5, 230, 160>}, {pipeline_mode = #tpu.pipeline_mode<synchronous>, transform_indices = @transform_4, window_bounds = array<i64: 1, 160>}, {pipeline_mode = #tpu.pipeline_mode<synchronous>, transform_indices = @transform_5, window_bounds = array<i64: 4, 140, 50>}, {pipeline_mode = #tpu.pipeline_mode<synchronous>, transform_indices = @transform_6, window_bounds = array<i64: 1, 50>}, {pipeline_mode = #tpu.pipeline_mode<synchronous>, transform_indices = @transform_7, window_bounds = array<i64: 1, 50>}, {pipeline_mode = #tpu.pipeline_mode<synchronous>, transform_indices = @transform_8, window_bounds = array<i64: 1, 1>}, {transform_indices = @transform_9, window_bounds = array<i64: 1, 1, 32>}]} {
    %c0 = arith.constant 0 : index
    %c0_0 = arith.constant 0 : index
    %c0_1 = arith.constant 0 : index
    %0 = vector.load %arg1[%c0, %c0_0, %c0_1] : memref<1x896x28xf32, #tpu.memory_space<vmem>>, vector<1x896x28xf32>
    %1 = vector.shape_cast %0 : vector<1x896x28xf32> to vector<896x28xf32>
    %2 = arith.truncf %1 : vector<896x28xf32> to vector<896x28xbf16>
    %3 = vector.extract_strided_slice %2 {offsets = [0, 0], sizes = [768, 28], strides = [1, 1]} : vector<896x28xbf16> to vector<768x28xbf16>
    %c0_2 = arith.constant 0 : index
    %c0_3 = arith.constant 0 : index
    %c0_4 = arith.constant 0 : index
    %4 = vector.load %arg2[%c0_2, %c0_3, %c0_4] : memref<5x28x240xbf16, #tpu.memory_space<vmem>>, vector<1x28x240xbf16>
    %5 = vector.shape_cast %4 : vector<1x28x240xbf16> to vector<28x240xbf16>
    %cst = arith.constant dense<0.000000e+00> : vector<768x240xf32>
    %6 = tpu.matmul %3, %5, %cst {dimension_numbers = #tpu.dot_dimension_numbers<[1], [0], [0], [1], [0, 0, 1, 1], [], []>} : vector<768x28xbf16>, vector<28x240xbf16>, vector<768x240xf32> -> vector<768x240xf32>
    %7 = vector.extract_strided_slice %2 {offsets = [32, 0], sizes = [768, 28], strides = [1, 1]} : vector<896x28xbf16> to vector<768x28xbf16>
    %c1 = arith.constant 1 : index
    %c0_5 = arith.constant 0 : index
    %c0_6 = arith.constant 0 : index
    %8 = vector.load %arg2[%c1, %c0_5, %c0_6] : memref<5x28x240xbf16, #tpu.memory_space<vmem>>, vector<1x28x240xbf16>
    %9 = vector.shape_cast %8 : vector<1x28x240xbf16> to vector<28x240xbf16>
    %cst_7 = arith.constant dense<0.000000e+00> : vector<768x240xf32>
    %10 = tpu.matmul %7, %9, %cst_7 {dimension_numbers = #tpu.dot_dimension_numbers<[1], [0], [0], [1], [0, 0, 1, 1], [], []>} : vector<768x28xbf16>, vector<28x240xbf16>, vector<768x240xf32> -> vector<768x240xf32>
    %11 = arith.addf %6, %10 : vector<768x240xf32>
    %12 = vector.extract_strided_slice %2 {offsets = [64, 0], sizes = [768, 28], strides = [1, 1]} : vector<896x28xbf16> to vector<768x28xbf16>
    %c2 = arith.constant 2 : index
    %c0_8 = arith.constant 0 : index
    %c0_9 = arith.constant 0 : index
    %13 = vector.load %arg2[%c2, %c0_8, %c0_9] : memref<5x28x240xbf16, #tpu.memory_space<vmem>>, vector<1x28x240xbf16>
    %14 = vector.shape_cast %13 : vector<1x28x240xbf16> to vector<28x240xbf16>
    %cst_10 = arith.constant dense<0.000000e+00> : vector<768x240xf32>
    %15 = tpu.matmul %12, %14, %cst_10 {dimension_numbers = #tpu.dot_dimension_numbers<[1], [0], [0], [1], [0, 0, 1, 1], [], []>} : vector<768x28xbf16>, vector<28x240xbf16>, vector<768x240xf32> -> vector<768x240xf32>
    %16 = arith.addf %11, %15 : vector<768x240xf32>
    %17 = vector.extract_strided_slice %2 {offsets = [96, 0], sizes = [768, 28], strides = [1, 1]} : vector<896x28xbf16> to vector<768x28xbf16>
    %c3 = arith.constant 3 : index
    %c0_11 = arith.constant 0 : index
    %c0_12 = arith.constant 0 : index
    %18 = vector.load %arg2[%c3, %c0_11, %c0_12] : memref<5x28x240xbf16, #tpu.memory_space<vmem>>, vector<1x28x240xbf16>
    %19 = vector.shape_cast %18 : vector<1x28x240xbf16> to vector<28x240xbf16>
    %cst_13 = arith.constant dense<0.000000e+00> : vector<768x240xf32>
    %20 = tpu.matmul %17, %19, %cst_13 {dimension_numbers = #tpu.dot_dimension_numbers<[1], [0], [0], [1], [0, 0, 1, 1], [], []>} : vector<768x28xbf16>, vector<28x240xbf16>, vector<768x240xf32> -> vector<768x240xf32>
    %21 = arith.addf %16, %20 : vector<768x240xf32>
    %22 = vector.extract_strided_slice %2 {offsets = [128, 0], sizes = [768, 28], strides = [1, 1]} : vector<896x28xbf16> to vector<768x28xbf16>
    %c4 = arith.constant 4 : index
    %c0_14 = arith.constant 0 : index
    %c0_15 = arith.constant 0 : index
    %23 = vector.load %arg2[%c4, %c0_14, %c0_15] : memref<5x28x240xbf16, #tpu.memory_space<vmem>>, vector<1x28x240xbf16>
    %24 = vector.shape_cast %23 : vector<1x28x240xbf16> to vector<28x240xbf16>
    %cst_16 = arith.constant dense<0.000000e+00> : vector<768x240xf32>
    %25 = tpu.matmul %22, %24, %cst_16 {dimension_numbers = #tpu.dot_dimension_numbers<[1], [0], [0], [1], [0, 0, 1, 1], [], []>} : vector<768x28xbf16>, vector<28x240xbf16>, vector<768x240xf32> -> vector<768x240xf32>
    %26 = arith.addf %21, %25 : vector<768x240xf32>
    %c0_17 = arith.constant 0 : index
    %c0_18 = arith.constant 0 : index
    %27 = vector.load %arg3[%c0_17, %c0_18] : memref<1x240xf32, #tpu.memory_space<vmem>>, vector<1x240xf32>
    %28 = vector.broadcast %27 : vector<1x240xf32> to vector<768x240xf32>
    %29 = arith.addf %26, %28 : vector<768x240xf32>
    %30 = vector.extract_strided_slice %29 {offsets = [0, 0], sizes = [32, 240], strides = [1, 1]} : vector<768x240xf32> to vector<32x240xf32>
    %31 = vector.extract_strided_slice %29 {offsets = [32, 0], sizes = [32, 240], strides = [1, 1]} : vector<768x240xf32> to vector<32x240xf32>
    %32 = arith.maximumf %30, %31 : vector<32x240xf32>
    %33 = vector.extract_strided_slice %29 {offsets = [64, 0], sizes = [32, 240], strides = [1, 1]} : vector<768x240xf32> to vector<32x240xf32>
    %34 = vector.extract_strided_slice %29 {offsets = [96, 0], sizes = [32, 240], strides = [1, 1]} : vector<768x240xf32> to vector<32x240xf32>
    %35 = arith.maximumf %33, %34 : vector<32x240xf32>
    %36 = vector.extract_strided_slice %29 {offsets = [128, 0], sizes = [32, 240], strides = [1, 1]} : vector<768x240xf32> to vector<32x240xf32>
    %37 = vector.extract_strided_slice %29 {offsets = [160, 0], sizes = [32, 240], strides = [1, 1]} : vector<768x240xf32> to vector<32x240xf32>
    %38 = arith.maximumf %36, %37 : vector<32x240xf32>
    %39 = vector.extract_strided_slice %29 {offsets = [192, 0], sizes = [32, 240], strides = [1, 1]} : vector<768x240xf32> to vector<32x240xf32>
    %40 = vector.extract_strided_slice %29 {offsets = [224, 0], sizes = [32, 240], strides = [1, 1]} : vector<768x240xf32> to vector<32x240xf32>
    %41 = arith.maximumf %39, %40 : vector<32x240xf32>
    %42 = vector.extract_strided_slice %29 {offsets = [256, 0], sizes = [32, 240], strides = [1, 1]} : vector<768x240xf32> to vector<32x240xf32>
    %43 = vector.extract_strided_slice %29 {offsets = [288, 0], sizes = [32, 240], strides = [1, 1]} : vector<768x240xf32> to vector<32x240xf32>
    %44 = arith.maximumf %42, %43 : vector<32x240xf32>
    %45 = vector.extract_strided_slice %29 {offsets = [320, 0], sizes = [32, 240], strides = [1, 1]} : vector<768x240xf32> to vector<32x240xf32>
    %46 = vector.extract_strided_slice %29 {offsets = [352, 0], sizes = [32, 240], strides = [1, 1]} : vector<768x240xf32> to vector<32x240xf32>
    %47 = arith.maximumf %45, %46 : vector<32x240xf32>
    %48 = vector.extract_strided_slice %29 {offsets = [384, 0], sizes = [32, 240], strides = [1, 1]} : vector<768x240xf32> to vector<32x240xf32>
    %49 = vector.extract_strided_slice %29 {offsets = [416, 0], sizes = [32, 240], strides = [1, 1]} : vector<768x240xf32> to vector<32x240xf32>
    %50 = arith.maximumf %48, %49 : vector<32x240xf32>
    %51 = vector.extract_strided_slice %29 {offsets = [448, 0], sizes = [32, 240], strides = [1, 1]} : vector<768x240xf32> to vector<32x240xf32>
    %52 = vector.extract_strided_slice %29 {offsets = [480, 0], sizes = [32, 240], strides = [1, 1]} : vector<768x240xf32> to vector<32x240xf32>
    %53 = arith.maximumf %51, %52 : vector<32x240xf32>
    %54 = vector.extract_strided_slice %29 {offsets = [512, 0], sizes = [32, 240], strides = [1, 1]} : vector<768x240xf32> to vector<32x240xf32>
    %55 = vector.extract_strided_slice %29 {offsets = [544, 0], sizes = [32, 240], strides = [1, 1]} : vector<768x240xf32> to vector<32x240xf32>
    %56 = arith.maximumf %54, %55 : vector<32x240xf32>
    %57 = vector.extract_strided_slice %29 {offsets = [576, 0], sizes = [32, 240], strides = [1, 1]} : vector<768x240xf32> to vector<32x240xf32>
    %58 = vector.extract_strided_slice %29 {offsets = [608, 0], sizes = [32, 240], strides = [1, 1]} : vector<768x240xf32> to vector<32x240xf32>
    %59 = arith.maximumf %57, %58 : vector<32x240xf32>
    %60 = vector.extract_strided_slice %29 {offsets = [640, 0], sizes = [32, 240], strides = [1, 1]} : vector<768x240xf32> to vector<32x240xf32>
    %61 = vector.extract_strided_slice %29 {offsets = [672, 0], sizes = [32, 240], strides = [1, 1]} : vector<768x240xf32> to vector<32x240xf32>
    %62 = arith.maximumf %60, %61 : vector<32x240xf32>
    %63 = vector.extract_strided_slice %29 {offsets = [704, 0], sizes = [32, 240], strides = [1, 1]} : vector<768x240xf32> to vector<32x240xf32>
    %64 = vector.extract_strided_slice %29 {offsets = [736, 0], sizes = [32, 240], strides = [1, 1]} : vector<768x240xf32> to vector<32x240xf32>
    %65 = arith.maximumf %63, %64 : vector<32x240xf32>
    %66 = tpu.concatenate %32, %35, %38, %41, %44, %47, %50, %53, %56, %59, %62, %65 in 0 : vector<32x240xf32>, vector<32x240xf32>, vector<32x240xf32>, vector<32x240xf32>, vector<32x240xf32>, vector<32x240xf32>, vector<32x240xf32>, vector<32x240xf32>, vector<32x240xf32>, vector<32x240xf32>, vector<32x240xf32>, vector<32x240xf32> -> vector<384x240xf32>
    %67 = vector.extract_strided_slice %66 {offsets = [0, 0], sizes = [384, 230], strides = [1, 1]} : vector<384x240xf32> to vector<384x230xf32>
    %68 = vector.extract_strided_slice %66 {offsets = [0, 10], sizes = [384, 230], strides = [1, 1]} : vector<384x240xf32> to vector<384x230xf32>
    %69 = arith.maximumf %67, %68 : vector<384x230xf32>
    %cst_19 = arith.constant 0.000000e+00 : f32
    %70 = vector.broadcast %cst_19 : f32 to vector<384x230xf32>
    %71 = arith.maximumf %69, %70 : vector<384x230xf32>
    %72 = arith.truncf %71 : vector<384x230xf32> to vector<384x230xbf16>
    %73 = vector.extract_strided_slice %72 {offsets = [0, 0], sizes = [256, 230], strides = [1, 1]} : vector<384x230xbf16> to vector<256x230xbf16>
    %c0_20 = arith.constant 0 : index
    %c0_21 = arith.constant 0 : index
    %c0_22 = arith.constant 0 : index
    %74 = vector.load %arg4[%c0_20, %c0_21, %c0_22] : memref<5x230x160xbf16, #tpu.memory_space<vmem>>, vector<1x230x160xbf16>
    %75 = vector.shape_cast %74 : vector<1x230x160xbf16> to vector<230x160xbf16>
    %cst_23 = arith.constant dense<0.000000e+00> : vector<256x160xf32>
    %76 = tpu.matmul %73, %75, %cst_23 {dimension_numbers = #tpu.dot_dimension_numbers<[1], [0], [0], [1], [0, 0, 1, 1], [], []>} : vector<256x230xbf16>, vector<230x160xbf16>, vector<256x160xf32> -> vector<256x160xf32>
    %77 = vector.extract_strided_slice %72 {offsets = [32, 0], sizes = [256, 230], strides = [1, 1]} : vector<384x230xbf16> to vector<256x230xbf16>
    %c1_24 = arith.constant 1 : index
    %c0_25 = arith.constant 0 : index
    %c0_26 = arith.constant 0 : index
    %78 = vector.load %arg4[%c1_24, %c0_25, %c0_26] : memref<5x230x160xbf16, #tpu.memory_space<vmem>>, vector<1x230x160xbf16>
    %79 = vector.shape_cast %78 : vector<1x230x160xbf16> to vector<230x160xbf16>
    %cst_27 = arith.constant dense<0.000000e+00> : vector<256x160xf32>
    %80 = tpu.matmul %77, %79, %cst_27 {dimension_numbers = #tpu.dot_dimension_numbers<[1], [0], [0], [1], [0, 0, 1, 1], [], []>} : vector<256x230xbf16>, vector<230x160xbf16>, vector<256x160xf32> -> vector<256x160xf32>
    %81 = arith.addf %76, %80 : vector<256x160xf32>
    %82 = vector.extract_strided_slice %72 {offsets = [64, 0], sizes = [256, 230], strides = [1, 1]} : vector<384x230xbf16> to vector<256x230xbf16>
    %c2_28 = arith.constant 2 : index
    %c0_29 = arith.constant 0 : index
    %c0_30 = arith.constant 0 : index
    %83 = vector.load %arg4[%c2_28, %c0_29, %c0_30] : memref<5x230x160xbf16, #tpu.memory_space<vmem>>, vector<1x230x160xbf16>
    %84 = vector.shape_cast %83 : vector<1x230x160xbf16> to vector<230x160xbf16>
    %cst_31 = arith.constant dense<0.000000e+00> : vector<256x160xf32>
    %85 = tpu.matmul %82, %84, %cst_31 {dimension_numbers = #tpu.dot_dimension_numbers<[1], [0], [0], [1], [0, 0, 1, 1], [], []>} : vector<256x230xbf16>, vector<230x160xbf16>, vector<256x160xf32> -> vector<256x160xf32>
    %86 = arith.addf %81, %85 : vector<256x160xf32>
    %87 = vector.extract_strided_slice %72 {offsets = [96, 0], sizes = [256, 230], strides = [1, 1]} : vector<384x230xbf16> to vector<256x230xbf16>
    %c3_32 = arith.constant 3 : index
    %c0_33 = arith.constant 0 : index
    %c0_34 = arith.constant 0 : index
    %88 = vector.load %arg4[%c3_32, %c0_33, %c0_34] : memref<5x230x160xbf16, #tpu.memory_space<vmem>>, vector<1x230x160xbf16>
    %89 = vector.shape_cast %88 : vector<1x230x160xbf16> to vector<230x160xbf16>
    %cst_35 = arith.constant dense<0.000000e+00> : vector<256x160xf32>
    %90 = tpu.matmul %87, %89, %cst_35 {dimension_numbers = #tpu.dot_dimension_numbers<[1], [0], [0], [1], [0, 0, 1, 1], [], []>} : vector<256x230xbf16>, vector<230x160xbf16>, vector<256x160xf32> -> vector<256x160xf32>
    %91 = arith.addf %86, %90 : vector<256x160xf32>
    %92 = vector.extract_strided_slice %72 {offsets = [128, 0], sizes = [256, 230], strides = [1, 1]} : vector<384x230xbf16> to vector<256x230xbf16>
    %c4_36 = arith.constant 4 : index
    %c0_37 = arith.constant 0 : index
    %c0_38 = arith.constant 0 : index
    %93 = vector.load %arg4[%c4_36, %c0_37, %c0_38] : memref<5x230x160xbf16, #tpu.memory_space<vmem>>, vector<1x230x160xbf16>
    %94 = vector.shape_cast %93 : vector<1x230x160xbf16> to vector<230x160xbf16>
    %cst_39 = arith.constant dense<0.000000e+00> : vector<256x160xf32>
    %95 = tpu.matmul %92, %94, %cst_39 {dimension_numbers = #tpu.dot_dimension_numbers<[1], [0], [0], [1], [0, 0, 1, 1], [], []>} : vector<256x230xbf16>, vector<230x160xbf16>, vector<256x160xf32> -> vector<256x160xf32>
    %96 = arith.addf %91, %95 : vector<256x160xf32>
    %c0_40 = arith.constant 0 : index
    %c0_41 = arith.constant 0 : index
    %97 = vector.load %arg5[%c0_40, %c0_41] : memref<1x160xf32, #tpu.memory_space<vmem>>, vector<1x160xf32>
    %98 = vector.broadcast %97 : vector<1x160xf32> to vector<256x160xf32>
    %99 = arith.addf %96, %98 : vector<256x160xf32>
    %100 = vector.extract_strided_slice %99 {offsets = [0, 0], sizes = [32, 160], strides = [1, 1]} : vector<256x160xf32> to vector<32x160xf32>
    %101 = vector.extract_strided_slice %99 {offsets = [32, 0], sizes = [32, 160], strides = [1, 1]} : vector<256x160xf32> to vector<32x160xf32>
    %102 = arith.maximumf %100, %101 : vector<32x160xf32>
    %103 = vector.extract_strided_slice %99 {offsets = [64, 0], sizes = [32, 160], strides = [1, 1]} : vector<256x160xf32> to vector<32x160xf32>
    %104 = vector.extract_strided_slice %99 {offsets = [96, 0], sizes = [32, 160], strides = [1, 1]} : vector<256x160xf32> to vector<32x160xf32>
    %105 = arith.maximumf %103, %104 : vector<32x160xf32>
    %106 = vector.extract_strided_slice %99 {offsets = [128, 0], sizes = [32, 160], strides = [1, 1]} : vector<256x160xf32> to vector<32x160xf32>
    %107 = vector.extract_strided_slice %99 {offsets = [160, 0], sizes = [32, 160], strides = [1, 1]} : vector<256x160xf32> to vector<32x160xf32>
    %108 = arith.maximumf %106, %107 : vector<32x160xf32>
    %109 = vector.extract_strided_slice %99 {offsets = [192, 0], sizes = [32, 160], strides = [1, 1]} : vector<256x160xf32> to vector<32x160xf32>
    %110 = vector.extract_strided_slice %99 {offsets = [224, 0], sizes = [32, 160], strides = [1, 1]} : vector<256x160xf32> to vector<32x160xf32>
    %111 = arith.maximumf %109, %110 : vector<32x160xf32>
    %112 = tpu.concatenate %102, %105, %108, %111 in 0 : vector<32x160xf32>, vector<32x160xf32>, vector<32x160xf32>, vector<32x160xf32> -> vector<128x160xf32>
    %113 = vector.extract_strided_slice %112 {offsets = [0, 0], sizes = [128, 140], strides = [1, 1]} : vector<128x160xf32> to vector<128x140xf32>
    %114 = vector.extract_strided_slice %112 {offsets = [0, 20], sizes = [128, 140], strides = [1, 1]} : vector<128x160xf32> to vector<128x140xf32>
    %115 = arith.maximumf %113, %114 : vector<128x140xf32>
    %cst_42 = arith.constant 0.000000e+00 : f32
    %116 = vector.broadcast %cst_42 : f32 to vector<128x140xf32>
    %117 = arith.maximumf %115, %116 : vector<128x140xf32>
    %118 = arith.truncf %117 : vector<128x140xf32> to vector<128x140xbf16>
    %119 = vector.extract_strided_slice %118 {offsets = [0, 0], sizes = [32, 140], strides = [1, 1]} : vector<128x140xbf16> to vector<32x140xbf16>
    %c0_43 = arith.constant 0 : index
    %c0_44 = arith.constant 0 : index
    %c0_45 = arith.constant 0 : index
    %120 = vector.load %arg6[%c0_43, %c0_44, %c0_45] : memref<4x140x50xbf16, #tpu.memory_space<vmem>>, vector<1x140x50xbf16>
    %121 = vector.shape_cast %120 : vector<1x140x50xbf16> to vector<140x50xbf16>
    %cst_46 = arith.constant dense<0.000000e+00> : vector<32x50xf32>
    %122 = tpu.matmul %119, %121, %cst_46 {dimension_numbers = #tpu.dot_dimension_numbers<[1], [0], [0], [1], [0, 0, 1, 1], [], []>} : vector<32x140xbf16>, vector<140x50xbf16>, vector<32x50xf32> -> vector<32x50xf32>
    %123 = vector.extract_strided_slice %118 {offsets = [32, 0], sizes = [32, 140], strides = [1, 1]} : vector<128x140xbf16> to vector<32x140xbf16>
    %c1_47 = arith.constant 1 : index
    %c0_48 = arith.constant 0 : index
    %c0_49 = arith.constant 0 : index
    %124 = vector.load %arg6[%c1_47, %c0_48, %c0_49] : memref<4x140x50xbf16, #tpu.memory_space<vmem>>, vector<1x140x50xbf16>
    %125 = vector.shape_cast %124 : vector<1x140x50xbf16> to vector<140x50xbf16>
    %cst_50 = arith.constant dense<0.000000e+00> : vector<32x50xf32>
    %126 = tpu.matmul %123, %125, %cst_50 {dimension_numbers = #tpu.dot_dimension_numbers<[1], [0], [0], [1], [0, 0, 1, 1], [], []>} : vector<32x140xbf16>, vector<140x50xbf16>, vector<32x50xf32> -> vector<32x50xf32>
    %127 = arith.addf %122, %126 : vector<32x50xf32>
    %128 = vector.extract_strided_slice %118 {offsets = [64, 0], sizes = [32, 140], strides = [1, 1]} : vector<128x140xbf16> to vector<32x140xbf16>
    %c2_51 = arith.constant 2 : index
    %c0_52 = arith.constant 0 : index
    %c0_53 = arith.constant 0 : index
    %129 = vector.load %arg6[%c2_51, %c0_52, %c0_53] : memref<4x140x50xbf16, #tpu.memory_space<vmem>>, vector<1x140x50xbf16>
    %130 = vector.shape_cast %129 : vector<1x140x50xbf16> to vector<140x50xbf16>
    %cst_54 = arith.constant dense<0.000000e+00> : vector<32x50xf32>
    %131 = tpu.matmul %128, %130, %cst_54 {dimension_numbers = #tpu.dot_dimension_numbers<[1], [0], [0], [1], [0, 0, 1, 1], [], []>} : vector<32x140xbf16>, vector<140x50xbf16>, vector<32x50xf32> -> vector<32x50xf32>
    %132 = arith.addf %127, %131 : vector<32x50xf32>
    %133 = vector.extract_strided_slice %118 {offsets = [96, 0], sizes = [32, 140], strides = [1, 1]} : vector<128x140xbf16> to vector<32x140xbf16>
    %c3_55 = arith.constant 3 : index
    %c0_56 = arith.constant 0 : index
    %c0_57 = arith.constant 0 : index
    %134 = vector.load %arg6[%c3_55, %c0_56, %c0_57] : memref<4x140x50xbf16, #tpu.memory_space<vmem>>, vector<1x140x50xbf16>
    %135 = vector.shape_cast %134 : vector<1x140x50xbf16> to vector<140x50xbf16>
    %cst_58 = arith.constant dense<0.000000e+00> : vector<32x50xf32>
    %136 = tpu.matmul %133, %135, %cst_58 {dimension_numbers = #tpu.dot_dimension_numbers<[1], [0], [0], [1], [0, 0, 1, 1], [], []>} : vector<32x140xbf16>, vector<140x50xbf16>, vector<32x50xf32> -> vector<32x50xf32>
    %137 = arith.addf %132, %136 : vector<32x50xf32>
    %c0_59 = arith.constant 0 : index
    %c0_60 = arith.constant 0 : index
    %138 = vector.load %arg7[%c0_59, %c0_60] : memref<1x50xf32, #tpu.memory_space<vmem>>, vector<1x50xf32>
    %139 = vector.broadcast %138 : vector<1x50xf32> to vector<32x50xf32>
    %140 = arith.addf %137, %139 : vector<32x50xf32>
    %cst_61 = arith.constant 0.000000e+00 : f32
    %141 = vector.broadcast %cst_61 : f32 to vector<32x50xf32>
    %142 = arith.maximumf %140, %141 : vector<32x50xf32>
    %c0_62 = arith.constant 0 : index
    %c0_63 = arith.constant 0 : index
    %143 = vector.load %arg8[%c0_62, %c0_63] : memref<1x50xbf16, #tpu.memory_space<vmem>>, vector<1x50xbf16>
    %144 = arith.truncf %142 : vector<32x50xf32> to vector<32x50xbf16>
    %cst_64 = arith.constant dense<0.000000e+00> : vector<1x32xf32>
    %145 = tpu.matmul %143, %144, %cst_64 {dimension_numbers = #tpu.dot_dimension_numbers<[1], [1], [0], [0], [0, 0, 1, 0], [], []>} : vector<1x50xbf16>, vector<32x50xbf16>, vector<1x32xf32> -> vector<1x32xf32>
    %c0_65 = arith.constant 0 : index
    %c0_66 = arith.constant 0 : index
    %146 = vector.load %arg9[%c0_65, %c0_66] : memref<1x1xf32, #tpu.memory_space<vmem>>, vector<1x1xf32>
    %147 = vector.broadcast %146 : vector<1x1xf32> to vector<1x32xf32>
    %148 = arith.addf %145, %147 : vector<1x32xf32>
    %149 = arith.negf %148 : vector<1x32xf32>
    %150 = math.exp %149 : vector<1x32xf32>
    %cst_67 = arith.constant 1.000000e+00 : f32
    %151 = vector.broadcast %cst_67 : f32 to vector<1x32xf32>
    %152 = arith.addf %151, %150 : vector<1x32xf32>
    %153 = arith.divf %151, %152 : vector<1x32xf32>
    %c0_68 = arith.constant 0 : index
    %c0_69 = arith.constant 0 : index
    %c0_70 = arith.constant 0 : index
    %154 = vector.load %arg10[%c0_68, %c0_69, %c0_70] : memref<1x1x32xf32, #tpu.memory_space<vmem>>, vector<1x1x32xf32>
    %155 = vector.shape_cast %154 : vector<1x1x32xf32> to vector<1x32xf32>
    %156 = vector.shape_cast %153 : vector<1x32xf32> to vector<1x1x32xf32>
    tpu.vector_store %arg10[%c0_68, %c0_69, %c0_70], %156 {strides = array<i32>} : memref<1x1x32xf32, #tpu.memory_space<vmem>>, vector<1x1x32xf32>,
    return
  }
  func.func @transform_0(%arg0: i32) -> (i32, i32, i32) {
    %c0_i32 = arith.constant 0 : i32
    %c0_i32_0 = arith.constant 0 : i32
    %c0_i32_1 = arith.constant 0 : i32
    return %arg0, %c0_i32, %c0_i32_0 : i32, i32, i32
  }
  func.func @transform_1(%arg0: i32) -> (i32, i32, i32) {
    %c0_i32 = arith.constant 0 : i32
    %c0_i32_0 = arith.constant 0 : i32
    %c0_i32_1 = arith.constant 0 : i32
    %c0_i32_2 = arith.constant 0 : i32
    return %c0_i32, %c0_i32_0, %c0_i32_1 : i32, i32, i32
  }
  func.func @transform_2(%arg0: i32) -> (i32, i32) {
    %c0_i32 = arith.constant 0 : i32
    %c0_i32_0 = arith.constant 0 : i32
    %c0_i32_1 = arith.constant 0 : i32
    return %c0_i32, %c0_i32_0 : i32, i32
  }
  func.func @transform_3(%arg0: i32) -> (i32, i32, i32) {
    %c0_i32 = arith.constant 0 : i32
    %c0_i32_0 = arith.constant 0 : i32
    %c0_i32_1 = arith.constant 0 : i32
    %c0_i32_2 = arith.constant 0 : i32
    return %c0_i32, %c0_i32_0, %c0_i32_1 : i32, i32, i32
  }
  func.func @transform_4(%arg0: i32) -> (i32, i32) {
    %c0_i32 = arith.constant 0 : i32
    %c0_i32_0 = arith.constant 0 : i32
    %c0_i32_1 = arith.constant 0 : i32
    return %c0_i32, %c0_i32_0 : i32, i32
  }
  func.func @transform_5(%arg0: i32) -> (i32, i32, i32) {
    %c0_i32 = arith.constant 0 : i32
    %c0_i32_0 = arith.constant 0 : i32
    %c0_i32_1 = arith.constant 0 : i32
    %c0_i32_2 = arith.constant 0 : i32
    return %c0_i32, %c0_i32_0, %c0_i32_1 : i32, i32, i32
  }
  func.func @transform_6(%arg0: i32) -> (i32, i32) {
    %c0_i32 = arith.constant 0 : i32
    %c0_i32_0 = arith.constant 0 : i32
    %c0_i32_1 = arith.constant 0 : i32
    return %c0_i32, %c0_i32_0 : i32, i32
  }
  func.func @transform_7(%arg0: i32) -> (i32, i32) {
    %c0_i32 = arith.constant 0 : i32
    %c0_i32_0 = arith.constant 0 : i32
    %c0_i32_1 = arith.constant 0 : i32
    return %c0_i32, %c0_i32_0 : i32, i32
  }
  func.func @transform_8(%arg0: i32) -> (i32, i32) {
    %c0_i32 = arith.constant 0 : i32
    %c0_i32_0 = arith.constant 0 : i32
    %c0_i32_1 = arith.constant 0 : i32
    return %c0_i32, %c0_i32_0 : i32, i32
  }
  func.func @transform_9(%arg0: i32) -> (i32, i32, i32) {
    %c0_i32 = arith.constant 0 : i32
    %c0_i32_0 = arith.constant 0 : i32
    %c0_i32_1 = arith.constant 0 : i32
    return %arg0, %c0_i32, %c0_i32_0 : i32, i32, i32
  }
}

</mosaic_0001>

<bundles_post_ra>
// kernel: squeeze.3
= control target key start
LH: loop header
LB: loop body
LE: loop exit
PB: predicated region body
PF: predicated region fallthrough
CT: control target
= control target key end

     0   :  { %s8085_s10 = smov 96   ;;  %vm3_vm0 = vcmask 261120   ;;  %s11541_s0 = inlined_call_operand.vmem [shape: f32[64,28,28], index: 0, kind: input, shape index: {}]   ;;  %s11542_s1 = inlined_call_operand.vmem [shape: f32[2,32,28,28], index: 1, kind: output, shape index: {}]  }
   0x1   :  { %v7205_v0 = vld [vmem:[%s11541_s0 + $0x10] sm:$0xff]   ;;  %v727_v1 = vld [vmem:[%s11541_s0] sm:$0xff]   ;;  %v7204_v2 = vld [vmem:[%s11541_s0 + $0x8] sm:$0xff]  }
   0x2   :  { %746 = vrot.lane.b32.xlu1 %v7205_v0, %s8085_s10  ;;  %728 = vrot.lane.b32.xlu0 %v727_v1, %s8085_s10  ;;  %v7206_v3 = vld.sshfl [vmem:[%s11541_s0 + $0x18] sm:$0xff pattern:$0xba983210]   ;;  %17 = vst.msk [vmem:[#allocation0 + $0x80] ss:$8 sm:$0xf] %vm3_vm0, %v7205_v0  }
   0x3   :  { %v7210_v4 = vld [vmem:[%s11541_s0 + $0x40] sm:$0xff]   ;;  %19 = vst.msk [vmem:[#allocation0 + $0x80] ss:$8 sm:$0xf0] %vm3_vm0, %v7205_v0   ;;  %v7212_v5 = vld [vmem:[%s11541_s0 + $0x50] sm:$0xff]   ;;  %v7211_v6 = vld [vmem:[%s11541_s0 + $0x48] sm:$0xff]  }
   0x4   :  { %4 = vst.msk [vmem:[#allocation0] ss:$8 sm:$0xf] %vm3_vm0, %v727_v1   ;;  %5 = vst.msk [vmem:[#allocation0] ss:$8 sm:$0xf0] %vm3_vm0, %v727_v1  }
   0x5   :  { %10 = vst.msk [vmem:[#allocation0 + $0x40] ss:$8 sm:$0xf] %vm3_vm0, %v7204_v2   ;;  %12 = vst.msk [vmem:[#allocation0 + $0x40] ss:$8 sm:$0xf0] %vm3_vm0, %v7204_v2  }
   0x6   :  { %55 = vst.msk [vmem:[#allocation0 + $0x1c0] ss:$8 sm:$0xf] %vm3_vm0, %v7210_v4   ;;  %57 = vst.msk [vmem:[#allocation0 + $0x1c0] ss:$8 sm:$0xf0] %vm3_vm0, %v7210_v4   ;;  %755 = vrot.lane.b32.xlu1 %v7206_v3, %s8085_s10  ;;  %737 = vrot.lane.b32.xlu0 %v7204_v2, %s8085_s10 }
   0x7   :  { %69 = vst.msk [vmem:[#allocation0 + $0x240] ss:$8 sm:$0xf] %vm3_vm0, %v7212_v5   ;;  %71 = vst.msk [vmem:[#allocation0 + $0x240] ss:$8 sm:$0xf0] %vm3_vm0, %v7212_v5  }
   0x8   :  { %62 = vst.msk [vmem:[#allocation0 + $0x200] ss:$8 sm:$0xf] %vm3_vm0, %v7211_v6   ;;  %64 = vst.msk [vmem:[#allocation0 + $0x200] ss:$8 sm:$0xf0] %vm3_vm0, %v7211_v6  }
   0x9   :  { %v7218_v7 = vld [vmem:[%s11541_s0 + $0x88] sm:$0xff]   ;;  %v7217_v8 = vld [vmem:[%s11541_s0 + $0x80] sm:$0xff]   ;;  %v7219_v11 = vld [vmem:[%s11541_s0 + $0x90] sm:$0xff]  }
   0xa   :  { %v7208_v9 = vld [vmem:[%s11541_s0 + $0x2c] sm:$0xff]   ;;  %v7207_v10 = vld [vmem:[%s11541_s0 + $0x24] sm:$0xff]   ;;  %114 = vst.msk [vmem:[#allocation0 + $0x3c0] ss:$8 sm:$0xf] %vm3_vm0, %v7218_v7   ;;  %v7209_v12 = vld [vmem:[%s11541_s0 + $0x34] sm:$0xff]  }
   0xb   :  { %116 = vst.msk [vmem:[#allocation0 + $0x3c0] ss:$8 sm:$0xf0] %vm3_vm0, %v7218_v7   ;;  %107 = vst.msk [vmem:[#allocation0 + $0x380] ss:$8 sm:$0xf] %vm3_vm0, %v7217_v8   ;;  %773 = vrot.lane.b32.xlu1 %v7208_v9, %s8085_s10  ;;  %764 = vrot.lane.b32.xlu0 %v7207_v10, %s8085_s10 }
   0xc   :  { %109 = vst.msk [vmem:[#allocation0 + $0x380] ss:$8 sm:$0xf0] %vm3_vm0, %v7217_v8   ;;  %121 = vst.msk [vmem:[#allocation0 + $0x400] ss:$8 sm:$0xf] %vm3_vm0, %v7219_v11  }
   0xd   :  { %123 = vst.msk [vmem:[#allocation0 + $0x400] ss:$8 sm:$0xf0] %vm3_vm0, %v7219_v11   ;;  %v7214_v13 = vld [vmem:[%s11541_s0 + $0x64] sm:$0xff]   ;;  %v7216_v15 = vld [vmem:[%s11541_s0 + $0x74] sm:$0xff]   ;;  %v7215_v16 = vld [vmem:[%s11541_s0 + $0x6c] sm:$0xff]  }
   0xe   :  { %v7213_v14 = vld.sshfl [vmem:[%s11541_s0 + $0x58] sm:$0xff pattern:$0xba983210]   ;;  %v7097_v19 = vld [vmem:[%s11541_s0 + $0x28] sm:$0xff]   ;;  %v7098_v20 = vld [vmem:[%s11541_s0 + $0x30] sm:$0xff]  }
   0xf   :  { %791 = vrot.lane.b32.xlu1 %v7210_v4, %s8085_s10  ;;  %782 = vrot.lane.b32.xlu0 %v7209_v12, %s8085_s10  ;;  %v7095_v17 = vld [vmem:[%s11541_s0 + $0x18] sm:$0xf]   ;;  %v7096_v18 = vld [vmem:[%s11541_s0 + $0x20] sm:$0xff]   ;;  %38 = vst.msk [vmem:[#allocation0 + $0x120] ss:$8 sm:$0xf0] %vm3_vm0, %v7097_v19  }
  0x10   :  { %24 = vst.msk [vmem:[#allocation0 + $0xc0] ss:$8 sm:$0xf] %vm3_vm0, %v7095_v17   ;;  %29 = vst.msk [vmem:[#allocation0 + $0xe0] ss:$8 sm:$0xf] %vm3_vm0, %v7096_v18  }
  0x11   :  { %31 = vst.msk [vmem:[#allocation0 + $0xe0] ss:$8 sm:$0xf0] %vm3_vm0, %v7096_v18   ;;  %43 = vst.msk [vmem:[#allocation0 + $0x160] ss:$8 sm:$0xf] %vm3_vm0, %v7098_v20  }
  0x12   :  { %36 = vst.msk [vmem:[#allocation0 + $0x120] ss:$8 sm:$0xf] %vm3_vm0, %v7097_v19   ;;  %45 = vst.msk [vmem:[#allocation0 + $0x160] ss:$8 sm:$0xf0] %vm3_vm0, %v7098_v20  }
  0x13   :  { %809 = vrot.lane.b32.xlu1 %v7212_v5, %s8085_s10  ;;  %800 = vrot.lane.b32.xlu0 %v7211_v6, %s8085_s10  ;;  %v7099_v21 = vld [vmem:[%s11541_s0 + $0x38] sm:$0xf]   ;;  %v7104_v22 = vld [vmem:[%s11541_s0 + $0x60] sm:$0xff]  }
  0x14   :  { %50 = vst.msk [vmem:[#allocation0 + $0x1a0] ss:$8 sm:$0xf] %vm3_vm0, %v7099_v21   ;;  %83 = vst.msk [vmem:[#allocation0 + $0x2a0] ss:$8 sm:$0xf0] %vm3_vm0, %v7104_v22  }
  0x15   :  { %v7105_v23 = vld [vmem:[%s11541_s0 + $0x68] sm:$0xff]   ;;  %81 = vst.msk [vmem:[#allocation0 + $0x2a0] ss:$8 sm:$0xf] %vm3_vm0, %v7104_v22   ;;  %v7103_v24 = vld [vmem:[%s11541_s0 + $0x58] sm:$0xf]  }
  0x16   :  { %88 = vst.msk [vmem:[#allocation0 + $0x2e0] ss:$8 sm:$0xf] %vm3_vm0, %v7105_v23   ;;  %90 = vst.msk [vmem:[#allocation0 + $0x2e0] ss:$8 sm:$0xf0] %vm3_vm0, %v7105_v23  }
  0x17   :  { %827 = vrot.lane.b32.xlu1 %v7214_v13, %s8085_s10  ;;  %818 = vrot.lane.b32.xlu0 %v7213_v14, %s8085_s10  ;;  %76 = vst.msk [vmem:[#allocation0 + $0x280] ss:$8 sm:$0xf] %vm3_vm0, %v7103_v24   ;;  %v7106_v25 = vld [vmem:[%s11541_s0 + $0x70] sm:$0xff]   ;;  %v7107_v26 = vld [vmem:[%s11541_s0 + $0x78] sm:$0xf]  }
  0x18   :  { %97 = vst.msk [vmem:[#allocation0 + $0x320] ss:$8 sm:$0xf0] %vm3_vm0, %v7106_v25   ;;  %102 = vst.msk [vmem:[#allocation0 + $0x360] ss:$8 sm:$0xf] %vm3_vm0, %v7107_v26  }
  0x19   :  { %95 = vst.msk [vmem:[#allocation0 + $0x320] ss:$8 sm:$0xf] %vm3_vm0, %v7106_v25   ;;  %v7220_v27 = vld.sshfl [vmem:[%s11541_s0 + $0x98] sm:$0xff pattern:$0xba983210]  }
  0x1a   :  { %v7111_v28 = vld [vmem:[%s11541_s0 + $0x98] sm:$0xf]   ;;  %v7112_v29 = vld [vmem:[%s11541_s0 + $0xa0] sm:$0xff]   ;;  %v7222_v30 = vld [vmem:[%s11541_s0 + $0xac] sm:$0xff]  }
  0x1b   :  { %845 = vrot.lane.b32.xlu1 %v7216_v15, %s8085_s10  ;;  %836 = vrot.lane.b32.xlu0 %v7215_v16, %s8085_s10  ;;  %v7221_v31 = vld [vmem:[%s11541_s0 + $0xa4] sm:$0xff]   ;;  %128 = vst.msk [vmem:[#allocation0 + $0x440] ss:$8 sm:$0xf] %vm3_vm0, %v7111_v28   ;;  %v7223_v33 = vld [vmem:[%s11541_s0 + $0xb4] sm:$0xff]  }
  0x1c   :  { %133 = vst.msk [vmem:[#allocation0 + $0x460] ss:$8 sm:$0xf] %vm3_vm0, %v7112_v29   ;;  %135 = vst.msk [vmem:[#allocation0 + $0x460] ss:$8 sm:$0xf0] %vm3_vm0, %v7112_v29  }
  0x1d   :  { %v7224_v32 = vld [vmem:[%s11541_s0 + $0xc0] sm:$0xff]   ;;  %v7113_v34 = vld [vmem:[%s11541_s0 + $0xa8] sm:$0xff]   ;;  %v7114_v35 = vld [vmem:[%s11541_s0 + $0xb0] sm:$0xff]  }
  0x1e   :  { %142 = vst.msk [vmem:[#allocation0 + $0x4a0] ss:$8 sm:$0xf0] %vm3_vm0, %v7113_v34   ;;  %147 = vst.msk [vmem:[#allocation0 + $0x4e0] ss:$8 sm:$0xf] %vm3_vm0, %v7114_v35  }
  0x1f   :  { %863 = vrot.lane.b32.xlu1 %v7218_v7, %s8085_s10  ;;  %854 = vrot.lane.b32.xlu0 %v7217_v8, %s8085_s10  ;;  %140 = vst.msk [vmem:[#allocation0 + $0x4a0] ss:$8 sm:$0xf] %vm3_vm0, %v7113_v34   ;;  %149 = vst.msk [vmem:[#allocation0 + $0x4e0] ss:$8 sm:$0xf0] %vm3_vm0, %v7114_v35  }
  0x20   :  { %v7226_v36 = vld [vmem:[%s11541_s0 + $0xd0] sm:$0xff]   ;;  %v7225_v37 = vld [vmem:[%s11541_s0 + $0xc8] sm:$0xff]   ;;  %v7116_v38 = vld [vmem:[%s11541_s0 + $0xc0] sm:$0xff]  }
  0x21   :  { %v7115_v39 = vld [vmem:[%s11541_s0 + $0xb8] sm:$0xf]   ;;  %159 = vst.msk [vmem:[#allocation0 + $0x540] ss:$8 sm:$0xf] %vm3_vm0, %v7116_v38   ;;  %v7228_v40 = vld [vmem:[%s11541_s0 + $0xe4] sm:$0xff]  }
  0x22   :  { %161 = vst.msk [vmem:[#allocation0 + $0x540] ss:$8 sm:$0xf0] %vm3_vm0, %v7116_v38   ;;  %154 = vst.msk [vmem:[#allocation0 + $0x520] ss:$8 sm:$0xf] %vm3_vm0, %v7115_v39  }
  0x23   :  { %881 = vrot.lane.b32.xlu1 %v7220_v27, %s8085_s10  ;;  %872 = vrot.lane.b32.xlu0 %v7219_v11, %s8085_s10  ;;  %v7227_v41 = vld.sshfl [vmem:[%s11541_s0 + $0xd8] sm:$0xff pattern:$0xba983210]   ;;  %v7118_v42 = vld [vmem:[%s11541_s0 + $0xd0] sm:$0xff]  }
  0x24   :  { %v7117_v43 = vld [vmem:[%s11541_s0 + $0xc8] sm:$0xff]   ;;  %v7230_v44 = vld [vmem:[%s11541_s0 + $0xf4] sm:$0xff]   ;;  %173 = vst.msk [vmem:[#allocation0 + $0x5c0] ss:$8 sm:$0xf] %vm3_vm0, %v7118_v42   ;;  %v7231_v47 = vld [vmem:[%s11541_s0 + $0x100] sm:$0xff]  }
  0x25   :  { %v7229_v45 = vld [vmem:[%s11541_s0 + $0xec] sm:$0xff]   ;;  %175 = vst.msk [vmem:[#allocation0 + $0x5c0] ss:$8 sm:$0xf0] %vm3_vm0, %v7118_v42   ;;  %v7120_v48 = vld [vmem:[%s11541_s0 + $0xe0] sm:$0xff]   ;;  %v7237_v60 = vld [vmem:[%s11541_s0 + $0x134] sm:$0xff]  }
  0x26   :  { %166 = vst.msk [vmem:[#allocation0 + $0x580] ss:$8 sm:$0xf] %vm3_vm0, %v7117_v43   ;;  %168 = vst.msk [vmem:[#allocation0 + $0x580] ss:$8 sm:$0xf0] %vm3_vm0, %v7117_v43  }
  0x27   :  { %899 = vrot.lane.b32.xlu1 %v7222_v30, %s8085_s10  ;;  %890 = vrot.lane.b32.xlu0 %v7221_v31, %s8085_s10  ;;  %v7232_v46 = vld [vmem:[%s11541_s0 + $0x108] sm:$0xff]   ;;  %v7119_v50 = vld [vmem:[%s11541_s0 + $0xd8] sm:$0xf]   ;;  %187 = vst.msk [vmem:[#allocation0 + $0x620] ss:$8 sm:$0xf0] %vm3_vm0, %v7120_v48  }
  0x28   :  { %v7121_v49 = vld [vmem:[%s11541_s0 + $0xe8] sm:$0xff]   ;;  %185 = vst.msk [vmem:[#allocation0 + $0x620] ss:$8 sm:$0xf] %vm3_vm0, %v7120_v48   ;;  %v7233_v52 = vld [vmem:[%s11541_s0 + $0x110] sm:$0xff]   ;;  %v7124_v58 = vld [vmem:[%s11541_s0 + $0x100] sm:$0xff]  }
  0x29   :  { %192 = vst.msk [vmem:[#allocation0 + $0x660] ss:$8 sm:$0xf] %vm3_vm0, %v7121_v49   ;;  %194 = vst.msk [vmem:[#allocation0 + $0x660] ss:$8 sm:$0xf0] %vm3_vm0, %v7121_v49  }
  0x2a   :  { %180 = vst.msk [vmem:[#allocation0 + $0x600] ss:$8 sm:$0xf] %vm3_vm0, %v7119_v50   ;;  %v7234_v51 = vld.sshfl [vmem:[%s11541_s0 + $0x118] sm:$0xff pattern:$0xba983210]  }
  0x2b   :  { %917 = vrot.lane.b32.xlu1 %v7224_v32, %s8085_s10  ;;  %908 = vrot.lane.b32.xlu0 %v7223_v33, %s8085_s10  ;;  %v7122_v53 = vld [vmem:[%s11541_s0 + $0xf0] sm:$0xff]   ;;  %v7123_v54 = vld [vmem:[%s11541_s0 + $0xf8] sm:$0xf]   ;;  %211 = vst.msk [vmem:[#allocation0 + $0x700] ss:$8 sm:$0xf] %vm3_vm0, %v7124_v58  }
  0x2c   :  { %201 = vst.msk [vmem:[#allocation0 + $0x6a0] ss:$8 sm:$0xf0] %vm3_vm0, %v7122_v53   ;;  %206 = vst.msk [vmem:[#allocation0 + $0x6e0] ss:$8 sm:$0xf] %vm3_vm0, %v7123_v54  }
  0x2d   :  { %199 = vst.msk [vmem:[#allocation0 + $0x6a0] ss:$8 sm:$0xf] %vm3_vm0, %v7122_v53   ;;  %v7236_v55 = vld [vmem:[%s11541_s0 + $0x12c] sm:$0xff]   ;;  %v7235_v56 = vld [vmem:[%s11541_s0 + $0x124] sm:$0xff]   ;;  %v7244_v6 = vld [vmem:[%s11541_s0 + $0x174] sm:$0xff]  }
  0x2e   :  { %v7125_v57 = vld [vmem:[%s11541_s0 + $0x108] sm:$0xff]   ;;  %v7238_v59 = vld [vmem:[%s11541_s0 + $0x140] sm:$0xff]   ;;  %213 = vst.msk [vmem:[#allocation0 + $0x700] ss:$8 sm:$0xf0] %vm3_vm0, %v7124_v58   ;;  %v7240_v61 = vld [vmem:[%s11541_s0 + $0x150] sm:$0xff]  }
  0x2f   :  { %935 = vrot.lane.b32.xlu1 %v7226_v36, %s8085_s10  ;;  %926 = vrot.lane.b32.xlu0 %v7225_v37, %s8085_s10  ;;  %218 = vst.msk [vmem:[#allocation0 + $0x740] ss:$8 sm:$0xf] %vm3_vm0, %v7125_v57   ;;  %220 = vst.msk [vmem:[#allocation0 + $0x740] ss:$8 sm:$0xf0] %vm3_vm0, %v7125_v57  }
  0x30   :  { %v7239_v62 = vld [vmem:[%s11541_s0 + $0x148] sm:$0xff]   ;;  %v7127_v63 = vld [vmem:[%s11541_s0 + $0x118] sm:$0xf]   ;;  %v7128_v0 = vld [vmem:[%s11541_s0 + $0x120] sm:$0xff]  }
  0x31   :  { %v7126_v1 = vld [vmem:[%s11541_s0 + $0x110] sm:$0xff]   ;;  %232 = vst.msk [vmem:[#allocation0 + $0x7c0] ss:$8 sm:$0xf] %vm3_vm0, %v7127_v63   ;;  %v7242_v2 = vld [vmem:[%s11541_s0 + $0x164] sm:$0xff]  }
  0x32   :  { %237 = vst.msk [vmem:[#allocation0 + $0x7e0] ss:$8 sm:$0xf] %vm3_vm0, %v7128_v0   ;;  %239 = vst.msk [vmem:[#allocation0 + $0x7e0] ss:$8 sm:$0xf0] %vm3_vm0, %v7128_v0  }
  0x33   :  { %953 = vrot.lane.b32.xlu1 %v7228_v40, %s8085_s10  ;;  %944 = vrot.lane.b32.xlu0 %v7227_v41, %s8085_s10  ;;  %225 = vst.msk [vmem:[#allocation0 + $0x780] ss:$8 sm:$0xf] %vm3_vm0, %v7126_v1   ;;  %227 = vst.msk [vmem:[#allocation0 + $0x780] ss:$8 sm:$0xf0] %vm3_vm0, %v7126_v1  }
  0x34   :  { %v7241_v3 = vld.sshfl [vmem:[%s11541_s0 + $0x158] sm:$0xff pattern:$0xba983210]   ;;  %v7129_v4 = vld [vmem:[%s11541_s0 + $0x128] sm:$0xff]   ;;  %v7130_v5 = vld [vmem:[%s11541_s0 + $0x130] sm:$0xff]  }
  0x35   :  { %246 = vst.msk [vmem:[#allocation0 + $0x820] ss:$8 sm:$0xf0] %vm3_vm0, %v7129_v4   ;;  %251 = vst.msk [vmem:[#allocation0 + $0x860] ss:$8 sm:$0xf] %vm3_vm0, %v7130_v5  }
  0x36   :  { %244 = vst.msk [vmem:[#allocation0 + $0x820] ss:$8 sm:$0xf] %vm3_vm0, %v7129_v4   ;;  %253 = vst.msk [vmem:[#allocation0 + $0x860] ss:$8 sm:$0xf0] %vm3_vm0, %v7130_v5  }
  0x37   :  { %971 = vrot.lane.b32.xlu1 %v7230_v44, %s8085_s10  ;;  %962 = vrot.lane.b32.xlu0 %v7229_v45, %s8085_s10  ;;  %v7243_v7 = vld [vmem:[%s11541_s0 + $0x16c] sm:$0xff]   ;;  %v7132_v8 = vld [vmem:[%s11541_s0 + $0x140] sm:$0xff]  }
  0x38   :  { %v7131_v9 = vld [vmem:[%s11541_s0 + $0x138] sm:$0xf]   ;;  %v7246_v10 = vld [vmem:[%s11541_s0 + $0x188] sm:$0xff]   ;;  %v7245_v11 = vld [vmem:[%s11541_s0 + $0x180] sm:$0xff]  }
  0x39   :  { %263 = vst.msk [vmem:[#allocation0 + $0x8c0] ss:$8 sm:$0xf] %vm3_vm0, %v7132_v8   ;;  %265 = vst.msk [vmem:[#allocation0 + $0x8c0] ss:$8 sm:$0xf0] %vm3_vm0, %v7132_v8  }
  0x3a   :  { %258 = vst.msk [vmem:[#allocation0 + $0x8a0] ss:$8 sm:$0xf] %vm3_vm0, %v7131_v9   ;;  %v7248_v12 = vld.sshfl [vmem:[%s11541_s0 + $0x198] sm:$0xff pattern:$0xba983210]  }
  0x3b   :  { %989 = vrot.lane.b32.xlu1 %v7232_v46, %s8085_s10  ;;  %980 = vrot.lane.b32.xlu0 %v7231_v47, %s8085_s10  ;;  %v7247_v13 = vld [vmem:[%s11541_s0 + $0x190] sm:$0xff]   ;;  %v7133_v15 = vld [vmem:[%s11541_s0 + $0x148] sm:$0xff]  }
  0x3c   :  { %v7134_v14 = vld [vmem:[%s11541_s0 + $0x150] sm:$0xff]   ;;  %270 = vst.msk [vmem:[#allocation0 + $0x900] ss:$8 sm:$0xf] %vm3_vm0, %v7133_v15   ;;  %v7249_v17 = vld [vmem:[%s11541_s0 + $0x1a4] sm:$0xff]  }
  0x3d   :  { %277 = vst.msk [vmem:[#allocation0 + $0x940] ss:$8 sm:$0xf] %vm3_vm0, %v7134_v14   ;;  %279 = vst.msk [vmem:[#allocation0 + $0x940] ss:$8 sm:$0xf0] %vm3_vm0, %v7134_v14  }
  0x3e   :  { %272 = vst.msk [vmem:[#allocation0 + $0x900] ss:$8 sm:$0xf0] %vm3_vm0, %v7133_v15   ;;  %v7250_v16 = vld [vmem:[%s11541_s0 + $0x1ac] sm:$0xff]   ;;  %v7136_v18 = vld [vmem:[%s11541_s0 + $0x160] sm:$0xff]   ;;  %v7251_v22 = vld [vmem:[%s11541_s0 + $0x1b4] sm:$0xff]  }
  0x3f   :  { %1007 = vrot.lane.b32.xlu1 %v7234_v51, %s8085_s10  ;;  %998 = vrot.lane.b32.xlu0 %v7233_v52, %s8085_s10  ;;  %v7137_v19 = vld [vmem:[%s11541_s0 + $0x168] sm:$0xff]   ;;  %v7135_v20 = vld [vmem:[%s11541_s0 + $0x158] sm:$0xf]   ;;  %291 = vst.msk [vmem:[#allocation0 + $0x9a0] ss:$8 sm:$0xf0] %vm3_vm0, %v7136_v18  }
  0x40   :  { %296 = vst.msk [vmem:[#allocation0 + $0x9e0] ss:$8 sm:$0xf] %vm3_vm0, %v7137_v19   ;;  %289 = vst.msk [vmem:[#allocation0 + $0x9a0] ss:$8 sm:$0xf] %vm3_vm0, %v7136_v18  }
  0x41   :  { %298 = vst.msk [vmem:[#allocation0 + $0x9e0] ss:$8 sm:$0xf0] %vm3_vm0, %v7137_v19   ;;  %284 = vst.msk [vmem:[#allocation0 + $0x980] ss:$8 sm:$0xf] %vm3_vm0, %v7135_v20  }
  0x42   :  { %v7252_v21 = vld [vmem:[%s11541_s0 + $0x1c0] sm:$0xff]   ;;  %v7138_v23 = vld [vmem:[%s11541_s0 + $0x170] sm:$0xff]   ;;  %v7139_v24 = vld [vmem:[%s11541_s0 + $0x178] sm:$0xf]  }
  0x43   :  { %1025 = vrot.lane.b32.xlu1 %v7236_v55, %s8085_s10  ;;  %1016 = vrot.lane.b32.xlu0 %v7235_v56, %s8085_s10  ;;  %v7254_v25 = vld [vmem:[%s11541_s0 + $0x1d0] sm:$0xff]   ;;  %v7253_v26 = vld [vmem:[%s11541_s0 + $0x1c8] sm:$0xff]   ;;  %305 = vst.msk [vmem:[#allocation0 + $0xa20] ss:$8 sm:$0xf0] %vm3_vm0, %v7138_v23  }
  0x44   :  { %310 = vst.msk [vmem:[#allocation0 + $0xa60] ss:$8 sm:$0xf] %vm3_vm0, %v7139_v24   ;;  %303 = vst.msk [vmem:[#allocation0 + $0xa20] ss:$8 sm:$0xf] %vm3_vm0, %v7138_v23  }
  0x45   :  { %v7256_v27 = vld [vmem:[%s11541_s0 + $0x1e4] sm:$0xff]   ;;  %v7255_v28 = vld.sshfl [vmem:[%s11541_s0 + $0x1d8] sm:$0xff pattern:$0xba983210]   ;;  %v7257_v32 = vld [vmem:[%s11541_s0 + $0x1ec] sm:$0xff]  }
  0x46   :  { %v7141_v29 = vld [vmem:[%s11541_s0 + $0x188] sm:$0xff]   ;;  %v7140_v30 = vld [vmem:[%s11541_s0 + $0x180] sm:$0xff]   ;;  %v7258_v31 = vld [vmem:[%s11541_s0 + $0x1f4] sm:$0xff]  }
  0x47   :  { %1043 = vrot.lane.b32.xlu1 %v7238_v59, %s8085_s10  ;;  %1034 = vrot.lane.b32.xlu0 %v7237_v60, %s8085_s10  ;;  %322 = vst.msk [vmem:[#allocation0 + $0xac0] ss:$8 sm:$0xf] %vm3_vm0, %v7141_v29   ;;  %324 = vst.msk [vmem:[#allocation0 + $0xac0] ss:$8 sm:$0xf0] %vm3_vm0, %v7141_v29  }
  0x48   :  { %315 = vst.msk [vmem:[#allocation0 + $0xa80] ss:$8 sm:$0xf] %vm3_vm0, %v7140_v30   ;;  %317 = vst.msk [vmem:[#allocation0 + $0xa80] ss:$8 sm:$0xf0] %vm3_vm0, %v7140_v30  }
  0x49   :  { %v7143_v33 = vld [vmem:[%s11541_s0 + $0x198] sm:$0xf]   ;;  %v7144_v34 = vld [vmem:[%s11541_s0 + $0x1a0] sm:$0xff]   ;;  %v7142_v35 = vld [vmem:[%s11541_s0 + $0x190] sm:$0xff]  }
  0x4a   :  { %336 = vst.msk [vmem:[#allocation0 + $0xb40] ss:$8 sm:$0xf] %vm3_vm0, %v7143_v33   ;;  %341 = vst.msk [vmem:[#allocation0 + $0xb60] ss:$8 sm:$0xf] %vm3_vm0, %v7144_v34  }
  0x4b   :  { %1061 = vrot.lane.b32.xlu1 %v7240_v61, %s8085_s10  ;;  %1052 = vrot.lane.b32.xlu0 %v7239_v62, %s8085_s10  ;;  %343 = vst.msk [vmem:[#allocation0 + $0xb60] ss:$8 sm:$0xf0] %vm3_vm0, %v7144_v34   ;;  %329 = vst.msk [vmem:[#allocation0 + $0xb00] ss:$8 sm:$0xf] %vm3_vm0, %v7142_v35  }
  0x4c   :  { %331 = vst.msk [vmem:[#allocation0 + $0xb00] ss:$8 sm:$0xf0] %vm3_vm0, %v7142_v35   ;;  %v7260_v36 = vld [vmem:[%s11541_s0 + $0x208] sm:$0xff]   ;;  %v7259_v37 = vld [vmem:[%s11541_s0 + $0x200] sm:$0xff]   ;;  %v7146_v39 = vld [vmem:[%s11541_s0 + $0x1b0] sm:$0xff]  }
  0x4d   :  { %v7145_v38 = vld [vmem:[%s11541_s0 + $0x1a8] sm:$0xff]   ;;  %v7262_v40 = vld.sshfl [vmem:[%s11541_s0 + $0x218] sm:$0xff pattern:$0xba983210]   ;;  %v7261_v41 = vld [vmem:[%s11541_s0 + $0x210] sm:$0xff]  }
  0x4e   :  { %350 = vst.msk [vmem:[#allocation0 + $0xba0] ss:$8 sm:$0xf0] %vm3_vm0, %v7145_v38   ;;  %355 = vst.msk [vmem:[#allocation0 + $0xbe0] ss:$8 sm:$0xf] %vm3_vm0, %v7146_v39  }
  0x4f   :  { %1079 = vrot.lane.b32.xlu1 %v7242_v2, %s8085_s10  ;;  %1070 = vrot.lane.b32.xlu0 %v7241_v3, %s8085_s10  ;;  %348 = vst.msk [vmem:[#allocation0 + $0xba0] ss:$8 sm:$0xf] %vm3_vm0, %v7145_v38   ;;  %357 = vst.msk [vmem:[#allocation0 + $0xbe0] ss:$8 sm:$0xf0] %vm3_vm0, %v7146_v39  }
  0x50   :  { %v7264_v44 = vld [vmem:[%s11541_s0 + $0x22c] sm:$0xff]   ;;  %v7263_v45 = vld [vmem:[%s11541_s0 + $0x224] sm:$0xff]   ;;  %v7147_v47 = vld [vmem:[%s11541_s0 + $0x1b8] sm:$0xf]  }
  0x51   :  { %v7148_v46 = vld [vmem:[%s11541_s0 + $0x1c0] sm:$0xff]   ;;  %362 = vst.msk [vmem:[#allocation0 + $0xc20] ss:$8 sm:$0xf] %vm3_vm0, %v7147_v47   ;;  %v7265_v51 = vld [vmem:[%s11541_s0 + $0x234] sm:$0xff]   ;;  %v7267_v61 = vld [vmem:[%s11541_s0 + $0x248] sm:$0xff]  }
  0x52   :  { %367 = vst.msk [vmem:[#allocation0 + $0xc40] ss:$8 sm:$0xf] %vm3_vm0, %v7148_v46   ;;  %369 = vst.msk [vmem:[#allocation0 + $0xc40] ss:$8 sm:$0xf0] %vm3_vm0, %v7148_v46  }
  0x53   :  { %1097 = vrot.lane.b32.xlu1 %v7244_v6, %s8085_s10  ;;  %1088 = vrot.lane.b32.xlu0 %v7243_v7, %s8085_s10  ;;  %v7266_v50 = vld [vmem:[%s11541_s0 + $0x240] sm:$0xff]   ;;  %v7268_v60 = vld [vmem:[%s11541_s0 + $0x250] sm:$0xff]  }
  0x54   :  { %v7271_v29 = vld [vmem:[%s11541_s0 + $0x26c] sm:$0xff]  }
  0x57   :  { %1115 = vrot.lane.b32.xlu1 %v7246_v10, %s8085_s10  ;;  %1106 = vrot.lane.b32.xlu0 %v7245_v11, %s8085_s10 }
  0x5b   :  { %1133 = vrot.lane.b32.xlu1 %v7248_v12, %s8085_s10  ;;  %1124 = vrot.lane.b32.xlu0 %v7247_v13, %s8085_s10  ;;  %v7270_v12 = vld [vmem:[%s11541_s0 + $0x264] sm:$0xff]   ;;  %v7269_v13 = vld.sshfl [vmem:[%s11541_s0 + $0x258] sm:$0xff pattern:$0xba983210]  }
  0x5f   :  { %1151 = vrot.lane.b32.xlu1 %v7250_v16, %s8085_s10  ;;  %1142 = vrot.lane.b32.xlu0 %v7249_v17, %s8085_s10 }
  0x63   :  { %1169 = vrot.lane.b32.xlu1 %v7252_v21, %s8085_s10  ;;  %1160 = vrot.lane.b32.xlu0 %v7251_v22, %s8085_s10 }
  0x67   :  { %1187 = vrot.lane.b32.xlu1 %v7254_v25, %s8085_s10  ;;  %1178 = vrot.lane.b32.xlu0 %v7253_v26, %s8085_s10 }
  0x6b   :  { %1205 = vrot.lane.b32.xlu1 %v7256_v27, %s8085_s10  ;;  %1196 = vrot.lane.b32.xlu0 %v7255_v28, %s8085_s10  ;;  %v7272_v28 = vld [vmem:[%s11541_s0 + $0x274] sm:$0xff]  }
  0x6f   :  { %1223 = vrot.lane.b32.xlu1 %v7258_v31, %s8085_s10  ;;  %1214 = vrot.lane.b32.xlu0 %v7257_v32, %s8085_s10 }
  0x73   :  { %1241 = vrot.lane.b32.xlu1 %v7260_v36, %s8085_s10  ;;  %1232 = vrot.lane.b32.xlu0 %v7259_v37, %s8085_s10 }
  0x74   :  { %v747_v42 = vpop.permute.xlu1 %746   ;;  %v729_v43 = vpop.permute.xlu0 %728  }
  0x75   :  { %750 = vst.msk [vmem:[#allocation0 + $0x81] ss:$8 sm:$0xf] %vm3_vm0, %v747_v42   ;;  %752 = vst.msk [vmem:[#allocation0 + $0x81] ss:$8 sm:$0xf0] %vm3_vm0, %v747_v42  }
  0x76   :  { %732 = vst.msk [vmem:[#allocation0 + $0x1] ss:$8 sm:$0xf] %vm3_vm0, %v729_v43   ;;  %734 = vst.msk [vmem:[#allocation0 + $0x1] ss:$8 sm:$0xf0] %vm3_vm0, %v729_v43  }
  0x77   :  { %1259 = vrot.lane.b32.xlu1 %v7262_v40, %s8085_s10  ;;  %1250 = vrot.lane.b32.xlu0 %v7261_v41, %s8085_s10 }
  0x78   :  { %v756_v48 = vpop.permute.xlu1 %755   ;;  %v738_v49 = vpop.permute.xlu0 %737  }
  0x79   :  { %759 = vst.msk [vmem:[#allocation0 + $0xc1] ss:$8 sm:$0xf] %vm3_vm0, %v756_v48   ;;  %761 = vst.msk [vmem:[#allocation0 + $0xc1] ss:$8 sm:$0xf0] %vm3_vm0, %v756_v48  }
  0x7a   :  { %741 = vst.msk [vmem:[#allocation0 + $0x41] ss:$8 sm:$0xf] %vm3_vm0, %v738_v49   ;;  %743 = vst.msk [vmem:[#allocation0 + $0x41] ss:$8 sm:$0xf0] %vm3_vm0, %v738_v49  }
  0x7b   :  { %1277 = vrot.lane.b32.xlu1 %v7264_v44, %s8085_s10  ;;  %1268 = vrot.lane.b32.xlu0 %v7263_v45, %s8085_s10  ;;  %v7274_v44 = vld [vmem:[%s11541_s0 + $0x288] sm:$0xff]   ;;  %v7273_v45 = vld [vmem:[%s11541_s0 + $0x280] sm:$0xff]  }
  0x7c   :  { %v1704_v52 = vld [vmem:[#allocation0 + $0x80] sm:$0x3]  ;;  %v1710_v53 = vld [vmem:[#allocation0 + $0x88] sm:$0x3]  ;;  %v1716_v54 = vld [vmem:[#allocation0 + $0x90] sm:$0x3] }
  0x7d   :  { %v774_v55 = vpop.permute.xlu1 %773   ;;  %v765_v56 = vpop.permute.xlu0 %764   ;;  %7316 = vst [vmem:[%s11542_s1 + $0x20] sm:$0x3] %v1704_v52  ;;  %7317 = vst [vmem:[%s11542_s1 + $0x22] sm:$0x3] %v1710_v53  ;;  %v1722_v57 = vld [vmem:[#allocation0 + $0x98] sm:$0x3] }
  0x7e   :  { %7318 = vst [vmem:[%s11542_s1 + $0x24] sm:$0x3] %v1716_v54  ;;  %v1728_v58 = vld [vmem:[#allocation0 + $0xa0] sm:$0x3]  ;;  %v1734_v59 = vld [vmem:[#allocation0 + $0xa8] sm:$0x3] }
  0x7f   :  { %777 = vst.msk [vmem:[#allocation0 + $0x141] ss:$8 sm:$0xf] %vm3_vm0, %v774_v55   ;;  %779 = vst.msk [vmem:[#allocation0 + $0x141] ss:$8 sm:$0xf0] %vm3_vm0, %v774_v55   ;;  %1295 = vrot.lane.b32.xlu1 %v7266_v50, %s8085_s10  ;;  %1286 = vrot.lane.b32.xlu0 %v7265_v51, %s8085_s10 }
  0x80   :  { %768 = vst.msk [vmem:[#allocation0 + $0x101] ss:$8 sm:$0xf] %vm3_vm0, %v765_v56   ;;  %770 = vst.msk [vmem:[#allocation0 + $0x101] ss:$8 sm:$0xf0] %vm3_vm0, %v765_v56  }
  0x81   :  { %7319 = vst [vmem:[%s11542_s1 + $0x26] sm:$0x3] %v1722_v57  ;;  %7320 = vst [vmem:[%s11542_s1 + $0x28] sm:$0x3] %v1728_v58  ;;  %v1740_v62 = vld [vmem:[#allocation0 + $0xb0] sm:$0x3]  ;;  %v792_v7 = vpop.permute.xlu1 %791   ;;  %v783_v8 = vpop.permute.xlu0 %782  }
  0x82   :  { %7321 = vst [vmem:[%s11542_s1 + $0x2a] sm:$0x3] %v1734_v59  ;;  %v1746_v63 = vld [vmem:[#allocation0 + $0xb8] sm:$0x3]  ;;  %v1611_v0 = vld [vmem:[#allocation0] sm:$0x3] }
  0x83   :  { %7322 = vst [vmem:[%s11542_s1 + $0x2c] sm:$0x3] %v1740_v62  ;;  %7323 = vst [vmem:[%s11542_s1 + $0x2e] sm:$0x3] %v1746_v63  ;;  %v1615_v1 = vld [vmem:[#allocation0 + $0x8] sm:$0x3]  ;;  %1313 = vrot.lane.b32.xlu1 %v7268_v60, %s8085_s10  ;;  %1304 = vrot.lane.b32.xlu0 %v7267_v61, %s8085_s10 }
  0x84   :  { %1613 = vst [vmem:[%s11542_s1] sm:$0x3] %v1611_v0  ;;  %v1620_v2 = vld [vmem:[#allocation0 + $0x10] sm:$0x3]  ;;  %v1626_v3 = vld [vmem:[#allocation0 + $0x18] sm:$0x3] }
  0x85   :  { %7301 = vst [vmem:[%s11542_s1 + $0x2] sm:$0x3] %v1615_v1  ;;  %7302 = vst [vmem:[%s11542_s1 + $0x4] sm:$0x3] %v1620_v2  ;;  %v1632_v4 = vld [vmem:[#allocation0 + $0x20] sm:$0x3]  ;;  %v810_v23 = vpop.permute.xlu1 %809   ;;  %v801_v24 = vpop.permute.xlu0 %800  }
  0x86   :  { %7303 = vst [vmem:[%s11542_s1 + $0x6] sm:$0x3] %v1626_v3  ;;  %v1638_v5 = vld [vmem:[#allocation0 + $0x28] sm:$0x3]  ;;  %v1644_v6 = vld [vmem:[#allocation0 + $0x30] sm:$0x3] }
  0x87   :  { %7304 = vst [vmem:[%s11542_s1 + $0x8] sm:$0x3] %v1632_v4  ;;  %7305 = vst [vmem:[%s11542_s1 + $0xa] sm:$0x3] %v1638_v5  ;;  %v1650_v9 = vld [vmem:[#allocation0 + $0x38] sm:$0x3]  ;;  %1331 = vrot.lane.b32.xlu1 %v7270_v12, %s8085_s10  ;;  %1322 = vrot.lane.b32.xlu0 %v7269_v13, %s8085_s10 }
  0x88   :  { %7306 = vst [vmem:[%s11542_s1 + $0xc] sm:$0x3] %v1644_v6  ;;  %v1752_v10 = vld [vmem:[#allocation0 + $0xc0] sm:$0x3]  ;;  %v1758_v11 = vld [vmem:[#allocation0 + $0xc8] sm:$0x3] }
  0x89   :  { %795 = vst.msk [vmem:[#allocation0 + $0x1c1] ss:$8 sm:$0xf] %vm3_vm0, %v792_v7   ;;  %797 = vst.msk [vmem:[#allocation0 + $0x1c1] ss:$8 sm:$0xf0] %vm3_vm0, %v792_v7   ;;  %v828_v39 = vpop.permute.xlu1 %827   ;;  %v819_v40 = vpop.permute.xlu0 %818  }
  0x8a   :  { %786 = vst.msk [vmem:[#allocation0 + $0x181] ss:$8 sm:$0xf] %vm3_vm0, %v783_v8   ;;  %788 = vst.msk [vmem:[#allocation0 + $0x181] ss:$8 sm:$0xf0] %vm3_vm0, %v783_v8  }
  0x8b   :  { %7307 = vst [vmem:[%s11542_s1 + $0xe] sm:$0x3] %v1650_v9  ;;  %7324 = vst [vmem:[%s11542_s1 + $0x30] sm:$0x3] %v1752_v10  ;;  %v1764_v14 = vld [vmem:[#allocation0 + $0xd0] sm:$0x3]  ;;  %1349 = vrot.lane.b32.xlu1 %v7272_v28, %s8085_s10  ;;  %1340 = vrot.lane.b32.xlu0 %v7271_v29, %s8085_s10 }
  0x8c   :  { %7325 = vst [vmem:[%s11542_s1 + $0x32] sm:$0x3] %v1758_v11  ;;  %v1770_v15 = vld [vmem:[#allocation0 + $0xd8] sm:$0x3]  ;;  %v1776_v16 = vld [vmem:[#allocation0 + $0xe0] sm:$0x3] }
  0x8d   :  { %7326 = vst [vmem:[%s11542_s1 + $0x34] sm:$0x3] %v1764_v14  ;;  %7327 = vst [vmem:[%s11542_s1 + $0x36] sm:$0x3] %v1770_v15  ;;  %v1782_v17 = vld [vmem:[#allocation0 + $0xe8] sm:$0x3]  ;;  %v846_v55 = vpop.permute.xlu1 %845   ;;  %v837_v56 = vpop.permute.xlu0 %836  }
  0x8e   :  { %7328 = vst [vmem:[%s11542_s1 + $0x38] sm:$0x3] %v1776_v16  ;;  %v1788_v18 = vld [vmem:[#allocation0 + $0xf0] sm:$0x3]  ;;  %v1794_v19 = vld [vmem:[#allocation0 + $0xf8] sm:$0x3] }
  0x8f   :  { %7329 = vst [vmem:[%s11542_s1 + $0x3a] sm:$0x3] %v1782_v17  ;;  %7330 = vst [vmem:[%s11542_s1 + $0x3c] sm:$0x3] %v1788_v18  ;;  %v1656_v20 = vld [vmem:[#allocation0 + $0x40] sm:$0x3]  ;;  %1367 = vrot.lane.b32.xlu1 %v7274_v44, %s8085_s10  ;;  %1358 = vrot.lane.b32.xlu0 %v7273_v45, %s8085_s10 }
  0x90   :  { %7331 = vst [vmem:[%s11542_s1 + $0x3e] sm:$0x3] %v1794_v19  ;;  %v1662_v21 = vld [vmem:[#allocation0 + $0x48] sm:$0x3]  ;;  %v1668_v22 = vld [vmem:[#allocation0 + $0x50] sm:$0x3] }
  0x91   :  { %7308 = vst [vmem:[%s11542_s1 + $0x10] sm:$0x3] %v1656_v20  ;;  %7309 = vst [vmem:[%s11542_s1 + $0x12] sm:$0x3] %v1662_v21  ;;  %v1674_v25 = vld [vmem:[#allocation0 + $0x58] sm:$0x3]  ;;  %v864_v7 = vpop.permute.xlu1 %863   ;;  %v855_v8 = vpop.permute.xlu0 %854  }
  0x92   :  { %7310 = vst [vmem:[%s11542_s1 + $0x14] sm:$0x3] %v1668_v22  ;;  %v1680_v26 = vld [vmem:[#allocation0 + $0x60] sm:$0x3]  ;;  %v1686_v27 = vld [vmem:[#allocation0 + $0x68] sm:$0x3] }
  0x93   :  { %813 = vst.msk [vmem:[#allocation0 + $0x241] ss:$8 sm:$0xf] %vm3_vm0, %v810_v23   ;;  %815 = vst.msk [vmem:[#allocation0 + $0x241] ss:$8 sm:$0xf0] %vm3_vm0, %v810_v23  }
  0x94   :  { %804 = vst.msk [vmem:[#allocation0 + $0x201] ss:$8 sm:$0xf] %vm3_vm0, %v801_v24   ;;  %806 = vst.msk [vmem:[#allocation0 + $0x201] ss:$8 sm:$0xf0] %vm3_vm0, %v801_v24  }
  0x95   :  { %7311 = vst [vmem:[%s11542_s1 + $0x16] sm:$0x3] %v1674_v25  ;;  %7312 = vst [vmem:[%s11542_s1 + $0x18] sm:$0x3] %v1680_v26  ;;  %v1692_v30 = vld [vmem:[#allocation0 + $0x70] sm:$0x3]  ;;  %v882_v23 = vpop.permute.xlu1 %881   ;;  %v873_v24 = vpop.permute.xlu0 %872  }
  0x96   :  { %7313 = vst [vmem:[%s11542_s1 + $0x1a] sm:$0x3] %v1686_v27  ;;  %v1698_v31 = vld [vmem:[#allocation0 + $0x78] sm:$0x3]  ;;  %v1848_v32 = vld [vmem:[#allocation0 + $0x140] sm:$0x3] }
  0x97   :  { %7314 = vst [vmem:[%s11542_s1 + $0x1c] sm:$0x3] %v1692_v30  ;;  %7315 = vst [vmem:[%s11542_s1 + $0x1e] sm:$0x3] %v1698_v31  ;;  %v1854_v33 = vld [vmem:[#allocation0 + $0x148] sm:$0x3] }
  0x98   :  { %7340 = vst [vmem:[%s11542_s1 + $0x50] sm:$0x3] %v1848_v32  ;;  %v1860_v34 = vld [vmem:[#allocation0 + $0x150] sm:$0x3]  ;;  %v1866_v35 = vld [vmem:[#allocation0 + $0x158] sm:$0x3] }
  0x99   :  { %7341 = vst [vmem:[%s11542_s1 + $0x52] sm:$0x3] %v1854_v33  ;;  %7342 = vst [vmem:[%s11542_s1 + $0x54] sm:$0x3] %v1860_v34  ;;  %v1872_v36 = vld [vmem:[#allocation0 + $0x160] sm:$0x3] }
  0x9a   :  { %7343 = vst [vmem:[%s11542_s1 + $0x56] sm:$0x3] %v1866_v35  ;;  %v1878_v37 = vld [vmem:[#allocation0 + $0x168] sm:$0x3]  ;;  %v1884_v38 = vld [vmem:[#allocation0 + $0x170] sm:$0x3] }
  0x9b   :  { %7344 = vst [vmem:[%s11542_s1 + $0x58] sm:$0x3] %v1872_v36  ;;  %7345 = vst [vmem:[%s11542_s1 + $0x5a] sm:$0x3] %v1878_v37  ;;  %v1890_v41 = vld [vmem:[#allocation0 + $0x178] sm:$0x3] }
  0x9c   :  { %7346 = vst [vmem:[%s11542_s1 + $0x5c] sm:$0x3] %v1884_v38  ;;  %v1800_v42 = vld [vmem:[#allocation0 + $0x100] sm:$0x3]  ;;  %v1806_v43 = vld [vmem:[#allocation0 + $0x108] sm:$0x3] }
  0x9d   :  { %831 = vst.msk [vmem:[#allocation0 + $0x2c1] ss:$8 sm:$0xf] %vm3_vm0, %v828_v39   ;;  %833 = vst.msk [vmem:[#allocation0 + $0x2c1] ss:$8 sm:$0xf0] %vm3_vm0, %v828_v39   ;;  %v900_v39 = vpop.permute.xlu1 %899  }
  0x9e   :  { %822 = vst.msk [vmem:[#allocation0 + $0x281] ss:$8 sm:$0xf] %vm3_vm0, %v819_v40   ;;  %824 = vst.msk [vmem:[#allocation0 + $0x281] ss:$8 sm:$0xf0] %vm3_vm0, %v819_v40   ;;  %v891_v40 = vpop.permute.xlu0 %890  }
  0x9f   :  { %7347 = vst [vmem:[%s11542_s1 + $0x5e] sm:$0x3] %v1890_v41  ;;  %7332 = vst [vmem:[%s11542_s1 + $0x40] sm:$0x3] %v1800_v42  ;;  %v1812_v46 = vld [vmem:[#allocation0 + $0x110] sm:$0x3] }
  0xa0   :  { %7333 = vst [vmem:[%s11542_s1 + $0x42] sm:$0x3] %v1806_v43  ;;  %v1818_v47 = vld [vmem:[#allocation0 + $0x118] sm:$0x3]  ;;  %v1824_v48 = vld [vmem:[#allocation0 + $0x120] sm:$0x3] }
  0xa1   :  { %7334 = vst [vmem:[%s11542_s1 + $0x44] sm:$0x3] %v1812_v46  ;;  %7335 = vst [vmem:[%s11542_s1 + $0x46] sm:$0x3] %v1818_v47  ;;  %v1830_v49 = vld [vmem:[#allocation0 + $0x128] sm:$0x3] }
  0xa2   :  { %7336 = vst [vmem:[%s11542_s1 + $0x48] sm:$0x3] %v1824_v48  ;;  %v1836_v50 = vld [vmem:[#allocation0 + $0x130] sm:$0x3]  ;;  %v1842_v51 = vld [vmem:[#allocation0 + $0x138] sm:$0x3] }
  0xa3   :  { %7337 = vst [vmem:[%s11542_s1 + $0x4a] sm:$0x3] %v1830_v49  ;;  %7338 = vst [vmem:[%s11542_s1 + $0x4c] sm:$0x3] %v1836_v50  ;;  %v1944_v52 = vld [vmem:[#allocation0 + $0x1c0] sm:$0x3] }
  0xa4   :  { %7339 = vst [vmem:[%s11542_s1 + $0x4e] sm:$0x3] %v1842_v51  ;;  %v1950_v53 = vld [vmem:[#allocation0 + $0x1c8] sm:$0x3]  ;;  %v1956_v54 = vld [vmem:[#allocation0 + $0x1d0] sm:$0x3] }
  0xa5   :  { %7356 = vst [vmem:[%s11542_s1 + $0x70] sm:$0x3] %v1944_v52  ;;  %7357 = vst [vmem:[%s11542_s1 + $0x72] sm:$0x3] %v1950_v53  ;;  %v1962_v57 = vld [vmem:[#allocation0 + $0x1d8] sm:$0x3] }
  0xa6   :  { %7358 = vst [vmem:[%s11542_s1 + $0x74] sm:$0x3] %v1956_v54  ;;  %v1968_v58 = vld [vmem:[#allocation0 + $0x1e0] sm:$0x3]  ;;  %v1974_v59 = vld [vmem:[#allocation0 + $0x1e8] sm:$0x3] }
  0xa7   :  { %849 = vst.msk [vmem:[#allocation0 + $0x341] ss:$8 sm:$0xf] %vm3_vm0, %v846_v55   ;;  %851 = vst.msk [vmem:[#allocation0 + $0x341] ss:$8 sm:$0xf0] %vm3_vm0, %v846_v55   ;;  %v918_v55 = vpop.permute.xlu1 %917  }
  0xa8   :  { %840 = vst.msk [vmem:[#allocation0 + $0x301] ss:$8 sm:$0xf] %vm3_vm0, %v837_v56   ;;  %842 = vst.msk [vmem:[#allocation0 + $0x301] ss:$8 sm:$0xf0] %vm3_vm0, %v837_v56   ;;  %v909_v56 = vpop.permute.xlu0 %908  }
  0xa9   :  { %v7276_v60 = vld.sshfl [vmem:[%s11541_s0 + $0x298] sm:$0xff pattern:$0xba983210]   ;;  %v7275_v61 = vld [vmem:[%s11541_s0 + $0x290] sm:$0xff]   ;;  %7359 = vst [vmem:[%s11542_s1 + $0x76] sm:$0x3] %v1962_v57 }
  0xaa   :  { %7360 = vst [vmem:[%s11542_s1 + $0x78] sm:$0x3] %v1968_v58  ;;  %7361 = vst [vmem:[%s11542_s1 + $0x7a] sm:$0x3] %v1974_v59  ;;  %v1980_v62 = vld [vmem:[#allocation0 + $0x1f0] sm:$0x3]  ;;  %1385 = vrot.lane.b32.xlu1 %v7276_v60, %s8085_s10  ;;  %1376 = vrot.lane.b32.xlu0 %v7275_v61, %s8085_s10 }
  0xab   :  { %v1986_v63 = vld [vmem:[#allocation0 + $0x1f8] sm:$0x3]  ;;  %v1896_v0 = vld [vmem:[#allocation0 + $0x180] sm:$0x3]  ;;  %7362 = vst [vmem:[%s11542_s1 + $0x7c] sm:$0x3] %v1980_v62 }
  0xac   :  { %7363 = vst [vmem:[%s11542_s1 + $0x7e] sm:$0x3] %v1986_v63  ;;  %7348 = vst [vmem:[%s11542_s1 + $0x60] sm:$0x3] %v1896_v0  ;;  %v1902_v1 = vld [vmem:[#allocation0 + $0x188] sm:$0x3] }
  0xad   :  { %v1908_v2 = vld [vmem:[#allocation0 + $0x190] sm:$0x3]  ;;  %v1914_v3 = vld [vmem:[#allocation0 + $0x198] sm:$0x3]  ;;  %7349 = vst [vmem:[%s11542_s1 + $0x62] sm:$0x3] %v1902_v1 }
  0xae   :  { %7350 = vst [vmem:[%s11542_s1 + $0x64] sm:$0x3] %v1908_v2  ;;  %7351 = vst [vmem:[%s11542_s1 + $0x66] sm:$0x3] %v1914_v3  ;;  %v1920_v4 = vld [vmem:[#allocation0 + $0x1a0] sm:$0x3] }
  0xaf   :  { %v1926_v5 = vld [vmem:[#allocation0 + $0x1a8] sm:$0x3]  ;;  %v1932_v6 = vld [vmem:[#allocation0 + $0x1b0] sm:$0x3]  ;;  %7352 = vst [vmem:[%s11542_s1 + $0x68] sm:$0x3] %v1920_v4 }
  0xb0   :  { %7353 = vst [vmem:[%s11542_s1 + $0x6a] sm:$0x3] %v1926_v5  ;;  %7354 = vst [vmem:[%s11542_s1 + $0x6c] sm:$0x3] %v1932_v6  ;;  %v1938_v9 = vld [vmem:[#allocation0 + $0x1b8] sm:$0x3] }
  0xb1   :  { %v2040_v10 = vld [vmem:[#allocation0 + $0x240] sm:$0x3]  ;;  %v2046_v11 = vld [vmem:[#allocation0 + $0x248] sm:$0x3]  ;;  %v7278_v12 = vld [vmem:[%s11541_s0 + $0x2ac] sm:$0xff]  }
  0xb2   :  { %867 = vst.msk [vmem:[#allocation0 + $0x3c1] ss:$8 sm:$0xf] %vm3_vm0, %v864_v7   ;;  %869 = vst.msk [vmem:[#allocation0 + $0x3c1] ss:$8 sm:$0xf0] %vm3_vm0, %v864_v7   ;;  %1403 = vrot.lane.b32.xlu1 %v7278_v12, %s8085_s10  ;;  %v936_v7 = vpop.permute.xlu1 %935  }
  0xb3   :  { %858 = vst.msk [vmem:[#allocation0 + $0x381] ss:$8 sm:$0xf] %vm3_vm0, %v855_v8   ;;  %860 = vst.msk [vmem:[#allocation0 + $0x381] ss:$8 sm:$0xf0] %vm3_vm0, %v855_v8   ;;  %v927_v8 = vpop.permute.xlu0 %926  }
  0xb4   :  { %v7277_v13 = vld [vmem:[%s11541_s0 + $0x2a4] sm:$0xff]   ;;  %7355 = vst [vmem:[%s11542_s1 + $0x6e] sm:$0x3] %v1938_v9  ;;  %7372 = vst [vmem:[%s11542_s1 + $0x90] sm:$0x3] %v2040_v10  ;;  %v7279_v29 = vld [vmem:[%s11541_s0 + $0x2b4] sm:$0xff]  }
  0xb5   :  { %7373 = vst [vmem:[%s11542_s1 + $0x92] sm:$0x3] %v2046_v11  ;;  %v2052_v14 = vld [vmem:[#allocation0 + $0x250] sm:$0x3]  ;;  %v2058_v15 = vld [vmem:[#allocation0 + $0x258] sm:$0x3]  ;;  %1394 = vrot.lane.b32.xlu0 %v7277_v13, %s8085_s10 }
  0xb6   :  { %v2064_v16 = vld [vmem:[#allocation0 + $0x260] sm:$0x3]  ;;  %7374 = vst [vmem:[%s11542_s1 + $0x94] sm:$0x3] %v2052_v14  ;;  %7375 = vst [vmem:[%s11542_s1 + $0x96] sm:$0x3] %v2058_v15 }
  0xb7   :  { %7376 = vst [vmem:[%s11542_s1 + $0x98] sm:$0x3] %v2064_v16  ;;  %v2070_v17 = vld [vmem:[#allocation0 + $0x268] sm:$0x3]  ;;  %v2076_v18 = vld [vmem:[#allocation0 + $0x270] sm:$0x3] }
  0xb8   :  { %v2082_v19 = vld [vmem:[#allocation0 + $0x278] sm:$0x3]  ;;  %7377 = vst [vmem:[%s11542_s1 + $0x9a] sm:$0x3] %v2070_v17  ;;  %7378 = vst [vmem:[%s11542_s1 + $0x9c] sm:$0x3] %v2076_v18 }
  0xb9   :  { %7379 = vst [vmem:[%s11542_s1 + $0x9e] sm:$0x3] %v2082_v19  ;;  %v1992_v20 = vld [vmem:[#allocation0 + $0x200] sm:$0x3]  ;;  %v1998_v21 = vld [vmem:[#allocation0 + $0x208] sm:$0x3]  ;;  %1412 = vrot.lane.b32.xlu0 %v7279_v29, %s8085_s10 }
  0xba   :  { %v2004_v22 = vld [vmem:[#allocation0 + $0x210] sm:$0x3]  ;;  %7364 = vst [vmem:[%s11542_s1 + $0x80] sm:$0x3] %v1992_v20  ;;  %7365 = vst [vmem:[%s11542_s1 + $0x82] sm:$0x3] %v1998_v21 }
  0xbb   :  { %7366 = vst [vmem:[%s11542_s1 + $0x84] sm:$0x3] %v2004_v22  ;;  %v2010_v25 = vld [vmem:[#allocation0 + $0x218] sm:$0x3]  ;;  %v2016_v26 = vld [vmem:[#allocation0 + $0x220] sm:$0x3] }
  0xbc   :  { %v2022_v27 = vld [vmem:[#allocation0 + $0x228] sm:$0x3]  ;;  %885 = vst.msk [vmem:[#allocation0 + $0x441] ss:$8 sm:$0xf] %vm3_vm0, %v882_v23   ;;  %v7280_v28 = vld [vmem:[%s11541_s0 + $0x2c0] sm:$0xff]  }
  0xbd   :  { %887 = vst.msk [vmem:[#allocation0 + $0x441] ss:$8 sm:$0xf0] %vm3_vm0, %v882_v23   ;;  %876 = vst.msk [vmem:[#allocation0 + $0x401] ss:$8 sm:$0xf] %vm3_vm0, %v873_v24   ;;  %1421 = vrot.lane.b32.xlu1 %v7280_v28, %s8085_s10  ;;  %v954_v23 = vpop.permute.xlu1 %953  }
  0xbe   :  { %878 = vst.msk [vmem:[#allocation0 + $0x401] ss:$8 sm:$0xf0] %vm3_vm0, %v873_v24   ;;  %7367 = vst [vmem:[%s11542_s1 + $0x86] sm:$0x3] %v2010_v25  ;;  %v7282_v44 = vld [vmem:[%s11541_s0 + $0x2d0] sm:$0xff]   ;;  %v945_v24 = vpop.permute.xlu0 %944  }
  0xbf   :  { %7368 = vst [vmem:[%s11542_s1 + $0x88] sm:$0x3] %v2016_v26  ;;  %7369 = vst [vmem:[%s11542_s1 + $0x8a] sm:$0x3] %v2022_v27  ;;  %v2028_v30 = vld [vmem:[#allocation0 + $0x230] sm:$0x3] }
  0xc0   :  { %v2034_v31 = vld [vmem:[#allocation0 + $0x238] sm:$0x3]  ;;  %v2136_v32 = vld [vmem:[#allocation0 + $0x2c0] sm:$0x3]  ;;  %7370 = vst [vmem:[%s11542_s1 + $0x8c] sm:$0x3] %v2028_v30 }
  0xc1   :  { %7371 = vst [vmem:[%s11542_s1 + $0x8e] sm:$0x3] %v2034_v31  ;;  %7388 = vst [vmem:[%s11542_s1 + $0xb0] sm:$0x3] %v2136_v32  ;;  %v2142_v33 = vld [vmem:[#allocation0 + $0x2c8] sm:$0x3]  ;;  %1439 = vrot.lane.b32.xlu1 %v7282_v44, %s8085_s10 }
  0xc2   :  { %v2148_v34 = vld [vmem:[#allocation0 + $0x2d0] sm:$0x3]  ;;  %v2154_v35 = vld [vmem:[#allocation0 + $0x2d8] sm:$0x3]  ;;  %7389 = vst [vmem:[%s11542_s1 + $0xb2] sm:$0x3] %v2142_v33 }
  0xc3   :  { %7390 = vst [vmem:[%s11542_s1 + $0xb4] sm:$0x3] %v2148_v34  ;;  %7391 = vst [vmem:[%s11542_s1 + $0xb6] sm:$0x3] %v2154_v35  ;;  %v2160_v36 = vld [vmem:[#allocation0 + $0x2e0] sm:$0x3] }
  0xc4   :  { %v2166_v37 = vld [vmem:[#allocation0 + $0x2e8] sm:$0x3]  ;;  %v2172_v38 = vld [vmem:[#allocation0 + $0x2f0] sm:$0x3]  ;;  %7392 = vst [vmem:[%s11542_s1 + $0xb8] sm:$0x3] %v2160_v36 }
  0xc5   :  { %7393 = vst [vmem:[%s11542_s1 + $0xba] sm:$0x3] %v2166_v37  ;;  %7394 = vst [vmem:[%s11542_s1 + $0xbc] sm:$0x3] %v2172_v38  ;;  %v2178_v41 = vld [vmem:[#allocation0 + $0x2f8] sm:$0x3] }
  0xc6   :  { %v2088_v42 = vld [vmem:[#allocation0 + $0x280] sm:$0x3]  ;;  %v2094_v43 = vld [vmem:[#allocation0 + $0x288] sm:$0x3]  ;;  %7395 = vst [vmem:[%s11542_s1 + $0xbe] sm:$0x3] %v2178_v41 }
  0xc7   :  { %903 = vst.msk [vmem:[#allocation0 + $0x4c1] ss:$8 sm:$0xf] %vm3_vm0, %v900_v39   ;;  %905 = vst.msk [vmem:[#allocation0 + $0x4c1] ss:$8 sm:$0xf0] %vm3_vm0, %v900_v39   ;;  %v972_v39 = vpop.permute.xlu1 %971  }
  0xc8   :  { %894 = vst.msk [vmem:[#allocation0 + $0x481] ss:$8 sm:$0xf] %vm3_vm0, %v891_v40   ;;  %896 = vst.msk [vmem:[#allocation0 + $0x481] ss:$8 sm:$0xf0] %vm3_vm0, %v891_v40   ;;  %v963_v40 = vpop.permute.xlu0 %962  }
  0xc9   :  { %v7281_v45 = vld [vmem:[%s11541_s0 + $0x2c8] sm:$0xff]   ;;  %7380 = vst [vmem:[%s11542_s1 + $0xa0] sm:$0x3] %v2088_v42  ;;  %7381 = vst [vmem:[%s11542_s1 + $0xa2] sm:$0x3] %v2094_v43  ;;  %v7286_v12 = vld [vmem:[%s11541_s0 + $0x2f4] sm:$0xff]  }
  0xca   :  { %v2100_v46 = vld [vmem:[#allocation0 + $0x290] sm:$0x3]  ;;  %v2106_v47 = vld [vmem:[#allocation0 + $0x298] sm:$0x3]  ;;  %v2112_v48 = vld [vmem:[#allocation0 + $0x2a0] sm:$0x3]  ;;  %1430 = vrot.lane.b32.xlu0 %v7281_v45, %s8085_s10 }
  0xcb   :  { %7382 = vst [vmem:[%s11542_s1 + $0xa4] sm:$0x3] %v2100_v46  ;;  %7383 = vst [vmem:[%s11542_s1 + $0xa6] sm:$0x3] %v2106_v47  ;;  %v2118_v49 = vld [vmem:[#allocation0 + $0x2a8] sm:$0x3] }
  0xcc   :  { %7384 = vst [vmem:[%s11542_s1 + $0xa8] sm:$0x3] %v2112_v48  ;;  %v2124_v50 = vld [vmem:[#allocation0 + $0x2b0] sm:$0x3]  ;;  %v2130_v51 = vld [vmem:[#allocation0 + $0x2b8] sm:$0x3] }
  0xcd   :  { %7385 = vst [vmem:[%s11542_s1 + $0xaa] sm:$0x3] %v2118_v49  ;;  %7386 = vst [vmem:[%s11542_s1 + $0xac] sm:$0x3] %v2124_v50  ;;  %v2232_v52 = vld [vmem:[#allocation0 + $0x340] sm:$0x3] }
  0xce   :  { %7387 = vst [vmem:[%s11542_s1 + $0xae] sm:$0x3] %v2130_v51  ;;  %v2238_v53 = vld [vmem:[#allocation0 + $0x348] sm:$0x3]  ;;  %v2244_v54 = vld [vmem:[#allocation0 + $0x350] sm:$0x3] }
  0xcf   :  { %7404 = vst [vmem:[%s11542_s1 + $0xd0] sm:$0x3] %v2232_v52  ;;  %7405 = vst [vmem:[%s11542_s1 + $0xd2] sm:$0x3] %v2238_v53  ;;  %v2250_v57 = vld [vmem:[#allocation0 + $0x358] sm:$0x3] }
  0xd0   :  { %7406 = vst [vmem:[%s11542_s1 + $0xd4] sm:$0x3] %v2244_v54  ;;  %v2256_v58 = vld [vmem:[#allocation0 + $0x360] sm:$0x3]  ;;  %v2262_v59 = vld [vmem:[#allocation0 + $0x368] sm:$0x3] }
  0xd1   :  { %921 = vst.msk [vmem:[#allocation0 + $0x541] ss:$8 sm:$0xf] %vm3_vm0, %v918_v55   ;;  %923 = vst.msk [vmem:[#allocation0 + $0x541] ss:$8 sm:$0xf0] %vm3_vm0, %v918_v55   ;;  %v990_v55 = vpop.permute.xlu1 %989  }
  0xd2   :  { %912 = vst.msk [vmem:[#allocation0 + $0x501] ss:$8 sm:$0xf] %vm3_vm0, %v909_v56   ;;  %914 = vst.msk [vmem:[#allocation0 + $0x501] ss:$8 sm:$0xf0] %vm3_vm0, %v909_v56   ;;  %v981_v56 = vpop.permute.xlu0 %980  }
  0xd3   :  { %v7284_v60 = vld [vmem:[%s11541_s0 + $0x2e4] sm:$0xff]   ;;  %v7283_v61 = vld.sshfl [vmem:[%s11541_s0 + $0x2d8] sm:$0xff pattern:$0xba983210]   ;;  %7407 = vst [vmem:[%s11542_s1 + $0xd6] sm:$0x3] %v2250_v57 }
  0xd4   :  { %7408 = vst [vmem:[%s11542_s1 + $0xd8] sm:$0x3] %v2256_v58  ;;  %7409 = vst [vmem:[%s11542_s1 + $0xda] sm:$0x3] %v2262_v59  ;;  %v2268_v62 = vld [vmem:[#allocation0 + $0x370] sm:$0x3]  ;;  %1457 = vrot.lane.b32.xlu1 %v7284_v60, %s8085_s10  ;;  %1448 = vrot.lane.b32.xlu0 %v7283_v61, %s8085_s10 }
  0xd5   :  { %v2274_v63 = vld [vmem:[#allocation0 + $0x378] sm:$0x3]  ;;  %v2184_v0 = vld [vmem:[#allocation0 + $0x300] sm:$0x3]  ;;  %7410 = vst [vmem:[%s11542_s1 + $0xdc] sm:$0x3] %v2268_v62 }
  0xd6   :  { %7411 = vst [vmem:[%s11542_s1 + $0xde] sm:$0x3] %v2274_v63  ;;  %7396 = vst [vmem:[%s11542_s1 + $0xc0] sm:$0x3] %v2184_v0  ;;  %v2190_v1 = vld [vmem:[#allocation0 + $0x308] sm:$0x3] }
  0xd7   :  { %v2196_v2 = vld [vmem:[#allocation0 + $0x310] sm:$0x3]  ;;  %v2202_v3 = vld [vmem:[#allocation0 + $0x318] sm:$0x3]  ;;  %7397 = vst [vmem:[%s11542_s1 + $0xc2] sm:$0x3] %v2190_v1 }
  0xd8   :  { %7398 = vst [vmem:[%s11542_s1 + $0xc4] sm:$0x3] %v2196_v2  ;;  %7399 = vst [vmem:[%s11542_s1 + $0xc6] sm:$0x3] %v2202_v3  ;;  %v2208_v4 = vld [vmem:[#allocation0 + $0x320] sm:$0x3]  ;;  %1475 = vrot.lane.b32.xlu1 %v7286_v12, %s8085_s10 }
  0xd9   :  { %v2214_v5 = vld [vmem:[#allocation0 + $0x328] sm:$0x3]  ;;  %v2220_v6 = vld [vmem:[#allocation0 + $0x330] sm:$0x3]  ;;  %7400 = vst [vmem:[%s11542_s1 + $0xc8] sm:$0x3] %v2208_v4 }
  0xda   :  { %7401 = vst [vmem:[%s11542_s1 + $0xca] sm:$0x3] %v2214_v5  ;;  %7402 = vst [vmem:[%s11542_s1 + $0xcc] sm:$0x3] %v2220_v6  ;;  %v2226_v9 = vld [vmem:[#allocation0 + $0x338] sm:$0x3] }
  0xdb   :  { %v2328_v10 = vld [vmem:[#allocation0 + $0x3c0] sm:$0x3]  ;;  %v2334_v11 = vld [vmem:[#allocation0 + $0x3c8] sm:$0x3]  ;;  %v7285_v13 = vld [vmem:[%s11541_s0 + $0x2ec] sm:$0xff]  }
  0xdc   :  { %939 = vst.msk [vmem:[#allocation0 + $0x5c1] ss:$8 sm:$0xf] %vm3_vm0, %v936_v7   ;;  %941 = vst.msk [vmem:[#allocation0 + $0x5c1] ss:$8 sm:$0xf0] %vm3_vm0, %v936_v7   ;;  %1466 = vrot.lane.b32.xlu0 %v7285_v13, %s8085_s10  ;;  %v1008_v7 = vpop.permute.xlu1 %1007  }
  0xdd   :  { %930 = vst.msk [vmem:[#allocation0 + $0x581] ss:$8 sm:$0xf] %vm3_vm0, %v927_v8   ;;  %932 = vst.msk [vmem:[#allocation0 + $0x581] ss:$8 sm:$0xf0] %vm3_vm0, %v927_v8   ;;  %v999_v8 = vpop.permute.xlu0 %998  }
  0xde   :  { %7403 = vst [vmem:[%s11542_s1 + $0xce] sm:$0x3] %v2226_v9  ;;  %7420 = vst [vmem:[%s11542_s1 + $0xf0] sm:$0x3] %v2328_v10  ;;  %v2340_v14 = vld [vmem:[#allocation0 + $0x3d0] sm:$0x3] }
  0xdf   :  { %7421 = vst [vmem:[%s11542_s1 + $0xf2] sm:$0x3] %v2334_v11  ;;  %v2346_v15 = vld [vmem:[#allocation0 + $0x3d8] sm:$0x3]  ;;  %v2352_v16 = vld [vmem:[#allocation0 + $0x3e0] sm:$0x3] }
  0xe0   :  { %7422 = vst [vmem:[%s11542_s1 + $0xf4] sm:$0x3] %v2340_v14  ;;  %7423 = vst [vmem:[%s11542_s1 + $0xf6] sm:$0x3] %v2346_v15  ;;  %v2358_v17 = vld [vmem:[#allocation0 + $0x3e8] sm:$0x3] }
  0xe1   :  { %7424 = vst [vmem:[%s11542_s1 + $0xf8] sm:$0x3] %v2352_v16  ;;  %v2364_v18 = vld [vmem:[#allocation0 + $0x3f0] sm:$0x3]  ;;  %v2370_v19 = vld [vmem:[#allocation0 + $0x3f8] sm:$0x3] }
  0xe2   :  { %7425 = vst [vmem:[%s11542_s1 + $0xfa] sm:$0x3] %v2358_v17  ;;  %7426 = vst [vmem:[%s11542_s1 + $0xfc] sm:$0x3] %v2364_v18  ;;  %v2280_v20 = vld [vmem:[#allocation0 + $0x380] sm:$0x3] }
  0xe3   :  { %7427 = vst [vmem:[%s11542_s1 + $0xfe] sm:$0x3] %v2370_v19  ;;  %v2286_v21 = vld [vmem:[#allocation0 + $0x388] sm:$0x3]  ;;  %v2292_v22 = vld [vmem:[#allocation0 + $0x390] sm:$0x3] }
  0xe4   :  { %7412 = vst [vmem:[%s11542_s1 + $0xe0] sm:$0x3] %v2280_v20  ;;  %7413 = vst [vmem:[%s11542_s1 + $0xe2] sm:$0x3] %v2286_v21  ;;  %v2298_v25 = vld [vmem:[#allocation0 + $0x398] sm:$0x3] }
  0xe5   :  { %7414 = vst [vmem:[%s11542_s1 + $0xe4] sm:$0x3] %v2292_v22  ;;  %v2304_v26 = vld [vmem:[#allocation0 + $0x3a0] sm:$0x3]  ;;  %v2310_v27 = vld [vmem:[#allocation0 + $0x3a8] sm:$0x3] }
  0xe6   :  { %957 = vst.msk [vmem:[#allocation0 + $0x641] ss:$8 sm:$0xf] %vm3_vm0, %v954_v23   ;;  %959 = vst.msk [vmem:[#allocation0 + $0x641] ss:$8 sm:$0xf0] %vm3_vm0, %v954_v23   ;;  %v1026_v23 = vpop.permute.xlu1 %1025  }
  0xe7   :  { %948 = vst.msk [vmem:[#allocation0 + $0x601] ss:$8 sm:$0xf] %vm3_vm0, %v945_v24   ;;  %950 = vst.msk [vmem:[#allocation0 + $0x601] ss:$8 sm:$0xf0] %vm3_vm0, %v945_v24   ;;  %v1017_v24 = vpop.permute.xlu0 %1016  }
  0xe8   :  { %v7288_v28 = vld [vmem:[%s11541_s0 + $0x308] sm:$0xff]   ;;  %v7287_v29 = vld [vmem:[%s11541_s0 + $0x300] sm:$0xff]   ;;  %7415 = vst [vmem:[%s11542_s1 + $0xe6] sm:$0x3] %v2298_v25  ;;  %7416 = vst [vmem:[%s11542_s1 + $0xe8] sm:$0x3] %v2304_v26 }
  0xe9   :  { %7417 = vst [vmem:[%s11542_s1 + $0xea] sm:$0x3] %v2310_v27  ;;  %v2316_v30 = vld [vmem:[#allocation0 + $0x3b0] sm:$0x3]  ;;  %v2322_v31 = vld [vmem:[#allocation0 + $0x3b8] sm:$0x3]  ;;  %1493 = vrot.lane.b32.xlu1 %v7288_v28, %s8085_s10  ;;  %1484 = vrot.lane.b32.xlu0 %v7287_v29, %s8085_s10 }
  0xea   :  { %v2424_v32 = vld [vmem:[#allocation0 + $0x440] sm:$0x3]  ;;  %7418 = vst [vmem:[%s11542_s1 + $0xec] sm:$0x3] %v2316_v30  ;;  %7419 = vst [vmem:[%s11542_s1 + $0xee] sm:$0x3] %v2322_v31 }
  0xeb   :  { %7436 = vst [vmem:[%s11542_s1 + $0x110] sm:$0x3] %v2424_v32  ;;  %v2430_v33 = vld [vmem:[#allocation0 + $0x448] sm:$0x3]  ;;  %v2436_v34 = vld [vmem:[#allocation0 + $0x450] sm:$0x3] }
  0xec   :  { %v2442_v35 = vld [vmem:[#allocation0 + $0x458] sm:$0x3]  ;;  %7437 = vst [vmem:[%s11542_s1 + $0x112] sm:$0x3] %v2430_v33  ;;  %7438 = vst [vmem:[%s11542_s1 + $0x114] sm:$0x3] %v2436_v34 }
  0xed   :  { %7439 = vst [vmem:[%s11542_s1 + $0x116] sm:$0x3] %v2442_v35  ;;  %v2448_v36 = vld [vmem:[#allocation0 + $0x460] sm:$0x3]  ;;  %v2454_v37 = vld [vmem:[#allocation0 + $0x468] sm:$0x3] }
  0xee   :  { %v2460_v38 = vld [vmem:[#allocation0 + $0x470] sm:$0x3]  ;;  %7440 = vst [vmem:[%s11542_s1 + $0x118] sm:$0x3] %v2448_v36  ;;  %7441 = vst [vmem:[%s11542_s1 + $0x11a] sm:$0x3] %v2454_v37 }
  0xef   :  { %7442 = vst [vmem:[%s11542_s1 + $0x11c] sm:$0x3] %v2460_v38  ;;  %v2466_v41 = vld [vmem:[#allocation0 + $0x478] sm:$0x3]  ;;  %v2376_v42 = vld [vmem:[#allocation0 + $0x400] sm:$0x3] }
  0xf0   :  { %v2382_v43 = vld [vmem:[#allocation0 + $0x408] sm:$0x3]  ;;  %975 = vst.msk [vmem:[#allocation0 + $0x6c1] ss:$8 sm:$0xf] %vm3_vm0, %v972_v39   ;;  %v7289_v45 = vld [vmem:[%s11541_s0 + $0x310] sm:$0xff]  }
  0xf1   :  { %977 = vst.msk [vmem:[#allocation0 + $0x6c1] ss:$8 sm:$0xf0] %vm3_vm0, %v972_v39   ;;  %966 = vst.msk [vmem:[#allocation0 + $0x681] ss:$8 sm:$0xf] %vm3_vm0, %v963_v40   ;;  %1502 = vrot.lane.b32.xlu0 %v7289_v45, %s8085_s10  ;;  %v1044_v39 = vpop.permute.xlu1 %1043  }
  0xf2   :  { %968 = vst.msk [vmem:[#allocation0 + $0x681] ss:$8 sm:$0xf0] %vm3_vm0, %v963_v40   ;;  %v7290_v44 = vld.sshfl [vmem:[%s11541_s0 + $0x318] sm:$0xff pattern:$0xba983210]   ;;  %v1035_v40 = vpop.permute.xlu0 %1034  }
  0xf3   :  { %7443 = vst [vmem:[%s11542_s1 + $0x11e] sm:$0x3] %v2466_v41  ;;  %7428 = vst [vmem:[%s11542_s1 + $0x100] sm:$0x3] %v2376_v42  ;;  %v2388_v46 = vld [vmem:[#allocation0 + $0x410] sm:$0x3]  ;;  %1511 = vrot.lane.b32.xlu1 %v7290_v44, %s8085_s10 }
  0xf4   :  { %7429 = vst [vmem:[%s11542_s1 + $0x102] sm:$0x3] %v2382_v43  ;;  %v2394_v47 = vld [vmem:[#allocation0 + $0x418] sm:$0x3]  ;;  %v2400_v48 = vld [vmem:[#allocation0 + $0x420] sm:$0x3] }
  0xf5   :  { %7430 = vst [vmem:[%s11542_s1 + $0x104] sm:$0x3] %v2388_v46  ;;  %7431 = vst [vmem:[%s11542_s1 + $0x106] sm:$0x3] %v2394_v47  ;;  %v2406_v49 = vld [vmem:[#allocation0 + $0x428] sm:$0x3] }
  0xf6   :  { %7432 = vst [vmem:[%s11542_s1 + $0x108] sm:$0x3] %v2400_v48  ;;  %v2412_v50 = vld [vmem:[#allocation0 + $0x430] sm:$0x3]  ;;  %v2418_v51 = vld [vmem:[#allocation0 + $0x438] sm:$0x3] }
  0xf7   :  { %7433 = vst [vmem:[%s11542_s1 + $0x10a] sm:$0x3] %v2406_v49  ;;  %7434 = vst [vmem:[%s11542_s1 + $0x10c] sm:$0x3] %v2412_v50  ;;  %v2520_v52 = vld [vmem:[#allocation0 + $0x4c0] sm:$0x3] }
  0xf8   :  { %7435 = vst [vmem:[%s11542_s1 + $0x10e] sm:$0x3] %v2418_v51  ;;  %v2526_v53 = vld [vmem:[#allocation0 + $0x4c8] sm:$0x3]  ;;  %v2532_v54 = vld [vmem:[#allocation0 + $0x4d0] sm:$0x3] }
  0xf9   :  { %7452 = vst [vmem:[%s11542_s1 + $0x130] sm:$0x3] %v2520_v52  ;;  %7453 = vst [vmem:[%s11542_s1 + $0x132] sm:$0x3] %v2526_v53  ;;  %v2538_v57 = vld [vmem:[#allocation0 + $0x4d8] sm:$0x3] }
  0xfa   :  { %7454 = vst [vmem:[%s11542_s1 + $0x134] sm:$0x3] %v2532_v54  ;;  %v2544_v58 = vld [vmem:[#allocation0 + $0x4e0] sm:$0x3]  ;;  %v2550_v59 = vld [vmem:[#allocation0 + $0x4e8] sm:$0x3] }
  0xfb   :  { %993 = vst.msk [vmem:[#allocation0 + $0x741] ss:$8 sm:$0xf] %vm3_vm0, %v990_v55   ;;  %995 = vst.msk [vmem:[#allocation0 + $0x741] ss:$8 sm:$0xf0] %vm3_vm0, %v990_v55   ;;  %v1062_v55 = vpop.permute.xlu1 %1061  }
  0xfc   :  { %984 = vst.msk [vmem:[#allocation0 + $0x701] ss:$8 sm:$0xf] %vm3_vm0, %v981_v56   ;;  %986 = vst.msk [vmem:[#allocation0 + $0x701] ss:$8 sm:$0xf0] %vm3_vm0, %v981_v56   ;;  %v1053_v56 = vpop.permute.xlu0 %1052  }
  0xfd   :  { %v7292_v60 = vld [vmem:[%s11541_s0 + $0x32c] sm:$0xff]   ;;  %v7291_v61 = vld [vmem:[%s11541_s0 + $0x324] sm:$0xff]   ;;  %7455 = vst [vmem:[%s11542_s1 + $0x136] sm:$0x3] %v2538_v57  ;;  %7456 = vst [vmem:[%s11542_s1 + $0x138] sm:$0x3] %v2544_v58 }
  0xfe   :  { %7457 = vst [vmem:[%s11542_s1 + $0x13a] sm:$0x3] %v2550_v59  ;;  %v2556_v62 = vld [vmem:[#allocation0 + $0x4f0] sm:$0x3]  ;;  %v2562_v63 = vld [vmem:[#allocation0 + $0x4f8] sm:$0x3]  ;;  %1529 = vrot.lane.b32.xlu1 %v7292_v60, %s8085_s10  ;;  %1520 = vrot.lane.b32.xlu0 %v7291_v61, %s8085_s10 }
  0xff   :  { %v2472_v0 = vld [vmem:[#allocation0 + $0x480] sm:$0x3]  ;;  %7458 = vst [vmem:[%s11542_s1 + $0x13c] sm:$0x3] %v2556_v62  ;;  %7459 = vst [vmem:[%s11542_s1 + $0x13e] sm:$0x3] %v2562_v63 }
 0x100   :  { %7444 = vst [vmem:[%s11542_s1 + $0x120] sm:$0x3] %v2472_v0  ;;  %v2478_v1 = vld [vmem:[#allocation0 + $0x488] sm:$0x3]  ;;  %v2484_v2 = vld [vmem:[#allocation0 + $0x490] sm:$0x3] }
 0x101   :  { %v2490_v3 = vld [vmem:[#allocation0 + $0x498] sm:$0x3]  ;;  %7445 = vst [vmem:[%s11542_s1 + $0x122] sm:$0x3] %v2478_v1  ;;  %7446 = vst [vmem:[%s11542_s1 + $0x124] sm:$0x3] %v2484_v2 }
 0x102   :  { %7447 = vst [vmem:[%s11542_s1 + $0x126] sm:$0x3] %v2490_v3  ;;  %v2496_v4 = vld [vmem:[#allocation0 + $0x4a0] sm:$0x3]  ;;  %v2502_v5 = vld [vmem:[#allocation0 + $0x4a8] sm:$0x3] }
 0x103   :  { %v2508_v6 = vld [vmem:[#allocation0 + $0x4b0] sm:$0x3]  ;;  %7448 = vst [vmem:[%s11542_s1 + $0x128] sm:$0x3] %v2496_v4  ;;  %7449 = vst [vmem:[%s11542_s1 + $0x12a] sm:$0x3] %v2502_v5 }
 0x104   :  { %7450 = vst [vmem:[%s11542_s1 + $0x12c] sm:$0x3] %v2508_v6  ;;  %v2514_v9 = vld [vmem:[#allocation0 + $0x4b8] sm:$0x3]  ;;  %v2616_v10 = vld [vmem:[#allocation0 + $0x540] sm:$0x3] }
 0x105   :  { %v2622_v11 = vld [vmem:[#allocation0 + $0x548] sm:$0x3]  ;;  %1011 = vst.msk [vmem:[#allocation0 + $0x7c1] ss:$8 sm:$0xf] %vm3_vm0, %v1008_v7   ;;  %v7294_v12 = vld [vmem:[%s11541_s0 + $0x340] sm:$0xff]  }
 0x106   :  { %1013 = vst.msk [vmem:[#allocation0 + $0x7c1] ss:$8 sm:$0xf0] %vm3_vm0, %v1008_v7   ;;  %1002 = vst.msk [vmem:[#allocation0 + $0x781] ss:$8 sm:$0xf] %vm3_vm0, %v999_v8   ;;  %1547 = vrot.lane.b32.xlu1 %v7294_v12, %s8085_s10  ;;  %v1080_v7 = vpop.permute.xlu1 %1079  }
 0x107   :  { %1004 = vst.msk [vmem:[#allocation0 + $0x781] ss:$8 sm:$0xf0] %vm3_vm0, %v999_v8   ;;  %v7293_v13 = vld [vmem:[%s11541_s0 + $0x334] sm:$0xff]   ;;  %7451 = vst [vmem:[%s11542_s1 + $0x12e] sm:$0x3] %v2514_v9  ;;  %v1071_v8 = vpop.permute.xlu0 %1070  }
 0x108   :  { %7468 = vst [vmem:[%s11542_s1 + $0x150] sm:$0x3] %v2616_v10  ;;  %7469 = vst [vmem:[%s11542_s1 + $0x152] sm:$0x3] %v2622_v11  ;;  %v2628_v14 = vld [vmem:[#allocation0 + $0x550] sm:$0x3]  ;;  %1538 = vrot.lane.b32.xlu0 %v7293_v13, %s8085_s10 }
 0x109   :  { %v2634_v15 = vld [vmem:[#allocation0 + $0x558] sm:$0x3]  ;;  %v2640_v16 = vld [vmem:[#allocation0 + $0x560] sm:$0x3]  ;;  %7470 = vst [vmem:[%s11542_s1 + $0x154] sm:$0x3] %v2628_v14 }
 0x10a   :  { %7471 = vst [vmem:[%s11542_s1 + $0x156] sm:$0x3] %v2634_v15  ;;  %7472 = vst [vmem:[%s11542_s1 + $0x158] sm:$0x3] %v2640_v16  ;;  %v2646_v17 = vld [vmem:[#allocation0 + $0x568] sm:$0x3] }
 0x10b   :  { %v2652_v18 = vld [vmem:[#allocation0 + $0x570] sm:$0x3]  ;;  %v2658_v19 = vld [vmem:[#allocation0 + $0x578] sm:$0x3]  ;;  %7473 = vst [vmem:[%s11542_s1 + $0x15a] sm:$0x3] %v2646_v17 }
 0x10c   :  { %7474 = vst [vmem:[%s11542_s1 + $0x15c] sm:$0x3] %v2652_v18  ;;  %7475 = vst [vmem:[%s11542_s1 + $0x15e] sm:$0x3] %v2658_v19  ;;  %v2568_v20 = vld [vmem:[#allocation0 + $0x500] sm:$0x3] }
 0x10d   :  { %v2574_v21 = vld [vmem:[#allocation0 + $0x508] sm:$0x3]  ;;  %v2580_v22 = vld [vmem:[#allocation0 + $0x510] sm:$0x3]  ;;  %7460 = vst [vmem:[%s11542_s1 + $0x140] sm:$0x3] %v2568_v20 }
 0x10e   :  { %7461 = vst [vmem:[%s11542_s1 + $0x142] sm:$0x3] %v2574_v21  ;;  %7462 = vst [vmem:[%s11542_s1 + $0x144] sm:$0x3] %v2580_v22  ;;  %v2586_v25 = vld [vmem:[#allocation0 + $0x518] sm:$0x3]  ;;  %v1098_v21 = vpop.permute.xlu1 %1097   ;;  %v1089_v22 = vpop.permute.xlu0 %1088  }
 0x10f   :  { %v2592_v26 = vld [vmem:[#allocation0 + $0x520] sm:$0x3]  ;;  %v2598_v27 = vld [vmem:[#allocation0 + $0x528] sm:$0x3]  ;;  %v7296_v28 = vld [vmem:[%s11541_s0 + $0x350] sm:$0xff]  }
 0x110   :  { %1029 = vst.msk [vmem:[#allocation0 + $0x841] ss:$8 sm:$0xf] %vm3_vm0, %v1026_v23   ;;  %1031 = vst.msk [vmem:[#allocation0 + $0x841] ss:$8 sm:$0xf0] %vm3_vm0, %v1026_v23   ;;  %1565 = vrot.lane.b32.xlu1 %v7296_v28, %s8085_s10 }
 0x111   :  { %1020 = vst.msk [vmem:[#allocation0 + $0x801] ss:$8 sm:$0xf] %vm3_vm0, %v1017_v24   ;;  %1022 = vst.msk [vmem:[#allocation0 + $0x801] ss:$8 sm:$0xf0] %vm3_vm0, %v1017_v24  }
 0x112   :  { %v7295_v29 = vld [vmem:[%s11541_s0 + $0x348] sm:$0xff]   ;;  %7463 = vst [vmem:[%s11542_s1 + $0x146] sm:$0x3] %v2586_v25  ;;  %7464 = vst [vmem:[%s11542_s1 + $0x148] sm:$0x3] %v2592_v26  ;;  %v7300_v60 = vld [vmem:[%s11541_s0 + $0x374] sm:$0xff]  }
 0x113   :  { %7465 = vst [vmem:[%s11542_s1 + $0x14a] sm:$0x3] %v2598_v27  ;;  %v2604_v30 = vld [vmem:[#allocation0 + $0x530] sm:$0x3]  ;;  %v2610_v31 = vld [vmem:[#allocation0 + $0x538] sm:$0x3]  ;;  %1556 = vrot.lane.b32.xlu0 %v7295_v29, %s8085_s10 }
 0x114   :  { %v2712_v32 = vld [vmem:[#allocation0 + $0x5c0] sm:$0x3]  ;;  %7466 = vst [vmem:[%s11542_s1 + $0x14c] sm:$0x3] %v2604_v30  ;;  %7467 = vst [vmem:[%s11542_s1 + $0x14e] sm:$0x3] %v2610_v31 }
 0x115   :  { %7484 = vst [vmem:[%s11542_s1 + $0x170] sm:$0x3] %v2712_v32  ;;  %v2718_v33 = vld [vmem:[#allocation0 + $0x5c8] sm:$0x3]  ;;  %v2724_v34 = vld [vmem:[#allocation0 + $0x5d0] sm:$0x3] }
 0x116   :  { %v2730_v35 = vld [vmem:[#allocation0 + $0x5d8] sm:$0x3]  ;;  %7485 = vst [vmem:[%s11542_s1 + $0x172] sm:$0x3] %v2718_v33  ;;  %7486 = vst [vmem:[%s11542_s1 + $0x174] sm:$0x3] %v2724_v34 }
 0x117   :  { %7487 = vst [vmem:[%s11542_s1 + $0x176] sm:$0x3] %v2730_v35  ;;  %v2736_v36 = vld [vmem:[#allocation0 + $0x5e0] sm:$0x3]  ;;  %v2742_v37 = vld [vmem:[#allocation0 + $0x5e8] sm:$0x3]  ;;  %v1116_v35 = vpop.permute.xlu1 %1115  }
 0x118   :  { %v2748_v38 = vld [vmem:[#allocation0 + $0x5f0] sm:$0x3]  ;;  %7488 = vst [vmem:[%s11542_s1 + $0x178] sm:$0x3] %v2736_v36  ;;  %7489 = vst [vmem:[%s11542_s1 + $0x17a] sm:$0x3] %v2742_v37  ;;  %v1107_v36 = vpop.permute.xlu0 %1106  }
 0x119   :  { %7490 = vst [vmem:[%s11542_s1 + $0x17c] sm:$0x3] %v2748_v38  ;;  %v2754_v41 = vld [vmem:[#allocation0 + $0x5f8] sm:$0x3]  ;;  %v2664_v42 = vld [vmem:[#allocation0 + $0x580] sm:$0x3] }
 0x11a   :  { %v2670_v43 = vld [vmem:[#allocation0 + $0x588] sm:$0x3]  ;;  %1047 = vst.msk [vmem:[#allocation0 + $0x8c1] ss:$8 sm:$0xf] %vm3_vm0, %v1044_v39   ;;  %v7299_v61 = vld [vmem:[%s11541_s0 + $0x36c] sm:$0xff]  }
 0x11b   :  { %1049 = vst.msk [vmem:[#allocation0 + $0x8c1] ss:$8 sm:$0xf0] %vm3_vm0, %v1044_v39   ;;  %1038 = vst.msk [vmem:[#allocation0 + $0x881] ss:$8 sm:$0xf] %vm3_vm0, %v1035_v40  }
 0x11c   :  { %1040 = vst.msk [vmem:[#allocation0 + $0x881] ss:$8 sm:$0xf0] %vm3_vm0, %v1035_v40   ;;  %v7298_v44 = vld [vmem:[%s11541_s0 + $0x364] sm:$0xff]   ;;  %7491 = vst [vmem:[%s11542_s1 + $0x17e] sm:$0x3] %v2754_v41 }
 0x11d   :  { %v7297_v45 = vld.sshfl [vmem:[%s11541_s0 + $0x358] sm:$0xff pattern:$0xba983210]   ;;  %7476 = vst [vmem:[%s11542_s1 + $0x160] sm:$0x3] %v2664_v42  ;;  %1583 = vrot.lane.b32.xlu1 %v7298_v44, %s8085_s10 }
 0x11e   :  { %7477 = vst [vmem:[%s11542_s1 + $0x162] sm:$0x3] %v2670_v43  ;;  %v2676_v46 = vld [vmem:[#allocation0 + $0x590] sm:$0x3]  ;;  %v2682_v47 = vld [vmem:[#allocation0 + $0x598] sm:$0x3]  ;;  %1574 = vrot.lane.b32.xlu0 %v7297_v45, %s8085_s10 }
 0x11f   :  { %v2688_v48 = vld [vmem:[#allocation0 + $0x5a0] sm:$0x3]  ;;  %7478 = vst [vmem:[%s11542_s1 + $0x164] sm:$0x3] %v2676_v46  ;;  %7479 = vst [vmem:[%s11542_s1 + $0x166] sm:$0x3] %v2682_v47 }
 0x120   :  { %7480 = vst [vmem:[%s11542_s1 + $0x168] sm:$0x3] %v2688_v48  ;;  %v2694_v49 = vld [vmem:[#allocation0 + $0x5a8] sm:$0x3]  ;;  %v2700_v50 = vld [vmem:[#allocation0 + $0x5b0] sm:$0x3] }
 0x121   :  { %v2706_v51 = vld [vmem:[#allocation0 + $0x5b8] sm:$0x3]  ;;  %7481 = vst [vmem:[%s11542_s1 + $0x16a] sm:$0x3] %v2694_v49  ;;  %7482 = vst [vmem:[%s11542_s1 + $0x16c] sm:$0x3] %v2700_v50  ;;  %1601 = vrot.lane.b32.xlu1 %v7300_v60, %s8085_s10  ;;  %v1134_v49 = vpop.permute.xlu1 %1133   ;;  %v1125_v50 = vpop.permute.xlu0 %1124  }
 0x122   :  { %7483 = vst [vmem:[%s11542_s1 + $0x16e] sm:$0x3] %v2706_v51  ;;  %v2808_v52 = vld [vmem:[#allocation0 + $0x640] sm:$0x3]  ;;  %v2814_v53 = vld [vmem:[#allocation0 + $0x648] sm:$0x3]  ;;  %1592 = vrot.lane.b32.xlu0 %v7299_v61, %s8085_s10 }
 0x123   :  { %v2820_v54 = vld [vmem:[#allocation0 + $0x650] sm:$0x3]  ;;  %7500 = vst [vmem:[%s11542_s1 + $0x190] sm:$0x3] %v2808_v52  ;;  %7501 = vst [vmem:[%s11542_s1 + $0x192] sm:$0x3] %v2814_v53 }
 0x124   :  { %7502 = vst [vmem:[%s11542_s1 + $0x194] sm:$0x3] %v2820_v54  ;;  %v2826_v57 = vld [vmem:[#allocation0 + $0x658] sm:$0x3]  ;;  %v2832_v58 = vld [vmem:[#allocation0 + $0x660] sm:$0x3] }
 0x125   :  { %v2838_v59 = vld [vmem:[#allocation0 + $0x668] sm:$0x3]  ;;  %1065 = vst.msk [vmem:[#allocation0 + $0x941] ss:$8 sm:$0xf] %vm3_vm0, %v1062_v55  }
 0x126   :  { %1067 = vst.msk [vmem:[#allocation0 + $0x941] ss:$8 sm:$0xf0] %vm3_vm0, %v1062_v55   ;;  %1056 = vst.msk [vmem:[#allocation0 + $0x901] ss:$8 sm:$0xf] %vm3_vm0, %v1053_v56  }
 0x127   :  { %1058 = vst.msk [vmem:[#allocation0 + $0x901] ss:$8 sm:$0xf0] %vm3_vm0, %v1053_v56   ;;  %7503 = vst [vmem:[%s11542_s1 + $0x196] sm:$0x3] %v2826_v57 }
 0x128   :  { %7504 = vst [vmem:[%s11542_s1 + $0x198] sm:$0x3] %v2832_v58  ;;  %7505 = vst [vmem:[%s11542_s1 + $0x19a] sm:$0x3] %v2838_v59  ;;  %v2844_v62 = vld [vmem:[#allocation0 + $0x670] sm:$0x3] }
 0x129   :  { %v2850_v63 = vld [vmem:[#allocation0 + $0x678] sm:$0x3]  ;;  %v2760_v0 = vld [vmem:[#allocation0 + $0x600] sm:$0x3]  ;;  %7506 = vst [vmem:[%s11542_s1 + $0x19c] sm:$0x3] %v2844_v62 }
 0x12a   :  { %7507 = vst [vmem:[%s11542_s1 + $0x19e] sm:$0x3] %v2850_v63  ;;  %7492 = vst [vmem:[%s11542_s1 + $0x180] sm:$0x3] %v2760_v0  ;;  %v2766_v1 = vld [vmem:[#allocation0 + $0x608] sm:$0x3]  ;;  %v1152_v63 = vpop.permute.xlu1 %1151   ;;  %v1143_v0 = vpop.permute.xlu0 %1142  }
 0x12b   :  { %v2772_v2 = vld [vmem:[#allocation0 + $0x610] sm:$0x3]  ;;  %v2778_v3 = vld [vmem:[#allocation0 + $0x618] sm:$0x3]  ;;  %7493 = vst [vmem:[%s11542_s1 + $0x182] sm:$0x3] %v2766_v1 }
 0x12c   :  { %7494 = vst [vmem:[%s11542_s1 + $0x184] sm:$0x3] %v2772_v2  ;;  %7495 = vst [vmem:[%s11542_s1 + $0x186] sm:$0x3] %v2778_v3  ;;  %v2784_v4 = vld [vmem:[#allocation0 + $0x620] sm:$0x3] }
 0x12d   :  { %v2790_v5 = vld [vmem:[#allocation0 + $0x628] sm:$0x3]  ;;  %v2796_v6 = vld [vmem:[#allocation0 + $0x630] sm:$0x3]  ;;  %7496 = vst [vmem:[%s11542_s1 + $0x188] sm:$0x3] %v2784_v4 }
 0x12e   :  { %7497 = vst [vmem:[%s11542_s1 + $0x18a] sm:$0x3] %v2790_v5  ;;  %7498 = vst [vmem:[%s11542_s1 + $0x18c] sm:$0x3] %v2796_v6  ;;  %v2802_v9 = vld [vmem:[#allocation0 + $0x638] sm:$0x3] }
 0x12f   :  { %v2904_v10 = vld [vmem:[#allocation0 + $0x6c0] sm:$0x3]  ;;  %v2910_v11 = vld [vmem:[#allocation0 + $0x6c8] sm:$0x3]  ;;  %7499 = vst [vmem:[%s11542_s1 + $0x18e] sm:$0x3] %v2802_v9 }
 0x130   :  { %1083 = vst.msk [vmem:[#allocation0 + $0x9c1] ss:$8 sm:$0xf] %vm3_vm0, %v1080_v7   ;;  %1085 = vst.msk [vmem:[#allocation0 + $0x9c1] ss:$8 sm:$0xf0] %vm3_vm0, %v1080_v7  }
 0x131   :  { %1074 = vst.msk [vmem:[#allocation0 + $0x981] ss:$8 sm:$0xf] %vm3_vm0, %v1071_v8   ;;  %1076 = vst.msk [vmem:[#allocation0 + $0x981] ss:$8 sm:$0xf0] %vm3_vm0, %v1071_v8  }
 0x132   :  { %7516 = vst [vmem:[%s11542_s1 + $0x1b0] sm:$0x3] %v2904_v10  ;;  %7517 = vst [vmem:[%s11542_s1 + $0x1b2] sm:$0x3] %v2910_v11  ;;  %v2916_v12 = vld [vmem:[#allocation0 + $0x6d0] sm:$0x3] }
 0x133   :  { %v2922_v13 = vld [vmem:[#allocation0 + $0x6d8] sm:$0x3]  ;;  %v2928_v14 = vld [vmem:[#allocation0 + $0x6e0] sm:$0x3]  ;;  %7518 = vst [vmem:[%s11542_s1 + $0x1b4] sm:$0x3] %v2916_v12 }
 0x134   :  { %7519 = vst [vmem:[%s11542_s1 + $0x1b6] sm:$0x3] %v2922_v13  ;;  %7520 = vst [vmem:[%s11542_s1 + $0x1b8] sm:$0x3] %v2928_v14  ;;  %v2934_v15 = vld [vmem:[#allocation0 + $0x6e8] sm:$0x3]  ;;  %v1170_v13 = vpop.permute.xlu1 %1169   ;;  %v1161_v14 = vpop.permute.xlu0 %1160  }
 0x135   :  { %v2940_v16 = vld [vmem:[#allocation0 + $0x6f0] sm:$0x3]  ;;  %v2946_v17 = vld [vmem:[#allocation0 + $0x6f8] sm:$0x3]  ;;  %7521 = vst [vmem:[%s11542_s1 + $0x1ba] sm:$0x3] %v2934_v15 }
 0x136   :  { %7522 = vst [vmem:[%s11542_s1 + $0x1bc] sm:$0x3] %v2940_v16  ;;  %7523 = vst [vmem:[%s11542_s1 + $0x1be] sm:$0x3] %v2946_v17  ;;  %v2856_v18 = vld [vmem:[#allocation0 + $0x680] sm:$0x3] }
 0x137   :  { %v2862_v19 = vld [vmem:[#allocation0 + $0x688] sm:$0x3]  ;;  %v2868_v20 = vld [vmem:[#allocation0 + $0x690] sm:$0x3]  ;;  %7508 = vst [vmem:[%s11542_s1 + $0x1a0] sm:$0x3] %v2856_v18 }
 0x138   :  { %7509 = vst [vmem:[%s11542_s1 + $0x1a2] sm:$0x3] %v2862_v19  ;;  %7510 = vst [vmem:[%s11542_s1 + $0x1a4] sm:$0x3] %v2868_v20  ;;  %v2874_v23 = vld [vmem:[#allocation0 + $0x698] sm:$0x3] }
 0x139   :  { %v2880_v24 = vld [vmem:[#allocation0 + $0x6a0] sm:$0x3]  ;;  %v2886_v25 = vld [vmem:[#allocation0 + $0x6a8] sm:$0x3]  ;;  %7511 = vst [vmem:[%s11542_s1 + $0x1a6] sm:$0x3] %v2874_v23 }
 0x13a   :  { %1101 = vst.msk [vmem:[#allocation0 + $0xa41] ss:$8 sm:$0xf] %vm3_vm0, %v1098_v21   ;;  %1103 = vst.msk [vmem:[#allocation0 + $0xa41] ss:$8 sm:$0xf0] %vm3_vm0, %v1098_v21  }
 0x13b   :  { %1092 = vst.msk [vmem:[#allocation0 + $0xa01] ss:$8 sm:$0xf] %vm3_vm0, %v1089_v22   ;;  %1094 = vst.msk [vmem:[#allocation0 + $0xa01] ss:$8 sm:$0xf0] %vm3_vm0, %v1089_v22  }
 0x13c   :  { %7512 = vst [vmem:[%s11542_s1 + $0x1a8] sm:$0x3] %v2880_v24  ;;  %7513 = vst [vmem:[%s11542_s1 + $0x1aa] sm:$0x3] %v2886_v25  ;;  %v2892_v26 = vld [vmem:[#allocation0 + $0x6b0] sm:$0x3] }
 0x13d   :  { %v2898_v27 = vld [vmem:[#allocation0 + $0x6b8] sm:$0x3]  ;;  %v3000_v28 = vld [vmem:[#allocation0 + $0x740] sm:$0x3]  ;;  %7514 = vst [vmem:[%s11542_s1 + $0x1ac] sm:$0x3] %v2892_v26 }
 0x13e   :  { %7515 = vst [vmem:[%s11542_s1 + $0x1ae] sm:$0x3] %v2898_v27  ;;  %7532 = vst [vmem:[%s11542_s1 + $0x1d0] sm:$0x3] %v3000_v28  ;;  %v3006_v29 = vld [vmem:[#allocation0 + $0x748] sm:$0x3]  ;;  %v1188_v27 = vpop.permute.xlu1 %1187   ;;  %v1179_v28 = vpop.permute.xlu0 %1178  }
 0x13f   :  { %v3012_v30 = vld [vmem:[#allocation0 + $0x750] sm:$0x3]  ;;  %v3018_v31 = vld [vmem:[#allocation0 + $0x758] sm:$0x3]  ;;  %7533 = vst [vmem:[%s11542_s1 + $0x1d2] sm:$0x3] %v3006_v29 }
 0x140   :  { %7534 = vst [vmem:[%s11542_s1 + $0x1d4] sm:$0x3] %v3012_v30  ;;  %7535 = vst [vmem:[%s11542_s1 + $0x1d6] sm:$0x3] %v3018_v31  ;;  %v3024_v32 = vld [vmem:[#allocation0 + $0x760] sm:$0x3] }
 0x141   :  { %v3030_v33 = vld [vmem:[#allocation0 + $0x768] sm:$0x3]  ;;  %v3036_v34 = vld [vmem:[#allocation0 + $0x770] sm:$0x3]  ;;  %7536 = vst [vmem:[%s11542_s1 + $0x1d8] sm:$0x3] %v3024_v32 }
 0x142   :  { %7537 = vst [vmem:[%s11542_s1 + $0x1da] sm:$0x3] %v3030_v33  ;;  %7538 = vst [vmem:[%s11542_s1 + $0x1dc] sm:$0x3] %v3036_v34  ;;  %v3042_v37 = vld [vmem:[#allocation0 + $0x778] sm:$0x3] }
 0x143   :  { %v2952_v38 = vld [vmem:[#allocation0 + $0x700] sm:$0x3]  ;;  %v2958_v39 = vld [vmem:[#allocation0 + $0x708] sm:$0x3]  ;;  %7539 = vst [vmem:[%s11542_s1 + $0x1de] sm:$0x3] %v3042_v37 }
 0x144   :  { %1119 = vst.msk [vmem:[#allocation0 + $0xac1] ss:$8 sm:$0xf] %vm3_vm0, %v1116_v35   ;;  %1121 = vst.msk [vmem:[#allocation0 + $0xac1] ss:$8 sm:$0xf0] %vm3_vm0, %v1116_v35  }
 0x145   :  { %1110 = vst.msk [vmem:[#allocation0 + $0xa81] ss:$8 sm:$0xf] %vm3_vm0, %v1107_v36   ;;  %1112 = vst.msk [vmem:[#allocation0 + $0xa81] ss:$8 sm:$0xf0] %vm3_vm0, %v1107_v36  }
 0x146   :  { %7524 = vst [vmem:[%s11542_s1 + $0x1c0] sm:$0x3] %v2952_v38  ;;  %7525 = vst [vmem:[%s11542_s1 + $0x1c2] sm:$0x3] %v2958_v39  ;;  %v2964_v40 = vld [vmem:[#allocation0 + $0x710] sm:$0x3] }
 0x147   :  { %v2970_v41 = vld [vmem:[#allocation0 + $0x718] sm:$0x3]  ;;  %v2976_v42 = vld [vmem:[#allocation0 + $0x720] sm:$0x3]  ;;  %7526 = vst [vmem:[%s11542_s1 + $0x1c4] sm:$0x3] %v2964_v40 }
 0x148   :  { %7527 = vst [vmem:[%s11542_s1 + $0x1c6] sm:$0x3] %v2970_v41  ;;  %7528 = vst [vmem:[%s11542_s1 + $0x1c8] sm:$0x3] %v2976_v42  ;;  %v2982_v43 = vld [vmem:[#allocation0 + $0x728] sm:$0x3]  ;;  %v1206_v41 = vpop.permute.xlu1 %1205   ;;  %v1197_v42 = vpop.permute.xlu0 %1196  }
 0x149   :  { %v2988_v44 = vld [vmem:[#allocation0 + $0x730] sm:$0x3]  ;;  %v2994_v45 = vld [vmem:[#allocation0 + $0x738] sm:$0x3]  ;;  %7529 = vst [vmem:[%s11542_s1 + $0x1ca] sm:$0x3] %v2982_v43 }
 0x14a   :  { %7530 = vst [vmem:[%s11542_s1 + $0x1cc] sm:$0x3] %v2988_v44  ;;  %7531 = vst [vmem:[%s11542_s1 + $0x1ce] sm:$0x3] %v2994_v45  ;;  %v3096_v46 = vld [vmem:[#allocation0 + $0x7c0] sm:$0x3] }
 0x14b   :  { %v3102_v47 = vld [vmem:[#allocation0 + $0x7c8] sm:$0x3]  ;;  %v3108_v48 = vld [vmem:[#allocation0 + $0x7d0] sm:$0x3]  ;;  %7548 = vst [vmem:[%s11542_s1 + $0x1f0] sm:$0x3] %v3096_v46 }
 0x14c   :  { %7549 = vst [vmem:[%s11542_s1 + $0x1f2] sm:$0x3] %v3102_v47  ;;  %7550 = vst [vmem:[%s11542_s1 + $0x1f4] sm:$0x3] %v3108_v48  ;;  %v3114_v51 = vld [vmem:[#allocation0 + $0x7d8] sm:$0x3] }
 0x14d   :  { %v3120_v52 = vld [vmem:[#allocation0 + $0x7e0] sm:$0x3]  ;;  %v3126_v53 = vld [vmem:[#allocation0 + $0x7e8] sm:$0x3]  ;;  %7551 = vst [vmem:[%s11542_s1 + $0x1f6] sm:$0x3] %v3114_v51 }
 0x14e   :  { %1137 = vst.msk [vmem:[#allocation0 + $0xb41] ss:$8 sm:$0xf] %vm3_vm0, %v1134_v49   ;;  %1139 = vst.msk [vmem:[#allocation0 + $0xb41] ss:$8 sm:$0xf0] %vm3_vm0, %v1134_v49  }
 0x14f   :  { %1128 = vst.msk [vmem:[#allocation0 + $0xb01] ss:$8 sm:$0xf] %vm3_vm0, %v1125_v50   ;;  %1130 = vst.msk [vmem:[#allocation0 + $0xb01] ss:$8 sm:$0xf0] %vm3_vm0, %v1125_v50  }
 0x150   :  { %7552 = vst [vmem:[%s11542_s1 + $0x1f8] sm:$0x3] %v3120_v52  ;;  %7553 = vst [vmem:[%s11542_s1 + $0x1fa] sm:$0x3] %v3126_v53  ;;  %v3132_v54 = vld [vmem:[#allocation0 + $0x7f0] sm:$0x3] }
 0x151   :  { %v3138_v55 = vld [vmem:[#allocation0 + $0x7f8] sm:$0x3]  ;;  %v3048_v56 = vld [vmem:[#allocation0 + $0x780] sm:$0x3]  ;;  %7554 = vst [vmem:[%s11542_s1 + $0x1fc] sm:$0x3] %v3132_v54 }
 0x152   :  { %7555 = vst [vmem:[%s11542_s1 + $0x1fe] sm:$0x3] %v3138_v55  ;;  %7540 = vst [vmem:[%s11542_s1 + $0x1e0] sm:$0x3] %v3048_v56  ;;  %v3054_v57 = vld [vmem:[#allocation0 + $0x788] sm:$0x3]  ;;  %v1224_v55 = vpop.permute.xlu1 %1223   ;;  %v1215_v56 = vpop.permute.xlu0 %1214  }
 0x153   :  { %v3060_v58 = vld [vmem:[#allocation0 + $0x790] sm:$0x3]  ;;  %v3066_v59 = vld [vmem:[#allocation0 + $0x798] sm:$0x3]  ;;  %7541 = vst [vmem:[%s11542_s1 + $0x1e2] sm:$0x3] %v3054_v57 }
 0x154   :  { %7542 = vst [vmem:[%s11542_s1 + $0x1e4] sm:$0x3] %v3060_v58  ;;  %7543 = vst [vmem:[%s11542_s1 + $0x1e6] sm:$0x3] %v3066_v59  ;;  %v3072_v60 = vld [vmem:[#allocation0 + $0x7a0] sm:$0x3] }
 0x155   :  { %v3078_v61 = vld [vmem:[#allocation0 + $0x7a8] sm:$0x3]  ;;  %v3084_v62 = vld [vmem:[#allocation0 + $0x7b0] sm:$0x3]  ;;  %7544 = vst [vmem:[%s11542_s1 + $0x1e8] sm:$0x3] %v3072_v60 }
 0x156   :  { %7545 = vst [vmem:[%s11542_s1 + $0x1ea] sm:$0x3] %v3078_v61  ;;  %7546 = vst [vmem:[%s11542_s1 + $0x1ec] sm:$0x3] %v3084_v62  ;;  %v3090_v1 = vld [vmem:[#allocation0 + $0x7b8] sm:$0x3] }
 0x157   :  { %v3192_v2 = vld [vmem:[#allocation0 + $0x840] sm:$0x3]  ;;  %v3198_v3 = vld [vmem:[#allocation0 + $0x848] sm:$0x3]  ;;  %7547 = vst [vmem:[%s11542_s1 + $0x1ee] sm:$0x3] %v3090_v1 }
 0x158   :  { %1155 = vst.msk [vmem:[#allocation0 + $0xbc1] ss:$8 sm:$0xf] %vm3_vm0, %v1152_v63   ;;  %1157 = vst.msk [vmem:[#allocation0 + $0xbc1] ss:$8 sm:$0xf0] %vm3_vm0, %v1152_v63  }
 0x159   :  { %1146 = vst.msk [vmem:[#allocation0 + $0xb81] ss:$8 sm:$0xf] %vm3_vm0, %v1143_v0   ;;  %1148 = vst.msk [vmem:[#allocation0 + $0xb81] ss:$8 sm:$0xf0] %vm3_vm0, %v1143_v0  }
 0x15a   :  { %7564 = vst [vmem:[%s11542_s1 + $0x210] sm:$0x3] %v3192_v2  ;;  %7565 = vst [vmem:[%s11542_s1 + $0x212] sm:$0x3] %v3198_v3  ;;  %v3204_v4 = vld [vmem:[#allocation0 + $0x850] sm:$0x3] }
 0x15b   :  { %v3210_v5 = vld [vmem:[#allocation0 + $0x858] sm:$0x3]  ;;  %v3216_v6 = vld [vmem:[#allocation0 + $0x860] sm:$0x3]  ;;  %7566 = vst [vmem:[%s11542_s1 + $0x214] sm:$0x3] %v3204_v4 }
 0x15c   :  { %7567 = vst [vmem:[%s11542_s1 + $0x216] sm:$0x3] %v3210_v5  ;;  %7568 = vst [vmem:[%s11542_s1 + $0x218] sm:$0x3] %v3216_v6  ;;  %v3222_v7 = vld [vmem:[#allocation0 + $0x868] sm:$0x3]  ;;  %v1242_v5 = vpop.permute.xlu1 %1241   ;;  %v1233_v6 = vpop.permute.xlu0 %1232  }
 0x15d   :  { %v3228_v8 = vld [vmem:[#allocation0 + $0x870] sm:$0x3]  ;;  %v3234_v9 = vld [vmem:[#allocation0 + $0x878] sm:$0x3]  ;;  %7569 = vst [vmem:[%s11542_s1 + $0x21a] sm:$0x3] %v3222_v7 }
 0x15e   :  { %7570 = vst [vmem:[%s11542_s1 + $0x21c] sm:$0x3] %v3228_v8  ;;  %7571 = vst [vmem:[%s11542_s1 + $0x21e] sm:$0x3] %v3234_v9  ;;  %v3144_v10 = vld [vmem:[#allocation0 + $0x800] sm:$0x3] }
 0x15f   :  { %v3150_v11 = vld [vmem:[#allocation0 + $0x808] sm:$0x3]  ;;  %v3156_v12 = vld [vmem:[#allocation0 + $0x810] sm:$0x3]  ;;  %7556 = vst [vmem:[%s11542_s1 + $0x200] sm:$0x3] %v3144_v10 }
 0x160   :  { %7557 = vst [vmem:[%s11542_s1 + $0x202] sm:$0x3] %v3150_v11  ;;  %7558 = vst [vmem:[%s11542_s1 + $0x204] sm:$0x3] %v3156_v12  ;;  %v3162_v15 = vld [vmem:[#allocation0 + $0x818] sm:$0x3] }
 0x161   :  { %v3168_v16 = vld [vmem:[#allocation0 + $0x820] sm:$0x3]  ;;  %v3174_v17 = vld [vmem:[#allocation0 + $0x828] sm:$0x3]  ;;  %7559 = vst [vmem:[%s11542_s1 + $0x206] sm:$0x3] %v3162_v15 }
 0x162   :  { %1173 = vst.msk [vmem:[#allocation0 + $0xc41] ss:$8 sm:$0xf] %vm3_vm0, %v1170_v13   ;;  %1175 = vst.msk [vmem:[#allocation0 + $0xc41] ss:$8 sm:$0xf0] %vm3_vm0, %v1170_v13  }
 0x163   :  { %1164 = vst.msk [vmem:[#allocation0 + $0xc01] ss:$8 sm:$0xf] %vm3_vm0, %v1161_v14   ;;  %1166 = vst.msk [vmem:[#allocation0 + $0xc01] ss:$8 sm:$0xf0] %vm3_vm0, %v1161_v14  }
 0x164   :  { %7560 = vst [vmem:[%s11542_s1 + $0x208] sm:$0x3] %v3168_v16  ;;  %7561 = vst [vmem:[%s11542_s1 + $0x20a] sm:$0x3] %v3174_v17  ;;  %v3180_v18 = vld [vmem:[#allocation0 + $0x830] sm:$0x3] }
 0x165   :  { %v3186_v19 = vld [vmem:[#allocation0 + $0x838] sm:$0x3]  ;;  %v3288_v20 = vld [vmem:[#allocation0 + $0x8c0] sm:$0x3]  ;;  %7562 = vst [vmem:[%s11542_s1 + $0x20c] sm:$0x3] %v3180_v18 }
 0x166   :  { %7563 = vst [vmem:[%s11542_s1 + $0x20e] sm:$0x3] %v3186_v19  ;;  %7580 = vst [vmem:[%s11542_s1 + $0x230] sm:$0x3] %v3288_v20  ;;  %v3294_v21 = vld [vmem:[#allocation0 + $0x8c8] sm:$0x3]  ;;  %v1260_v19 = vpop.permute.xlu1 %1259   ;;  %v1251_v20 = vpop.permute.xlu0 %1250  }
 0x167   :  { %v3300_v22 = vld [vmem:[#allocation0 + $0x8d0] sm:$0x3]  ;;  %v3306_v23 = vld [vmem:[#allocation0 + $0x8d8] sm:$0x3]  ;;  %7581 = vst [vmem:[%s11542_s1 + $0x232] sm:$0x3] %v3294_v21 }
 0x168   :  { %7582 = vst [vmem:[%s11542_s1 + $0x234] sm:$0x3] %v3300_v22  ;;  %7583 = vst [vmem:[%s11542_s1 + $0x236] sm:$0x3] %v3306_v23  ;;  %v3312_v24 = vld [vmem:[#allocation0 + $0x8e0] sm:$0x3] }
 0x169   :  { %v3318_v25 = vld [vmem:[#allocation0 + $0x8e8] sm:$0x3]  ;;  %v3324_v26 = vld [vmem:[#allocation0 + $0x8f0] sm:$0x3]  ;;  %7584 = vst [vmem:[%s11542_s1 + $0x238] sm:$0x3] %v3312_v24 }
 0x16a   :  { %7585 = vst [vmem:[%s11542_s1 + $0x23a] sm:$0x3] %v3318_v25  ;;  %7586 = vst [vmem:[%s11542_s1 + $0x23c] sm:$0x3] %v3324_v26  ;;  %v3330_v29 = vld [vmem:[#allocation0 + $0x8f8] sm:$0x3] }
 0x16b   :  { %v3240_v30 = vld [vmem:[#allocation0 + $0x880] sm:$0x3]  ;;  %v3246_v31 = vld [vmem:[#allocation0 + $0x888] sm:$0x3]  ;;  %7587 = vst [vmem:[%s11542_s1 + $0x23e] sm:$0x3] %v3330_v29 }
 0x16c   :  { %1191 = vst.msk [vmem:[#allocation0 + $0xcc1] ss:$8 sm:$0xf] %vm3_vm0, %v1188_v27   ;;  %1193 = vst.msk [vmem:[#allocation0 + $0xcc1] ss:$8 sm:$0xf0] %vm3_vm0, %v1188_v27  }
 0x16d   :  { %1182 = vst.msk [vmem:[#allocation0 + $0xc81] ss:$8 sm:$0xf] %vm3_vm0, %v1179_v28   ;;  %1184 = vst.msk [vmem:[#allocation0 + $0xc81] ss:$8 sm:$0xf0] %vm3_vm0, %v1179_v28  }
 0x16e   :  { %7572 = vst [vmem:[%s11542_s1 + $0x220] sm:$0x3] %v3240_v30  ;;  %7573 = vst [vmem:[%s11542_s1 + $0x222] sm:$0x3] %v3246_v31  ;;  %v3252_v32 = vld [vmem:[#allocation0 + $0x890] sm:$0x3] }
 0x16f   :  { %v3258_v33 = vld [vmem:[#allocation0 + $0x898] sm:$0x3]  ;;  %v3264_v34 = vld [vmem:[#allocation0 + $0x8a0] sm:$0x3]  ;;  %7574 = vst [vmem:[%s11542_s1 + $0x224] sm:$0x3] %v3252_v32 }
 0x170   :  { %7575 = vst [vmem:[%s11542_s1 + $0x226] sm:$0x3] %v3258_v33  ;;  %7576 = vst [vmem:[%s11542_s1 + $0x228] sm:$0x3] %v3264_v34  ;;  %v3270_v35 = vld [vmem:[#allocation0 + $0x8a8] sm:$0x3]  ;;  %v1278_v33 = vpop.permute.xlu1 %1277   ;;  %v1269_v34 = vpop.permute.xlu0 %1268  }
 0x171   :  { %v3276_v36 = vld [vmem:[#allocation0 + $0x8b0] sm:$0x3]  ;;  %v3282_v37 = vld [vmem:[#allocation0 + $0x8b8] sm:$0x3]  ;;  %7577 = vst [vmem:[%s11542_s1 + $0x22a] sm:$0x3] %v3270_v35 }
 0x172   :  { %7578 = vst [vmem:[%s11542_s1 + $0x22c] sm:$0x3] %v3276_v36  ;;  %7579 = vst [vmem:[%s11542_s1 + $0x22e] sm:$0x3] %v3282_v37  ;;  %v3384_v38 = vld [vmem:[#allocation0 + $0x940] sm:$0x3] }
 0x173   :  { %v3390_v39 = vld [vmem:[#allocation0 + $0x948] sm:$0x3]  ;;  %v3396_v40 = vld [vmem:[#allocation0 + $0x950] sm:$0x3]  ;;  %7596 = vst [vmem:[%s11542_s1 + $0x250] sm:$0x3] %v3384_v38 }
 0x174   :  { %7597 = vst [vmem:[%s11542_s1 + $0x252] sm:$0x3] %v3390_v39  ;;  %7598 = vst [vmem:[%s11542_s1 + $0x254] sm:$0x3] %v3396_v40  ;;  %v3402_v43 = vld [vmem:[#allocation0 + $0x958] sm:$0x3] }
 0x175   :  { %v3408_v44 = vld [vmem:[#allocation0 + $0x960] sm:$0x3]  ;;  %v3414_v45 = vld [vmem:[#allocation0 + $0x968] sm:$0x3]  ;;  %7599 = vst [vmem:[%s11542_s1 + $0x256] sm:$0x3] %v3402_v43 }
 0x176   :  { %1209 = vst.msk [vmem:[#allocation0 + $0xd41] ss:$8 sm:$0xf] %vm3_vm0, %v1206_v41   ;;  %1211 = vst.msk [vmem:[#allocation0 + $0xd41] ss:$8 sm:$0xf0] %vm3_vm0, %v1206_v41  }
 0x177   :  { %1200 = vst.msk [vmem:[#allocation0 + $0xd01] ss:$8 sm:$0xf] %vm3_vm0, %v1197_v42   ;;  %1202 = vst.msk [vmem:[#allocation0 + $0xd01] ss:$8 sm:$0xf0] %vm3_vm0, %v1197_v42  }
 0x178   :  { %7600 = vst [vmem:[%s11542_s1 + $0x258] sm:$0x3] %v3408_v44  ;;  %7601 = vst [vmem:[%s11542_s1 + $0x25a] sm:$0x3] %v3414_v45  ;;  %v3420_v46 = vld [vmem:[#allocation0 + $0x970] sm:$0x3] }
 0x179   :  { %v3426_v47 = vld [vmem:[#allocation0 + $0x978] sm:$0x3]  ;;  %v3336_v48 = vld [vmem:[#allocation0 + $0x900] sm:$0x3]  ;;  %7602 = vst [vmem:[%s11542_s1 + $0x25c] sm:$0x3] %v3420_v46 }
 0x17a   :  { %7603 = vst [vmem:[%s11542_s1 + $0x25e] sm:$0x3] %v3426_v47  ;;  %7588 = vst [vmem:[%s11542_s1 + $0x240] sm:$0x3] %v3336_v48  ;;  %v3342_v49 = vld [vmem:[#allocation0 + $0x908] sm:$0x3]  ;;  %v1296_v47 = vpop.permute.xlu1 %1295   ;;  %v1287_v48 = vpop.permute.xlu0 %1286  }
 0x17b   :  { %v3348_v50 = vld [vmem:[#allocation0 + $0x910] sm:$0x3]  ;;  %v3354_v51 = vld [vmem:[#allocation0 + $0x918] sm:$0x3]  ;;  %7589 = vst [vmem:[%s11542_s1 + $0x242] sm:$0x3] %v3342_v49 }
 0x17c   :  { %7590 = vst [vmem:[%s11542_s1 + $0x244] sm:$0x3] %v3348_v50  ;;  %7591 = vst [vmem:[%s11542_s1 + $0x246] sm:$0x3] %v3354_v51  ;;  %v3360_v52 = vld [vmem:[#allocation0 + $0x920] sm:$0x3] }
 0x17d   :  { %v3366_v53 = vld [vmem:[#allocation0 + $0x928] sm:$0x3]  ;;  %v3372_v54 = vld [vmem:[#allocation0 + $0x930] sm:$0x3]  ;;  %7592 = vst [vmem:[%s11542_s1 + $0x248] sm:$0x3] %v3360_v52 }
 0x17e   :  { %7593 = vst [vmem:[%s11542_s1 + $0x24a] sm:$0x3] %v3366_v53  ;;  %7594 = vst [vmem:[%s11542_s1 + $0x24c] sm:$0x3] %v3372_v54  ;;  %v3378_v57 = vld [vmem:[#allocation0 + $0x938] sm:$0x3] }
 0x17f   :  { %v3480_v58 = vld [vmem:[#allocation0 + $0x9c0] sm:$0x3]  ;;  %v3486_v59 = vld [vmem:[#allocation0 + $0x9c8] sm:$0x3]  ;;  %7595 = vst [vmem:[%s11542_s1 + $0x24e] sm:$0x3] %v3378_v57 }
 0x180   :  { %1227 = vst.msk [vmem:[#allocation0 + $0xdc1] ss:$8 sm:$0xf] %vm3_vm0, %v1224_v55   ;;  %1229 = vst.msk [vmem:[#allocation0 + $0xdc1] ss:$8 sm:$0xf0] %vm3_vm0, %v1224_v55  }
 0x181   :  { %1218 = vst.msk [vmem:[#allocation0 + $0xd81] ss:$8 sm:$0xf] %vm3_vm0, %v1215_v56   ;;  %1220 = vst.msk [vmem:[#allocation0 + $0xd81] ss:$8 sm:$0xf0] %vm3_vm0, %v1215_v56  }
 0x182   :  { %7612 = vst [vmem:[%s11542_s1 + $0x270] sm:$0x3] %v3480_v58  ;;  %7613 = vst [vmem:[%s11542_s1 + $0x272] sm:$0x3] %v3486_v59  ;;  %v3492_v60 = vld [vmem:[#allocation0 + $0x9d0] sm:$0x3] }
 0x183   :  { %v3498_v61 = vld [vmem:[#allocation0 + $0x9d8] sm:$0x3]  ;;  %v3504_v62 = vld [vmem:[#allocation0 + $0x9e0] sm:$0x3]  ;;  %7614 = vst [vmem:[%s11542_s1 + $0x274] sm:$0x3] %v3492_v60 }
 0x184   :  { %7615 = vst [vmem:[%s11542_s1 + $0x276] sm:$0x3] %v3498_v61  ;;  %7616 = vst [vmem:[%s11542_s1 + $0x278] sm:$0x3] %v3504_v62  ;;  %v3510_v63 = vld [vmem:[#allocation0 + $0x9e8] sm:$0x3]  ;;  %v1314_v61 = vpop.permute.xlu1 %1313   ;;  %v1305_v62 = vpop.permute.xlu0 %1304  }
 0x185   :  { %v3516_v0 = vld [vmem:[#allocation0 + $0x9f0] sm:$0x3]  ;;  %v3522_v1 = vld [vmem:[#allocation0 + $0x9f8] sm:$0x3]  ;;  %7617 = vst [vmem:[%s11542_s1 + $0x27a] sm:$0x3] %v3510_v63 }
 0x186   :  { %7618 = vst [vmem:[%s11542_s1 + $0x27c] sm:$0x3] %v3516_v0  ;;  %7619 = vst [vmem:[%s11542_s1 + $0x27e] sm:$0x3] %v3522_v1  ;;  %v3432_v2 = vld [vmem:[#allocation0 + $0x980] sm:$0x3] }
 0x187   :  { %v3438_v3 = vld [vmem:[#allocation0 + $0x988] sm:$0x3]  ;;  %v3444_v4 = vld [vmem:[#allocation0 + $0x990] sm:$0x3]  ;;  %7604 = vst [vmem:[%s11542_s1 + $0x260] sm:$0x3] %v3432_v2 }
 0x188   :  { %7605 = vst [vmem:[%s11542_s1 + $0x262] sm:$0x3] %v3438_v3  ;;  %7606 = vst [vmem:[%s11542_s1 + $0x264] sm:$0x3] %v3444_v4  ;;  %v3450_v7 = vld [vmem:[#allocation0 + $0x998] sm:$0x3] }
 0x189   :  { %v3456_v8 = vld [vmem:[#allocation0 + $0x9a0] sm:$0x3]  ;;  %v3462_v9 = vld [vmem:[#allocation0 + $0x9a8] sm:$0x3]  ;;  %7607 = vst [vmem:[%s11542_s1 + $0x266] sm:$0x3] %v3450_v7 }
 0x18a   :  { %1245 = vst.msk [vmem:[#allocation0 + $0xe41] ss:$8 sm:$0xf] %vm3_vm0, %v1242_v5   ;;  %1247 = vst.msk [vmem:[#allocation0 + $0xe41] ss:$8 sm:$0xf0] %vm3_vm0, %v1242_v5  }
 0x18b   :  { %1236 = vst.msk [vmem:[#allocation0 + $0xe01] ss:$8 sm:$0xf] %vm3_vm0, %v1233_v6   ;;  %1238 = vst.msk [vmem:[#allocation0 + $0xe01] ss:$8 sm:$0xf0] %vm3_vm0, %v1233_v6  }
 0x18c   :  { %7608 = vst [vmem:[%s11542_s1 + $0x268] sm:$0x3] %v3456_v8  ;;  %7609 = vst [vmem:[%s11542_s1 + $0x26a] sm:$0x3] %v3462_v9  ;;  %v3468_v10 = vld [vmem:[#allocation0 + $0x9b0] sm:$0x3] }
 0x18d   :  { %v3474_v11 = vld [vmem:[#allocation0 + $0x9b8] sm:$0x3]  ;;  %v3576_v12 = vld [vmem:[#allocation0 + $0xa40] sm:$0x3]  ;;  %7610 = vst [vmem:[%s11542_s1 + $0x26c] sm:$0x3] %v3468_v10 }
 0x18e   :  { %7611 = vst [vmem:[%s11542_s1 + $0x26e] sm:$0x3] %v3474_v11  ;;  %7628 = vst [vmem:[%s11542_s1 + $0x290] sm:$0x3] %v3576_v12  ;;  %v3582_v13 = vld [vmem:[#allocation0 + $0xa48] sm:$0x3]  ;;  %v1332_v11 = vpop.permute.xlu1 %1331   ;;  %v1323_v12 = vpop.permute.xlu0 %1322  }
 0x18f   :  { %v3588_v14 = vld [vmem:[#allocation0 + $0xa50] sm:$0x3]  ;;  %v3594_v15 = vld [vmem:[#allocation0 + $0xa58] sm:$0x3]  ;;  %7629 = vst [vmem:[%s11542_s1 + $0x292] sm:$0x3] %v3582_v13 }
 0x190   :  { %7630 = vst [vmem:[%s11542_s1 + $0x294] sm:$0x3] %v3588_v14  ;;  %7631 = vst [vmem:[%s11542_s1 + $0x296] sm:$0x3] %v3594_v15  ;;  %v3600_v16 = vld [vmem:[#allocation0 + $0xa60] sm:$0x3] }
 0x191   :  { %v3606_v17 = vld [vmem:[#allocation0 + $0xa68] sm:$0x3]  ;;  %v3612_v18 = vld [vmem:[#allocation0 + $0xa70] sm:$0x3]  ;;  %7632 = vst [vmem:[%s11542_s1 + $0x298] sm:$0x3] %v3600_v16 }
 0x192   :  { %7633 = vst [vmem:[%s11542_s1 + $0x29a] sm:$0x3] %v3606_v17  ;;  %7634 = vst [vmem:[%s11542_s1 + $0x29c] sm:$0x3] %v3612_v18  ;;  %v3618_v21 = vld [vmem:[#allocation0 + $0xa78] sm:$0x3] }
 0x193   :  { %v3528_v22 = vld [vmem:[#allocation0 + $0xa00] sm:$0x3]  ;;  %v3534_v23 = vld [vmem:[#allocation0 + $0xa08] sm:$0x3]  ;;  %7635 = vst [vmem:[%s11542_s1 + $0x29e] sm:$0x3] %v3618_v21 }
 0x194   :  { %1263 = vst.msk [vmem:[#allocation0 + $0xec1] ss:$8 sm:$0xf] %vm3_vm0, %v1260_v19   ;;  %1265 = vst.msk [vmem:[#allocation0 + $0xec1] ss:$8 sm:$0xf0] %vm3_vm0, %v1260_v19  }
 0x195   :  { %1254 = vst.msk [vmem:[#allocation0 + $0xe81] ss:$8 sm:$0xf] %vm3_vm0, %v1251_v20   ;;  %1256 = vst.msk [vmem:[#allocation0 + $0xe81] ss:$8 sm:$0xf0] %vm3_vm0, %v1251_v20  }
 0x196   :  { %7620 = vst [vmem:[%s11542_s1 + $0x280] sm:$0x3] %v3528_v22  ;;  %7621 = vst [vmem:[%s11542_s1 + $0x282] sm:$0x3] %v3534_v23  ;;  %v3540_v24 = vld [vmem:[#allocation0 + $0xa10] sm:$0x3] }
 0x197   :  { %v3546_v25 = vld [vmem:[#allocation0 + $0xa18] sm:$0x3]  ;;  %v3552_v26 = vld [vmem:[#allocation0 + $0xa20] sm:$0x3]  ;;  %7622 = vst [vmem:[%s11542_s1 + $0x284] sm:$0x3] %v3540_v24 }
 0x198   :  { %7623 = vst [vmem:[%s11542_s1 + $0x286] sm:$0x3] %v3546_v25  ;;  %7624 = vst [vmem:[%s11542_s1 + $0x288] sm:$0x3] %v3552_v26  ;;  %v3558_v27 = vld [vmem:[#allocation0 + $0xa28] sm:$0x3]  ;;  %v1350_v25 = vpop.permute.xlu1 %1349   ;;  %v1341_v26 = vpop.permute.xlu0 %1340  }
 0x199   :  { %v3564_v28 = vld [vmem:[#allocation0 + $0xa30] sm:$0x3]  ;;  %v3570_v29 = vld [vmem:[#allocation0 + $0xa38] sm:$0x3]  ;;  %7625 = vst [vmem:[%s11542_s1 + $0x28a] sm:$0x3] %v3558_v27 }
 0x19a   :  { %7626 = vst [vmem:[%s11542_s1 + $0x28c] sm:$0x3] %v3564_v28  ;;  %7627 = vst [vmem:[%s11542_s1 + $0x28e] sm:$0x3] %v3570_v29  ;;  %v3672_v30 = vld [vmem:[#allocation0 + $0xac0] sm:$0x3] }
 0x19b   :  { %v3678_v31 = vld [vmem:[#allocation0 + $0xac8] sm:$0x3]  ;;  %v3684_v32 = vld [vmem:[#allocation0 + $0xad0] sm:$0x3]  ;;  %7644 = vst [vmem:[%s11542_s1 + $0x2b0] sm:$0x3] %v3672_v30 }
 0x19c   :  { %7645 = vst [vmem:[%s11542_s1 + $0x2b2] sm:$0x3] %v3678_v31  ;;  %7646 = vst [vmem:[%s11542_s1 + $0x2b4] sm:$0x3] %v3684_v32  ;;  %v3690_v35 = vld [vmem:[#allocation0 + $0xad8] sm:$0x3] }
 0x19d   :  { %v3696_v36 = vld [vmem:[#allocation0 + $0xae0] sm:$0x3]  ;;  %v3702_v37 = vld [vmem:[#allocation0 + $0xae8] sm:$0x3]  ;;  %7647 = vst [vmem:[%s11542_s1 + $0x2b6] sm:$0x3] %v3690_v35 }
 0x19e   :  { %1281 = vst.msk [vmem:[#allocation0 + $0xf41] ss:$8 sm:$0xf] %vm3_vm0, %v1278_v33   ;;  %1283 = vst.msk [vmem:[#allocation0 + $0xf41] ss:$8 sm:$0xf0] %vm3_vm0, %v1278_v33  }
 0x19f   :  { %1272 = vst.msk [vmem:[#allocation0 + $0xf01] ss:$8 sm:$0xf] %vm3_vm0, %v1269_v34   ;;  %1274 = vst.msk [vmem:[#allocation0 + $0xf01] ss:$8 sm:$0xf0] %vm3_vm0, %v1269_v34  }
 0x1a0   :  { %7648 = vst [vmem:[%s11542_s1 + $0x2b8] sm:$0x3] %v3696_v36  ;;  %7649 = vst [vmem:[%s11542_s1 + $0x2ba] sm:$0x3] %v3702_v37  ;;  %v3708_v38 = vld [vmem:[#allocation0 + $0xaf0] sm:$0x3] }
 0x1a1   :  { %v3714_v39 = vld [vmem:[#allocation0 + $0xaf8] sm:$0x3]  ;;  %v3624_v40 = vld [vmem:[#allocation0 + $0xa80] sm:$0x3]  ;;  %7650 = vst [vmem:[%s11542_s1 + $0x2bc] sm:$0x3] %v3708_v38 }
 0x1a2   :  { %7651 = vst [vmem:[%s11542_s1 + $0x2be] sm:$0x3] %v3714_v39  ;;  %7636 = vst [vmem:[%s11542_s1 + $0x2a0] sm:$0x3] %v3624_v40  ;;  %v3630_v41 = vld [vmem:[#allocation0 + $0xa88] sm:$0x3]  ;;  %v1368_v39 = vpop.permute.xlu1 %1367   ;;  %v1359_v40 = vpop.permute.xlu0 %1358  }
 0x1a3   :  { %v3636_v42 = vld [vmem:[#allocation0 + $0xa90] sm:$0x3]  ;;  %v3642_v43 = vld [vmem:[#allocation0 + $0xa98] sm:$0x3]  ;;  %7637 = vst [vmem:[%s11542_s1 + $0x2a2] sm:$0x3] %v3630_v41 }
 0x1a4   :  { %7638 = vst [vmem:[%s11542_s1 + $0x2a4] sm:$0x3] %v3636_v42  ;;  %7639 = vst [vmem:[%s11542_s1 + $0x2a6] sm:$0x3] %v3642_v43  ;;  %v3648_v44 = vld [vmem:[#allocation0 + $0xaa0] sm:$0x3] }
 0x1a5   :  { %v3654_v45 = vld [vmem:[#allocation0 + $0xaa8] sm:$0x3]  ;;  %v3660_v46 = vld [vmem:[#allocation0 + $0xab0] sm:$0x3]  ;;  %7640 = vst [vmem:[%s11542_s1 + $0x2a8] sm:$0x3] %v3648_v44 }
 0x1a6   :  { %7641 = vst [vmem:[%s11542_s1 + $0x2aa] sm:$0x3] %v3654_v45  ;;  %7642 = vst [vmem:[%s11542_s1 + $0x2ac] sm:$0x3] %v3660_v46  ;;  %v3666_v49 = vld [vmem:[#allocation0 + $0xab8] sm:$0x3] }
 0x1a7   :  { %v3768_v50 = vld [vmem:[#allocation0 + $0xb40] sm:$0x3]  ;;  %v3774_v51 = vld [vmem:[#allocation0 + $0xb48] sm:$0x3]  ;;  %7643 = vst [vmem:[%s11542_s1 + $0x2ae] sm:$0x3] %v3666_v49 }
 0x1a8   :  { %1299 = vst.msk [vmem:[#allocation0 + $0xfc1] ss:$8 sm:$0xf] %vm3_vm0, %v1296_v47   ;;  %1301 = vst.msk [vmem:[#allocation0 + $0xfc1] ss:$8 sm:$0xf0] %vm3_vm0, %v1296_v47  }
 0x1a9   :  { %1290 = vst.msk [vmem:[#allocation0 + $0xf81] ss:$8 sm:$0xf] %vm3_vm0, %v1287_v48   ;;  %1292 = vst.msk [vmem:[#allocation0 + $0xf81] ss:$8 sm:$0xf0] %vm3_vm0, %v1287_v48  }
 0x1aa   :  { %7660 = vst [vmem:[%s11542_s1 + $0x2d0] sm:$0x3] %v3768_v50  ;;  %7661 = vst [vmem:[%s11542_s1 + $0x2d2] sm:$0x3] %v3774_v51  ;;  %v3780_v52 = vld [vmem:[#allocation0 + $0xb50] sm:$0x3] }
 0x1ab   :  { %v3786_v53 = vld [vmem:[#allocation0 + $0xb58] sm:$0x3]  ;;  %v3792_v54 = vld [vmem:[#allocation0 + $0xb60] sm:$0x3]  ;;  %7662 = vst [vmem:[%s11542_s1 + $0x2d4] sm:$0x3] %v3780_v52 }
 0x1ac   :  { %7663 = vst [vmem:[%s11542_s1 + $0x2d6] sm:$0x3] %v3786_v53  ;;  %7664 = vst [vmem:[%s11542_s1 + $0x2d8] sm:$0x3] %v3792_v54  ;;  %v3798_v55 = vld [vmem:[#allocation0 + $0xb68] sm:$0x3]  ;;  %v1386_v53 = vpop.permute.xlu1 %1385   ;;  %v1377_v54 = vpop.permute.xlu0 %1376  }
 0x1ad   :  { %v3804_v56 = vld [vmem:[#allocation0 + $0xb70] sm:$0x3]  ;;  %v3810_v57 = vld [vmem:[#allocation0 + $0xb78] sm:$0x3]  ;;  %7665 = vst [vmem:[%s11542_s1 + $0x2da] sm:$0x3] %v3798_v55 }
 0x1ae   :  { %7666 = vst [vmem:[%s11542_s1 + $0x2dc] sm:$0x3] %v3804_v56  ;;  %7667 = vst [vmem:[%s11542_s1 + $0x2de] sm:$0x3] %v3810_v57  ;;  %v3720_v58 = vld [vmem:[#allocation0 + $0xb00] sm:$0x3] }
 0x1af   :  { %v3726_v59 = vld [vmem:[#allocation0 + $0xb08] sm:$0x3]  ;;  %v3732_v60 = vld [vmem:[#allocation0 + $0xb10] sm:$0x3]  ;;  %7652 = vst [vmem:[%s11542_s1 + $0x2c0] sm:$0x3] %v3720_v58 }
 0x1b0   :  { %7653 = vst [vmem:[%s11542_s1 + $0x2c2] sm:$0x3] %v3726_v59  ;;  %7654 = vst [vmem:[%s11542_s1 + $0x2c4] sm:$0x3] %v3732_v60  ;;  %v3738_v63 = vld [vmem:[#allocation0 + $0xb18] sm:$0x3] }
 0x1b1   :  { %v3744_v0 = vld [vmem:[#allocation0 + $0xb20] sm:$0x3]  ;;  %v3750_v1 = vld [vmem:[#allocation0 + $0xb28] sm:$0x3]  ;;  %7655 = vst [vmem:[%s11542_s1 + $0x2c6] sm:$0x3] %v3738_v63 }
 0x1b2   :  { %1317 = vst.msk [vmem:[#allocation0 + $0x1041] ss:$8 sm:$0xf] %vm3_vm0, %v1314_v61   ;;  %1319 = vst.msk [vmem:[#allocation0 + $0x1041] ss:$8 sm:$0xf0] %vm3_vm0, %v1314_v61  }
 0x1b3   :  { %1308 = vst.msk [vmem:[#allocation0 + $0x1001] ss:$8 sm:$0xf] %vm3_vm0, %v1305_v62   ;;  %1310 = vst.msk [vmem:[#allocation0 + $0x1001] ss:$8 sm:$0xf0] %vm3_vm0, %v1305_v62  }
 0x1b4   :  { %7656 = vst [vmem:[%s11542_s1 + $0x2c8] sm:$0x3] %v3744_v0  ;;  %7657 = vst [vmem:[%s11542_s1 + $0x2ca] sm:$0x3] %v3750_v1  ;;  %v3756_v2 = vld [vmem:[#allocation0 + $0xb30] sm:$0x3] }
 0x1b5   :  { %v3762_v3 = vld [vmem:[#allocation0 + $0xb38] sm:$0x3]  ;;  %v3864_v4 = vld [vmem:[#allocation0 + $0xbc0] sm:$0x3]  ;;  %7658 = vst [vmem:[%s11542_s1 + $0x2cc] sm:$0x3] %v3756_v2 }
 0x1b6   :  { %7659 = vst [vmem:[%s11542_s1 + $0x2ce] sm:$0x3] %v3762_v3  ;;  %7676 = vst [vmem:[%s11542_s1 + $0x2f0] sm:$0x3] %v3864_v4  ;;  %v3870_v5 = vld [vmem:[#allocation0 + $0xbc8] sm:$0x3]  ;;  %v1404_v3 = vpop.permute.xlu1 %1403   ;;  %v1395_v4 = vpop.permute.xlu0 %1394  }
 0x1b7   :  { %v3876_v6 = vld [vmem:[#allocation0 + $0xbd0] sm:$0x3]  ;;  %v3882_v7 = vld [vmem:[#allocation0 + $0xbd8] sm:$0x3]  ;;  %7677 = vst [vmem:[%s11542_s1 + $0x2f2] sm:$0x3] %v3870_v5 }
 0x1b8   :  { %7678 = vst [vmem:[%s11542_s1 + $0x2f4] sm:$0x3] %v3876_v6  ;;  %7679 = vst [vmem:[%s11542_s1 + $0x2f6] sm:$0x3] %v3882_v7  ;;  %v3888_v8 = vld [vmem:[#allocation0 + $0xbe0] sm:$0x3] }
 0x1b9   :  { %v3894_v9 = vld [vmem:[#allocation0 + $0xbe8] sm:$0x3]  ;;  %v3900_v10 = vld [vmem:[#allocation0 + $0xbf0] sm:$0x3]  ;;  %7680 = vst [vmem:[%s11542_s1 + $0x2f8] sm:$0x3] %v3888_v8 }
 0x1ba   :  { %7681 = vst [vmem:[%s11542_s1 + $0x2fa] sm:$0x3] %v3894_v9  ;;  %7682 = vst [vmem:[%s11542_s1 + $0x2fc] sm:$0x3] %v3900_v10  ;;  %v3906_v13 = vld [vmem:[#allocation0 + $0xbf8] sm:$0x3] }
 0x1bb   :  { %v3816_v14 = vld [vmem:[#allocation0 + $0xb80] sm:$0x3]  ;;  %v3822_v15 = vld [vmem:[#allocation0 + $0xb88] sm:$0x3]  ;;  %7683 = vst [vmem:[%s11542_s1 + $0x2fe] sm:$0x3] %v3906_v13 }
 0x1bc   :  { %1335 = vst.msk [vmem:[#allocation0 + $0x10c1] ss:$8 sm:$0xf] %vm3_vm0, %v1332_v11   ;;  %1337 = vst.msk [vmem:[#allocation0 + $0x10c1] ss:$8 sm:$0xf0] %vm3_vm0, %v1332_v11  }
 0x1bd   :  { %1326 = vst.msk [vmem:[#allocation0 + $0x1081] ss:$8 sm:$0xf] %vm3_vm0, %v1323_v12   ;;  %1328 = vst.msk [vmem:[#allocation0 + $0x1081] ss:$8 sm:$0xf0] %vm3_vm0, %v1323_v12  }
 0x1be   :  { %7668 = vst [vmem:[%s11542_s1 + $0x2e0] sm:$0x3] %v3816_v14  ;;  %7669 = vst [vmem:[%s11542_s1 + $0x2e2] sm:$0x3] %v3822_v15  ;;  %v3828_v16 = vld [vmem:[#allocation0 + $0xb90] sm:$0x3] }
 0x1bf   :  { %v3834_v17 = vld [vmem:[#allocation0 + $0xb98] sm:$0x3]  ;;  %v3840_v18 = vld [vmem:[#allocation0 + $0xba0] sm:$0x3]  ;;  %7670 = vst [vmem:[%s11542_s1 + $0x2e4] sm:$0x3] %v3828_v16 }
 0x1c0   :  { %7671 = vst [vmem:[%s11542_s1 + $0x2e6] sm:$0x3] %v3834_v17  ;;  %7672 = vst [vmem:[%s11542_s1 + $0x2e8] sm:$0x3] %v3840_v18  ;;  %v3846_v19 = vld [vmem:[#allocation0 + $0xba8] sm:$0x3]  ;;  %v1422_v17 = vpop.permute.xlu1 %1421   ;;  %v1413_v18 = vpop.permute.xlu0 %1412  }
 0x1c1   :  { %v3852_v20 = vld [vmem:[#allocation0 + $0xbb0] sm:$0x3]  ;;  %v3858_v21 = vld [vmem:[#allocation0 + $0xbb8] sm:$0x3]  ;;  %7673 = vst [vmem:[%s11542_s1 + $0x2ea] sm:$0x3] %v3846_v19 }
 0x1c2   :  { %7674 = vst [vmem:[%s11542_s1 + $0x2ec] sm:$0x3] %v3852_v20  ;;  %7675 = vst [vmem:[%s11542_s1 + $0x2ee] sm:$0x3] %v3858_v21  ;;  %v3960_v22 = vld [vmem:[#allocation0 + $0xc40] sm:$0x3] }
 0x1c3   :  { %v3966_v23 = vld [vmem:[#allocation0 + $0xc48] sm:$0x3]  ;;  %v3972_v24 = vld [vmem:[#allocation0 + $0xc50] sm:$0x3]  ;;  %7692 = vst [vmem:[%s11542_s1 + $0x310] sm:$0x3] %v3960_v22 }
 0x1c4   :  { %7693 = vst [vmem:[%s11542_s1 + $0x312] sm:$0x3] %v3966_v23  ;;  %7694 = vst [vmem:[%s11542_s1 + $0x314] sm:$0x3] %v3972_v24  ;;  %v3978_v27 = vld [vmem:[#allocation0 + $0xc58] sm:$0x3] }
 0x1c5   :  { %v3984_v28 = vld [vmem:[#allocation0 + $0xc60] sm:$0x3]  ;;  %v3990_v29 = vld [vmem:[#allocation0 + $0xc68] sm:$0x3]  ;;  %7695 = vst [vmem:[%s11542_s1 + $0x316] sm:$0x3] %v3978_v27 }
 0x1c6   :  { %1353 = vst.msk [vmem:[#allocation0 + $0x1141] ss:$8 sm:$0xf] %vm3_vm0, %v1350_v25   ;;  %1355 = vst.msk [vmem:[#allocation0 + $0x1141] ss:$8 sm:$0xf0] %vm3_vm0, %v1350_v25  }
 0x1c7   :  { %1344 = vst.msk [vmem:[#allocation0 + $0x1101] ss:$8 sm:$0xf] %vm3_vm0, %v1341_v26   ;;  %1346 = vst.msk [vmem:[#allocation0 + $0x1101] ss:$8 sm:$0xf0] %vm3_vm0, %v1341_v26  }
 0x1c8   :  { %7696 = vst [vmem:[%s11542_s1 + $0x318] sm:$0x3] %v3984_v28  ;;  %7697 = vst [vmem:[%s11542_s1 + $0x31a] sm:$0x3] %v3990_v29  ;;  %v3996_v30 = vld [vmem:[#allocation0 + $0xc70] sm:$0x3] }
 0x1c9   :  { %v4002_v31 = vld [vmem:[#allocation0 + $0xc78] sm:$0x3]  ;;  %v3912_v32 = vld [vmem:[#allocation0 + $0xc00] sm:$0x3]  ;;  %7698 = vst [vmem:[%s11542_s1 + $0x31c] sm:$0x3] %v3996_v30 }
 0x1ca   :  { %7699 = vst [vmem:[%s11542_s1 + $0x31e] sm:$0x3] %v4002_v31  ;;  %7684 = vst [vmem:[%s11542_s1 + $0x300] sm:$0x3] %v3912_v32  ;;  %v3918_v33 = vld [vmem:[#allocation0 + $0xc08] sm:$0x3]  ;;  %v1440_v31 = vpop.permute.xlu1 %1439   ;;  %v1431_v32 = vpop.permute.xlu0 %1430  }
 0x1cb   :  { %v3924_v34 = vld [vmem:[#allocation0 + $0xc10] sm:$0x3]  ;;  %v3930_v35 = vld [vmem:[#allocation0 + $0xc18] sm:$0x3]  ;;  %7685 = vst [vmem:[%s11542_s1 + $0x302] sm:$0x3] %v3918_v33 }
 0x1cc   :  { %7686 = vst [vmem:[%s11542_s1 + $0x304] sm:$0x3] %v3924_v34  ;;  %7687 = vst [vmem:[%s11542_s1 + $0x306] sm:$0x3] %v3930_v35  ;;  %v3936_v36 = vld [vmem:[#allocation0 + $0xc20] sm:$0x3] }
 0x1cd   :  { %v3942_v37 = vld [vmem:[#allocation0 + $0xc28] sm:$0x3]  ;;  %v3948_v38 = vld [vmem:[#allocation0 + $0xc30] sm:$0x3]  ;;  %7688 = vst [vmem:[%s11542_s1 + $0x308] sm:$0x3] %v3936_v36 }
 0x1ce   :  { %7689 = vst [vmem:[%s11542_s1 + $0x30a] sm:$0x3] %v3942_v37  ;;  %7690 = vst [vmem:[%s11542_s1 + $0x30c] sm:$0x3] %v3948_v38  ;;  %v3954_v41 = vld [vmem:[#allocation0 + $0xc38] sm:$0x3] }
 0x1cf   :  { %v7150_v42 = vld [vmem:[%s11541_s0 + $0x1d0] sm:$0xff]   ;;  %v7149_v43 = vld [vmem:[%s11541_s0 + $0x1c8] sm:$0xff]   ;;  %1371 = vst.msk [vmem:[#allocation0 + $0x11c1] ss:$8 sm:$0xf] %vm3_vm0, %v1368_v39   ;;  %v7152_v44 = vld [vmem:[%s11541_s0 + $0x1e0] sm:$0xff]  }
 0x1d0   :  { %1373 = vst.msk [vmem:[#allocation0 + $0x11c1] ss:$8 sm:$0xf0] %vm3_vm0, %v1368_v39   ;;  %1362 = vst.msk [vmem:[#allocation0 + $0x1181] ss:$8 sm:$0xf] %vm3_vm0, %v1359_v40  }
 0x1d1   :  { %1364 = vst.msk [vmem:[#allocation0 + $0x1181] ss:$8 sm:$0xf0] %vm3_vm0, %v1359_v40   ;;  %7691 = vst [vmem:[%s11542_s1 + $0x30e] sm:$0x3] %v3954_v41  ;;  %v7153_v45 = vld [vmem:[%s11541_s0 + $0x1e8] sm:$0xff]  }
 0x1d2   :  { %381 = vst.msk [vmem:[#allocation0 + $0xcc0] ss:$8 sm:$0xf] %vm3_vm0, %v7150_v42   ;;  %383 = vst.msk [vmem:[#allocation0 + $0xcc0] ss:$8 sm:$0xf0] %vm3_vm0, %v7150_v42  }
 0x1d3   :  { %374 = vst.msk [vmem:[#allocation0 + $0xc80] ss:$8 sm:$0xf] %vm3_vm0, %v7149_v43   ;;  %376 = vst.msk [vmem:[#allocation0 + $0xc80] ss:$8 sm:$0xf0] %vm3_vm0, %v7149_v43  }
 0x1d4   :  { %v7151_v46 = vld [vmem:[%s11541_s0 + $0x1d8] sm:$0xf]   ;;  %395 = vst.msk [vmem:[#allocation0 + $0xd20] ss:$8 sm:$0xf0] %vm3_vm0, %v7152_v44   ;;  %v7154_v47 = vld [vmem:[%s11541_s0 + $0x1f0] sm:$0xff]  }
 0x1d5   :  { %400 = vst.msk [vmem:[#allocation0 + $0xd60] ss:$8 sm:$0xf] %vm3_vm0, %v7153_v45   ;;  %393 = vst.msk [vmem:[#allocation0 + $0xd20] ss:$8 sm:$0xf] %vm3_vm0, %v7152_v44  }
 0x1d6   :  { %402 = vst.msk [vmem:[#allocation0 + $0xd60] ss:$8 sm:$0xf0] %vm3_vm0, %v7153_v45   ;;  %388 = vst.msk [vmem:[#allocation0 + $0xd00] ss:$8 sm:$0xf] %vm3_vm0, %v7151_v46   ;;  %v1458_v45 = vpop.permute.xlu1 %1457   ;;  %v1449_v46 = vpop.permute.xlu0 %1448  }
 0x1d7   :  { %v7155_v48 = vld [vmem:[%s11541_s0 + $0x1f8] sm:$0xf]   ;;  %v7157_v49 = vld [vmem:[%s11541_s0 + $0x208] sm:$0xff]   ;;  %409 = vst.msk [vmem:[#allocation0 + $0xda0] ss:$8 sm:$0xf0] %vm3_vm0, %v7154_v47  }
 0x1d8   :  { %414 = vst.msk [vmem:[#allocation0 + $0xde0] ss:$8 sm:$0xf] %vm3_vm0, %v7155_v48   ;;  %407 = vst.msk [vmem:[#allocation0 + $0xda0] ss:$8 sm:$0xf] %vm3_vm0, %v7154_v47  }
 0x1d9   :  { %426 = vst.msk [vmem:[#allocation0 + $0xe40] ss:$8 sm:$0xf] %vm3_vm0, %v7157_v49   ;;  %428 = vst.msk [vmem:[#allocation0 + $0xe40] ss:$8 sm:$0xf0] %vm3_vm0, %v7157_v49  }
 0x1da   :  { %v7156_v50 = vld [vmem:[%s11541_s0 + $0x200] sm:$0xff]   ;;  %v7159_v51 = vld [vmem:[%s11541_s0 + $0x218] sm:$0xf]   ;;  %v7158_v55 = vld [vmem:[%s11541_s0 + $0x210] sm:$0xff]  }
 0x1db   :  { %v7160_v52 = vld [vmem:[%s11541_s0 + $0x220] sm:$0xff]   ;;  %419 = vst.msk [vmem:[#allocation0 + $0xe00] ss:$8 sm:$0xf] %vm3_vm0, %v7156_v50   ;;  %v7161_v56 = vld [vmem:[%s11541_s0 + $0x228] sm:$0xff]   ;;  %v7162_v57 = vld [vmem:[%s11541_s0 + $0x230] sm:$0xff]  }
 0x1dc   :  { %421 = vst.msk [vmem:[#allocation0 + $0xe00] ss:$8 sm:$0xf0] %vm3_vm0, %v7156_v50   ;;  %440 = vst.msk [vmem:[#allocation0 + $0xec0] ss:$8 sm:$0xf] %vm3_vm0, %v7159_v51  }
 0x1dd   :  { %445 = vst.msk [vmem:[#allocation0 + $0xee0] ss:$8 sm:$0xf] %vm3_vm0, %v7160_v52   ;;  %447 = vst.msk [vmem:[#allocation0 + $0xee0] ss:$8 sm:$0xf0] %vm3_vm0, %v7160_v52  }
 0x1de   :  { %1389 = vst.msk [vmem:[#allocation0 + $0x1241] ss:$8 sm:$0xf] %vm3_vm0, %v1386_v53   ;;  %1391 = vst.msk [vmem:[#allocation0 + $0x1241] ss:$8 sm:$0xf0] %vm3_vm0, %v1386_v53  }
 0x1df   :  { %1380 = vst.msk [vmem:[#allocation0 + $0x1201] ss:$8 sm:$0xf] %vm3_vm0, %v1377_v54   ;;  %1382 = vst.msk [vmem:[#allocation0 + $0x1201] ss:$8 sm:$0xf0] %vm3_vm0, %v1377_v54  }
 0x1e0   :  { %433 = vst.msk [vmem:[#allocation0 + $0xe80] ss:$8 sm:$0xf] %vm3_vm0, %v7158_v55   ;;  %435 = vst.msk [vmem:[#allocation0 + $0xe80] ss:$8 sm:$0xf0] %vm3_vm0, %v7158_v55  }
 0x1e1   :  { %454 = vst.msk [vmem:[#allocation0 + $0xf20] ss:$8 sm:$0xf0] %vm3_vm0, %v7161_v56   ;;  %459 = vst.msk [vmem:[#allocation0 + $0xf60] ss:$8 sm:$0xf] %vm3_vm0, %v7162_v57  }
 0x1e2   :  { %452 = vst.msk [vmem:[#allocation0 + $0xf20] ss:$8 sm:$0xf] %vm3_vm0, %v7161_v56   ;;  %461 = vst.msk [vmem:[#allocation0 + $0xf60] ss:$8 sm:$0xf0] %vm3_vm0, %v7162_v57  }
 0x1e3   :  { %v7164_v58 = vld [vmem:[%s11541_s0 + $0x240] sm:$0xff]   ;;  %v7163_v59 = vld [vmem:[%s11541_s0 + $0x238] sm:$0xf]   ;;  %v7166_v60 = vld [vmem:[%s11541_s0 + $0x250] sm:$0xff]  }
 0x1e4   :  { %471 = vst.msk [vmem:[#allocation0 + $0xfc0] ss:$8 sm:$0xf] %vm3_vm0, %v7164_v58   ;;  %473 = vst.msk [vmem:[#allocation0 + $0xfc0] ss:$8 sm:$0xf0] %vm3_vm0, %v7164_v58  }
 0x1e5   :  { %466 = vst.msk [vmem:[#allocation0 + $0xfa0] ss:$8 sm:$0xf] %vm3_vm0, %v7163_v59   ;;  %485 = vst.msk [vmem:[#allocation0 + $0x1040] ss:$8 sm:$0xf] %vm3_vm0, %v7166_v60   ;;  %v1476_v59 = vpop.permute.xlu1 %1475  }
 0x1e6   :  { %487 = vst.msk [vmem:[#allocation0 + $0x1040] ss:$8 sm:$0xf0] %vm3_vm0, %v7166_v60   ;;  %v7165_v61 = vld [vmem:[%s11541_s0 + $0x248] sm:$0xff]   ;;  %v7168_v62 = vld [vmem:[%s11541_s0 + $0x260] sm:$0xff]   ;;  %v7170_v1 = vld [vmem:[%s11541_s0 + $0x270] sm:$0xff]   ;;  %v1467_v60 = vpop.permute.xlu0 %1466  }
 0x1e7   :  { %v7169_v63 = vld [vmem:[%s11541_s0 + $0x268] sm:$0xff]   ;;  %478 = vst.msk [vmem:[#allocation0 + $0x1000] ss:$8 sm:$0xf] %vm3_vm0, %v7165_v61   ;;  %v7167_v0 = vld [vmem:[%s11541_s0 + $0x258] sm:$0xf]  }
 0x1e8   :  { %480 = vst.msk [vmem:[#allocation0 + $0x1000] ss:$8 sm:$0xf0] %vm3_vm0, %v7165_v61   ;;  %499 = vst.msk [vmem:[#allocation0 + $0x10a0] ss:$8 sm:$0xf0] %vm3_vm0, %v7168_v62  }
 0x1e9   :  { %504 = vst.msk [vmem:[#allocation0 + $0x10e0] ss:$8 sm:$0xf] %vm3_vm0, %v7169_v63   ;;  %497 = vst.msk [vmem:[#allocation0 + $0x10a0] ss:$8 sm:$0xf] %vm3_vm0, %v7168_v62  }
 0x1ea   :  { %506 = vst.msk [vmem:[#allocation0 + $0x10e0] ss:$8 sm:$0xf0] %vm3_vm0, %v7169_v63   ;;  %v7171_v2 = vld [vmem:[%s11541_s0 + $0x278] sm:$0xf]  }
 0x1eb   :  { %v4056_v5 = vld [vmem:[#allocation0 + $0xcc0] sm:$0x3]  ;;  %v4062_v6 = vld [vmem:[#allocation0 + $0xcc8] sm:$0x3]  ;;  %v4068_v7 = vld [vmem:[#allocation0 + $0xcd0] sm:$0x3] }
 0x1ec   :  { %492 = vst.msk [vmem:[#allocation0 + $0x1080] ss:$8 sm:$0xf] %vm3_vm0, %v7167_v0   ;;  %513 = vst.msk [vmem:[#allocation0 + $0x1120] ss:$8 sm:$0xf0] %vm3_vm0, %v7170_v1  }
 0x1ed   :  { %518 = vst.msk [vmem:[#allocation0 + $0x1160] ss:$8 sm:$0xf] %vm3_vm0, %v7171_v2   ;;  %511 = vst.msk [vmem:[#allocation0 + $0x1120] ss:$8 sm:$0xf] %vm3_vm0, %v7170_v1  }
 0x1ee   :  { %1407 = vst.msk [vmem:[#allocation0 + $0x12c1] ss:$8 sm:$0xf] %vm3_vm0, %v1404_v3   ;;  %1409 = vst.msk [vmem:[#allocation0 + $0x12c1] ss:$8 sm:$0xf0] %vm3_vm0, %v1404_v3  }
 0x1ef   :  { %1398 = vst.msk [vmem:[#allocation0 + $0x1281] ss:$8 sm:$0xf] %vm3_vm0, %v1395_v4   ;;  %1400 = vst.msk [vmem:[#allocation0 + $0x1281] ss:$8 sm:$0xf0] %vm3_vm0, %v1395_v4  }
 0x1f0   :  { %7708 = vst [vmem:[%s11542_s1 + $0x330] sm:$0x3] %v4056_v5  ;;  %7709 = vst [vmem:[%s11542_s1 + $0x332] sm:$0x3] %v4062_v6  ;;  %v4074_v8 = vld [vmem:[#allocation0 + $0xcd8] sm:$0x3] }
 0x1f1   :  { %7710 = vst [vmem:[%s11542_s1 + $0x334] sm:$0x3] %v4068_v7  ;;  %v4080_v9 = vld [vmem:[#allocation0 + $0xce0] sm:$0x3]  ;;  %v4086_v10 = vld [vmem:[#allocation0 + $0xce8] sm:$0x3] }
 0x1f2   :  { %7711 = vst [vmem:[%s11542_s1 + $0x336] sm:$0x3] %v4074_v8  ;;  %7712 = vst [vmem:[%s11542_s1 + $0x338] sm:$0x3] %v4080_v9  ;;  %v4092_v11 = vld [vmem:[#allocation0 + $0xcf0] sm:$0x3]  ;;  %v1494_v9 = vpop.permute.xlu1 %1493  }
 0x1f3   :  { %7713 = vst [vmem:[%s11542_s1 + $0x33a] sm:$0x3] %v4086_v10  ;;  %v4098_v12 = vld [vmem:[#allocation0 + $0xcf8] sm:$0x3]  ;;  %v4008_v13 = vld [vmem:[#allocation0 + $0xc80] sm:$0x3]  ;;  %v1485_v10 = vpop.permute.xlu0 %1484  }
 0x1f4   :  { %7714 = vst [vmem:[%s11542_s1 + $0x33c] sm:$0x3] %v4092_v11  ;;  %7715 = vst [vmem:[%s11542_s1 + $0x33e] sm:$0x3] %v4098_v12  ;;  %v4014_v14 = vld [vmem:[#allocation0 + $0xc88] sm:$0x3] }
 0x1f5   :  { %7700 = vst [vmem:[%s11542_s1 + $0x320] sm:$0x3] %v4008_v13  ;;  %v4020_v15 = vld [vmem:[#allocation0 + $0xc90] sm:$0x3]  ;;  %v4026_v16 = vld [vmem:[#allocation0 + $0xc98] sm:$0x3] }
 0x1f6   :  { %7701 = vst [vmem:[%s11542_s1 + $0x322] sm:$0x3] %v4014_v14  ;;  %7702 = vst [vmem:[%s11542_s1 + $0x324] sm:$0x3] %v4020_v15  ;;  %v4032_v19 = vld [vmem:[#allocation0 + $0xca0] sm:$0x3] }
 0x1f7   :  { %7703 = vst [vmem:[%s11542_s1 + $0x326] sm:$0x3] %v4026_v16  ;;  %v4038_v20 = vld [vmem:[#allocation0 + $0xca8] sm:$0x3]  ;;  %v4044_v21 = vld [vmem:[#allocation0 + $0xcb0] sm:$0x3] }
 0x1f8   :  { %1425 = vst.msk [vmem:[#allocation0 + $0x1341] ss:$8 sm:$0xf] %vm3_vm0, %v1422_v17   ;;  %1427 = vst.msk [vmem:[#allocation0 + $0x1341] ss:$8 sm:$0xf0] %vm3_vm0, %v1422_v17  }
 0x1f9   :  { %1416 = vst.msk [vmem:[#allocation0 + $0x1301] ss:$8 sm:$0xf] %vm3_vm0, %v1413_v18   ;;  %1418 = vst.msk [vmem:[#allocation0 + $0x1301] ss:$8 sm:$0xf0] %vm3_vm0, %v1413_v18  }
 0x1fa   :  { %7704 = vst [vmem:[%s11542_s1 + $0x328] sm:$0x3] %v4032_v19  ;;  %7705 = vst [vmem:[%s11542_s1 + $0x32a] sm:$0x3] %v4038_v20  ;;  %v4050_v22 = vld [vmem:[#allocation0 + $0xcb8] sm:$0x3] }
 0x1fb   :  { %7706 = vst [vmem:[%s11542_s1 + $0x32c] sm:$0x3] %v4044_v21  ;;  %v4152_v23 = vld [vmem:[#allocation0 + $0xd40] sm:$0x3]  ;;  %v4158_v24 = vld [vmem:[#allocation0 + $0xd48] sm:$0x3] }
 0x1fc   :  { %7707 = vst [vmem:[%s11542_s1 + $0x32e] sm:$0x3] %v4050_v22  ;;  %7724 = vst [vmem:[%s11542_s1 + $0x350] sm:$0x3] %v4152_v23  ;;  %v4164_v25 = vld [vmem:[#allocation0 + $0xd50] sm:$0x3]  ;;  %v1512_v23 = vpop.permute.xlu1 %1511  }
 0x1fd   :  { %7725 = vst [vmem:[%s11542_s1 + $0x352] sm:$0x3] %v4158_v24  ;;  %v4170_v26 = vld [vmem:[#allocation0 + $0xd58] sm:$0x3]  ;;  %v4176_v27 = vld [vmem:[#allocation0 + $0xd60] sm:$0x3]  ;;  %v1503_v24 = vpop.permute.xlu0 %1502  }
 0x1fe   :  { %7726 = vst [vmem:[%s11542_s1 + $0x354] sm:$0x3] %v4164_v25  ;;  %7727 = vst [vmem:[%s11542_s1 + $0x356] sm:$0x3] %v4170_v26  ;;  %v4182_v28 = vld [vmem:[#allocation0 + $0xd68] sm:$0x3] }
 0x1ff   :  { %7728 = vst [vmem:[%s11542_s1 + $0x358] sm:$0x3] %v4176_v27  ;;  %v4188_v29 = vld [vmem:[#allocation0 + $0xd70] sm:$0x3]  ;;  %v4194_v30 = vld [vmem:[#allocation0 + $0xd78] sm:$0x3] }
 0x200   :  { %7729 = vst [vmem:[%s11542_s1 + $0x35a] sm:$0x3] %v4182_v28  ;;  %7730 = vst [vmem:[%s11542_s1 + $0x35c] sm:$0x3] %v4188_v29  ;;  %v4104_v33 = vld [vmem:[#allocation0 + $0xd00] sm:$0x3] }
 0x201   :  { %7731 = vst [vmem:[%s11542_s1 + $0x35e] sm:$0x3] %v4194_v30  ;;  %v4110_v34 = vld [vmem:[#allocation0 + $0xd08] sm:$0x3]  ;;  %v4116_v35 = vld [vmem:[#allocation0 + $0xd10] sm:$0x3] }
 0x202   :  { %1443 = vst.msk [vmem:[#allocation0 + $0x13c1] ss:$8 sm:$0xf] %vm3_vm0, %v1440_v31   ;;  %1445 = vst.msk [vmem:[#allocation0 + $0x13c1] ss:$8 sm:$0xf0] %vm3_vm0, %v1440_v31  }
 0x203   :  { %1434 = vst.msk [vmem:[#allocation0 + $0x1381] ss:$8 sm:$0xf] %vm3_vm0, %v1431_v32   ;;  %1436 = vst.msk [vmem:[#allocation0 + $0x1381] ss:$8 sm:$0xf0] %vm3_vm0, %v1431_v32  }
 0x204   :  { %7716 = vst [vmem:[%s11542_s1 + $0x340] sm:$0x3] %v4104_v33  ;;  %7717 = vst [vmem:[%s11542_s1 + $0x342] sm:$0x3] %v4110_v34  ;;  %v4122_v36 = vld [vmem:[#allocation0 + $0xd18] sm:$0x3] }
 0x205   :  { %7718 = vst [vmem:[%s11542_s1 + $0x344] sm:$0x3] %v4116_v35  ;;  %v4128_v37 = vld [vmem:[#allocation0 + $0xd20] sm:$0x3]  ;;  %v4134_v38 = vld [vmem:[#allocation0 + $0xd28] sm:$0x3] }
 0x206   :  { %7719 = vst [vmem:[%s11542_s1 + $0x346] sm:$0x3] %v4122_v36  ;;  %7720 = vst [vmem:[%s11542_s1 + $0x348] sm:$0x3] %v4128_v37  ;;  %v4140_v39 = vld [vmem:[#allocation0 + $0xd30] sm:$0x3]  ;;  %v1530_v37 = vpop.permute.xlu1 %1529  }
 0x207   :  { %7721 = vst [vmem:[%s11542_s1 + $0x34a] sm:$0x3] %v4134_v38  ;;  %v4146_v40 = vld [vmem:[#allocation0 + $0xd38] sm:$0x3]  ;;  %v4248_v41 = vld [vmem:[#allocation0 + $0xdc0] sm:$0x3]  ;;  %v1521_v38 = vpop.permute.xlu0 %1520  }
 0x208   :  { %7722 = vst [vmem:[%s11542_s1 + $0x34c] sm:$0x3] %v4140_v39  ;;  %7723 = vst [vmem:[%s11542_s1 + $0x34e] sm:$0x3] %v4146_v40  ;;  %v4254_v42 = vld [vmem:[#allocation0 + $0xdc8] sm:$0x3] }
 0x209   :  { %7740 = vst [vmem:[%s11542_s1 + $0x370] sm:$0x3] %v4248_v41  ;;  %v4260_v43 = vld [vmem:[#allocation0 + $0xdd0] sm:$0x3]  ;;  %v4266_v44 = vld [vmem:[#allocation0 + $0xdd8] sm:$0x3] }
 0x20a   :  { %7741 = vst [vmem:[%s11542_s1 + $0x372] sm:$0x3] %v4254_v42  ;;  %7742 = vst [vmem:[%s11542_s1 + $0x374] sm:$0x3] %v4260_v43  ;;  %v4272_v47 = vld [vmem:[#allocation0 + $0xde0] sm:$0x3] }
 0x20b   :  { %7743 = vst [vmem:[%s11542_s1 + $0x376] sm:$0x3] %v4266_v44  ;;  %v4278_v48 = vld [vmem:[#allocation0 + $0xde8] sm:$0x3]  ;;  %v4284_v49 = vld [vmem:[#allocation0 + $0xdf0] sm:$0x3] }
 0x20c   :  { %1461 = vst.msk [vmem:[#allocation0 + $0x1441] ss:$8 sm:$0xf] %vm3_vm0, %v1458_v45   ;;  %1463 = vst.msk [vmem:[#allocation0 + $0x1441] ss:$8 sm:$0xf0] %vm3_vm0, %v1458_v45  }
 0x20d   :  { %1452 = vst.msk [vmem:[#allocation0 + $0x1401] ss:$8 sm:$0xf] %vm3_vm0, %v1449_v46   ;;  %1454 = vst.msk [vmem:[#allocation0 + $0x1401] ss:$8 sm:$0xf0] %vm3_vm0, %v1449_v46  }
 0x20e   :  { %7744 = vst [vmem:[%s11542_s1 + $0x378] sm:$0x3] %v4272_v47  ;;  %7745 = vst [vmem:[%s11542_s1 + $0x37a] sm:$0x3] %v4278_v48  ;;  %v4290_v50 = vld [vmem:[#allocation0 + $0xdf8] sm:$0x3] }
 0x20f   :  { %7746 = vst [vmem:[%s11542_s1 + $0x37c] sm:$0x3] %v4284_v49  ;;  %v4200_v51 = vld [vmem:[#allocation0 + $0xd80] sm:$0x3]  ;;  %v4206_v52 = vld [vmem:[#allocation0 + $0xd88] sm:$0x3] }
 0x210   :  { %7747 = vst [vmem:[%s11542_s1 + $0x37e] sm:$0x3] %v4290_v50  ;;  %7732 = vst [vmem:[%s11542_s1 + $0x360] sm:$0x3] %v4200_v51  ;;  %v4212_v53 = vld [vmem:[#allocation0 + $0xd90] sm:$0x3]  ;;  %v1548_v51 = vpop.permute.xlu1 %1547  }
 0x211   :  { %7733 = vst [vmem:[%s11542_s1 + $0x362] sm:$0x3] %v4206_v52  ;;  %v4218_v54 = vld [vmem:[#allocation0 + $0xd98] sm:$0x3]  ;;  %v4224_v55 = vld [vmem:[#allocation0 + $0xda0] sm:$0x3]  ;;  %v1539_v52 = vpop.permute.xlu0 %1538  }
 0x212   :  { %7734 = vst [vmem:[%s11542_s1 + $0x364] sm:$0x3] %v4212_v53  ;;  %7735 = vst [vmem:[%s11542_s1 + $0x366] sm:$0x3] %v4218_v54  ;;  %v4230_v56 = vld [vmem:[#allocation0 + $0xda8] sm:$0x3] }
 0x213   :  { %7736 = vst [vmem:[%s11542_s1 + $0x368] sm:$0x3] %v4224_v55  ;;  %v4236_v57 = vld [vmem:[#allocation0 + $0xdb0] sm:$0x3]  ;;  %v4242_v58 = vld [vmem:[#allocation0 + $0xdb8] sm:$0x3] }
 0x214   :  { %7737 = vst [vmem:[%s11542_s1 + $0x36a] sm:$0x3] %v4230_v56  ;;  %7738 = vst [vmem:[%s11542_s1 + $0x36c] sm:$0x3] %v4236_v57  ;;  %v4344_v61 = vld [vmem:[#allocation0 + $0xe40] sm:$0x3] }
 0x215   :  { %7739 = vst [vmem:[%s11542_s1 + $0x36e] sm:$0x3] %v4242_v58  ;;  %v4350_v62 = vld [vmem:[#allocation0 + $0xe48] sm:$0x3]  ;;  %v4356_v63 = vld [vmem:[#allocation0 + $0xe50] sm:$0x3] }
 0x216   :  { %1479 = vst.msk [vmem:[#allocation0 + $0x14c1] ss:$8 sm:$0xf] %vm3_vm0, %v1476_v59   ;;  %1481 = vst.msk [vmem:[#allocation0 + $0x14c1] ss:$8 sm:$0xf0] %vm3_vm0, %v1476_v59  }
 0x217   :  { %1470 = vst.msk [vmem:[#allocation0 + $0x1481] ss:$8 sm:$0xf] %vm3_vm0, %v1467_v60   ;;  %1472 = vst.msk [vmem:[#allocation0 + $0x1481] ss:$8 sm:$0xf0] %vm3_vm0, %v1467_v60  }
 0x218   :  { %7756 = vst [vmem:[%s11542_s1 + $0x390] sm:$0x3] %v4344_v61  ;;  %7757 = vst [vmem:[%s11542_s1 + $0x392] sm:$0x3] %v4350_v62  ;;  %v4362_v0 = vld [vmem:[#allocation0 + $0xe58] sm:$0x3] }
 0x219   :  { %7758 = vst [vmem:[%s11542_s1 + $0x394] sm:$0x3] %v4356_v63  ;;  %v4368_v1 = vld [vmem:[#allocation0 + $0xe60] sm:$0x3]  ;;  %v4374_v2 = vld [vmem:[#allocation0 + $0xe68] sm:$0x3] }
 0x21a   :  { %7759 = vst [vmem:[%s11542_s1 + $0x396] sm:$0x3] %v4362_v0  ;;  %7760 = vst [vmem:[%s11542_s1 + $0x398] sm:$0x3] %v4368_v1  ;;  %v4380_v3 = vld [vmem:[#allocation0 + $0xe70] sm:$0x3]  ;;  %v1566_v1 = vpop.permute.xlu1 %1565  }
 0x21b   :  { %7761 = vst [vmem:[%s11542_s1 + $0x39a] sm:$0x3] %v4374_v2  ;;  %v4386_v4 = vld [vmem:[#allocation0 + $0xe78] sm:$0x3]  ;;  %v4296_v5 = vld [vmem:[#allocation0 + $0xe00] sm:$0x3]  ;;  %v1557_v2 = vpop.permute.xlu0 %1556  }
 0x21c   :  { %7762 = vst [vmem:[%s11542_s1 + $0x39c] sm:$0x3] %v4380_v3  ;;  %7763 = vst [vmem:[%s11542_s1 + $0x39e] sm:$0x3] %v4386_v4  ;;  %v4302_v6 = vld [vmem:[#allocation0 + $0xe08] sm:$0x3] }
 0x21d   :  { %7748 = vst [vmem:[%s11542_s1 + $0x380] sm:$0x3] %v4296_v5  ;;  %v4308_v7 = vld [vmem:[#allocation0 + $0xe10] sm:$0x3]  ;;  %v4314_v8 = vld [vmem:[#allocation0 + $0xe18] sm:$0x3] }
 0x21e   :  { %7749 = vst [vmem:[%s11542_s1 + $0x382] sm:$0x3] %v4302_v6  ;;  %7750 = vst [vmem:[%s11542_s1 + $0x384] sm:$0x3] %v4308_v7  ;;  %v4320_v11 = vld [vmem:[#allocation0 + $0xe20] sm:$0x3] }
 0x21f   :  { %7751 = vst [vmem:[%s11542_s1 + $0x386] sm:$0x3] %v4314_v8  ;;  %v4326_v12 = vld [vmem:[#allocation0 + $0xe28] sm:$0x3]  ;;  %v4332_v13 = vld [vmem:[#allocation0 + $0xe30] sm:$0x3] }
 0x220   :  { %1497 = vst.msk [vmem:[#allocation0 + $0x1541] ss:$8 sm:$0xf] %vm3_vm0, %v1494_v9   ;;  %1499 = vst.msk [vmem:[#allocation0 + $0x1541] ss:$8 sm:$0xf0] %vm3_vm0, %v1494_v9  }
 0x221   :  { %1488 = vst.msk [vmem:[#allocation0 + $0x1501] ss:$8 sm:$0xf] %vm3_vm0, %v1485_v10   ;;  %1490 = vst.msk [vmem:[#allocation0 + $0x1501] ss:$8 sm:$0xf0] %vm3_vm0, %v1485_v10  }
 0x222   :  { %7752 = vst [vmem:[%s11542_s1 + $0x388] sm:$0x3] %v4320_v11  ;;  %7753 = vst [vmem:[%s11542_s1 + $0x38a] sm:$0x3] %v4326_v12  ;;  %v4338_v14 = vld [vmem:[#allocation0 + $0xe38] sm:$0x3] }
 0x223   :  { %7754 = vst [vmem:[%s11542_s1 + $0x38c] sm:$0x3] %v4332_v13  ;;  %v4440_v15 = vld [vmem:[#allocation0 + $0xec0] sm:$0x3]  ;;  %v4446_v16 = vld [vmem:[#allocation0 + $0xec8] sm:$0x3] }
 0x224   :  { %7755 = vst [vmem:[%s11542_s1 + $0x38e] sm:$0x3] %v4338_v14  ;;  %7772 = vst [vmem:[%s11542_s1 + $0x3b0] sm:$0x3] %v4440_v15  ;;  %v4452_v17 = vld [vmem:[#allocation0 + $0xed0] sm:$0x3]  ;;  %v1584_v15 = vpop.permute.xlu1 %1583  }
 0x225   :  { %7773 = vst [vmem:[%s11542_s1 + $0x3b2] sm:$0x3] %v4446_v16  ;;  %v4458_v18 = vld [vmem:[#allocation0 + $0xed8] sm:$0x3]  ;;  %v4464_v19 = vld [vmem:[#allocation0 + $0xee0] sm:$0x3]  ;;  %v1575_v16 = vpop.permute.xlu0 %1574  }
 0x226   :  { %7774 = vst [vmem:[%s11542_s1 + $0x3b4] sm:$0x3] %v4452_v17  ;;  %7775 = vst [vmem:[%s11542_s1 + $0x3b6] sm:$0x3] %v4458_v18  ;;  %v4470_v20 = vld [vmem:[#allocation0 + $0xee8] sm:$0x3] }
 0x227   :  { %7776 = vst [vmem:[%s11542_s1 + $0x3b8] sm:$0x3] %v4464_v19  ;;  %v4476_v21 = vld [vmem:[#allocation0 + $0xef0] sm:$0x3]  ;;  %v4482_v22 = vld [vmem:[#allocation0 + $0xef8] sm:$0x3] }
 0x228   :  { %7777 = vst [vmem:[%s11542_s1 + $0x3ba] sm:$0x3] %v4470_v20  ;;  %7778 = vst [vmem:[%s11542_s1 + $0x3bc] sm:$0x3] %v4476_v21  ;;  %v4392_v25 = vld [vmem:[#allocation0 + $0xe80] sm:$0x3] }
 0x229   :  { %7779 = vst [vmem:[%s11542_s1 + $0x3be] sm:$0x3] %v4482_v22  ;;  %v4398_v26 = vld [vmem:[#allocation0 + $0xe88] sm:$0x3]  ;;  %v4404_v27 = vld [vmem:[#allocation0 + $0xe90] sm:$0x3] }
 0x22a   :  { %1515 = vst.msk [vmem:[#allocation0 + $0x15c1] ss:$8 sm:$0xf] %vm3_vm0, %v1512_v23   ;;  %1517 = vst.msk [vmem:[#allocation0 + $0x15c1] ss:$8 sm:$0xf0] %vm3_vm0, %v1512_v23  }
 0x22b   :  { %1506 = vst.msk [vmem:[#allocation0 + $0x1581] ss:$8 sm:$0xf] %vm3_vm0, %v1503_v24   ;;  %1508 = vst.msk [vmem:[#allocation0 + $0x1581] ss:$8 sm:$0xf0] %vm3_vm0, %v1503_v24  }
 0x22c   :  { %7764 = vst [vmem:[%s11542_s1 + $0x3a0] sm:$0x3] %v4392_v25  ;;  %7765 = vst [vmem:[%s11542_s1 + $0x3a2] sm:$0x3] %v4398_v26  ;;  %v4410_v28 = vld [vmem:[#allocation0 + $0xe98] sm:$0x3] }
 0x22d   :  { %7766 = vst [vmem:[%s11542_s1 + $0x3a4] sm:$0x3] %v4404_v27  ;;  %v4416_v29 = vld [vmem:[#allocation0 + $0xea0] sm:$0x3]  ;;  %v4422_v30 = vld [vmem:[#allocation0 + $0xea8] sm:$0x3] }
 0x22e   :  { %7767 = vst [vmem:[%s11542_s1 + $0x3a6] sm:$0x3] %v4410_v28  ;;  %7768 = vst [vmem:[%s11542_s1 + $0x3a8] sm:$0x3] %v4416_v29  ;;  %v4428_v31 = vld [vmem:[#allocation0 + $0xeb0] sm:$0x3]  ;;  %v1602_v29 = vpop.permute.xlu1 %1601  }
 0x22f   :  { %7769 = vst [vmem:[%s11542_s1 + $0x3aa] sm:$0x3] %v4422_v30  ;;  %v4434_v32 = vld [vmem:[#allocation0 + $0xeb8] sm:$0x3]  ;;  %v4536_v33 = vld [vmem:[#allocation0 + $0xf40] sm:$0x3]  ;;  %v1593_v30 = vpop.permute.xlu0 %1592  }
 0x230   :  { %7770 = vst [vmem:[%s11542_s1 + $0x3ac] sm:$0x3] %v4428_v31  ;;  %7771 = vst [vmem:[%s11542_s1 + $0x3ae] sm:$0x3] %v4434_v32  ;;  %v4542_v34 = vld [vmem:[#allocation0 + $0xf48] sm:$0x3] }
 0x231   :  { %7788 = vst [vmem:[%s11542_s1 + $0x3d0] sm:$0x3] %v4536_v33  ;;  %v4548_v35 = vld [vmem:[#allocation0 + $0xf50] sm:$0x3]  ;;  %v4554_v36 = vld [vmem:[#allocation0 + $0xf58] sm:$0x3] }
 0x232   :  { %7789 = vst [vmem:[%s11542_s1 + $0x3d2] sm:$0x3] %v4542_v34  ;;  %7790 = vst [vmem:[%s11542_s1 + $0x3d4] sm:$0x3] %v4548_v35  ;;  %v4560_v39 = vld [vmem:[#allocation0 + $0xf60] sm:$0x3] }
 0x233   :  { %7791 = vst [vmem:[%s11542_s1 + $0x3d6] sm:$0x3] %v4554_v36  ;;  %v4566_v40 = vld [vmem:[#allocation0 + $0xf68] sm:$0x3]  ;;  %v4572_v41 = vld [vmem:[#allocation0 + $0xf70] sm:$0x3] }
 0x234   :  { %1533 = vst.msk [vmem:[#allocation0 + $0x1641] ss:$8 sm:$0xf] %vm3_vm0, %v1530_v37   ;;  %1535 = vst.msk [vmem:[#allocation0 + $0x1641] ss:$8 sm:$0xf0] %vm3_vm0, %v1530_v37  }
 0x235   :  { %1524 = vst.msk [vmem:[#allocation0 + $0x1601] ss:$8 sm:$0xf] %vm3_vm0, %v1521_v38   ;;  %1526 = vst.msk [vmem:[#allocation0 + $0x1601] ss:$8 sm:$0xf0] %vm3_vm0, %v1521_v38  }
 0x236   :  { %7792 = vst [vmem:[%s11542_s1 + $0x3d8] sm:$0x3] %v4560_v39  ;;  %7793 = vst [vmem:[%s11542_s1 + $0x3da] sm:$0x3] %v4566_v40  ;;  %v4578_v42 = vld [vmem:[#allocation0 + $0xf78] sm:$0x3] }
 0x237   :  { %7794 = vst [vmem:[%s11542_s1 + $0x3dc] sm:$0x3] %v4572_v41  ;;  %v4488_v43 = vld [vmem:[#allocation0 + $0xf00] sm:$0x3]  ;;  %v4494_v44 = vld [vmem:[#allocation0 + $0xf08] sm:$0x3] }
 0x238   :  { %7795 = vst [vmem:[%s11542_s1 + $0x3de] sm:$0x3] %v4578_v42  ;;  %7780 = vst [vmem:[%s11542_s1 + $0x3c0] sm:$0x3] %v4488_v43  ;;  %v4500_v45 = vld [vmem:[#allocation0 + $0xf10] sm:$0x3] }
 0x239   :  { %7781 = vst [vmem:[%s11542_s1 + $0x3c2] sm:$0x3] %v4494_v44  ;;  %v4506_v46 = vld [vmem:[#allocation0 + $0xf18] sm:$0x3]  ;;  %v4512_v47 = vld [vmem:[#allocation0 + $0xf20] sm:$0x3] }
 0x23a   :  { %7782 = vst [vmem:[%s11542_s1 + $0x3c4] sm:$0x3] %v4500_v45  ;;  %7783 = vst [vmem:[%s11542_s1 + $0x3c6] sm:$0x3] %v4506_v46  ;;  %v4518_v48 = vld [vmem:[#allocation0 + $0xf28] sm:$0x3] }
 0x23b   :  { %7784 = vst [vmem:[%s11542_s1 + $0x3c8] sm:$0x3] %v4512_v47  ;;  %v4524_v49 = vld [vmem:[#allocation0 + $0xf30] sm:$0x3]  ;;  %v4530_v50 = vld [vmem:[#allocation0 + $0xf38] sm:$0x3] }
 0x23c   :  { %7785 = vst [vmem:[%s11542_s1 + $0x3ca] sm:$0x3] %v4518_v48  ;;  %7786 = vst [vmem:[%s11542_s1 + $0x3cc] sm:$0x3] %v4524_v49  ;;  %v4632_v53 = vld [vmem:[#allocation0 + $0xfc0] sm:$0x3] }
 0x23d   :  { %7787 = vst [vmem:[%s11542_s1 + $0x3ce] sm:$0x3] %v4530_v50  ;;  %v4638_v54 = vld [vmem:[#allocation0 + $0xfc8] sm:$0x3]  ;;  %v4644_v55 = vld [vmem:[#allocation0 + $0xfd0] sm:$0x3] }
 0x23e   :  { %1551 = vst.msk [vmem:[#allocation0 + $0x16c1] ss:$8 sm:$0xf] %vm3_vm0, %v1548_v51   ;;  %1553 = vst.msk [vmem:[#allocation0 + $0x16c1] ss:$8 sm:$0xf0] %vm3_vm0, %v1548_v51  }
 0x23f   :  { %1542 = vst.msk [vmem:[#allocation0 + $0x1681] ss:$8 sm:$0xf] %vm3_vm0, %v1539_v52   ;;  %1544 = vst.msk [vmem:[#allocation0 + $0x1681] ss:$8 sm:$0xf0] %vm3_vm0, %v1539_v52  }
 0x240   :  { %7804 = vst [vmem:[%s11542_s1 + $0x3f0] sm:$0x3] %v4632_v53  ;;  %7805 = vst [vmem:[%s11542_s1 + $0x3f2] sm:$0x3] %v4638_v54  ;;  %v4650_v56 = vld [vmem:[#allocation0 + $0xfd8] sm:$0x3] }
 0x241   :  { %7806 = vst [vmem:[%s11542_s1 + $0x3f4] sm:$0x3] %v4644_v55  ;;  %v4656_v57 = vld [vmem:[#allocation0 + $0xfe0] sm:$0x3]  ;;  %v4662_v58 = vld [vmem:[#allocation0 + $0xfe8] sm:$0x3] }
 0x242   :  { %7807 = vst [vmem:[%s11542_s1 + $0x3f6] sm:$0x3] %v4650_v56  ;;  %7808 = vst [vmem:[%s11542_s1 + $0x3f8] sm:$0x3] %v4656_v57  ;;  %v4668_v59 = vld [vmem:[#allocation0 + $0xff0] sm:$0x3] }
 0x243   :  { %7809 = vst [vmem:[%s11542_s1 + $0x3fa] sm:$0x3] %v4662_v58  ;;  %v4674_v60 = vld [vmem:[#allocation0 + $0xff8] sm:$0x3]  ;;  %v4584_v61 = vld [vmem:[#allocation0 + $0xf80] sm:$0x3] }
 0x244   :  { %7810 = vst [vmem:[%s11542_s1 + $0x3fc] sm:$0x3] %v4668_v59  ;;  %7811 = vst [vmem:[%s11542_s1 + $0x3fe] sm:$0x3] %v4674_v60  ;;  %v4590_v62 = vld [vmem:[#allocation0 + $0xf88] sm:$0x3] }
 0x245   :  { %7796 = vst [vmem:[%s11542_s1 + $0x3e0] sm:$0x3] %v4584_v61  ;;  %v4596_v63 = vld [vmem:[#allocation0 + $0xf90] sm:$0x3]  ;;  %v4602_v0 = vld [vmem:[#allocation0 + $0xf98] sm:$0x3] }
 0x246   :  { %7797 = vst [vmem:[%s11542_s1 + $0x3e2] sm:$0x3] %v4590_v62  ;;  %7798 = vst [vmem:[%s11542_s1 + $0x3e4] sm:$0x3] %v4596_v63  ;;  %v4608_v3 = vld [vmem:[#allocation0 + $0xfa0] sm:$0x3] }
 0x247   :  { %7799 = vst [vmem:[%s11542_s1 + $0x3e6] sm:$0x3] %v4602_v0  ;;  %v4614_v4 = vld [vmem:[#allocation0 + $0xfa8] sm:$0x3]  ;;  %v4620_v5 = vld [vmem:[#allocation0 + $0xfb0] sm:$0x3] }
 0x248   :  { %1569 = vst.msk [vmem:[#allocation0 + $0x1741] ss:$8 sm:$0xf] %vm3_vm0, %v1566_v1   ;;  %1571 = vst.msk [vmem:[#allocation0 + $0x1741] ss:$8 sm:$0xf0] %vm3_vm0, %v1566_v1  }
 0x249   :  { %1560 = vst.msk [vmem:[#allocation0 + $0x1701] ss:$8 sm:$0xf] %vm3_vm0, %v1557_v2   ;;  %1562 = vst.msk [vmem:[#allocation0 + $0x1701] ss:$8 sm:$0xf0] %vm3_vm0, %v1557_v2  }
 0x24a   :  { %7800 = vst [vmem:[%s11542_s1 + $0x3e8] sm:$0x3] %v4608_v3  ;;  %7801 = vst [vmem:[%s11542_s1 + $0x3ea] sm:$0x3] %v4614_v4  ;;  %v4626_v6 = vld [vmem:[#allocation0 + $0xfb8] sm:$0x3] }
 0x24b   :  { %7802 = vst [vmem:[%s11542_s1 + $0x3ec] sm:$0x3] %v4620_v5  ;;  %v4728_v7 = vld [vmem:[#allocation0 + $0x1040] sm:$0x3]  ;;  %v4734_v8 = vld [vmem:[#allocation0 + $0x1048] sm:$0x3] }
 0x24c   :  { %7803 = vst [vmem:[%s11542_s1 + $0x3ee] sm:$0x3] %v4626_v6  ;;  %7820 = vst [vmem:[%s11542_s1 + $0x410] sm:$0x3] %v4728_v7  ;;  %v4740_v9 = vld [vmem:[#allocation0 + $0x1050] sm:$0x3] }
 0x24d   :  { %7821 = vst [vmem:[%s11542_s1 + $0x412] sm:$0x3] %v4734_v8  ;;  %v4746_v10 = vld [vmem:[#allocation0 + $0x1058] sm:$0x3]  ;;  %v4752_v11 = vld [vmem:[#allocation0 + $0x1060] sm:$0x3] }
 0x24e   :  { %7822 = vst [vmem:[%s11542_s1 + $0x414] sm:$0x3] %v4740_v9  ;;  %7823 = vst [vmem:[%s11542_s1 + $0x416] sm:$0x3] %v4746_v10  ;;  %v4758_v12 = vld [vmem:[#allocation0 + $0x1068] sm:$0x3] }
 0x24f   :  { %7824 = vst [vmem:[%s11542_s1 + $0x418] sm:$0x3] %v4752_v11  ;;  %v4764_v13 = vld [vmem:[#allocation0 + $0x1070] sm:$0x3]  ;;  %v4770_v14 = vld [vmem:[#allocation0 + $0x1078] sm:$0x3] }
 0x250   :  { %7825 = vst [vmem:[%s11542_s1 + $0x41a] sm:$0x3] %v4758_v12  ;;  %7826 = vst [vmem:[%s11542_s1 + $0x41c] sm:$0x3] %v4764_v13  ;;  %v4680_v17 = vld [vmem:[#allocation0 + $0x1000] sm:$0x3] }
 0x251   :  { %7827 = vst [vmem:[%s11542_s1 + $0x41e] sm:$0x3] %v4770_v14  ;;  %v4686_v18 = vld [vmem:[#allocation0 + $0x1008] sm:$0x3]  ;;  %v4692_v19 = vld [vmem:[#allocation0 + $0x1010] sm:$0x3] }
 0x252   :  { %1587 = vst.msk [vmem:[#allocation0 + $0x17c1] ss:$8 sm:$0xf] %vm3_vm0, %v1584_v15   ;;  %1589 = vst.msk [vmem:[#allocation0 + $0x17c1] ss:$8 sm:$0xf0] %vm3_vm0, %v1584_v15  }
 0x253   :  { %1578 = vst.msk [vmem:[#allocation0 + $0x1781] ss:$8 sm:$0xf] %vm3_vm0, %v1575_v16   ;;  %1580 = vst.msk [vmem:[#allocation0 + $0x1781] ss:$8 sm:$0xf0] %vm3_vm0, %v1575_v16  }
 0x254   :  { %7812 = vst [vmem:[%s11542_s1 + $0x400] sm:$0x3] %v4680_v17  ;;  %7813 = vst [vmem:[%s11542_s1 + $0x402] sm:$0x3] %v4686_v18  ;;  %v4698_v20 = vld [vmem:[#allocation0 + $0x1018] sm:$0x3] }
 0x255   :  { %7814 = vst [vmem:[%s11542_s1 + $0x404] sm:$0x3] %v4692_v19  ;;  %v4704_v21 = vld [vmem:[#allocation0 + $0x1020] sm:$0x3]  ;;  %v4710_v22 = vld [vmem:[#allocation0 + $0x1028] sm:$0x3] }
 0x256   :  { %7815 = vst [vmem:[%s11542_s1 + $0x406] sm:$0x3] %v4698_v20  ;;  %7816 = vst [vmem:[%s11542_s1 + $0x408] sm:$0x3] %v4704_v21  ;;  %v4716_v23 = vld [vmem:[#allocation0 + $0x1030] sm:$0x3] }
 0x257   :  { %7817 = vst [vmem:[%s11542_s1 + $0x40a] sm:$0x3] %v4710_v22  ;;  %v4722_v24 = vld [vmem:[#allocation0 + $0x1038] sm:$0x3]  ;;  %v4824_v25 = vld [vmem:[#allocation0 + $0x10c0] sm:$0x3] }
 0x258   :  { %7818 = vst [vmem:[%s11542_s1 + $0x40c] sm:$0x3] %v4716_v23  ;;  %7819 = vst [vmem:[%s11542_s1 + $0x40e] sm:$0x3] %v4722_v24  ;;  %v4830_v26 = vld [vmem:[#allocation0 + $0x10c8] sm:$0x3] }
 0x259   :  { %7836 = vst [vmem:[%s11542_s1 + $0x430] sm:$0x3] %v4824_v25  ;;  %v4836_v27 = vld [vmem:[#allocation0 + $0x10d0] sm:$0x3]  ;;  %v4842_v28 = vld [vmem:[#allocation0 + $0x10d8] sm:$0x3] }
 0x25a   :  { %7837 = vst [vmem:[%s11542_s1 + $0x432] sm:$0x3] %v4830_v26  ;;  %7838 = vst [vmem:[%s11542_s1 + $0x434] sm:$0x3] %v4836_v27  ;;  %v4848_v31 = vld [vmem:[#allocation0 + $0x10e0] sm:$0x3] }
 0x25b   :  { %7839 = vst [vmem:[%s11542_s1 + $0x436] sm:$0x3] %v4842_v28  ;;  %v4854_v32 = vld [vmem:[#allocation0 + $0x10e8] sm:$0x3]  ;;  %v4860_v33 = vld [vmem:[#allocation0 + $0x10f0] sm:$0x3] }
 0x25c   :  { %1605 = vst.msk [vmem:[#allocation0 + $0x1841] ss:$8 sm:$0xf] %vm3_vm0, %v1602_v29   ;;  %1607 = vst.msk [vmem:[#allocation0 + $0x1841] ss:$8 sm:$0xf0] %vm3_vm0, %v1602_v29  }
 0x25d   :  { %1596 = vst.msk [vmem:[#allocation0 + $0x1801] ss:$8 sm:$0xf] %vm3_vm0, %v1593_v30   ;;  %1598 = vst.msk [vmem:[#allocation0 + $0x1801] ss:$8 sm:$0xf0] %vm3_vm0, %v1593_v30  }
 0x25e   :  { %7840 = vst [vmem:[%s11542_s1 + $0x438] sm:$0x3] %v4848_v31  ;;  %7841 = vst [vmem:[%s11542_s1 + $0x43a] sm:$0x3] %v4854_v32  ;;  %v4866_v34 = vld [vmem:[#allocation0 + $0x10f8] sm:$0x3] }
 0x25f   :  { %7842 = vst [vmem:[%s11542_s1 + $0x43c] sm:$0x3] %v4860_v33  ;;  %v4776_v35 = vld [vmem:[#allocation0 + $0x1080] sm:$0x3]  ;;  %v4782_v36 = vld [vmem:[#allocation0 + $0x1088] sm:$0x3] }
 0x260   :  { %7843 = vst [vmem:[%s11542_s1 + $0x43e] sm:$0x3] %v4866_v34  ;;  %7828 = vst [vmem:[%s11542_s1 + $0x420] sm:$0x3] %v4776_v35  ;;  %v4788_v37 = vld [vmem:[#allocation0 + $0x1090] sm:$0x3] }
 0x261   :  { %7829 = vst [vmem:[%s11542_s1 + $0x422] sm:$0x3] %v4782_v36  ;;  %v4794_v38 = vld [vmem:[#allocation0 + $0x1098] sm:$0x3]  ;;  %v4800_v39 = vld [vmem:[#allocation0 + $0x10a0] sm:$0x3] }
 0x262   :  { %7830 = vst [vmem:[%s11542_s1 + $0x424] sm:$0x3] %v4788_v37  ;;  %7831 = vst [vmem:[%s11542_s1 + $0x426] sm:$0x3] %v4794_v38  ;;  %v4806_v40 = vld [vmem:[#allocation0 + $0x10a8] sm:$0x3] }
 0x263   :  { %7832 = vst [vmem:[%s11542_s1 + $0x428] sm:$0x3] %v4800_v39  ;;  %v4812_v41 = vld [vmem:[#allocation0 + $0x10b0] sm:$0x3]  ;;  %v4818_v42 = vld [vmem:[#allocation0 + $0x10b8] sm:$0x3] }
 0x264   :  { %7833 = vst [vmem:[%s11542_s1 + $0x42a] sm:$0x3] %v4806_v40  ;;  %7834 = vst [vmem:[%s11542_s1 + $0x42c] sm:$0x3] %v4812_v41  ;;  %v4920_v43 = vld [vmem:[#allocation0 + $0x1140] sm:$0x3] }
 0x265   :  { %7835 = vst [vmem:[%s11542_s1 + $0x42e] sm:$0x3] %v4818_v42  ;;  %v4926_v44 = vld [vmem:[#allocation0 + $0x1148] sm:$0x3]  ;;  %v4932_v45 = vld [vmem:[#allocation0 + $0x1150] sm:$0x3] }
 0x266   :  { %7852 = vst [vmem:[%s11542_s1 + $0x450] sm:$0x3] %v4920_v43  ;;  %7853 = vst [vmem:[%s11542_s1 + $0x452] sm:$0x3] %v4926_v44  ;;  %v4938_v46 = vld [vmem:[#allocation0 + $0x1158] sm:$0x3] }
 0x267   :  { %7854 = vst [vmem:[%s11542_s1 + $0x454] sm:$0x3] %v4932_v45  ;;  %v4944_v47 = vld [vmem:[#allocation0 + $0x1160] sm:$0x3]  ;;  %v4950_v48 = vld [vmem:[#allocation0 + $0x1168] sm:$0x3] }
 0x268   :  { %7855 = vst [vmem:[%s11542_s1 + $0x456] sm:$0x3] %v4938_v46  ;;  %7856 = vst [vmem:[%s11542_s1 + $0x458] sm:$0x3] %v4944_v47  ;;  %v4956_v49 = vld [vmem:[#allocation0 + $0x1170] sm:$0x3] }
 0x269   :  { %7857 = vst [vmem:[%s11542_s1 + $0x45a] sm:$0x3] %v4950_v48  ;;  %v4962_v50 = vld [vmem:[#allocation0 + $0x1178] sm:$0x3]  ;;  %v4872_v51 = vld [vmem:[#allocation0 + $0x1100] sm:$0x3] }
 0x26a   :  { %7858 = vst [vmem:[%s11542_s1 + $0x45c] sm:$0x3] %v4956_v49  ;;  %7859 = vst [vmem:[%s11542_s1 + $0x45e] sm:$0x3] %v4962_v50  ;;  %v4878_v52 = vld [vmem:[#allocation0 + $0x1108] sm:$0x3] }
 0x26b   :  { %7844 = vst [vmem:[%s11542_s1 + $0x440] sm:$0x3] %v4872_v51  ;;  %v4884_v53 = vld [vmem:[#allocation0 + $0x1110] sm:$0x3]  ;;  %v4890_v54 = vld [vmem:[#allocation0 + $0x1118] sm:$0x3] }
 0x26c   :  { %7845 = vst [vmem:[%s11542_s1 + $0x442] sm:$0x3] %v4878_v52  ;;  %7846 = vst [vmem:[%s11542_s1 + $0x444] sm:$0x3] %v4884_v53  ;;  %v4896_v55 = vld [vmem:[#allocation0 + $0x1120] sm:$0x3] }
 0x26d   :  { %7847 = vst [vmem:[%s11542_s1 + $0x446] sm:$0x3] %v4890_v54  ;;  %v4902_v56 = vld [vmem:[#allocation0 + $0x1128] sm:$0x3]  ;;  %v4908_v57 = vld [vmem:[#allocation0 + $0x1130] sm:$0x3] }
 0x26e   :  { %7848 = vst [vmem:[%s11542_s1 + $0x448] sm:$0x3] %v4896_v55  ;;  %7849 = vst [vmem:[%s11542_s1 + $0x44a] sm:$0x3] %v4902_v56  ;;  %v4914_v58 = vld [vmem:[#allocation0 + $0x1138] sm:$0x3] }
 0x26f   :  { %7850 = vst [vmem:[%s11542_s1 + $0x44c] sm:$0x3] %v4908_v57  ;;  %v7173_v59 = vld [vmem:[%s11541_s0 + $0x288] sm:$0xff]   ;;  %v7172_v60 = vld [vmem:[%s11541_s0 + $0x280] sm:$0xff]   ;;  %7851 = vst [vmem:[%s11542_s1 + $0x44e] sm:$0x3] %v4914_v58 }
 0x270   :  { %530 = vst.msk [vmem:[#allocation0 + $0x11c0] ss:$8 sm:$0xf] %vm3_vm0, %v7173_v59   ;;  %532 = vst.msk [vmem:[#allocation0 + $0x11c0] ss:$8 sm:$0xf0] %vm3_vm0, %v7173_v59  }
 0x271   :  { %523 = vst.msk [vmem:[#allocation0 + $0x1180] ss:$8 sm:$0xf] %vm3_vm0, %v7172_v60   ;;  %525 = vst.msk [vmem:[#allocation0 + $0x1180] ss:$8 sm:$0xf0] %vm3_vm0, %v7172_v60  }
 0x272   :  { %v7175_v61 = vld [vmem:[%s11541_s0 + $0x298] sm:$0xf]   ;;  %v7176_v62 = vld [vmem:[%s11541_s0 + $0x2a0] sm:$0xff]   ;;  %v7174_v63 = vld [vmem:[%s11541_s0 + $0x290] sm:$0xff]  }
 0x273   :  { %544 = vst.msk [vmem:[#allocation0 + $0x1240] ss:$8 sm:$0xf] %vm3_vm0, %v7175_v61   ;;  %549 = vst.msk [vmem:[#allocation0 + $0x1260] ss:$8 sm:$0xf] %vm3_vm0, %v7176_v62  }
 0x274   :  { %551 = vst.msk [vmem:[#allocation0 + $0x1260] ss:$8 sm:$0xf0] %vm3_vm0, %v7176_v62   ;;  %537 = vst.msk [vmem:[#allocation0 + $0x1200] ss:$8 sm:$0xf] %vm3_vm0, %v7174_v63  }
 0x275   :  { %539 = vst.msk [vmem:[#allocation0 + $0x1200] ss:$8 sm:$0xf0] %vm3_vm0, %v7174_v63   ;;  %v7177_v0 = vld [vmem:[%s11541_s0 + $0x2a8] sm:$0xff]   ;;  %v7178_v1 = vld [vmem:[%s11541_s0 + $0x2b0] sm:$0xff]   ;;  %v7180_v2 = vld [vmem:[%s11541_s0 + $0x2c0] sm:$0xff]  }
 0x276   :  { %558 = vst.msk [vmem:[#allocation0 + $0x12a0] ss:$8 sm:$0xf0] %vm3_vm0, %v7177_v0   ;;  %563 = vst.msk [vmem:[#allocation0 + $0x12e0] ss:$8 sm:$0xf] %vm3_vm0, %v7178_v1  }
 0x277   :  { %556 = vst.msk [vmem:[#allocation0 + $0x12a0] ss:$8 sm:$0xf] %vm3_vm0, %v7177_v0   ;;  %565 = vst.msk [vmem:[#allocation0 + $0x12e0] ss:$8 sm:$0xf0] %vm3_vm0, %v7178_v1  }
 0x278   :  { %575 = vst.msk [vmem:[#allocation0 + $0x1340] ss:$8 sm:$0xf] %vm3_vm0, %v7180_v2   ;;  %577 = vst.msk [vmem:[#allocation0 + $0x1340] ss:$8 sm:$0xf0] %vm3_vm0, %v7180_v2  }
 0x279   :  { %v7179_v3 = vld [vmem:[%s11541_s0 + $0x2b8] sm:$0xf]   ;;  %v7182_v4 = vld [vmem:[%s11541_s0 + $0x2d0] sm:$0xff]   ;;  %v7181_v5 = vld [vmem:[%s11541_s0 + $0x2c8] sm:$0xff]  }
 0x27a   :  { %570 = vst.msk [vmem:[#allocation0 + $0x1320] ss:$8 sm:$0xf] %vm3_vm0, %v7179_v3   ;;  %589 = vst.msk [vmem:[#allocation0 + $0x13c0] ss:$8 sm:$0xf] %vm3_vm0, %v7182_v4  }
 0x27b   :  { %591 = vst.msk [vmem:[#allocation0 + $0x13c0] ss:$8 sm:$0xf0] %vm3_vm0, %v7182_v4   ;;  %582 = vst.msk [vmem:[#allocation0 + $0x1380] ss:$8 sm:$0xf] %vm3_vm0, %v7181_v5  }
 0x27c   :  { %584 = vst.msk [vmem:[#allocation0 + $0x1380] ss:$8 sm:$0xf0] %vm3_vm0, %v7181_v5   ;;  %v7184_v6 = vld [vmem:[%s11541_s0 + $0x2e0] sm:$0xff]   ;;  %v7185_v7 = vld [vmem:[%s11541_s0 + $0x2e8] sm:$0xff]   ;;  %v7186_v9 = vld [vmem:[%s11541_s0 + $0x2f0] sm:$0xff]  }
 0x27d   :  { %v7183_v8 = vld [vmem:[%s11541_s0 + $0x2d8] sm:$0xf]   ;;  %603 = vst.msk [vmem:[#allocation0 + $0x1420] ss:$8 sm:$0xf0] %vm3_vm0, %v7184_v6   ;;  %v7189_v11 = vld [vmem:[%s11541_s0 + $0x308] sm:$0xff]  }
 0x27e   :  { %608 = vst.msk [vmem:[#allocation0 + $0x1460] ss:$8 sm:$0xf] %vm3_vm0, %v7185_v7   ;;  %601 = vst.msk [vmem:[#allocation0 + $0x1420] ss:$8 sm:$0xf] %vm3_vm0, %v7184_v6  }
 0x27f   :  { %610 = vst.msk [vmem:[#allocation0 + $0x1460] ss:$8 sm:$0xf0] %vm3_vm0, %v7185_v7   ;;  %596 = vst.msk [vmem:[#allocation0 + $0x1400] ss:$8 sm:$0xf] %vm3_vm0, %v7183_v8  }
 0x280   :  { %v7187_v10 = vld [vmem:[%s11541_s0 + $0x2f8] sm:$0xf]   ;;  %617 = vst.msk [vmem:[#allocation0 + $0x14a0] ss:$8 sm:$0xf0] %vm3_vm0, %v7186_v9   ;;  %v7188_v12 = vld [vmem:[%s11541_s0 + $0x300] sm:$0xff]  }
 0x281   :  { %622 = vst.msk [vmem:[#allocation0 + $0x14e0] ss:$8 sm:$0xf] %vm3_vm0, %v7187_v10   ;;  %615 = vst.msk [vmem:[#allocation0 + $0x14a0] ss:$8 sm:$0xf] %vm3_vm0, %v7186_v9  }
 0x282   :  { %634 = vst.msk [vmem:[#allocation0 + $0x1540] ss:$8 sm:$0xf] %vm3_vm0, %v7189_v11   ;;  %636 = vst.msk [vmem:[#allocation0 + $0x1540] ss:$8 sm:$0xf0] %vm3_vm0, %v7189_v11  }
 0x283   :  { %v7191_v13 = vld [vmem:[%s11541_s0 + $0x318] sm:$0xf]   ;;  %v7192_v14 = vld [vmem:[%s11541_s0 + $0x320] sm:$0xff]   ;;  %627 = vst.msk [vmem:[#allocation0 + $0x1500] ss:$8 sm:$0xf] %vm3_vm0, %v7188_v12  }
 0x284   :  { %629 = vst.msk [vmem:[#allocation0 + $0x1500] ss:$8 sm:$0xf0] %vm3_vm0, %v7188_v12   ;;  %648 = vst.msk [vmem:[#allocation0 + $0x15c0] ss:$8 sm:$0xf] %vm3_vm0, %v7191_v13  }
 0x285   :  { %653 = vst.msk [vmem:[#allocation0 + $0x15e0] ss:$8 sm:$0xf] %vm3_vm0, %v7192_v14   ;;  %655 = vst.msk [vmem:[#allocation0 + $0x15e0] ss:$8 sm:$0xf0] %vm3_vm0, %v7192_v14  }
 0x286   :  { %v7190_v15 = vld [vmem:[%s11541_s0 + $0x310] sm:$0xff]   ;;  %v7193_v16 = vld [vmem:[%s11541_s0 + $0x328] sm:$0xff]   ;;  %v5016_v18 = vld [vmem:[#allocation0 + $0x11c0] sm:$0x3] }
 0x287   :  { %v7194_v17 = vld [vmem:[%s11541_s0 + $0x330] sm:$0xff]   ;;  %v5022_v19 = vld [vmem:[#allocation0 + $0x11c8] sm:$0x3]  ;;  %641 = vst.msk [vmem:[#allocation0 + $0x1580] ss:$8 sm:$0xf] %vm3_vm0, %v7190_v15  }
 0x288   :  { %v5028_v20 = vld [vmem:[#allocation0 + $0x11d0] sm:$0x3]  ;;  %643 = vst.msk [vmem:[#allocation0 + $0x1580] ss:$8 sm:$0xf0] %vm3_vm0, %v7190_v15  }
 0x289   :  { %662 = vst.msk [vmem:[#allocation0 + $0x1620] ss:$8 sm:$0xf0] %vm3_vm0, %v7193_v16   ;;  %667 = vst.msk [vmem:[#allocation0 + $0x1660] ss:$8 sm:$0xf] %vm3_vm0, %v7194_v17  }
 0x28a   :  { %660 = vst.msk [vmem:[#allocation0 + $0x1620] ss:$8 sm:$0xf] %vm3_vm0, %v7193_v16   ;;  %669 = vst.msk [vmem:[#allocation0 + $0x1660] ss:$8 sm:$0xf0] %vm3_vm0, %v7194_v17  }
 0x28b   :  { %7868 = vst [vmem:[%s11542_s1 + $0x470] sm:$0x3] %v5016_v18  ;;  %7869 = vst [vmem:[%s11542_s1 + $0x472] sm:$0x3] %v5022_v19  ;;  %v5034_v21 = vld [vmem:[#allocation0 + $0x11d8] sm:$0x3] }
 0x28c   :  { %7870 = vst [vmem:[%s11542_s1 + $0x474] sm:$0x3] %v5028_v20  ;;  %v5040_v22 = vld [vmem:[#allocation0 + $0x11e0] sm:$0x3]  ;;  %v5046_v23 = vld [vmem:[#allocation0 + $0x11e8] sm:$0x3] }
 0x28d   :  { %7871 = vst [vmem:[%s11542_s1 + $0x476] sm:$0x3] %v5034_v21  ;;  %7872 = vst [vmem:[%s11542_s1 + $0x478] sm:$0x3] %v5040_v22  ;;  %v5052_v24 = vld [vmem:[#allocation0 + $0x11f0] sm:$0x3] }
 0x28e   :  { %7873 = vst [vmem:[%s11542_s1 + $0x47a] sm:$0x3] %v5046_v23  ;;  %v5058_v25 = vld [vmem:[#allocation0 + $0x11f8] sm:$0x3]  ;;  %v4968_v26 = vld [vmem:[#allocation0 + $0x1180] sm:$0x3] }
 0x28f   :  { %7874 = vst [vmem:[%s11542_s1 + $0x47c] sm:$0x3] %v5052_v24  ;;  %7875 = vst [vmem:[%s11542_s1 + $0x47e] sm:$0x3] %v5058_v25  ;;  %v4974_v27 = vld [vmem:[#allocation0 + $0x1188] sm:$0x3] }
 0x290   :  { %7860 = vst [vmem:[%s11542_s1 + $0x460] sm:$0x3] %v4968_v26  ;;  %v4980_v28 = vld [vmem:[#allocation0 + $0x1190] sm:$0x3]  ;;  %v4986_v29 = vld [vmem:[#allocation0 + $0x1198] sm:$0x3] }
 0x291   :  { %7861 = vst [vmem:[%s11542_s1 + $0x462] sm:$0x3] %v4974_v27  ;;  %7862 = vst [vmem:[%s11542_s1 + $0x464] sm:$0x3] %v4980_v28  ;;  %v4992_v30 = vld [vmem:[#allocation0 + $0x11a0] sm:$0x3] }
 0x292   :  { %7863 = vst [vmem:[%s11542_s1 + $0x466] sm:$0x3] %v4986_v29  ;;  %v4998_v31 = vld [vmem:[#allocation0 + $0x11a8] sm:$0x3]  ;;  %v5004_v32 = vld [vmem:[#allocation0 + $0x11b0] sm:$0x3] }
 0x293   :  { %7864 = vst [vmem:[%s11542_s1 + $0x468] sm:$0x3] %v4992_v30  ;;  %7865 = vst [vmem:[%s11542_s1 + $0x46a] sm:$0x3] %v4998_v31  ;;  %v5010_v33 = vld [vmem:[#allocation0 + $0x11b8] sm:$0x3] }
 0x294   :  { %7866 = vst [vmem:[%s11542_s1 + $0x46c] sm:$0x3] %v5004_v32  ;;  %v5112_v34 = vld [vmem:[#allocation0 + $0x1240] sm:$0x3]  ;;  %v5118_v35 = vld [vmem:[#allocation0 + $0x1248] sm:$0x3] }
 0x295   :  { %7867 = vst [vmem:[%s11542_s1 + $0x46e] sm:$0x3] %v5010_v33  ;;  %7884 = vst [vmem:[%s11542_s1 + $0x490] sm:$0x3] %v5112_v34  ;;  %v5124_v36 = vld [vmem:[#allocation0 + $0x1250] sm:$0x3] }
 0x296   :  { %7885 = vst [vmem:[%s11542_s1 + $0x492] sm:$0x3] %v5118_v35  ;;  %v5130_v37 = vld [vmem:[#allocation0 + $0x1258] sm:$0x3]  ;;  %v5136_v38 = vld [vmem:[#allocation0 + $0x1260] sm:$0x3] }
 0x297   :  { %7886 = vst [vmem:[%s11542_s1 + $0x494] sm:$0x3] %v5124_v36  ;;  %7887 = vst [vmem:[%s11542_s1 + $0x496] sm:$0x3] %v5130_v37  ;;  %v5142_v39 = vld [vmem:[#allocation0 + $0x1268] sm:$0x3] }
 0x298   :  { %7888 = vst [vmem:[%s11542_s1 + $0x498] sm:$0x3] %v5136_v38  ;;  %v5148_v40 = vld [vmem:[#allocation0 + $0x1270] sm:$0x3]  ;;  %v5154_v41 = vld [vmem:[#allocation0 + $0x1278] sm:$0x3] }
 0x299   :  { %7889 = vst [vmem:[%s11542_s1 + $0x49a] sm:$0x3] %v5142_v39  ;;  %7890 = vst [vmem:[%s11542_s1 + $0x49c] sm:$0x3] %v5148_v40  ;;  %v5064_v42 = vld [vmem:[#allocation0 + $0x1200] sm:$0x3] }
 0x29a   :  { %7891 = vst [vmem:[%s11542_s1 + $0x49e] sm:$0x3] %v5154_v41  ;;  %v5070_v43 = vld [vmem:[#allocation0 + $0x1208] sm:$0x3]  ;;  %v5076_v44 = vld [vmem:[#allocation0 + $0x1210] sm:$0x3] }
 0x29b   :  { %7876 = vst [vmem:[%s11542_s1 + $0x480] sm:$0x3] %v5064_v42  ;;  %7877 = vst [vmem:[%s11542_s1 + $0x482] sm:$0x3] %v5070_v43  ;;  %v5082_v45 = vld [vmem:[#allocation0 + $0x1218] sm:$0x3] }
 0x29c   :  { %7878 = vst [vmem:[%s11542_s1 + $0x484] sm:$0x3] %v5076_v44  ;;  %v5088_v46 = vld [vmem:[#allocation0 + $0x1220] sm:$0x3]  ;;  %v5094_v47 = vld [vmem:[#allocation0 + $0x1228] sm:$0x3] }
 0x29d   :  { %7879 = vst [vmem:[%s11542_s1 + $0x486] sm:$0x3] %v5082_v45  ;;  %7880 = vst [vmem:[%s11542_s1 + $0x488] sm:$0x3] %v5088_v46  ;;  %v5100_v48 = vld [vmem:[#allocation0 + $0x1230] sm:$0x3] }
 0x29e   :  { %7881 = vst [vmem:[%s11542_s1 + $0x48a] sm:$0x3] %v5094_v47  ;;  %v5106_v49 = vld [vmem:[#allocation0 + $0x1238] sm:$0x3]  ;;  %v5208_v50 = vld [vmem:[#allocation0 + $0x12c0] sm:$0x3] }
 0x29f   :  { %7882 = vst [vmem:[%s11542_s1 + $0x48c] sm:$0x3] %v5100_v48  ;;  %7883 = vst [vmem:[%s11542_s1 + $0x48e] sm:$0x3] %v5106_v49  ;;  %v5214_v51 = vld [vmem:[#allocation0 + $0x12c8] sm:$0x3] }
 0x2a0   :  { %7900 = vst [vmem:[%s11542_s1 + $0x4b0] sm:$0x3] %v5208_v50  ;;  %v5220_v52 = vld [vmem:[#allocation0 + $0x12d0] sm:$0x3]  ;;  %v5226_v53 = vld [vmem:[#allocation0 + $0x12d8] sm:$0x3] }
 0x2a1   :  { %7901 = vst [vmem:[%s11542_s1 + $0x4b2] sm:$0x3] %v5214_v51  ;;  %7902 = vst [vmem:[%s11542_s1 + $0x4b4] sm:$0x3] %v5220_v52  ;;  %v5232_v54 = vld [vmem:[#allocation0 + $0x12e0] sm:$0x3] }
 0x2a2   :  { %7903 = vst [vmem:[%s11542_s1 + $0x4b6] sm:$0x3] %v5226_v53  ;;  %v5238_v55 = vld [vmem:[#allocation0 + $0x12e8] sm:$0x3]  ;;  %v5244_v56 = vld [vmem:[#allocation0 + $0x12f0] sm:$0x3] }
 0x2a3   :  { %7904 = vst [vmem:[%s11542_s1 + $0x4b8] sm:$0x3] %v5232_v54  ;;  %7905 = vst [vmem:[%s11542_s1 + $0x4ba] sm:$0x3] %v5238_v55  ;;  %v5250_v57 = vld [vmem:[#allocation0 + $0x12f8] sm:$0x3] }
 0x2a4   :  { %7906 = vst [vmem:[%s11542_s1 + $0x4bc] sm:$0x3] %v5244_v56  ;;  %v5160_v58 = vld [vmem:[#allocation0 + $0x1280] sm:$0x3]  ;;  %v5166_v59 = vld [vmem:[#allocation0 + $0x1288] sm:$0x3] }
 0x2a5   :  { %7907 = vst [vmem:[%s11542_s1 + $0x4be] sm:$0x3] %v5250_v57  ;;  %7892 = vst [vmem:[%s11542_s1 + $0x4a0] sm:$0x3] %v5160_v58  ;;  %v5172_v60 = vld [vmem:[#allocation0 + $0x1290] sm:$0x3] }
 0x2a6   :  { %7893 = vst [vmem:[%s11542_s1 + $0x4a2] sm:$0x3] %v5166_v59  ;;  %v5178_v61 = vld [vmem:[#allocation0 + $0x1298] sm:$0x3]  ;;  %v5184_v62 = vld [vmem:[#allocation0 + $0x12a0] sm:$0x3] }
 0x2a7   :  { %7894 = vst [vmem:[%s11542_s1 + $0x4a4] sm:$0x3] %v5172_v60  ;;  %7895 = vst [vmem:[%s11542_s1 + $0x4a6] sm:$0x3] %v5178_v61  ;;  %v5190_v63 = vld [vmem:[#allocation0 + $0x12a8] sm:$0x3] }
 0x2a8   :  { %7896 = vst [vmem:[%s11542_s1 + $0x4a8] sm:$0x3] %v5184_v62  ;;  %v5196_v0 = vld [vmem:[#allocation0 + $0x12b0] sm:$0x3]  ;;  %v5202_v1 = vld [vmem:[#allocation0 + $0x12b8] sm:$0x3] }
 0x2a9   :  { %7897 = vst [vmem:[%s11542_s1 + $0x4aa] sm:$0x3] %v5190_v63  ;;  %7898 = vst [vmem:[%s11542_s1 + $0x4ac] sm:$0x3] %v5196_v0  ;;  %v5304_v2 = vld [vmem:[#allocation0 + $0x1340] sm:$0x3] }
 0x2aa   :  { %7899 = vst [vmem:[%s11542_s1 + $0x4ae] sm:$0x3] %v5202_v1  ;;  %v5310_v3 = vld [vmem:[#allocation0 + $0x1348] sm:$0x3]  ;;  %v5316_v4 = vld [vmem:[#allocation0 + $0x1350] sm:$0x3] }
 0x2ab   :  { %7916 = vst [vmem:[%s11542_s1 + $0x4d0] sm:$0x3] %v5304_v2  ;;  %7917 = vst [vmem:[%s11542_s1 + $0x4d2] sm:$0x3] %v5310_v3  ;;  %v5322_v5 = vld [vmem:[#allocation0 + $0x1358] sm:$0x3] }
 0x2ac   :  { %7918 = vst [vmem:[%s11542_s1 + $0x4d4] sm:$0x3] %v5316_v4  ;;  %v5328_v6 = vld [vmem:[#allocation0 + $0x1360] sm:$0x3]  ;;  %v5334_v7 = vld [vmem:[#allocation0 + $0x1368] sm:$0x3] }
 0x2ad   :  { %7919 = vst [vmem:[%s11542_s1 + $0x4d6] sm:$0x3] %v5322_v5  ;;  %7920 = vst [vmem:[%s11542_s1 + $0x4d8] sm:$0x3] %v5328_v6  ;;  %v5340_v8 = vld [vmem:[#allocation0 + $0x1370] sm:$0x3] }
 0x2ae   :  { %7921 = vst [vmem:[%s11542_s1 + $0x4da] sm:$0x3] %v5334_v7  ;;  %v5346_v9 = vld [vmem:[#allocation0 + $0x1378] sm:$0x3]  ;;  %v5256_v10 = vld [vmem:[#allocation0 + $0x1300] sm:$0x3] }
 0x2af   :  { %7922 = vst [vmem:[%s11542_s1 + $0x4dc] sm:$0x3] %v5340_v8  ;;  %7923 = vst [vmem:[%s11542_s1 + $0x4de] sm:$0x3] %v5346_v9  ;;  %v5262_v11 = vld [vmem:[#allocation0 + $0x1308] sm:$0x3] }
 0x2b0   :  { %7908 = vst [vmem:[%s11542_s1 + $0x4c0] sm:$0x3] %v5256_v10  ;;  %v5268_v12 = vld [vmem:[#allocation0 + $0x1310] sm:$0x3]  ;;  %v5274_v13 = vld [vmem:[#allocation0 + $0x1318] sm:$0x3] }
 0x2b1   :  { %7909 = vst [vmem:[%s11542_s1 + $0x4c2] sm:$0x3] %v5262_v11  ;;  %7910 = vst [vmem:[%s11542_s1 + $0x4c4] sm:$0x3] %v5268_v12  ;;  %v5280_v14 = vld [vmem:[#allocation0 + $0x1320] sm:$0x3] }
 0x2b2   :  { %7911 = vst [vmem:[%s11542_s1 + $0x4c6] sm:$0x3] %v5274_v13  ;;  %v5286_v15 = vld [vmem:[#allocation0 + $0x1328] sm:$0x3]  ;;  %v5292_v16 = vld [vmem:[#allocation0 + $0x1330] sm:$0x3] }
 0x2b3   :  { %7912 = vst [vmem:[%s11542_s1 + $0x4c8] sm:$0x3] %v5280_v14  ;;  %7913 = vst [vmem:[%s11542_s1 + $0x4ca] sm:$0x3] %v5286_v15  ;;  %v5298_v17 = vld [vmem:[#allocation0 + $0x1338] sm:$0x3] }
 0x2b4   :  { %7914 = vst [vmem:[%s11542_s1 + $0x4cc] sm:$0x3] %v5292_v16  ;;  %v5400_v18 = vld [vmem:[#allocation0 + $0x13c0] sm:$0x3]  ;;  %v5406_v19 = vld [vmem:[#allocation0 + $0x13c8] sm:$0x3] }
 0x2b5   :  { %7915 = vst [vmem:[%s11542_s1 + $0x4ce] sm:$0x3] %v5298_v17  ;;  %7932 = vst [vmem:[%s11542_s1 + $0x4f0] sm:$0x3] %v5400_v18  ;;  %v5412_v20 = vld [vmem:[#allocation0 + $0x13d0] sm:$0x3] }
 0x2b6   :  { %7933 = vst [vmem:[%s11542_s1 + $0x4f2] sm:$0x3] %v5406_v19  ;;  %v5418_v21 = vld [vmem:[#allocation0 + $0x13d8] sm:$0x3]  ;;  %v5424_v22 = vld [vmem:[#allocation0 + $0x13e0] sm:$0x3] }
 0x2b7   :  { %7934 = vst [vmem:[%s11542_s1 + $0x4f4] sm:$0x3] %v5412_v20  ;;  %7935 = vst [vmem:[%s11542_s1 + $0x4f6] sm:$0x3] %v5418_v21  ;;  %v5430_v23 = vld [vmem:[#allocation0 + $0x13e8] sm:$0x3] }
 0x2b8   :  { %7936 = vst [vmem:[%s11542_s1 + $0x4f8] sm:$0x3] %v5424_v22  ;;  %v5436_v24 = vld [vmem:[#allocation0 + $0x13f0] sm:$0x3]  ;;  %v5442_v25 = vld [vmem:[#allocation0 + $0x13f8] sm:$0x3] }
 0x2b9   :  { %7937 = vst [vmem:[%s11542_s1 + $0x4fa] sm:$0x3] %v5430_v23  ;;  %7938 = vst [vmem:[%s11542_s1 + $0x4fc] sm:$0x3] %v5436_v24  ;;  %v5352_v26 = vld [vmem:[#allocation0 + $0x1380] sm:$0x3] }
 0x2ba   :  { %7939 = vst [vmem:[%s11542_s1 + $0x4fe] sm:$0x3] %v5442_v25  ;;  %v5358_v27 = vld [vmem:[#allocation0 + $0x1388] sm:$0x3]  ;;  %v5364_v28 = vld [vmem:[#allocation0 + $0x1390] sm:$0x3] }
 0x2bb   :  { %7924 = vst [vmem:[%s11542_s1 + $0x4e0] sm:$0x3] %v5352_v26  ;;  %7925 = vst [vmem:[%s11542_s1 + $0x4e2] sm:$0x3] %v5358_v27  ;;  %v5370_v29 = vld [vmem:[#allocation0 + $0x1398] sm:$0x3] }
 0x2bc   :  { %7926 = vst [vmem:[%s11542_s1 + $0x4e4] sm:$0x3] %v5364_v28  ;;  %v5376_v30 = vld [vmem:[#allocation0 + $0x13a0] sm:$0x3]  ;;  %v5382_v31 = vld [vmem:[#allocation0 + $0x13a8] sm:$0x3] }
 0x2bd   :  { %7927 = vst [vmem:[%s11542_s1 + $0x4e6] sm:$0x3] %v5370_v29  ;;  %7928 = vst [vmem:[%s11542_s1 + $0x4e8] sm:$0x3] %v5376_v30  ;;  %v5388_v32 = vld [vmem:[#allocation0 + $0x13b0] sm:$0x3] }
 0x2be   :  { %7929 = vst [vmem:[%s11542_s1 + $0x4ea] sm:$0x3] %v5382_v31  ;;  %v5394_v33 = vld [vmem:[#allocation0 + $0x13b8] sm:$0x3]  ;;  %v5496_v34 = vld [vmem:[#allocation0 + $0x1440] sm:$0x3] }
 0x2bf   :  { %7930 = vst [vmem:[%s11542_s1 + $0x4ec] sm:$0x3] %v5388_v32  ;;  %7931 = vst [vmem:[%s11542_s1 + $0x4ee] sm:$0x3] %v5394_v33  ;;  %v5502_v35 = vld [vmem:[#allocation0 + $0x1448] sm:$0x3] }
 0x2c0   :  { %7948 = vst [vmem:[%s11542_s1 + $0x510] sm:$0x3] %v5496_v34  ;;  %v5508_v36 = vld [vmem:[#allocation0 + $0x1450] sm:$0x3]  ;;  %v5514_v37 = vld [vmem:[#allocation0 + $0x1458] sm:$0x3] }
 0x2c1   :  { %7949 = vst [vmem:[%s11542_s1 + $0x512] sm:$0x3] %v5502_v35  ;;  %7950 = vst [vmem:[%s11542_s1 + $0x514] sm:$0x3] %v5508_v36  ;;  %v5520_v38 = vld [vmem:[#allocation0 + $0x1460] sm:$0x3] }
 0x2c2   :  { %7951 = vst [vmem:[%s11542_s1 + $0x516] sm:$0x3] %v5514_v37  ;;  %v5526_v39 = vld [vmem:[#allocation0 + $0x1468] sm:$0x3]  ;;  %v5532_v40 = vld [vmem:[#allocation0 + $0x1470] sm:$0x3] }
 0x2c3   :  { %7952 = vst [vmem:[%s11542_s1 + $0x518] sm:$0x3] %v5520_v38  ;;  %7953 = vst [vmem:[%s11542_s1 + $0x51a] sm:$0x3] %v5526_v39  ;;  %v5538_v41 = vld [vmem:[#allocation0 + $0x1478] sm:$0x3] }
 0x2c4   :  { %7954 = vst [vmem:[%s11542_s1 + $0x51c] sm:$0x3] %v5532_v40  ;;  %v5448_v42 = vld [vmem:[#allocation0 + $0x1400] sm:$0x3]  ;;  %v5454_v43 = vld [vmem:[#allocation0 + $0x1408] sm:$0x3] }
 0x2c5   :  { %7955 = vst [vmem:[%s11542_s1 + $0x51e] sm:$0x3] %v5538_v41  ;;  %7940 = vst [vmem:[%s11542_s1 + $0x500] sm:$0x3] %v5448_v42  ;;  %v5460_v44 = vld [vmem:[#allocation0 + $0x1410] sm:$0x3] }
 0x2c6   :  { %7941 = vst [vmem:[%s11542_s1 + $0x502] sm:$0x3] %v5454_v43  ;;  %v5466_v45 = vld [vmem:[#allocation0 + $0x1418] sm:$0x3]  ;;  %v5472_v46 = vld [vmem:[#allocation0 + $0x1420] sm:$0x3] }
 0x2c7   :  { %7942 = vst [vmem:[%s11542_s1 + $0x504] sm:$0x3] %v5460_v44  ;;  %7943 = vst [vmem:[%s11542_s1 + $0x506] sm:$0x3] %v5466_v45  ;;  %v5478_v47 = vld [vmem:[#allocation0 + $0x1428] sm:$0x3] }
 0x2c8   :  { %7944 = vst [vmem:[%s11542_s1 + $0x508] sm:$0x3] %v5472_v46  ;;  %v5484_v48 = vld [vmem:[#allocation0 + $0x1430] sm:$0x3]  ;;  %v5490_v49 = vld [vmem:[#allocation0 + $0x1438] sm:$0x3] }
 0x2c9   :  { %7945 = vst [vmem:[%s11542_s1 + $0x50a] sm:$0x3] %v5478_v47  ;;  %7946 = vst [vmem:[%s11542_s1 + $0x50c] sm:$0x3] %v5484_v48  ;;  %v5592_v50 = vld [vmem:[#allocation0 + $0x14c0] sm:$0x3] }
 0x2ca   :  { %7947 = vst [vmem:[%s11542_s1 + $0x50e] sm:$0x3] %v5490_v49  ;;  %v5598_v51 = vld [vmem:[#allocation0 + $0x14c8] sm:$0x3]  ;;  %v5604_v52 = vld [vmem:[#allocation0 + $0x14d0] sm:$0x3] }
 0x2cb   :  { %7964 = vst [vmem:[%s11542_s1 + $0x530] sm:$0x3] %v5592_v50  ;;  %7965 = vst [vmem:[%s11542_s1 + $0x532] sm:$0x3] %v5598_v51  ;;  %v5610_v53 = vld [vmem:[#allocation0 + $0x14d8] sm:$0x3] }
 0x2cc   :  { %7966 = vst [vmem:[%s11542_s1 + $0x534] sm:$0x3] %v5604_v52  ;;  %v5616_v54 = vld [vmem:[#allocation0 + $0x14e0] sm:$0x3]  ;;  %v5622_v55 = vld [vmem:[#allocation0 + $0x14e8] sm:$0x3] }
 0x2cd   :  { %7967 = vst [vmem:[%s11542_s1 + $0x536] sm:$0x3] %v5610_v53  ;;  %7968 = vst [vmem:[%s11542_s1 + $0x538] sm:$0x3] %v5616_v54  ;;  %v5628_v56 = vld [vmem:[#allocation0 + $0x14f0] sm:$0x3] }
 0x2ce   :  { %7969 = vst [vmem:[%s11542_s1 + $0x53a] sm:$0x3] %v5622_v55  ;;  %v5634_v57 = vld [vmem:[#allocation0 + $0x14f8] sm:$0x3]  ;;  %v5544_v58 = vld [vmem:[#allocation0 + $0x1480] sm:$0x3] }
 0x2cf   :  { %7970 = vst [vmem:[%s11542_s1 + $0x53c] sm:$0x3] %v5628_v56  ;;  %7971 = vst [vmem:[%s11542_s1 + $0x53e] sm:$0x3] %v5634_v57  ;;  %v5550_v59 = vld [vmem:[#allocation0 + $0x1488] sm:$0x3] }
 0x2d0   :  { %7956 = vst [vmem:[%s11542_s1 + $0x520] sm:$0x3] %v5544_v58  ;;  %v5556_v60 = vld [vmem:[#allocation0 + $0x1490] sm:$0x3]  ;;  %v5562_v61 = vld [vmem:[#allocation0 + $0x1498] sm:$0x3] }
 0x2d1   :  { %7957 = vst [vmem:[%s11542_s1 + $0x522] sm:$0x3] %v5550_v59  ;;  %7958 = vst [vmem:[%s11542_s1 + $0x524] sm:$0x3] %v5556_v60  ;;  %v5568_v62 = vld [vmem:[#allocation0 + $0x14a0] sm:$0x3] }
 0x2d2   :  { %7959 = vst [vmem:[%s11542_s1 + $0x526] sm:$0x3] %v5562_v61  ;;  %v5574_v63 = vld [vmem:[#allocation0 + $0x14a8] sm:$0x3]  ;;  %v5580_v0 = vld [vmem:[#allocation0 + $0x14b0] sm:$0x3] }
 0x2d3   :  { %7960 = vst [vmem:[%s11542_s1 + $0x528] sm:$0x3] %v5568_v62  ;;  %7961 = vst [vmem:[%s11542_s1 + $0x52a] sm:$0x3] %v5574_v63  ;;  %v5586_v1 = vld [vmem:[#allocation0 + $0x14b8] sm:$0x3] }
 0x2d4   :  { %7962 = vst [vmem:[%s11542_s1 + $0x52c] sm:$0x3] %v5580_v0  ;;  %v5688_v2 = vld [vmem:[#allocation0 + $0x1540] sm:$0x3]  ;;  %v5694_v3 = vld [vmem:[#allocation0 + $0x1548] sm:$0x3] }
 0x2d5   :  { %7963 = vst [vmem:[%s11542_s1 + $0x52e] sm:$0x3] %v5586_v1  ;;  %7980 = vst [vmem:[%s11542_s1 + $0x550] sm:$0x3] %v5688_v2  ;;  %v5700_v4 = vld [vmem:[#allocation0 + $0x1550] sm:$0x3] }
 0x2d6   :  { %7981 = vst [vmem:[%s11542_s1 + $0x552] sm:$0x3] %v5694_v3  ;;  %v5706_v5 = vld [vmem:[#allocation0 + $0x1558] sm:$0x3]  ;;  %v5712_v6 = vld [vmem:[#allocation0 + $0x1560] sm:$0x3] }
 0x2d7   :  { %7982 = vst [vmem:[%s11542_s1 + $0x554] sm:$0x3] %v5700_v4  ;;  %7983 = vst [vmem:[%s11542_s1 + $0x556] sm:$0x3] %v5706_v5  ;;  %v5718_v7 = vld [vmem:[#allocation0 + $0x1568] sm:$0x3] }
 0x2d8   :  { %7984 = vst [vmem:[%s11542_s1 + $0x558] sm:$0x3] %v5712_v6  ;;  %v5724_v8 = vld [vmem:[#allocation0 + $0x1570] sm:$0x3]  ;;  %v5730_v9 = vld [vmem:[#allocation0 + $0x1578] sm:$0x3] }
 0x2d9   :  { %7985 = vst [vmem:[%s11542_s1 + $0x55a] sm:$0x3] %v5718_v7  ;;  %7986 = vst [vmem:[%s11542_s1 + $0x55c] sm:$0x3] %v5724_v8  ;;  %v5640_v10 = vld [vmem:[#allocation0 + $0x1500] sm:$0x3] }
 0x2da   :  { %7987 = vst [vmem:[%s11542_s1 + $0x55e] sm:$0x3] %v5730_v9  ;;  %v5646_v11 = vld [vmem:[#allocation0 + $0x1508] sm:$0x3]  ;;  %v5652_v12 = vld [vmem:[#allocation0 + $0x1510] sm:$0x3] }
 0x2db   :  { %7972 = vst [vmem:[%s11542_s1 + $0x540] sm:$0x3] %v5640_v10  ;;  %7973 = vst [vmem:[%s11542_s1 + $0x542] sm:$0x3] %v5646_v11  ;;  %v5658_v13 = vld [vmem:[#allocation0 + $0x1518] sm:$0x3] }
 0x2dc   :  { %7974 = vst [vmem:[%s11542_s1 + $0x544] sm:$0x3] %v5652_v12  ;;  %v5664_v14 = vld [vmem:[#allocation0 + $0x1520] sm:$0x3]  ;;  %v5670_v15 = vld [vmem:[#allocation0 + $0x1528] sm:$0x3] }
 0x2dd   :  { %7975 = vst [vmem:[%s11542_s1 + $0x546] sm:$0x3] %v5658_v13  ;;  %7976 = vst [vmem:[%s11542_s1 + $0x548] sm:$0x3] %v5664_v14  ;;  %v5676_v16 = vld [vmem:[#allocation0 + $0x1530] sm:$0x3] }
 0x2de   :  { %7977 = vst [vmem:[%s11542_s1 + $0x54a] sm:$0x3] %v5670_v15  ;;  %v5682_v17 = vld [vmem:[#allocation0 + $0x1538] sm:$0x3]  ;;  %v5784_v18 = vld [vmem:[#allocation0 + $0x15c0] sm:$0x3] }
 0x2df   :  { %7978 = vst [vmem:[%s11542_s1 + $0x54c] sm:$0x3] %v5676_v16  ;;  %7979 = vst [vmem:[%s11542_s1 + $0x54e] sm:$0x3] %v5682_v17  ;;  %v5790_v19 = vld [vmem:[#allocation0 + $0x15c8] sm:$0x3] }
 0x2e0   :  { %7996 = vst [vmem:[%s11542_s1 + $0x570] sm:$0x3] %v5784_v18  ;;  %v5796_v20 = vld [vmem:[#allocation0 + $0x15d0] sm:$0x3]  ;;  %v5802_v21 = vld [vmem:[#allocation0 + $0x15d8] sm:$0x3] }
 0x2e1   :  { %7997 = vst [vmem:[%s11542_s1 + $0x572] sm:$0x3] %v5790_v19  ;;  %7998 = vst [vmem:[%s11542_s1 + $0x574] sm:$0x3] %v5796_v20  ;;  %v5808_v22 = vld [vmem:[#allocation0 + $0x15e0] sm:$0x3] }
 0x2e2   :  { %7999 = vst [vmem:[%s11542_s1 + $0x576] sm:$0x3] %v5802_v21  ;;  %v5814_v23 = vld [vmem:[#allocation0 + $0x15e8] sm:$0x3]  ;;  %v5820_v24 = vld [vmem:[#allocation0 + $0x15f0] sm:$0x3] }
 0x2e3   :  { %8000 = vst [vmem:[%s11542_s1 + $0x578] sm:$0x3] %v5808_v22  ;;  %8001 = vst [vmem:[%s11542_s1 + $0x57a] sm:$0x3] %v5814_v23  ;;  %v5826_v25 = vld [vmem:[#allocation0 + $0x15f8] sm:$0x3] }
 0x2e4   :  { %8002 = vst [vmem:[%s11542_s1 + $0x57c] sm:$0x3] %v5820_v24  ;;  %v5736_v26 = vld [vmem:[#allocation0 + $0x1580] sm:$0x3]  ;;  %v5742_v27 = vld [vmem:[#allocation0 + $0x1588] sm:$0x3] }
 0x2e5   :  { %8003 = vst [vmem:[%s11542_s1 + $0x57e] sm:$0x3] %v5826_v25  ;;  %7988 = vst [vmem:[%s11542_s1 + $0x560] sm:$0x3] %v5736_v26  ;;  %v5748_v28 = vld [vmem:[#allocation0 + $0x1590] sm:$0x3] }
 0x2e6   :  { %7989 = vst [vmem:[%s11542_s1 + $0x562] sm:$0x3] %v5742_v27  ;;  %v5754_v29 = vld [vmem:[#allocation0 + $0x1598] sm:$0x3]  ;;  %v5760_v30 = vld [vmem:[#allocation0 + $0x15a0] sm:$0x3] }
 0x2e7   :  { %7990 = vst [vmem:[%s11542_s1 + $0x564] sm:$0x3] %v5748_v28  ;;  %7991 = vst [vmem:[%s11542_s1 + $0x566] sm:$0x3] %v5754_v29  ;;  %v5766_v31 = vld [vmem:[#allocation0 + $0x15a8] sm:$0x3] }
 0x2e8   :  { %7992 = vst [vmem:[%s11542_s1 + $0x568] sm:$0x3] %v5760_v30  ;;  %v5772_v32 = vld [vmem:[#allocation0 + $0x15b0] sm:$0x3]  ;;  %v5778_v33 = vld [vmem:[#allocation0 + $0x15b8] sm:$0x3] }
 0x2e9   :  { %7993 = vst [vmem:[%s11542_s1 + $0x56a] sm:$0x3] %v5766_v31  ;;  %7994 = vst [vmem:[%s11542_s1 + $0x56c] sm:$0x3] %v5772_v32  ;;  %v5880_v34 = vld [vmem:[#allocation0 + $0x1640] sm:$0x3] }
 0x2ea   :  { %7995 = vst [vmem:[%s11542_s1 + $0x56e] sm:$0x3] %v5778_v33  ;;  %v5886_v35 = vld [vmem:[#allocation0 + $0x1648] sm:$0x3]  ;;  %v5892_v36 = vld [vmem:[#allocation0 + $0x1650] sm:$0x3] }
 0x2eb   :  { %8012 = vst [vmem:[%s11542_s1 + $0x590] sm:$0x3] %v5880_v34  ;;  %8013 = vst [vmem:[%s11542_s1 + $0x592] sm:$0x3] %v5886_v35  ;;  %v5898_v37 = vld [vmem:[#allocation0 + $0x1658] sm:$0x3] }
 0x2ec   :  { %8014 = vst [vmem:[%s11542_s1 + $0x594] sm:$0x3] %v5892_v36  ;;  %v5904_v38 = vld [vmem:[#allocation0 + $0x1660] sm:$0x3]  ;;  %v5910_v39 = vld [vmem:[#allocation0 + $0x1668] sm:$0x3] }
 0x2ed   :  { %8015 = vst [vmem:[%s11542_s1 + $0x596] sm:$0x3] %v5898_v37  ;;  %8016 = vst [vmem:[%s11542_s1 + $0x598] sm:$0x3] %v5904_v38  ;;  %v5916_v40 = vld [vmem:[#allocation0 + $0x1670] sm:$0x3] }
 0x2ee   :  { %8017 = vst [vmem:[%s11542_s1 + $0x59a] sm:$0x3] %v5910_v39  ;;  %v5922_v41 = vld [vmem:[#allocation0 + $0x1678] sm:$0x3]  ;;  %v5832_v42 = vld [vmem:[#allocation0 + $0x1600] sm:$0x3] }
 0x2ef   :  { %8018 = vst [vmem:[%s11542_s1 + $0x59c] sm:$0x3] %v5916_v40  ;;  %8019 = vst [vmem:[%s11542_s1 + $0x59e] sm:$0x3] %v5922_v41  ;;  %v5838_v43 = vld [vmem:[#allocation0 + $0x1608] sm:$0x3] }
 0x2f0   :  { %8004 = vst [vmem:[%s11542_s1 + $0x580] sm:$0x3] %v5832_v42  ;;  %v5844_v44 = vld [vmem:[#allocation0 + $0x1610] sm:$0x3]  ;;  %v5850_v45 = vld [vmem:[#allocation0 + $0x1618] sm:$0x3] }
 0x2f1   :  { %8005 = vst [vmem:[%s11542_s1 + $0x582] sm:$0x3] %v5838_v43  ;;  %8006 = vst [vmem:[%s11542_s1 + $0x584] sm:$0x3] %v5844_v44  ;;  %v5856_v46 = vld [vmem:[#allocation0 + $0x1620] sm:$0x3] }
 0x2f2   :  { %8007 = vst [vmem:[%s11542_s1 + $0x586] sm:$0x3] %v5850_v45  ;;  %v5862_v47 = vld [vmem:[#allocation0 + $0x1628] sm:$0x3]  ;;  %v5868_v48 = vld [vmem:[#allocation0 + $0x1630] sm:$0x3] }
 0x2f3   :  { %8008 = vst [vmem:[%s11542_s1 + $0x588] sm:$0x3] %v5856_v46  ;;  %8009 = vst [vmem:[%s11542_s1 + $0x58a] sm:$0x3] %v5862_v47  ;;  %v5874_v49 = vld [vmem:[#allocation0 + $0x1638] sm:$0x3] }
 0x2f4   :  { %8010 = vst [vmem:[%s11542_s1 + $0x58c] sm:$0x3] %v5868_v48  ;;  %v7196_v50 = vld [vmem:[%s11541_s0 + $0x340] sm:$0xff]   ;;  %v7195_v51 = vld [vmem:[%s11541_s0 + $0x338] sm:$0xf]   ;;  %v7198_v56 = vld [vmem:[%s11541_s0 + $0x350] sm:$0xff]  }
 0x2f5   :  { %8011 = vst [vmem:[%s11542_s1 + $0x58e] sm:$0x3] %v5874_v49  ;;  %679 = vst.msk [vmem:[#allocation0 + $0x16c0] ss:$8 sm:$0xf] %vm3_vm0, %v7196_v50   ;;  %v7197_v57 = vld [vmem:[%s11541_s0 + $0x348] sm:$0xff]  }
 0x2f6   :  { %681 = vst.msk [vmem:[#allocation0 + $0x16c0] ss:$8 sm:$0xf0] %vm3_vm0, %v7196_v50   ;;  %674 = vst.msk [vmem:[#allocation0 + $0x16a0] ss:$8 sm:$0xf] %vm3_vm0, %v7195_v51  }
 0x2f7   :  { %v5928_v52 = vld [vmem:[#allocation0 + $0x1680] sm:$0x3]  ;;  %v5934_v53 = vld [vmem:[#allocation0 + $0x1688] sm:$0x3]  ;;  %v5940_v54 = vld [vmem:[#allocation0 + $0x1690] sm:$0x3] }
 0x2f8   :  { %8020 = vst [vmem:[%s11542_s1 + $0x5a0] sm:$0x3] %v5928_v52  ;;  %8021 = vst [vmem:[%s11542_s1 + $0x5a2] sm:$0x3] %v5934_v53  ;;  %v5946_v55 = vld [vmem:[#allocation0 + $0x1698] sm:$0x3] }
 0x2f9   :  { %8022 = vst [vmem:[%s11542_s1 + $0x5a4] sm:$0x3] %v5940_v54  ;;  %8023 = vst [vmem:[%s11542_s1 + $0x5a6] sm:$0x3] %v5946_v55  ;;  %v7200_v58 = vld [vmem:[%s11541_s0 + $0x360] sm:$0xff]   ;;  %v7201_v59 = vld [vmem:[%s11541_s0 + $0x368] sm:$0xff]  }
 0x2fa   :  { %693 = vst.msk [vmem:[#allocation0 + $0x1740] ss:$8 sm:$0xf] %vm3_vm0, %v7198_v56   ;;  %695 = vst.msk [vmem:[#allocation0 + $0x1740] ss:$8 sm:$0xf0] %vm3_vm0, %v7198_v56  }
 0x2fb   :  { %686 = vst.msk [vmem:[#allocation0 + $0x1700] ss:$8 sm:$0xf] %vm3_vm0, %v7197_v57   ;;  %688 = vst.msk [vmem:[#allocation0 + $0x1700] ss:$8 sm:$0xf0] %vm3_vm0, %v7197_v57  }
 0x2fc   :  { %v7199_v60 = vld [vmem:[%s11541_s0 + $0x358] sm:$0xf]   ;;  %707 = vst.msk [vmem:[#allocation0 + $0x17a0] ss:$8 sm:$0xf0] %vm3_vm0, %v7200_v58   ;;  %v7202_v61 = vld [vmem:[%s11541_s0 + $0x370] sm:$0xff]  }
 0x2fd   :  { %712 = vst.msk [vmem:[#allocation0 + $0x17e0] ss:$8 sm:$0xf] %vm3_vm0, %v7201_v59   ;;  %705 = vst.msk [vmem:[#allocation0 + $0x17a0] ss:$8 sm:$0xf] %vm3_vm0, %v7200_v58  }
 0x2fe   :  { %714 = vst.msk [vmem:[#allocation0 + $0x17e0] ss:$8 sm:$0xf0] %vm3_vm0, %v7201_v59   ;;  %700 = vst.msk [vmem:[#allocation0 + $0x1780] ss:$8 sm:$0xf] %vm3_vm0, %v7199_v60  }
 0x2ff   :  { %v7203_v62 = vld [vmem:[%s11541_s0 + $0x378] sm:$0xf]   ;;  %721 = vst.msk [vmem:[#allocation0 + $0x1820] ss:$8 sm:$0xf0] %vm3_vm0, %v7202_v61  }
 0x300   :  { %726 = vst.msk [vmem:[#allocation0 + $0x1860] ss:$8 sm:$0xf] %vm3_vm0, %v7203_v62   ;;  %719 = vst.msk [vmem:[#allocation0 + $0x1820] ss:$8 sm:$0xf] %vm3_vm0, %v7202_v61  }
 0x301   :  { %v5976_v63 = vld [vmem:[#allocation0 + $0x16c0] sm:$0x3]  ;;  %v5982_v0 = vld [vmem:[#allocation0 + $0x16c8] sm:$0x3]  ;;  %v5988_v1 = vld [vmem:[#allocation0 + $0x16d0] sm:$0x3] }
 0x302   :  { %8028 = vst [vmem:[%s11542_s1 + $0x5b0] sm:$0x3] %v5976_v63  ;;  %8029 = vst [vmem:[%s11542_s1 + $0x5b2] sm:$0x3] %v5982_v0  ;;  %v5994_v2 = vld [vmem:[#allocation0 + $0x16d8] sm:$0x3] }
 0x303   :  { %8030 = vst [vmem:[%s11542_s1 + $0x5b4] sm:$0x3] %v5988_v1  ;;  %v6000_v3 = vld [vmem:[#allocation0 + $0x16e0] sm:$0x3]  ;;  %v6006_v4 = vld [vmem:[#allocation0 + $0x16e8] sm:$0x3] }
 0x304   :  { %8031 = vst [vmem:[%s11542_s1 + $0x5b6] sm:$0x3] %v5994_v2  ;;  %8032 = vst [vmem:[%s11542_s1 + $0x5b8] sm:$0x3] %v6000_v3  ;;  %v6012_v5 = vld [vmem:[#allocation0 + $0x16f0] sm:$0x3] }
 0x305   :  { %8033 = vst [vmem:[%s11542_s1 + $0x5ba] sm:$0x3] %v6006_v4  ;;  %v6018_v6 = vld [vmem:[#allocation0 + $0x16f8] sm:$0x3]  ;;  %v5952_v7 = vld [vmem:[#allocation0 + $0x16a0] sm:$0x3] }
 0x306   :  { %8034 = vst [vmem:[%s11542_s1 + $0x5bc] sm:$0x3] %v6012_v5  ;;  %8035 = vst [vmem:[%s11542_s1 + $0x5be] sm:$0x3] %v6018_v6  ;;  %v5958_v8 = vld [vmem:[#allocation0 + $0x16a8] sm:$0x3] }
 0x307   :  { %8024 = vst [vmem:[%s11542_s1 + $0x5a8] sm:$0x3] %v5952_v7  ;;  %v5964_v9 = vld [vmem:[#allocation0 + $0x16b0] sm:$0x3]  ;;  %v5970_v10 = vld [vmem:[#allocation0 + $0x16b8] sm:$0x3] }
 0x308   :  { %8025 = vst [vmem:[%s11542_s1 + $0x5aa] sm:$0x3] %v5958_v8  ;;  %8026 = vst [vmem:[%s11542_s1 + $0x5ac] sm:$0x3] %v5964_v9  ;;  %v6072_v11 = vld [vmem:[#allocation0 + $0x1740] sm:$0x3] }
 0x309   :  { %8027 = vst [vmem:[%s11542_s1 + $0x5ae] sm:$0x3] %v5970_v10  ;;  %v6078_v12 = vld [vmem:[#allocation0 + $0x1748] sm:$0x3]  ;;  %v6084_v13 = vld [vmem:[#allocation0 + $0x1750] sm:$0x3] }
 0x30a   :  { %8044 = vst [vmem:[%s11542_s1 + $0x5d0] sm:$0x3] %v6072_v11  ;;  %8045 = vst [vmem:[%s11542_s1 + $0x5d2] sm:$0x3] %v6078_v12  ;;  %v6090_v14 = vld [vmem:[#allocation0 + $0x1758] sm:$0x3] }
 0x30b   :  { %8046 = vst [vmem:[%s11542_s1 + $0x5d4] sm:$0x3] %v6084_v13  ;;  %v6096_v15 = vld [vmem:[#allocation0 + $0x1760] sm:$0x3]  ;;  %v6102_v16 = vld [vmem:[#allocation0 + $0x1768] sm:$0x3] }
 0x30c   :  { %8047 = vst [vmem:[%s11542_s1 + $0x5d6] sm:$0x3] %v6090_v14  ;;  %8048 = vst [vmem:[%s11542_s1 + $0x5d8] sm:$0x3] %v6096_v15  ;;  %v6108_v17 = vld [vmem:[#allocation0 + $0x1770] sm:$0x3] }
 0x30d   :  { %8049 = vst [vmem:[%s11542_s1 + $0x5da] sm:$0x3] %v6102_v16  ;;  %v6114_v18 = vld [vmem:[#allocation0 + $0x1778] sm:$0x3]  ;;  %v6024_v19 = vld [vmem:[#allocation0 + $0x1700] sm:$0x3] }
 0x30e   :  { %8050 = vst [vmem:[%s11542_s1 + $0x5dc] sm:$0x3] %v6108_v17  ;;  %8051 = vst [vmem:[%s11542_s1 + $0x5de] sm:$0x3] %v6114_v18  ;;  %v6030_v20 = vld [vmem:[#allocation0 + $0x1708] sm:$0x3] }
 0x30f   :  { %8036 = vst [vmem:[%s11542_s1 + $0x5c0] sm:$0x3] %v6024_v19  ;;  %v6036_v21 = vld [vmem:[#allocation0 + $0x1710] sm:$0x3]  ;;  %v6042_v22 = vld [vmem:[#allocation0 + $0x1718] sm:$0x3] }
 0x310   :  { %8037 = vst [vmem:[%s11542_s1 + $0x5c2] sm:$0x3] %v6030_v20  ;;  %8038 = vst [vmem:[%s11542_s1 + $0x5c4] sm:$0x3] %v6036_v21  ;;  %v6048_v23 = vld [vmem:[#allocation0 + $0x1720] sm:$0x3] }
 0x311   :  { %8039 = vst [vmem:[%s11542_s1 + $0x5c6] sm:$0x3] %v6042_v22  ;;  %v6054_v24 = vld [vmem:[#allocation0 + $0x1728] sm:$0x3]  ;;  %v6060_v25 = vld [vmem:[#allocation0 + $0x1730] sm:$0x3] }
 0x312   :  { %8040 = vst [vmem:[%s11542_s1 + $0x5c8] sm:$0x3] %v6048_v23  ;;  %8041 = vst [vmem:[%s11542_s1 + $0x5ca] sm:$0x3] %v6054_v24  ;;  %v6066_v26 = vld [vmem:[#allocation0 + $0x1738] sm:$0x3] }
 0x313   :  { %8042 = vst [vmem:[%s11542_s1 + $0x5cc] sm:$0x3] %v6060_v25  ;;  %v6168_v27 = vld [vmem:[#allocation0 + $0x17c0] sm:$0x3]  ;;  %v6174_v28 = vld [vmem:[#allocation0 + $0x17c8] sm:$0x3] }
 0x314   :  { %8043 = vst [vmem:[%s11542_s1 + $0x5ce] sm:$0x3] %v6066_v26  ;;  %8060 = vst [vmem:[%s11542_s1 + $0x5f0] sm:$0x3] %v6168_v27  ;;  %v6180_v29 = vld [vmem:[#allocation0 + $0x17d0] sm:$0x3] }
 0x315   :  { %8061 = vst [vmem:[%s11542_s1 + $0x5f2] sm:$0x3] %v6174_v28  ;;  %v6186_v30 = vld [vmem:[#allocation0 + $0x17d8] sm:$0x3]  ;;  %v6192_v31 = vld [vmem:[#allocation0 + $0x17e0] sm:$0x3] }
 0x316   :  { %8062 = vst [vmem:[%s11542_s1 + $0x5f4] sm:$0x3] %v6180_v29  ;;  %8063 = vst [vmem:[%s11542_s1 + $0x5f6] sm:$0x3] %v6186_v30  ;;  %v6198_v32 = vld [vmem:[#allocation0 + $0x17e8] sm:$0x3] }
 0x317   :  { %8064 = vst [vmem:[%s11542_s1 + $0x5f8] sm:$0x3] %v6192_v31  ;;  %v6204_v33 = vld [vmem:[#allocation0 + $0x17f0] sm:$0x3]  ;;  %v6210_v34 = vld [vmem:[#allocation0 + $0x17f8] sm:$0x3] }
 0x318   :  { %8065 = vst [vmem:[%s11542_s1 + $0x5fa] sm:$0x3] %v6198_v32  ;;  %8066 = vst [vmem:[%s11542_s1 + $0x5fc] sm:$0x3] %v6204_v33  ;;  %v6120_v35 = vld [vmem:[#allocation0 + $0x1780] sm:$0x3] }
 0x319   :  { %8067 = vst [vmem:[%s11542_s1 + $0x5fe] sm:$0x3] %v6210_v34  ;;  %v6126_v36 = vld [vmem:[#allocation0 + $0x1788] sm:$0x3]  ;;  %v6132_v37 = vld [vmem:[#allocation0 + $0x1790] sm:$0x3] }
 0x31a   :  { %8052 = vst [vmem:[%s11542_s1 + $0x5e0] sm:$0x3] %v6120_v35  ;;  %8053 = vst [vmem:[%s11542_s1 + $0x5e2] sm:$0x3] %v6126_v36  ;;  %v6138_v38 = vld [vmem:[#allocation0 + $0x1798] sm:$0x3] }
 0x31b   :  { %8054 = vst [vmem:[%s11542_s1 + $0x5e4] sm:$0x3] %v6132_v37  ;;  %v6144_v39 = vld [vmem:[#allocation0 + $0x17a0] sm:$0x3]  ;;  %v6150_v40 = vld [vmem:[#allocation0 + $0x17a8] sm:$0x3] }
 0x31c   :  { %8055 = vst [vmem:[%s11542_s1 + $0x5e6] sm:$0x3] %v6138_v38  ;;  %8056 = vst [vmem:[%s11542_s1 + $0x5e8] sm:$0x3] %v6144_v39  ;;  %v6156_v41 = vld [vmem:[#allocation0 + $0x17b0] sm:$0x3] }
 0x31d   :  { %8057 = vst [vmem:[%s11542_s1 + $0x5ea] sm:$0x3] %v6150_v40  ;;  %v6162_v42 = vld [vmem:[#allocation0 + $0x17b8] sm:$0x3]  ;;  %v6264_v43 = vld [vmem:[#allocation0 + $0x1840] sm:$0x3] }
 0x31e   :  { %8058 = vst [vmem:[%s11542_s1 + $0x5ec] sm:$0x3] %v6156_v41  ;;  %8059 = vst [vmem:[%s11542_s1 + $0x5ee] sm:$0x3] %v6162_v42  ;;  %v6270_v44 = vld [vmem:[#allocation0 + $0x1848] sm:$0x3] }
 0x31f   :  { %8076 = vst [vmem:[%s11542_s1 + $0x610] sm:$0x3] %v6264_v43  ;;  %v6276_v45 = vld [vmem:[#allocation0 + $0x1850] sm:$0x3]  ;;  %v6282_v46 = vld [vmem:[#allocation0 + $0x1858] sm:$0x3] }
 0x320   :  { %8077 = vst [vmem:[%s11542_s1 + $0x612] sm:$0x3] %v6270_v44  ;;  %8078 = vst [vmem:[%s11542_s1 + $0x614] sm:$0x3] %v6276_v45  ;;  %v6288_v47 = vld [vmem:[#allocation0 + $0x1860] sm:$0x3] }
 0x321   :  { %8079 = vst [vmem:[%s11542_s1 + $0x616] sm:$0x3] %v6282_v46  ;;  %v6294_v48 = vld [vmem:[#allocation0 + $0x1868] sm:$0x3]  ;;  %v6300_v49 = vld [vmem:[#allocation0 + $0x1870] sm:$0x3] }
 0x322   :  { %8080 = vst [vmem:[%s11542_s1 + $0x618] sm:$0x3] %v6288_v47  ;;  %8081 = vst [vmem:[%s11542_s1 + $0x61a] sm:$0x3] %v6294_v48  ;;  %v6306_v50 = vld [vmem:[#allocation0 + $0x1878] sm:$0x3] }
 0x323   :  { %8082 = vst [vmem:[%s11542_s1 + $0x61c] sm:$0x3] %v6300_v49  ;;  %v6216_v51 = vld [vmem:[#allocation0 + $0x1800] sm:$0x3]  ;;  %v6222_v52 = vld [vmem:[#allocation0 + $0x1808] sm:$0x3] }
 0x324   :  { %8083 = vst [vmem:[%s11542_s1 + $0x61e] sm:$0x3] %v6306_v50  ;;  %8068 = vst [vmem:[%s11542_s1 + $0x600] sm:$0x3] %v6216_v51  ;;  %v6228_v53 = vld [vmem:[#allocation0 + $0x1810] sm:$0x3] }
 0x325   :  { %8069 = vst [vmem:[%s11542_s1 + $0x602] sm:$0x3] %v6222_v52  ;;  %v6234_v54 = vld [vmem:[#allocation0 + $0x1818] sm:$0x3]  ;;  %v6240_v55 = vld [vmem:[#allocation0 + $0x1820] sm:$0x3] }
 0x326   :  { %8070 = vst [vmem:[%s11542_s1 + $0x604] sm:$0x3] %v6228_v53  ;;  %8071 = vst [vmem:[%s11542_s1 + $0x606] sm:$0x3] %v6234_v54  ;;  %v6246_v56 = vld [vmem:[#allocation0 + $0x1828] sm:$0x3] }
 0x327   :  { %8072 = vst [vmem:[%s11542_s1 + $0x608] sm:$0x3] %v6240_v55  ;;  %v6252_v57 = vld [vmem:[#allocation0 + $0x1830] sm:$0x3]  ;;  %v6258_v58 = vld [vmem:[#allocation0 + $0x1838] sm:$0x3] }
 0x328   :  { %8073 = vst [vmem:[%s11542_s1 + $0x60a] sm:$0x3] %v6246_v56  ;;  %8074 = vst [vmem:[%s11542_s1 + $0x60c] sm:$0x3] %v6252_v57 }
 0x329   :  { %8075 = vst [vmem:[%s11542_s1 + $0x60e] sm:$0x3] %v6258_v58 }

// kernel: discriminator_forward.1
= control target key start
LH: loop header
LB: loop body
LE: loop exit
PB: predicated region body
PF: predicated region fallthrough
CT: control target
= control target key end

     0   :  { %s10530_s11 = smov 0   ;;  %s14036_s0 = inlined_call_operand.vmem [shape: f32[2,896,28], index: 0, kind: input, shape index: {}]   ;;  %s14037_s1 = inlined_call_operand.vmem [shape: bf16[5,28,240], index: 1, kind: input, shape index: {}]   ;;  %s14038_s2 = inlined_call_operand.vmem [shape: f32[1,240], index: 2, kind: input, shape index: {}]   ;;  %s14039_s3 = inlined_call_operand.vmem [shape: bf16[5,230,160], index: 3, kind: input, shape index: {}]   ;;  %s14040_s4 = inlined_call_operand.vmem [shape: f32[1,160], index: 4, kind: input, shape index: {}]   ;;  %s14041_s5 = inlined_call_operand.vmem [shape: bf16[4,140,50], index: 5, kind: input, shape index: {}]   ;;  %s14042_s6 = inlined_call_operand.vmem [shape: f32[1,50], index: 6, kind: input, shape index: {}]   ;;  %s14043_s7 = inlined_call_operand.vmem [shape: bf16[1,50], index: 7, kind: input, shape index: {}]   ;;  %s14044_s8 = inlined_call_operand.<no memory space> [shape: f32[1,1], index: 8, kind: input, shape index: {}]   ;;  %s14045_s9 = inlined_call_operand.vmem [shape: f32[2,1,32], index: 9, kind: output, shape index: {}]  }
   0x1   :  { %v14_v0 = vstv %s14044_s8 }
   0x2   :  { %15 = vst [vmem:[#allocation2] sm:$0x1] %v14_v0 }
   0x3 LB: > { %s8057_s12 = sadd.s32 4294967295, %s10470_s11   ;;  %p8061_p0 = scmp.ge.s32.totalorder %s10470_s11, 1  ;;  %s10470_s11 = sphi %s10530_s11, %s21_s11  }
   0x4   : > { %p289_p1 = scmp.lt.s32.totalorder %s10470_s11, 3 }
   0x6   : > { %p290_p2 = pnand %p8061_p0, %p289_p1 }
   0x8   : > { %293 = sbr.rel (%p290_p2) target bundleno = 2992 (0xbb0), region = 56 }
   0xf   : > { %v10172_v1 = vld [vmem:[%s14037_s1 + $0x4] ss:$8 sps:$4 sm:$0xff]   ;;  %vm672_vm0 = vcmask 1045504   ;;  %v10174_v2 = vld [vmem:[%s14037_s1] ss:$8 sps:$4 sm:$0xff]   ;;  %v14052_v3 = vmov 0  }
  0x10   : > { %1254 = vmatprep.mubr.bf16.mxu0 %v14052_v3  ;;  %p323_p3 = scmp.lt.s32.totalorder %s8057_s12, 1  ;;  %711 = vmatprep.mubr.bf16.mxu1 %v14052_v3  ;;  %v10549_v4 = vld [vmem:[%s14037_s1 + $0x14] ss:$8 sps:$4 sm:$0x3f]   ;;  %v10180_v7 = vld [vmem:[%s14037_s1 + $0x44] ss:$8 sps:$4 sm:$0xff]  }
  0x11   : > { %1222 = vmatprep.subr.bf16.mxu0 %v10172_v1  ;;  %v10177_v5 = vld [vmem:[%s14037_s1 + $0x10] ss:$8 sps:$4 sm:$0x3f]   ;;  %10171 = vset.pattern.permute.xlu0 %v14052_v3  ;;  %vm527_vm1 = vcmask 228352   ;;  %v10178_v10 = vld [vmem:[%s14037_s1 + $0x40] ss:$8 sps:$4 sm:$0xff]  }
  0x12   : > { %1223 = vmatpush1.bf16.msra.mxu0 %v10174_v2  ;;  %s14527_s12 = smov (!%p323_p3, %s8057_s12), 1  ;;  %v10560_v6 = vsel %vm672_vm0, %v10177_v5, 0  ;;  %v10181_v12 = vld [vmem:[%s14037_s1 + $0x54] ss:$8 sps:$4 sm:$0x3f]   ;;  %vm5181_vm2 = vcmask 1042432  }
  0x13   : > { %8124 = vmatprep.subr.msk.bf16.mxu0 %vm672_vm0, %v10549_v4  ;;  %s9837_s22 = smul.u32 896, %s14527_s12  ;;  %v10183_v13 = vld [vmem:[%s14037_s1 + $0x50] ss:$8 sps:$4 sm:$0x3f]   ;;  %v10186_v44 = vld [vmem:[%s14037_s1 + $0x64] ss:$8 sps:$4 sm:$0xff]   ;;  %s330_s20 = scalar_lea.vmem %s14045_s9, %s14527_s12 }
  0x14   : > { %v1765_v16 = vsel %vm672_vm0, %v10183_v13, 0  ;;  %s10473_s24 = smov 118   ;;  %vm4543_vm3 = vcmask 965632   ;;  %vm5132_vm4 = vcmask 834560   ;;  %s10474_s19 = smov 108   ;;  %vm7267_vm5 = vcmask 883712  }
  0x15   : > { %s10570_s25 = scalar_lea.vmem %s14036_s0, %s9837_s22  ;;  %vm7486_vm6 = vcmask 97280   ;;  %vm10476_vm7 = vmmov 0   ;;  %vm7952_vm8 = vcmask 408576   ;;  %vm8008_vm9 = vcmask 253952  }
  0x16   : > { %1225 = vmatpush1.bf16.msra.mxu0 %v10560_v6  ;;  %v332_v8 = vld [vmem:[%s10570_s25] sm:$0xff]  ;;  %v333_v9 = vld [vmem:[%s10570_s25 + $0x8] sm:$0xff]  ;;  %v334_v14 = vld [vmem:[%s10570_s25 + $0x10] sm:$0xff] }
  0x17   : > { %1770 = vmatprep.subr.bf16.mxu0 %v10180_v7  ;;  %v444_v11 = vpack.c.bf16 %v333_v9, %v332_v8  ;;  %v335_v15 = vld [vmem:[%s10570_s25 + $0x18] sm:$0xff]  ;;  %v336_v18 = vld [vmem:[%s10570_s25 + $0x20] sm:$0xff]  ;;  %v337_v19 = vld [vmem:[%s10570_s25 + $0x28] sm:$0xff] }
  0x18   : > { %v445_v17 = vpack.c.bf16 %v335_v15, %v334_v14  ;;  %v10593_v20 = vpack.c.bf16 %v337_v19, %v336_v18  ;;  %v338_v21 = vld [vmem:[%s10570_s25 + $0x30] sm:$0xff]  ;;  %v339_v22 = vld [vmem:[%s10570_s25 + $0x38] sm:$0xff]  ;;  %v340_v24 = vld [vmem:[%s10570_s25 + $0x40] sm:$0xff] }
  0x19   : > { %8125 = vmatmul.mubr.msk.bf16.vlgmr.msra.gmra.mrb[0].mxu0 %vm527_vm1, %v444_v11  ;;  %v10600_v23 = vpack.c.bf16 %v339_v22, %v338_v21  ;;  %v341_v25 = vld [vmem:[%s10570_s25 + $0x48] sm:$0xff]  ;;  %v342_v27 = vld [vmem:[%s10570_s25 + $0x50] sm:$0xff]  ;;  %v343_v28 = vld [vmem:[%s10570_s25 + $0x58] sm:$0xff] }
  0x1a   : > { %1771 = vmatpush1.bf16.msra.mxu0 %v10178_v10  ;;  %1264 = vmatprep.mubr.bf16.mxu0 %v14052_v3  ;;  %v10607_v26 = vpack.c.bf16 %v341_v25, %v340_v24  ;;  %v10614_v29 = vpack.c.bf16 %v343_v28, %v342_v27  ;;  %v344_v30 = vld [vmem:[%s10570_s25 + $0x60] sm:$0xff]  ;;  %v345_v31 = vld [vmem:[%s10570_s25 + $0x68] sm:$0xff]  ;;  %v346_v33 = vld [vmem:[%s10570_s25 + $0x70] sm:$0xff] }
  0x1b   : > { %8181 = vmatprep.subr.msk.bf16.mxu0 %vm672_vm0, %v10181_v12  ;;  %v10621_v32 = vpack.c.bf16 %v345_v31, %v344_v30  ;;  %v347_v34 = vld [vmem:[%s10570_s25 + $0x78] sm:$0xff]  ;;  %v348_v36 = vld [vmem:[%s10570_s25 + $0x80] sm:$0xff]  ;;  %v349_v37 = vld [vmem:[%s10570_s25 + $0x88] sm:$0xff] }
  0x1c   : > { %v10628_v35 = vpack.c.bf16 %v347_v34, %v346_v33  ;;  %v10635_v38 = vpack.c.bf16 %v349_v37, %v348_v36  ;;  %v350_v39 = vld [vmem:[%s10570_s25 + $0x90] sm:$0xff]  ;;  %v351_v40 = vld [vmem:[%s10570_s25 + $0x98] sm:$0xff]  ;;  %v352_v42 = vld [vmem:[%s10570_s25 + $0xa0] sm:$0xff] }
  0x1d   : > { %v10642_v41 = vpack.c.bf16 %v351_v40, %v350_v39  ;;  %v353_v43 = vld [vmem:[%s10570_s25 + $0xa8] sm:$0xff]  ;;  %v354_v46 = vld [vmem:[%s10570_s25 + $0xb0] sm:$0xff]  ;;  %v355_v47 = vld [vmem:[%s10570_s25 + $0xb8] sm:$0xff] }
  0x1e   : > { %1773 = vmatpush1.bf16.msra.mxu0 %v1765_v16  ;;  %v10652_v45 = vpack.c.bf16 %v353_v43, %v352_v42  ;;  %v10659_v48 = vpack.c.bf16 %v355_v47, %v354_v46  ;;  %v356_v49 = vld [vmem:[%s10570_s25 + $0xc0] sm:$0xff]  ;;  %v357_v50 = vld [vmem:[%s10570_s25 + $0xc8] sm:$0xff]  ;;  %v358_v52 = vld [vmem:[%s10570_s25 + $0xd0] sm:$0xff] }
  0x1f   : > { %2510 = vmatprep.subr.bf16.mxu0 %v10186_v44  ;;  %v10666_v51 = vpack.c.bf16 %v357_v50, %v356_v49  ;;  %v359_v53 = vld [vmem:[%s10570_s25 + $0xd8] sm:$0xff]  ;;  %v360_v55 = vld [vmem:[%s10570_s25 + $0xe0] sm:$0xff]  ;;  %v361_v56 = vld [vmem:[%s10570_s25 + $0xe8] sm:$0xff] }
  0x20   : > { %v10673_v54 = vpack.c.bf16 %v359_v53, %v358_v52  ;;  %v10680_v57 = vpack.c.bf16 %v361_v56, %v360_v55  ;;  %v362_v58 = vld [vmem:[%s10570_s25 + $0xf0] sm:$0xff]  ;;  %v363_v59 = vld [vmem:[%s10570_s25 + $0xf8] sm:$0xff]  ;;  %v364_v61 = vld [vmem:[%s10570_s25 + $0x100] sm:$0xff] }
  0x21   : > { %8126 = vmatmul.mubr.msk.bf16.gmra.mrb[4].mxu0 %vm527_vm1, %v445_v17  ;;  %v10687_v60 = vpack.c.bf16 %v363_v59, %v362_v58  ;;  %v365_v62 = vld [vmem:[%s10570_s25 + $0x108] sm:$0xff]  ;;  %v366_v0 = vld [vmem:[%s10570_s25 + $0x110] sm:$0xff]  ;;  %v367_v1 = vld [vmem:[%s10570_s25 + $0x118] sm:$0xff] }
  0x22   : > { %1274 = vmatprep.mubr.bf16.mxu0 %v14052_v3  ;;  %v10694_v63 = vpack.c.bf16 %v365_v62, %v364_v61  ;;  %v10701_v2 = vpack.c.bf16 %v367_v1, %v366_v0  ;;  %v368_v5 = vld [vmem:[%s10570_s25 + $0x120] sm:$0xff]  ;;  %v369_v7 = vld [vmem:[%s10570_s25 + $0x128] sm:$0xff]  ;;  %v370_v9 = vld [vmem:[%s10570_s25 + $0x130] sm:$0xff] }
  0x23   : > { %v10708_v8 = vpack.c.bf16 %v369_v7, %v368_v5  ;;  %v371_v10 = vld [vmem:[%s10570_s25 + $0x138] sm:$0xff]  ;;  %v372_v12 = vld [vmem:[%s10570_s25 + $0x140] sm:$0xff]  ;;  %v373_v13 = vld [vmem:[%s10570_s25 + $0x148] sm:$0xff] }
  0x24   : > { %v10715_v11 = vpack.c.bf16 %v371_v10, %v370_v9  ;;  %v10722_v14 = vpack.c.bf16 %v373_v13, %v372_v12  ;;  %v374_v15 = vld [vmem:[%s10570_s25 + $0x150] sm:$0xff]  ;;  %v375_v16 = vld [vmem:[%s10570_s25 + $0x158] sm:$0xff]  ;;  %v376_v18 = vld [vmem:[%s10570_s25 + $0x160] sm:$0xff] }
  0x25   : > { %v10729_v17 = vpack.c.bf16 %v375_v16, %v374_v15  ;;  %v377_v19 = vld [vmem:[%s10570_s25 + $0x168] sm:$0xff]  ;;  %v378_v22 = vld [vmem:[%s10570_s25 + $0x170] sm:$0xff]  ;;  %v379_v24 = vld [vmem:[%s10570_s25 + $0x178] sm:$0xff] }
  0x26   : > { %v10736_v21 = vpack.c.bf16 %v377_v19, %v376_v18  ;;  %v10743_v25 = vpack.c.bf16 %v379_v24, %v378_v22  ;;  %v380_v27 = vld [vmem:[%s10570_s25 + $0x180] sm:$0xff]  ;;  %v381_v28 = vld [vmem:[%s10570_s25 + $0x188] sm:$0xff]  ;;  %v10187_v33 = vld [vmem:[%s14037_s1 + $0x74] ss:$8 sps:$4 sm:$0x3f]  }
  0x27   : > { %v10750_v30 = vpack.c.bf16 %v381_v28, %v380_v27  ;;  %v10184_v31 = vld [vmem:[%s14037_s1 + $0x60] ss:$8 sps:$4 sm:$0xff]   ;;  %v10189_v34 = vld [vmem:[%s14037_s1 + $0x70] ss:$8 sps:$4 sm:$0x3f]  }
  0x28   : > { %v2505_v36 = vsel %vm672_vm0, %v10189_v34, 0  ;;  %v382_v37 = vld [vmem:[%s10570_s25 + $0x190] sm:$0xff]  ;;  %v383_v39 = vld [vmem:[%s10570_s25 + $0x198] sm:$0xff]  ;;  %v384_v42 = vld [vmem:[%s10570_s25 + $0x1a0] sm:$0xff] }
  0x29   : > { %8127 = vmatmul.mubr.msk.bf16.gmra.mrb[8].mxu0 %vm527_vm1, %v10593_v20  ;;  %v10831_v40 = vpack.c.bf16 %v383_v39, %v382_v37  ;;  %v385_v43 = vld [vmem:[%s10570_s25 + $0x1a8] sm:$0xff]  ;;  %v386_v46 = vld [vmem:[%s10570_s25 + $0x1b0] sm:$0xff]  ;;  %v387_v47 = vld [vmem:[%s10570_s25 + $0x1b8] sm:$0xff] }
  0x2a   : > { %1284 = vmatprep.mubr.bf16.mxu0 %v14052_v3  ;;  %v10838_v44 = vpack.c.bf16 %v385_v43, %v384_v42  ;;  %v10845_v49 = vpack.c.bf16 %v387_v47, %v386_v46  ;;  %v388_v50 = vld [vmem:[%s10570_s25 + $0x1c0] sm:$0xff]  ;;  %v389_v52 = vld [vmem:[%s10570_s25 + $0x1c8] sm:$0xff]  ;;  %v390_v55 = vld [vmem:[%s10570_s25 + $0x1d0] sm:$0xff] }
  0x2b   : > { %v10852_v53 = vpack.c.bf16 %v389_v52, %v388_v50  ;;  %v391_v56 = vld [vmem:[%s10570_s25 + $0x1d8] sm:$0xff]  ;;  %v392_v59 = vld [vmem:[%s10570_s25 + $0x1e0] sm:$0xff]  ;;  %v393_v61 = vld [vmem:[%s10570_s25 + $0x1e8] sm:$0xff] }
  0x2c   : > { %v10859_v58 = vpack.c.bf16 %v391_v56, %v390_v55  ;;  %v10866_v62 = vpack.c.bf16 %v393_v61, %v392_v59  ;;  %v394_v0 = vld [vmem:[%s10570_s25 + $0x1f0] sm:$0xff]  ;;  %v395_v1 = vld [vmem:[%s10570_s25 + $0x1f8] sm:$0xff]  ;;  %v396_v7 = vld [vmem:[%s10570_s25 + $0x200] sm:$0xff] }
  0x2d   : > { %v10873_v5 = vpack.c.bf16 %v395_v1, %v394_v0  ;;  %v397_v9 = vld [vmem:[%s10570_s25 + $0x208] sm:$0xff]  ;;  %v398_v12 = vld [vmem:[%s10570_s25 + $0x210] sm:$0xff]  ;;  %v399_v13 = vld [vmem:[%s10570_s25 + $0x218] sm:$0xff] }
  0x2e   : > { %v10880_v10 = vpack.c.bf16 %v397_v9, %v396_v7  ;;  %v10887_v15 = vpack.c.bf16 %v399_v13, %v398_v12  ;;  %v400_v16 = vld [vmem:[%s10570_s25 + $0x220] sm:$0xff]  ;;  %v401_v18 = vld [vmem:[%s10570_s25 + $0x228] sm:$0xff]  ;;  %v402_v22 = vld [vmem:[%s10570_s25 + $0x230] sm:$0xff] }
  0x2f   : > { %v10894_v19 = vpack.c.bf16 %v401_v18, %v400_v16  ;;  %v403_v24 = vld [vmem:[%s10570_s25 + $0x238] sm:$0xff]  ;;  %v404_v28 = vld [vmem:[%s10570_s25 + $0x240] sm:$0xff]  ;;  %v406_v34 = vld [vmem:[%s10570_s25 + $0x250] sm:$0xff] }
  0x30   : > { %v10901_v27 = vpack.c.bf16 %v403_v24, %v402_v22  ;;  %v407_v37 = vld [vmem:[%s10570_s25 + $0x258] sm:$0xff]  ;;  %v10193_v39 = vld [vmem:[%s14037_s1 + $0x24] ss:$8 sps:$4 sm:$0xff]   ;;  %v10195_v42 = vld [vmem:[%s14037_s1 + $0x20] ss:$8 sps:$4 sm:$0xff]  }
  0x31   : > { %8128 = vmatmul.mubr.msk.bf16.gmra.mrb[12].mxu0 %vm527_vm1, %v10600_v23  ;;  %679 = vmatprep.subr.bf16.mxu1 %v10193_v39  ;;  %v10924_v43 = vpack.c.bf16 %v407_v37, %v406_v34  ;;  %v10196_v46 = vld [vmem:[%s14037_s1 + $0x34] ss:$8 sps:$4 sm:$0x3f]   ;;  %v10198_v47 = vld [vmem:[%s14037_s1 + $0x30] ss:$8 sps:$4 sm:$0x3f]  }
  0x32   : > { %1294 = vmatprep.mubr.bf16.mxu0 %v14052_v3  ;;  %680 = vmatpush1.bf16.msra.mxu1 %v10195_v42  ;;  %v408_v50 = vld [vmem:[%s10570_s25 + $0x260] sm:$0xff]  ;;  %v409_v52 = vld [vmem:[%s10570_s25 + $0x268] sm:$0xff]  ;;  %v674_v55 = vsel %vm672_vm0, %v10198_v47, 0  ;;  %v410_v0 = vld [vmem:[%s10570_s25 + $0x270] sm:$0xff] }
  0x33   : > { %8071 = vmatprep.subr.msk.bf16.mxu1 %vm672_vm0, %v10196_v46  ;;  %v10462_v56 = vld [vmem:[%s14037_s1 + $0x4] ss:$8 sps:$4 sm:$0xff]   ;;  %v10942_v59 = vpack.c.bf16 %v409_v52, %v408_v50  ;;  %v10463_v61 = vld [vmem:[%s14037_s1] ss:$8 sps:$4 sm:$0xff]   ;;  %v419_v18 = vld [vmem:[%s10570_s25 + $0x2b8] sm:$0xff] }
  0x34   : > { %v413_v7 = vld [vmem:[%s10570_s25 + $0x288] sm:$0xff]  ;;  %v420_v24 = vld [vmem:[%s10570_s25 + $0x2c0] sm:$0xff]  ;;  %v422_v34 = vld [vmem:[%s10570_s25 + $0x2d0] sm:$0xff] }
  0x35   : > { %v417_v13 = vld [vmem:[%s10570_s25 + $0x2a8] sm:$0xff]  ;;  %v424_v39 = vld [vmem:[%s10570_s25 + $0x2e0] sm:$0xff]  ;;  %v426_v47 = vld [vmem:[%s10570_s25 + $0x2f0] sm:$0xff] }
  0x36   : > { %682 = vmatpush1.bf16.msra.mxu1 %v674_v55  ;;  %v425_v42 = vld [vmem:[%s10570_s25 + $0x2e8] sm:$0xff]  ;;  %v427_v50 = vld [vmem:[%s10570_s25 + $0x2f8] sm:$0xff]  ;;  %v428_v55 = vld [vmem:[%s10570_s25 + $0x300] sm:$0xff] }
  0x37   : > { %8809 = vmatprep.subr.bf16.mxu1 %v10462_v56  ;;  %v11028_v46 = vpack.c.bf16 %v425_v42, %v424_v39  ;;  %v11038_v52 = vpack.c.bf16 %v427_v50, %v426_v47  ;;  %v429_v56 = vld [vmem:[%s10570_s25 + $0x308] sm:$0xff] }
  0x39   : > { %8129 = vmatmul.mubr.msk.bf16.gmra.mrb[16].mxu0 %vm527_vm1, %v10607_v26  ;;  %8072 = vmatmul.mubr.msk.bf16.vlgmr.msra.gmra.mrb[0].mxu1 %vm527_vm1, %v10593_v20  ;;  %v411_v20 = vld [vmem:[%s10570_s25 + $0x278] sm:$0xff] }
  0x3a   : > { %1304 = vmatprep.mubr.bf16.mxu0 %v14052_v3  ;;  %721 = vmatprep.mubr.bf16.mxu1 %v14052_v3  ;;  %v10958_v1 = vpack.c.bf16 %v411_v20, %v410_v0  ;;  %v430_v0 = vld [vmem:[%s10570_s25 + $0x310] sm:$0xff]  ;;  %v431_v20 = vld [vmem:[%s10570_s25 + $0x318] sm:$0xff] }
  0x3b   : > { %8811 = vmatpush1.bf16.msra.mxu1 %v10463_v61  ;;  %v11048_v61 = vpack.c.bf16 %v429_v56, %v428_v55 }
  0x3c   : > { %8810 = vmatprep.subr.msk.bf16.mxu1 %vm672_vm0, %v10549_v4  ;;  %v412_v4 = vld [vmem:[%s10570_s25 + $0x280] sm:$0xff] }
  0x3d   : > { %v10968_v9 = vpack.c.bf16 %v413_v7, %v412_v4  ;;  %14111 = vst [vmem:[#allocation3_spill] sm:$0xff] %v11048_v61  ;;  %v11058_v4 = vpack.c.bf16 %v431_v20, %v430_v0  ;;  %v432_v7 = vld [vmem:[%s10570_s25 + $0x320] sm:$0xff] }
  0x3f   : > { %8812 = vmatpush1.bf16.msra.mxu1 %v10560_v6  ;;  %v414_v6 = vld [vmem:[%s10570_s25 + $0x290] sm:$0xff]  ;;  %14112 = vst [vmem:[#allocation4_spill] sm:$0xff] %v11058_v4 }
  0x41   : > { %8130 = vmatmul.mubr.msk.bf16.gmra.mrb[20].mxu0 %vm527_vm1, %v10614_v29  ;;  %8073 = vmatmul.mubr.msk.bf16.gmra.mrb[4].mxu1 %vm527_vm1, %v10600_v23  ;;  %v415_v23 = vld [vmem:[%s10570_s25 + $0x298] sm:$0xff] }
  0x42   : > { %1314 = vmatprep.mubr.bf16.mxu0 %v14052_v3  ;;  %731 = vmatprep.mubr.bf16.mxu1 %v14052_v3  ;;  %v10978_v12 = vpack.c.bf16 %v415_v23, %v414_v6  ;;  %v433_v6 = vld [vmem:[%s10570_s25 + $0x328] sm:$0xff] }
  0x43   : > { %v11068_v23 = vpack.c.bf16 %v433_v6, %v432_v7 }
  0x45   : > { %14113 = vst [vmem:[#allocation5_spill] sm:$0xff] %v11068_v23 }
  0x49   : > { %8131 = vmatmul.mubr.msk.bf16.gmra.mrb[24].mxu0 %vm527_vm1, %v10621_v32  ;;  %8074 = vmatmul.mubr.msk.bf16.gmra.mrb[8].mxu1 %vm527_vm1, %v10607_v26 }
  0x4a   : > { %1324 = vmatprep.mubr.bf16.mxu0 %v14052_v3  ;;  %741 = vmatprep.mubr.bf16.mxu1 %v14052_v3 }
  0x51   : > { %8132 = vmatmul.mubr.msk.bf16.gmra.mrb[28].mxu0 %vm527_vm1, %v10628_v35  ;;  %8075 = vmatmul.mubr.msk.bf16.gmra.mrb[12].mxu1 %vm527_vm1, %v10614_v29 }
  0x52   : > { %1334 = vmatprep.mubr.bf16.mxu0 %v14052_v3  ;;  %751 = vmatprep.mubr.bf16.mxu1 %v14052_v3 }
  0x59   : > { %8133 = vmatmul.mubr.msk.bf16.gmra.mrb[32].mxu0 %vm527_vm1, %v10635_v38  ;;  %8076 = vmatmul.mubr.msk.bf16.gmra.mrb[16].mxu1 %vm527_vm1, %v10621_v32 }
  0x5a   : > { %1344 = vmatprep.mubr.bf16.mxu0 %v14052_v3  ;;  %761 = vmatprep.mubr.bf16.mxu1 %v14052_v3 }
  0x61   : > { %8134 = vmatmul.mubr.msk.bf16.gmra.mrb[36].mxu0 %vm527_vm1, %v10642_v41  ;;  %8077 = vmatmul.mubr.msk.bf16.gmra.mrb[20].mxu1 %vm527_vm1, %v10628_v35 }
  0x62   : > { %1354 = vmatprep.mubr.bf16.mxu0 %v14052_v3  ;;  %771 = vmatprep.mubr.bf16.mxu1 %v14052_v3 }
  0x69   : > { %8135 = vmatmul.mubr.msk.bf16.gmra.mrb[40].mxu0 %vm527_vm1, %v10652_v45  ;;  %8078 = vmatmul.mubr.msk.bf16.gmra.mrb[24].mxu1 %vm527_vm1, %v10635_v38 }
  0x6a   : > { %1364 = vmatprep.mubr.bf16.mxu0 %v14052_v3  ;;  %781 = vmatprep.mubr.bf16.mxu1 %v14052_v3 }
  0x71   : > { %8136 = vmatmul.mubr.msk.bf16.gmra.mrb[44].mxu0 %vm527_vm1, %v10659_v48  ;;  %8079 = vmatmul.mubr.msk.bf16.gmra.mrb[28].mxu1 %vm527_vm1, %v10642_v41 }
  0x72   : > { %1374 = vmatprep.mubr.bf16.mxu0 %v14052_v3  ;;  %791 = vmatprep.mubr.bf16.mxu1 %v14052_v3 }
  0x79   : > { %8137 = vmatmul.mubr.msk.bf16.gmra.mrb[48].mxu0 %vm527_vm1, %v10666_v51  ;;  %8080 = vmatmul.mubr.msk.bf16.gmra.mrb[32].mxu1 %vm527_vm1, %v10652_v45 }
  0x7a   : > { %1384 = vmatprep.mubr.bf16.mxu0 %v14052_v3  ;;  %801 = vmatprep.mubr.bf16.mxu1 %v14052_v3 }
  0x81   : > { %8138 = vmatmul.mubr.msk.bf16.gmra.mrb[52].mxu0 %vm527_vm1, %v10673_v54  ;;  %8081 = vmatmul.mubr.msk.bf16.gmra.mrb[36].mxu1 %vm527_vm1, %v10659_v48 }
  0x82   : > { %1394 = vmatprep.mubr.bf16.mxu0 %v14052_v3  ;;  %811 = vmatprep.mubr.bf16.mxu1 %v14052_v3 }
  0x89   : > { %8139 = vmatmul.mubr.msk.bf16.gmra.mrb[56].mxu0 %vm527_vm1, %v10680_v57  ;;  %8082 = vmatmul.mubr.msk.bf16.gmra.mrb[40].mxu1 %vm527_vm1, %v10666_v51 }
  0x8a   : > { %1404 = vmatprep.mubr.bf16.mxu0 %v14052_v3  ;;  %821 = vmatprep.mubr.bf16.mxu1 %v14052_v3 }
  0x91   : > { %8140 = vmatmul.mubr.msk.bf16.gmra.mrb[60].mxu0 %vm527_vm1, %v10687_v60  ;;  %8083 = vmatmul.mubr.msk.bf16.gmra.mrb[44].mxu1 %vm527_vm1, %v10673_v54 }
  0x92   : > { %1414 = vmatprep.mubr.bf16.mxu0 %v14052_v3  ;;  %831 = vmatprep.mubr.bf16.mxu1 %v14052_v3 }
  0x99   : > { %8141 = vmatmul.mubr.msk.bf16.gmra.mrb[64].mxu0 %vm527_vm1, %v10694_v63  ;;  %8084 = vmatmul.mubr.msk.bf16.gmra.mrb[48].mxu1 %vm527_vm1, %v10680_v57 }
  0x9a   : > { %1424 = vmatprep.mubr.bf16.mxu0 %v14052_v3  ;;  %841 = vmatprep.mubr.bf16.mxu1 %v14052_v3 }
  0xa1   : > { %8142 = vmatmul.mubr.msk.bf16.gmra.mrb[68].mxu0 %vm527_vm1, %v10701_v2  ;;  %8085 = vmatmul.mubr.msk.bf16.gmra.mrb[52].mxu1 %vm527_vm1, %v10687_v60 }
  0xa2   : > { %1434 = vmatprep.mubr.bf16.mxu0 %v14052_v3  ;;  %851 = vmatprep.mubr.bf16.mxu1 %v14052_v3 }
  0xa9   : > { %8143 = vmatmul.mubr.msk.bf16.gmra.mrb[72].mxu0 %vm527_vm1, %v10708_v8  ;;  %8086 = vmatmul.mubr.msk.bf16.gmra.mrb[56].mxu1 %vm527_vm1, %v10694_v63 }
  0xaa   : > { %1444 = vmatprep.mubr.bf16.mxu0 %v14052_v3  ;;  %861 = vmatprep.mubr.bf16.mxu1 %v14052_v3 }
  0xb1   : > { %8144 = vmatmul.mubr.msk.bf16.gmra.mrb[76].mxu0 %vm527_vm1, %v10715_v11  ;;  %8087 = vmatmul.mubr.msk.bf16.gmra.mrb[60].mxu1 %vm527_vm1, %v10701_v2 }
  0xb2   : > { %1454 = vmatprep.mubr.bf16.mxu0 %v14052_v3  ;;  %871 = vmatprep.mubr.bf16.mxu1 %v14052_v3 }
  0xb9   : > { %8145 = vmatmul.mubr.msk.bf16.gmra.mrb[80].mxu0 %vm527_vm1, %v10722_v14  ;;  %8088 = vmatmul.mubr.msk.bf16.gmra.mrb[64].mxu1 %vm527_vm1, %v10708_v8 }
  0xba   : > { %1464 = vmatprep.mubr.bf16.mxu0 %v14052_v3  ;;  %881 = vmatprep.mubr.bf16.mxu1 %v14052_v3 }
  0xc1   : > { %8146 = vmatmul.mubr.msk.bf16.gmra.mrb[84].mxu0 %vm527_vm1, %v10729_v17  ;;  %8089 = vmatmul.mubr.msk.bf16.gmra.mrb[68].mxu1 %vm527_vm1, %v10715_v11 }
  0xc2   : > { %1474 = vmatprep.mubr.bf16.mxu0 %v14052_v3  ;;  %891 = vmatprep.mubr.bf16.mxu1 %v14052_v3 }
  0xc9   : > { %8147 = vmatmul.mubr.msk.bf16.gmra.mrb[88].mxu0 %vm527_vm1, %v10736_v21  ;;  %8090 = vmatmul.mubr.msk.bf16.gmra.mrb[72].mxu1 %vm527_vm1, %v10722_v14 }
  0xca   : > { %1484 = vmatprep.mubr.bf16.mxu0 %v14052_v3  ;;  %901 = vmatprep.mubr.bf16.mxu1 %v14052_v3 }
  0xd1   : > { %8148 = vmatmul.mubr.msk.bf16.gmra.mrb[92].mxu0 %vm527_vm1, %v10743_v25  ;;  %8091 = vmatmul.mubr.msk.bf16.gmra.mrb[76].mxu1 %vm527_vm1, %v10729_v17 }
  0xd2   : > { %1494 = vmatprep.mubr.bf16.mxu0 %v14052_v3  ;;  %911 = vmatprep.mubr.bf16.mxu1 %v14052_v3 }
  0xd9   : > { %8149 = vmatmul.mubr.msk.bf16.gmra.mrb[96].mxu0 %vm527_vm1, %v10750_v30  ;;  %8092 = vmatmul.mubr.msk.bf16.gmra.mrb[80].mxu1 %vm527_vm1, %v10736_v21 }
  0xda   : > { %1802 = vmatprep.mubr.bf16.mxu0 %v14052_v3  ;;  %921 = vmatprep.mubr.bf16.mxu1 %v14052_v3 }
  0xe1   : > { %8182 = vmatmul.mubr.msk.bf16.vlgmr.msra.gmra.mrb[0].mxu0 %vm527_vm1, %v10607_v26  ;;  %v416_v26 = vld [vmem:[%s10570_s25 + $0x2a0] sm:$0xff]  ;;  %8093 = vmatmul.mubr.msk.bf16.gmra.mrb[84].mxu1 %vm527_vm1, %v10743_v25 }
  0xe2   : > { %2511 = vmatpush1.bf16.msra.mxu0 %v10184_v31  ;;  %1812 = vmatprep.mubr.bf16.mxu0 %v14052_v3  ;;  %v405_v31 = vld [vmem:[%s10570_s25 + $0x248] sm:$0xff]  ;;  %v10988_v16 = vpack.c.bf16 %v417_v13, %v416_v26  ;;  %v434_v26 = vld [vmem:[%s10570_s25 + $0x330] sm:$0xff]  ;;  %v435_v13 = vld [vmem:[%s10570_s25 + $0x338] sm:$0xff] }
  0xe3   : > { %8238 = vmatprep.subr.msk.bf16.mxu0 %vm672_vm0, %v10187_v33  ;;  %v10908_v33 = vpack.c.bf16 %v405_v31, %v404_v28  ;;  %v421_v28 = vld [vmem:[%s10570_s25 + $0x2c8] sm:$0xff]  ;;  %931 = vmatprep.mubr.bf16.mxu1 %v14052_v3 }
  0xe4   : > { %v11008_v31 = vpack.c.bf16 %v421_v28, %v420_v24 }
  0xe6   : > { %2513 = vmatpush1.bf16.msra.mxu0 %v2505_v36  ;;  %v10192_v36 = vld [vmem:[%s14037_s1 + $0x84] ss:$8 sps:$4 sm:$0xff]  }
  0xe7   : > { %3250 = vmatprep.subr.bf16.mxu0 %v10192_v36  ;;  %v423_v36 = vld [vmem:[%s10570_s25 + $0x2d8] sm:$0xff] }
  0xe8   : > { %v11018_v37 = vpack.c.bf16 %v423_v36, %v422_v34 }
  0xe9   : > { %8183 = vmatmul.mubr.msk.bf16.gmra.mrb[4].mxu0 %vm527_vm1, %v10614_v29  ;;  %v418_v29 = vld [vmem:[%s10570_s25 + $0x2b0] sm:$0xff]  ;;  %8094 = vmatmul.mubr.msk.bf16.gmra.mrb[88].mxu1 %vm527_vm1, %v10750_v30 }
  0xea   : > { %1822 = vmatprep.mubr.bf16.mxu0 %v14052_v3  ;;  %v10998_v22 = vpack.c.bf16 %v419_v18, %v418_v29  ;;  %v11078_v29 = vpack.c.bf16 %v435_v13, %v434_v26  ;;  %v10190_v18 = vld [vmem:[%s14037_s1 + $0x80] ss:$8 sps:$4 sm:$0xff]   ;;  %941 = vmatprep.mubr.bf16.mxu1 %v14052_v3 }
  0xec   : > { %14114 = vst [vmem:[#allocation6_spill] sm:$0xff] %v11078_v29 }
  0xf1   : > { %8184 = vmatmul.mubr.msk.bf16.gmra.mrb[8].mxu0 %vm527_vm1, %v10621_v32  ;;  %8095 = vmatmul.mubr.msk.bf16.gmra.mrb[92].mxu1 %vm527_vm1, %v10831_v40 }
  0xf2   : > { %1832 = vmatprep.mubr.bf16.mxu0 %v14052_v3  ;;  %951 = vmatprep.mubr.bf16.mxu1 %v14052_v3 }
  0xf9   : > { %8185 = vmatmul.mubr.msk.bf16.gmra.mrb[12].mxu0 %vm527_vm1, %v10628_v35  ;;  %8096 = vmatmul.mubr.msk.bf16.gmra.mrb[96].mxu1 %vm527_vm1, %v10838_v44 }
  0xfa   : > { %1842 = vmatprep.mubr.bf16.mxu0 %v14052_v3  ;;  %961 = vmatprep.mubr.bf16.mxu1 %v14052_v3 }
 0x101   : > { %8186 = vmatmul.mubr.msk.bf16.gmra.mrb[16].mxu0 %vm527_vm1, %v10635_v38  ;;  %8097 = vmatmul.mubr.msk.bf16.gmra.mrb[100].mxu1 %vm527_vm1, %v10845_v49 }
 0x102   : > { %1852 = vmatprep.mubr.bf16.mxu0 %v14052_v3  ;;  %971 = vmatprep.mubr.bf16.mxu1 %v14052_v3 }
 0x109   : > { %8187 = vmatmul.mubr.msk.bf16.gmra.mrb[20].mxu0 %vm527_vm1, %v10642_v41  ;;  %8098 = vmatmul.mubr.msk.bf16.gmra.mrb[104].mxu1 %vm527_vm1, %v10852_v53 }
 0x10a   : > { %1862 = vmatprep.mubr.bf16.mxu0 %v14052_v3  ;;  %981 = vmatprep.mubr.bf16.mxu1 %v14052_v3 }
 0x10c   : > { %v11307_v28 = vpop.f32.mrb[0].mxu1 }
 0x10d   : > { %v11314_v34 = vpop.f32.mrb[1].mxu1 }
 0x10e   : > { %v11317_v36 = vpop.f32.mrb[2].mxu1 }
 0x10f   : > { %v11319_v39 = vpop.f32.mrb[3].mxu1 }
 0x111   : > { %8188 = vmatmul.mubr.msk.bf16.gmra.mrb[24].mxu0 %vm527_vm1, %v10652_v45  ;;  %8099 = vmatmul.mubr.msk.bf16.gmra.mrb[108].mxu1 %vm527_vm1, %v10859_v58 }
 0x112   : > { %1872 = vmatprep.mubr.bf16.mxu0 %v14052_v3  ;;  %991 = vmatprep.mubr.bf16.mxu1 %v14052_v3 }
 0x114   : > { %v11321_v42 = vpop.f32.mrb[4].mxu1 }
 0x115   : > { %v11328_v47 = vpop.f32.mrb[5].mxu1 }
 0x116   : > { %v11331_v50 = vpop.f32.mrb[6].mxu1 }
 0x117   : > { %v11333_v55 = vpop.f32.mrb[7].mxu1 }
 0x119   : > { %8189 = vmatmul.mubr.msk.bf16.gmra.mrb[28].mxu0 %vm527_vm1, %v10659_v48  ;;  %8100 = vmatmul.mubr.msk.bf16.gmra.mrb[112].mxu1 %vm527_vm1, %v10866_v62 }
 0x11a   : > { %1882 = vmatprep.mubr.bf16.mxu0 %v14052_v3  ;;  %1001 = vmatprep.mubr.bf16.mxu1 %v14052_v3 }
 0x11c   : > { %v11335_v56 = vpop.f32.mrb[8].mxu1 }
 0x11d   : > { %v11342_v0 = vpop.f32.mrb[9].mxu1 }
 0x11e   : > { %v11345_v20 = vpop.f32.mrb[10].mxu1 }
 0x11f   : > { %v11347_v7 = vpop.f32.mrb[11].mxu1 }
 0x121   : > { %8190 = vmatmul.mubr.msk.bf16.gmra.mrb[32].mxu0 %vm527_vm1, %v10666_v51  ;;  %8101 = vmatmul.mubr.msk.bf16.gmra.mrb[116].mxu1 %vm527_vm1, %v10873_v5 }
 0x122   : > { %1892 = vmatprep.mubr.bf16.mxu0 %v14052_v3  ;;  %1011 = vmatprep.mubr.bf16.mxu1 %v14052_v3 }
 0x124   : > { %v11349_v6 = vpop.f32.mrb[12].mxu1 }
 0x125   : > { %v11356_v26 = vpop.f32.mrb[13].mxu1 }
 0x126   : > { %14115 = vst [vmem:[#allocation7_spill] sm:$0xff] %v11356_v26  ;;  %v11359_v13 = vpop.f32.mrb[14].mxu1 }
 0x127   : > { %14116 = vst [vmem:[#allocation8_spill] sm:$0xff] %v11359_v13 }
 0x129   : > { %8191 = vmatmul.mubr.msk.bf16.gmra.mrb[36].mxu0 %vm527_vm1, %v10673_v54  ;;  %8102 = vmatmul.mubr.msk.bf16.gmra.mrb[120].mxu1 %vm527_vm1, %v10880_v10 }
 0x12a   : > { %1902 = vmatprep.mubr.bf16.mxu0 %v14052_v3  ;;  %1021 = vmatprep.mubr.bf16.mxu1 %v14052_v3 }
 0x131   : > { %8192 = vmatmul.mubr.msk.bf16.gmra.mrb[40].mxu0 %vm527_vm1, %v10680_v57  ;;  %8103 = vmatmul.mubr.msk.bf16.gmra.mrb[124].mxu1 %vm527_vm1, %v10887_v15 }
 0x132   : > { %1912 = vmatprep.mubr.bf16.mxu0 %v14052_v3  ;;  %1031 = vmatprep.mubr.bf16.mxu1 %v14052_v3 }
 0x139   : > { %8193 = vmatmul.mubr.msk.bf16.gmra.mrb[44].mxu0 %vm527_vm1, %v10687_v60  ;;  %8104 = vmatmul.mubr.msk.bf16.gmra.mrb[128].mxu1 %vm527_vm1, %v10894_v19 }
 0x13a   : > { %1922 = vmatprep.mubr.bf16.mxu0 %v14052_v3  ;;  %1041 = vmatprep.mubr.bf16.mxu1 %v14052_v3 }
 0x141   : > { %8194 = vmatmul.mubr.msk.bf16.gmra.mrb[48].mxu0 %vm527_vm1, %v10694_v63  ;;  %8105 = vmatmul.mubr.msk.bf16.gmra.mrb[132].mxu1 %vm527_vm1, %v10901_v27 }
 0x142   : > { %1932 = vmatprep.mubr.bf16.mxu0 %v14052_v3  ;;  %1051 = vmatprep.mubr.bf16.mxu1 %v14052_v3 }
 0x149   : > { %8195 = vmatmul.mubr.msk.bf16.gmra.mrb[52].mxu0 %vm527_vm1, %v10701_v2  ;;  %8106 = vmatmul.mubr.msk.bf16.gmra.mrb[136].mxu1 %vm527_vm1, %v10908_v33 }
 0x14a   : > { %1942 = vmatprep.mubr.bf16.mxu0 %v14052_v3  ;;  %1061 = vmatprep.mubr.bf16.mxu1 %v14052_v3 }
 0x151   : > { %8196 = vmatmul.mubr.msk.bf16.gmra.mrb[56].mxu0 %vm527_vm1, %v10708_v8  ;;  %8107 = vmatmul.mubr.msk.bf16.gmra.mrb[140].mxu1 %vm527_vm1, %v10924_v43 }
 0x152   : > { %1952 = vmatprep.mubr.bf16.mxu0 %v14052_v3  ;;  %1071 = vmatprep.mubr.bf16.mxu1 %v14052_v3 }
 0x159   : > { %8197 = vmatmul.mubr.msk.bf16.gmra.mrb[60].mxu0 %vm527_vm1, %v10715_v11  ;;  %8108 = vmatmul.mubr.msk.bf16.gmra.mrb[144].mxu1 %vm527_vm1, %v10942_v59 }
 0x15a   : > { %1962 = vmatprep.mubr.bf16.mxu0 %v14052_v3  ;;  %1081 = vmatprep.mubr.bf16.mxu1 %v14052_v3 }
 0x161   : > { %8198 = vmatmul.mubr.msk.bf16.gmra.mrb[64].mxu0 %vm527_vm1, %v10722_v14  ;;  %8109 = vmatmul.mubr.msk.bf16.gmra.mrb[148].mxu1 %vm527_vm1, %v10958_v1 }
 0x162   : > { %1972 = vmatprep.mubr.bf16.mxu0 %v14052_v3  ;;  %1091 = vmatprep.mubr.bf16.mxu1 %v14052_v3 }
 0x169   : > { %8199 = vmatmul.mubr.msk.bf16.gmra.mrb[68].mxu0 %vm527_vm1, %v10729_v17  ;;  %8110 = vmatmul.mubr.msk.bf16.gmra.mrb[152].mxu1 %vm527_vm1, %v10968_v9 }
 0x16a   : > { %1982 = vmatprep.mubr.bf16.mxu0 %v14052_v3  ;;  %1101 = vmatprep.mubr.bf16.mxu1 %v14052_v3 }
 0x171   : > { %8200 = vmatmul.mubr.msk.bf16.gmra.mrb[72].mxu0 %vm527_vm1, %v10736_v21  ;;  %8111 = vmatmul.mubr.msk.bf16.gmra.mrb[156].mxu1 %vm527_vm1, %v10978_v12 }
 0x172   : > { %1992 = vmatprep.mubr.bf16.mxu0 %v14052_v3  ;;  %1111 = vmatprep.mubr.bf16.mxu1 %v14052_v3 }
 0x179   : > { %8201 = vmatmul.mubr.msk.bf16.gmra.mrb[76].mxu0 %vm527_vm1, %v10743_v25  ;;  %8112 = vmatmul.mubr.msk.bf16.gmra.mrb[160].mxu1 %vm527_vm1, %v10988_v16 }
 0x17a   : > { %2002 = vmatprep.mubr.bf16.mxu0 %v14052_v3  ;;  %1121 = vmatprep.mubr.bf16.mxu1 %v14052_v3 }
 0x181   : > { %8202 = vmatmul.mubr.msk.bf16.gmra.mrb[80].mxu0 %vm527_vm1, %v10750_v30  ;;  %8113 = vmatmul.mubr.msk.bf16.gmra.mrb[164].mxu1 %vm527_vm1, %v10998_v22 }
 0x182   : > { %2012 = vmatprep.mubr.bf16.mxu0 %v14052_v3  ;;  %1131 = vmatprep.mubr.bf16.mxu1 %v14052_v3 }
 0x189   : > { %8203 = vmatmul.mubr.msk.bf16.gmra.mrb[84].mxu0 %vm527_vm1, %v10831_v40  ;;  %8114 = vmatmul.mubr.msk.bf16.gmra.mrb[168].mxu1 %vm527_vm1, %v11008_v31 }
 0x18a   : > { %2022 = vmatprep.mubr.bf16.mxu0 %v14052_v3  ;;  %1141 = vmatprep.mubr.bf16.mxu1 %v14052_v3 }
 0x191   : > { %8204 = vmatmul.mubr.msk.bf16.gmra.mrb[88].mxu0 %vm527_vm1, %v10838_v44  ;;  %8115 = vmatmul.mubr.msk.bf16.gmra.mrb[172].mxu1 %vm527_vm1, %v11018_v37 }
 0x192   : > { %2032 = vmatprep.mubr.bf16.mxu0 %v14052_v3  ;;  %1151 = vmatprep.mubr.bf16.mxu1 %v14052_v3 }
 0x199   : > { %8205 = vmatmul.mubr.msk.bf16.gmra.mrb[92].mxu0 %vm527_vm1, %v10845_v49  ;;  %8116 = vmatmul.mubr.msk.bf16.gmra.mrb[176].mxu1 %vm527_vm1, %v11028_v46 }
 0x19a   : > { %2042 = vmatprep.mubr.bf16.mxu0 %v14052_v3  ;;  %1161 = vmatprep.mubr.bf16.mxu1 %v14052_v3 }
 0x1a1   : > { %8206 = vmatmul.mubr.msk.bf16.gmra.mrb[96].mxu0 %vm527_vm1, %v10852_v53  ;;  %8117 = vmatmul.mubr.msk.bf16.gmra.mrb[180].mxu1 %vm527_vm1, %v11038_v52 }
 0x1a2   : > { %2052 = vmatprep.mubr.bf16.mxu0 %v14052_v3  ;;  %1171 = vmatprep.mubr.bf16.mxu1 %v14052_v3 }
 0x1a9   : > { %8207 = vmatmul.mubr.msk.bf16.gmra.mrb[100].mxu0 %vm527_vm1, %v10859_v58  ;;  %8118 = vmatmul.mubr.msk.bf16.gmra.mrb[184].mxu1 %vm527_vm1, %v11048_v61 }
 0x1aa   : > { %2062 = vmatprep.mubr.bf16.mxu0 %v14052_v3  ;;  %1181 = vmatprep.mubr.bf16.mxu1 %v14052_v3 }
 0x1b1   : > { %8208 = vmatmul.mubr.msk.bf16.gmra.mrb[104].mxu0 %vm527_vm1, %v10866_v62  ;;  %8119 = vmatmul.mubr.msk.bf16.gmra.mrb[188].mxu1 %vm527_vm1, %v11058_v4 }
 0x1b2   : > { %2072 = vmatprep.mubr.bf16.mxu0 %v14052_v3  ;;  %1504 = vmatprep.mubr.bf16.mxu1 %v14052_v3 }
 0x1b9   : > { %8209 = vmatmul.mubr.msk.bf16.gmra.mrb[108].mxu0 %vm527_vm1, %v10873_v5  ;;  %8150 = vmatmul.mubr.msk.bf16.vlgmr.msra.gmra.mrb[100].mxu1 %vm527_vm1, %v10831_v40 }
 0x1ba   : > { %2082 = vmatprep.mubr.bf16.mxu0 %v14052_v3  ;;  %1514 = vmatprep.mubr.bf16.mxu1 %v14052_v3 }
 0x1c1   : > { %8210 = vmatmul.mubr.msk.bf16.gmra.mrb[112].mxu0 %vm527_vm1, %v10880_v10  ;;  %8151 = vmatmul.mubr.msk.bf16.gmra.mrb[104].mxu1 %vm527_vm1, %v10838_v44 }
 0x1c2   : > { %2092 = vmatprep.mubr.bf16.mxu0 %v14052_v3  ;;  %1524 = vmatprep.mubr.bf16.mxu1 %v14052_v3 }
 0x1c9   : > { %8211 = vmatmul.mubr.msk.bf16.gmra.mrb[116].mxu0 %vm527_vm1, %v10887_v15  ;;  %8152 = vmatmul.mubr.msk.bf16.gmra.mrb[108].mxu1 %vm527_vm1, %v10845_v49 }
 0x1ca   : > { %2102 = vmatprep.mubr.bf16.mxu0 %v14052_v3  ;;  %1534 = vmatprep.mubr.bf16.mxu1 %v14052_v3 }
 0x1d1   : > { %8212 = vmatmul.mubr.msk.bf16.gmra.mrb[120].mxu0 %vm527_vm1, %v10894_v19  ;;  %8153 = vmatmul.mubr.msk.bf16.gmra.mrb[112].mxu1 %vm527_vm1, %v10852_v53 }
 0x1d2   : > { %2112 = vmatprep.mubr.bf16.mxu0 %v14052_v3  ;;  %1544 = vmatprep.mubr.bf16.mxu1 %v14052_v3 }
 0x1d9   : > { %8213 = vmatmul.mubr.msk.bf16.gmra.mrb[124].mxu0 %vm527_vm1, %v10901_v27  ;;  %8154 = vmatmul.mubr.msk.bf16.gmra.mrb[116].mxu1 %vm527_vm1, %v10859_v58 }
 0x1da   : > { %2122 = vmatprep.mubr.bf16.mxu0 %v14052_v3  ;;  %1554 = vmatprep.mubr.bf16.mxu1 %v14052_v3 }
 0x1e1   : > { %8214 = vmatmul.mubr.msk.bf16.gmra.mrb[128].mxu0 %vm527_vm1, %v10908_v33  ;;  %8155 = vmatmul.mubr.msk.bf16.gmra.mrb[120].mxu1 %vm527_vm1, %v10866_v62 }
 0x1e2   : > { %2132 = vmatprep.mubr.bf16.mxu0 %v14052_v3  ;;  %1564 = vmatprep.mubr.bf16.mxu1 %v14052_v3 }
 0x1e9   : > { %8215 = vmatmul.mubr.msk.bf16.gmra.mrb[132].mxu0 %vm527_vm1, %v10924_v43  ;;  %8156 = vmatmul.mubr.msk.bf16.gmra.mrb[124].mxu1 %vm527_vm1, %v10873_v5 }
 0x1ea   : > { %2142 = vmatprep.mubr.bf16.mxu0 %v14052_v3  ;;  %1574 = vmatprep.mubr.bf16.mxu1 %v14052_v3 }
 0x1f1   : > { %8216 = vmatmul.mubr.msk.bf16.gmra.mrb[136].mxu0 %vm527_vm1, %v10942_v59  ;;  %8157 = vmatmul.mubr.msk.bf16.gmra.mrb[128].mxu1 %vm527_vm1, %v10880_v10 }
 0x1f2   : > { %2152 = vmatprep.mubr.bf16.mxu0 %v14052_v3  ;;  %1584 = vmatprep.mubr.bf16.mxu1 %v14052_v3 }
 0x1f9   : > { %8217 = vmatmul.mubr.msk.bf16.gmra.mrb[140].mxu0 %vm527_vm1, %v10958_v1  ;;  %8158 = vmatmul.mubr.msk.bf16.gmra.mrb[132].mxu1 %vm527_vm1, %v10887_v15 }
 0x1fa   : > { %2162 = vmatprep.mubr.bf16.mxu0 %v14052_v3  ;;  %1594 = vmatprep.mubr.bf16.mxu1 %v14052_v3 }
 0x201   : > { %8218 = vmatmul.mubr.msk.bf16.gmra.mrb[144].mxu0 %vm527_vm1, %v10968_v9  ;;  %8159 = vmatmul.mubr.msk.bf16.gmra.mrb[136].mxu1 %vm527_vm1, %v10894_v19 }
 0x202   : > { %2172 = vmatprep.mubr.bf16.mxu0 %v14052_v3  ;;  %1604 = vmatprep.mubr.bf16.mxu1 %v14052_v3 }
 0x209   : > { %8219 = vmatmul.mubr.msk.bf16.gmra.mrb[148].mxu0 %vm527_vm1, %v10978_v12  ;;  %8160 = vmatmul.mubr.msk.bf16.gmra.mrb[140].mxu1 %vm527_vm1, %v10901_v27 }
 0x20a   : > { %2182 = vmatprep.mubr.bf16.mxu0 %v14052_v3  ;;  %1614 = vmatprep.mubr.bf16.mxu1 %v14052_v3 }
 0x211   : > { %8220 = vmatmul.mubr.msk.bf16.gmra.mrb[152].mxu0 %vm527_vm1, %v10988_v16  ;;  %8161 = vmatmul.mubr.msk.bf16.gmra.mrb[144].mxu1 %vm527_vm1, %v10908_v33 }
 0x212   : > { %2192 = vmatprep.mubr.bf16.mxu0 %v14052_v3  ;;  %1624 = vmatprep.mubr.bf16.mxu1 %v14052_v3 }
 0x219   : > { %8221 = vmatmul.mubr.msk.bf16.gmra.mrb[156].mxu0 %vm527_vm1, %v10998_v22  ;;  %8162 = vmatmul.mubr.msk.bf16.gmra.mrb[148].mxu1 %vm527_vm1, %v10924_v43 }
 0x21a   : > { %2202 = vmatprep.mubr.bf16.mxu0 %v14052_v3  ;;  %1634 = vmatprep.mubr.bf16.mxu1 %v14052_v3 }
 0x221   : > { %8222 = vmatmul.mubr.msk.bf16.gmra.mrb[160].mxu0 %vm527_vm1, %v11008_v31  ;;  %8163 = vmatmul.mubr.msk.bf16.gmra.mrb[152].mxu1 %vm527_vm1, %v10942_v59 }
 0x222   : > { %2212 = vmatprep.mubr.bf16.mxu0 %v14052_v3  ;;  %1644 = vmatprep.mubr.bf16.mxu1 %v14052_v3 }
 0x229   : > { %8223 = vmatmul.mubr.msk.bf16.gmra.mrb[164].mxu0 %vm527_vm1, %v11018_v37  ;;  %8164 = vmatmul.mubr.msk.bf16.gmra.mrb[156].mxu1 %vm527_vm1, %v10958_v1 }
 0x22a   : > { %2222 = vmatprep.mubr.bf16.mxu0 %v14052_v3  ;;  %1654 = vmatprep.mubr.bf16.mxu1 %v14052_v3 }
 0x231   : > { %8224 = vmatmul.mubr.msk.bf16.gmra.mrb[168].mxu0 %vm527_vm1, %v11028_v46  ;;  %8165 = vmatmul.mubr.msk.bf16.gmra.mrb[160].mxu1 %vm527_vm1, %v10968_v9 }
 0x232   : > { %2232 = vmatprep.mubr.bf16.mxu0 %v14052_v3  ;;  %1664 = vmatprep.mubr.bf16.mxu1 %v14052_v3 }
 0x239   : > { %8225 = vmatmul.mubr.msk.bf16.gmra.mrb[172].mxu0 %vm527_vm1, %v11038_v52  ;;  %8166 = vmatmul.mubr.msk.bf16.gmra.mrb[164].mxu1 %vm527_vm1, %v10978_v12 }
 0x23a   : > { %2242 = vmatprep.mubr.bf16.mxu0 %v14052_v3  ;;  %1674 = vmatprep.mubr.bf16.mxu1 %v14052_v3 }
 0x241   : > { %8226 = vmatmul.mubr.msk.bf16.gmra.mrb[176].mxu0 %vm527_vm1, %v11048_v61  ;;  %8167 = vmatmul.mubr.msk.bf16.gmra.mrb[168].mxu1 %vm527_vm1, %v10988_v16 }
 0x242   : > { %2252 = vmatprep.mubr.bf16.mxu0 %v14052_v3  ;;  %1684 = vmatprep.mubr.bf16.mxu1 %v14052_v3 }
 0x249   : > { %8227 = vmatmul.mubr.msk.bf16.gmra.mrb[180].mxu0 %vm527_vm1, %v11058_v4  ;;  %8168 = vmatmul.mubr.msk.bf16.gmra.mrb[172].mxu1 %vm527_vm1, %v10998_v22 }
 0x24a   : > { %2262 = vmatprep.mubr.bf16.mxu0 %v14052_v3  ;;  %1694 = vmatprep.mubr.bf16.mxu1 %v14052_v3 }
 0x251   : > { %8228 = vmatmul.mubr.msk.bf16.gmra.mrb[184].mxu0 %vm527_vm1, %v11068_v23  ;;  %8169 = vmatmul.mubr.msk.bf16.gmra.mrb[176].mxu1 %vm527_vm1, %v11008_v31 }
 0x252   : > { %2272 = vmatprep.mubr.bf16.mxu0 %v14052_v3  ;;  %1704 = vmatprep.mubr.bf16.mxu1 %v14052_v3 }
 0x259   : > { %8229 = vmatmul.mubr.msk.bf16.gmra.mrb[188].mxu0 %vm527_vm1, %v11078_v29  ;;  %8170 = vmatmul.mubr.msk.bf16.gmra.mrb[180].mxu1 %vm527_vm1, %v11018_v37 }
 0x25a   : > { %2542 = vmatprep.mubr.bf16.mxu0 %v14052_v3  ;;  %1714 = vmatprep.mubr.bf16.mxu1 %v14052_v3 }
 0x261   : > { %8239 = vmatmul.mubr.msk.bf16.vlgmr.msra.gmra.mrb[0].mxu0 %vm527_vm1, %v10621_v32  ;;  %v10199_v32 = vld [vmem:[%s14037_s1 + $0x94] ss:$8 sps:$4 sm:$0x3f]   ;;  %8171 = vmatmul.mubr.msk.bf16.gmra.mrb[184].mxu1 %vm527_vm1, %v11028_v46 }
 0x262   : > { %3251 = vmatpush1.bf16.msra.mxu0 %v10190_v18  ;;  %2552 = vmatprep.mubr.bf16.mxu0 %v14052_v3  ;;  %v11361_v18 = vpop.f32.mrb[15].mxu1 }
 0x263   : > { %8295 = vmatprep.subr.msk.bf16.mxu0 %vm672_vm0, %v10199_v32  ;;  %14117 = vst [vmem:[#allocation9_spill] sm:$0xff] %v11361_v18  ;;  %v11363_v32 = vpop.f32.mrb[16].mxu1  ;;  %1724 = vmatprep.mubr.bf16.mxu1 %v14052_v3 }
 0x264   : > { %14118 = vst [vmem:[#allocation10_spill] sm:$0xff] %v11363_v32 }
 0x269   : > { %8240 = vmatmul.mubr.msk.bf16.gmra.mrb[4].mxu0 %vm527_vm1, %v10628_v35  ;;  %v10201_v35 = vld [vmem:[%s14037_s1 + $0x90] ss:$8 sps:$4 sm:$0x3f]   ;;  %8172 = vmatmul.mubr.msk.bf16.gmra.mrb[188].mxu1 %vm527_vm1, %v11038_v52 }
 0x26a   : > { %2562 = vmatprep.mubr.bf16.mxu0 %v14052_v3  ;;  %v3245_v24 = vsel %vm672_vm0, %v10201_v35, 0  ;;  %v11370_v35 = vpop.f32.mrb[17].mxu1 }
 0x26b   : > { %3253 = vmatpush1.bf16.msra.mxu0 %v3245_v24  ;;  %14119 = vst [vmem:[#allocation11_spill] sm:$0xff] %v11370_v35  ;;  %v11373_v24 = vpop.f32.mrb[18].mxu1 }
 0x26c   : > { %14120 = vst [vmem:[#allocation12_spill] sm:$0xff] %v11373_v24  ;;  %v11375_v26 = vpop.f32.mrb[19].mxu1 }
 0x26d   : > { %14121 = vst [vmem:[#allocation13_spill] sm:$0xff] %v11375_v26  ;;  %v11377_v13 = vpop.f32.mrb[20].mxu1 }
 0x26e   : > { %14122 = vst [vmem:[#allocation14_spill] sm:$0xff] %v11377_v13  ;;  %v11384_v32 = vpop.f32.mrb[21].mxu1 }
 0x26f   : > { %14123 = vst [vmem:[#allocation15_spill] sm:$0xff] %v11384_v32  ;;  %v11387_v35 = vpop.f32.mrb[22].mxu1 }
 0x270   : > { %14124 = vst [vmem:[#allocation16_spill] sm:$0xff] %v11387_v35  ;;  %v11389_v18 = vpop.f32.mrb[23].mxu1 }
 0x271   : > { %8241 = vmatmul.mubr.msk.bf16.gmra.mrb[8].mxu0 %vm527_vm1, %v10635_v38  ;;  %14125 = vst [vmem:[#allocation17_spill] sm:$0xff] %v11389_v18  ;;  %v11391_v24 = vpop.f32.mrb[24].mxu1 }
 0x272   : > { %2572 = vmatprep.mubr.bf16.mxu0 %v14052_v3  ;;  %14126 = vst [vmem:[#allocation18_spill] sm:$0xff] %v11391_v24  ;;  %v11398_v13 = vpop.f32.mrb[25].mxu1 }
 0x273   : > { %14127 = vst [vmem:[#allocation19_spill] sm:$0xff] %v11398_v13  ;;  %v11401_v32 = vpop.f32.mrb[26].mxu1 }
 0x274   : > { %14128 = vst [vmem:[#allocation20_spill] sm:$0xff] %v11401_v32  ;;  %v11403_v26 = vpop.f32.mrb[27].mxu1 }
 0x275   : > { %v11405_v35 = vpop.f32.mrb[28].mxu1 }
 0x276   : > { %14129 = vst [vmem:[#allocation21_spill] sm:$0xff] %v11405_v35  ;;  %v11412_v24 = vpop.f32.mrb[29].mxu1 }
 0x277   : > { %14130 = vst [vmem:[#allocation22_spill] sm:$0xff] %v11412_v24  ;;  %v11415_v13 = vpop.f32.mrb[30].mxu1 }
 0x278   : > { %14131 = vst [vmem:[#allocation23_spill] sm:$0xff] %v11415_v13  ;;  %v11417_v18 = vpop.f32.mrb[31].mxu1 }
 0x279   : > { %8242 = vmatmul.mubr.msk.bf16.gmra.mrb[12].mxu0 %vm527_vm1, %v10642_v41  ;;  %14132 = vst [vmem:[#allocation24_spill] sm:$0xff] %v11417_v18  ;;  %v11419_v32 = vpop.f32.mrb[32].mxu1 }
 0x27a   : > { %2582 = vmatprep.mubr.bf16.mxu0 %v14052_v3  ;;  %14133 = vst [vmem:[#allocation25_spill] sm:$0xff] %v11419_v32  ;;  %v11426_v35 = vpop.f32.mrb[33].mxu1 }
 0x27b   : > { %14134 = vst [vmem:[#allocation26_spill] sm:$0xff] %v11426_v35 }
 0x281   : > { %8243 = vmatmul.mubr.msk.bf16.gmra.mrb[16].mxu0 %vm527_vm1, %v10652_v45 }
 0x282   : > { %2592 = vmatprep.mubr.bf16.mxu0 %v14052_v3 }
 0x289   : > { %8244 = vmatmul.mubr.msk.bf16.gmra.mrb[20].mxu0 %vm527_vm1, %v10659_v48 }
 0x28a   : > { %2602 = vmatprep.mubr.bf16.mxu0 %v14052_v3 }
 0x291   : > { %8245 = vmatmul.mubr.msk.bf16.gmra.mrb[24].mxu0 %vm527_vm1, %v10666_v51 }
 0x292   : > { %2612 = vmatprep.mubr.bf16.mxu0 %v14052_v3 }
 0x299   : > { %8246 = vmatmul.mubr.msk.bf16.gmra.mrb[28].mxu0 %vm527_vm1, %v10673_v54 }
 0x29a   : > { %2622 = vmatprep.mubr.bf16.mxu0 %v14052_v3 }
 0x2a1   : > { %8247 = vmatmul.mubr.msk.bf16.gmra.mrb[32].mxu0 %vm527_vm1, %v10680_v57 }
 0x2a2   : > { %2632 = vmatprep.mubr.bf16.mxu0 %v14052_v3 }
 0x2a9   : > { %8248 = vmatmul.mubr.msk.bf16.gmra.mrb[36].mxu0 %vm527_vm1, %v10687_v60 }
 0x2aa   : > { %2642 = vmatprep.mubr.bf16.mxu0 %v14052_v3 }
 0x2b1   : > { %8249 = vmatmul.mubr.msk.bf16.gmra.mrb[40].mxu0 %vm527_vm1, %v10694_v63 }
 0x2b2   : > { %2652 = vmatprep.mubr.bf16.mxu0 %v14052_v3 }
 0x2b9   : > { %8250 = vmatmul.mubr.msk.bf16.gmra.mrb[44].mxu0 %vm527_vm1, %v10701_v2 }
 0x2ba   : > { %2662 = vmatprep.mubr.bf16.mxu0 %v14052_v3 }
 0x2c1   : > { %8251 = vmatmul.mubr.msk.bf16.gmra.mrb[48].mxu0 %vm527_vm1, %v10708_v8 }
 0x2c2   : > { %2672 = vmatprep.mubr.bf16.mxu0 %v14052_v3 }
 0x2c9   : > { %8252 = vmatmul.mubr.msk.bf16.gmra.mrb[52].mxu0 %vm527_vm1, %v10715_v11 }
 0x2ca   : > { %2682 = vmatprep.mubr.bf16.mxu0 %v14052_v3 }
 0x2d1   : > { %8253 = vmatmul.mubr.msk.bf16.gmra.mrb[56].mxu0 %vm527_vm1, %v10722_v14 }
 0x2d2   : > { %2692 = vmatprep.mubr.bf16.mxu0 %v14052_v3 }
 0x2d9   : > { %8254 = vmatmul.mubr.msk.bf16.gmra.mrb[60].mxu0 %vm527_vm1, %v10729_v17 }
 0x2da   : > { %2702 = vmatprep.mubr.bf16.mxu0 %v14052_v3 }
 0x2e1   : > { %8255 = vmatmul.mubr.msk.bf16.gmra.mrb[64].mxu0 %vm527_vm1, %v10736_v21 }
 0x2e2   : > { %2712 = vmatprep.mubr.bf16.mxu0 %v14052_v3 }
 0x2e9   : > { %8256 = vmatmul.mubr.msk.bf16.gmra.mrb[68].mxu0 %vm527_vm1, %v10743_v25 }
 0x2ea   : > { %2722 = vmatprep.mubr.bf16.mxu0 %v14052_v3 }
 0x2f1   : > { %8257 = vmatmul.mubr.msk.bf16.gmra.mrb[72].mxu0 %vm527_vm1, %v10750_v30 }
 0x2f2   : > { %2732 = vmatprep.mubr.bf16.mxu0 %v14052_v3 }
 0x2f9   : > { %8258 = vmatmul.mubr.msk.bf16.gmra.mrb[76].mxu0 %vm527_vm1, %v10831_v40 }
 0x2fa   : > { %2742 = vmatprep.mubr.bf16.mxu0 %v14052_v3 }
 0x301   : > { %8259 = vmatmul.mubr.msk.bf16.gmra.mrb[80].mxu0 %vm527_vm1, %v10838_v44 }
 0x302   : > { %2752 = vmatprep.mubr.bf16.mxu0 %v14052_v3 }
 0x309   : > { %8260 = vmatmul.mubr.msk.bf16.gmra.mrb[84].mxu0 %vm527_vm1, %v10845_v49 }
 0x30a   : > { %2762 = vmatprep.mubr.bf16.mxu0 %v14052_v3 }
 0x311   : > { %8261 = vmatmul.mubr.msk.bf16.gmra.mrb[88].mxu0 %vm527_vm1, %v10852_v53 }
 0x312   : > { %2772 = vmatprep.mubr.bf16.mxu0 %v14052_v3 }
 0x319   : > { %8262 = vmatmul.mubr.msk.bf16.gmra.mrb[92].mxu0 %vm527_vm1, %v10859_v58 }
 0x31a   : > { %2782 = vmatprep.mubr.bf16.mxu0 %v14052_v3 }
 0x321   : > { %8263 = vmatmul.mubr.msk.bf16.gmra.mrb[96].mxu0 %vm527_vm1, %v10866_v62 }
 0x322   : > { %2792 = vmatprep.mubr.bf16.mxu0 %v14052_v3 }
 0x329   : > { %8264 = vmatmul.mubr.msk.bf16.gmra.mrb[100].mxu0 %vm527_vm1, %v10873_v5 }
 0x32a   : > { %2802 = vmatprep.mubr.bf16.mxu0 %v14052_v3 }
 0x331   : > { %8265 = vmatmul.mubr.msk.bf16.gmra.mrb[104].mxu0 %vm527_vm1, %v10880_v10 }
 0x332   : > { %2812 = vmatprep.mubr.bf16.mxu0 %v14052_v3 }
 0x339   : > { %8266 = vmatmul.mubr.msk.bf16.gmra.mrb[108].mxu0 %vm527_vm1, %v10887_v15 }
 0x33a   : > { %2822 = vmatprep.mubr.bf16.mxu0 %v14052_v3 }
 0x341   : > { %8267 = vmatmul.mubr.msk.bf16.gmra.mrb[112].mxu0 %vm527_vm1, %v10894_v19 }
 0x342   : > { %2832 = vmatprep.mubr.bf16.mxu0 %v14052_v3 }
 0x349   : > { %8268 = vmatmul.mubr.msk.bf16.gmra.mrb[116].mxu0 %vm527_vm1, %v10901_v27 }
 0x34a   : > { %2842 = vmatprep.mubr.bf16.mxu0 %v14052_v3 }
 0x351   : > { %8269 = vmatmul.mubr.msk.bf16.gmra.mrb[120].mxu0 %vm527_vm1, %v10908_v33 }
 0x352   : > { %2852 = vmatprep.mubr.bf16.mxu0 %v14052_v3 }
 0x359   : > { %8270 = vmatmul.mubr.msk.bf16.gmra.mrb[124].mxu0 %vm527_vm1, %v10924_v43 }
 0x35a   : > { %2862 = vmatprep.mubr.bf16.mxu0 %v14052_v3 }
 0x361   : > { %8271 = vmatmul.mubr.msk.bf16.gmra.mrb[128].mxu0 %vm527_vm1, %v10942_v59 }
 0x362   : > { %2872 = vmatprep.mubr.bf16.mxu0 %v14052_v3 }
 0x369   : > { %8272 = vmatmul.mubr.msk.bf16.gmra.mrb[132].mxu0 %vm527_vm1, %v10958_v1 }
 0x36a   : > { %2882 = vmatprep.mubr.bf16.mxu0 %v14052_v3 }
 0x371   : > { %8273 = vmatmul.mubr.msk.bf16.gmra.mrb[136].mxu0 %vm527_vm1, %v10968_v9 }
 0x372   : > { %2892 = vmatprep.mubr.bf16.mxu0 %v14052_v3 }
 0x379   : > { %8274 = vmatmul.mubr.msk.bf16.gmra.mrb[140].mxu0 %vm527_vm1, %v10978_v12 }
 0x37a   : > { %2902 = vmatprep.mubr.bf16.mxu0 %v14052_v3 }
 0x381   : > { %8275 = vmatmul.mubr.msk.bf16.gmra.mrb[144].mxu0 %vm527_vm1, %v10988_v16 }
 0x382   : > { %2912 = vmatprep.mubr.bf16.mxu0 %v14052_v3 }
 0x389   : > { %8276 = vmatmul.mubr.msk.bf16.gmra.mrb[148].mxu0 %vm527_vm1, %v10998_v22 }
 0x38a   : > { %2922 = vmatprep.mubr.bf16.mxu0 %v14052_v3 }
 0x391   : > { %8277 = vmatmul.mubr.msk.bf16.gmra.mrb[152].mxu0 %vm527_vm1, %v11008_v31 }
 0x392   : > { %2932 = vmatprep.mubr.bf16.mxu0 %v14052_v3 }
 0x399   : > { %8278 = vmatmul.mubr.msk.bf16.gmra.mrb[156].mxu0 %vm527_vm1, %v11018_v37 }
 0x39a   : > { %2942 = vmatprep.mubr.bf16.mxu0 %v14052_v3 }
 0x3a1   : > { %8279 = vmatmul.mubr.msk.bf16.gmra.mrb[160].mxu0 %vm527_vm1, %v11028_v46 }
 0x3a2   : > { %2952 = vmatprep.mubr.bf16.mxu0 %v14052_v3 }
 0x3a9   : > { %8280 = vmatmul.mubr.msk.bf16.gmra.mrb[164].mxu0 %vm527_vm1, %v11038_v52 }
 0x3aa   : > { %2962 = vmatprep.mubr.bf16.mxu0 %v14052_v3 }
 0x3b1   : > { %8281 = vmatmul.mubr.msk.bf16.gmra.mrb[168].mxu0 %vm527_vm1, %v11048_v61  ;;  %v11429_v61 = vpop.f32.mrb[34].mxu1 }
 0x3b2   : > { %2972 = vmatprep.mubr.bf16.mxu0 %v14052_v3  ;;  %14135 = vst [vmem:[#allocation27_spill] sm:$0xff] %v11429_v61  ;;  %v11431_v13 = vpop.f32.mrb[35].mxu1 }
 0x3b3   : > { %14136 = vst [vmem:[#allocation28_spill] sm:$0xff] %v11431_v13  ;;  %v11433_v18 = vpop.f32.mrb[36].mxu1 }
 0x3b4   : > { %14137 = vst [vmem:[#allocation29_spill] sm:$0xff] %v11433_v18 }
 0x3b9   : > { %8282 = vmatmul.mubr.msk.bf16.gmra.mrb[172].mxu0 %vm527_vm1, %v11058_v4  ;;  %v11440_v4 = vpop.f32.mrb[37].mxu1 }
 0x3ba   : > { %2982 = vmatprep.mubr.bf16.mxu0 %v14052_v3  ;;  %14138 = vst [vmem:[#allocation30_spill] sm:$0xff] %v11440_v4  ;;  %v11443_v35 = vpop.f32.mrb[38].mxu1  ;;  %v436_v4 = vld [vmem:[%s10570_s25 + $0x340] sm:$0xff] }
 0x3bb   : > { %14139 = vst [vmem:[#allocation31_spill] sm:$0xff] %v11443_v35  ;;  %v11445_v61 = vpop.f32.mrb[39].mxu1  ;;  %v437_v35 = vld [vmem:[%s10570_s25 + $0x348] sm:$0xff] }
 0x3bc   : > { %14140 = vst [vmem:[#allocation32_spill] sm:$0xff] %v11445_v61  ;;  %v11447_v13 = vpop.f32.mrb[40].mxu1  ;;  %v11465_v32 = vpack.c.bf16 %v437_v35, %v436_v4 }
 0x3bd   : > { %14141 = vst [vmem:[#allocation33_spill] sm:$0xff] %v11447_v13 }
 0x3be   : > { %14145 = vst [vmem:[#allocation37_spill] sm:$0xff] %v11465_v32 }
 0x3c1   : > { %8283 = vmatmul.mubr.msk.bf16.gmra.mrb[176].mxu0 %vm527_vm1, %v11068_v23  ;;  %v11454_v23 = vpop.f32.mrb[41].mxu1 }
 0x3c2   : > { %2992 = vmatprep.mubr.bf16.mxu0 %v14052_v3  ;;  %14142 = vst [vmem:[#allocation34_spill] sm:$0xff] %v11454_v23  ;;  %v11459_v18 = vpop.f32.mrb[42].mxu1  ;;  %v438_v23 = vld [vmem:[%s10570_s25 + $0x350] sm:$0xff] }
 0x3c3   : > { %14143 = vst [vmem:[#allocation35_spill] sm:$0xff] %v11459_v18  ;;  %v11461_v61 = vpop.f32.mrb[43].mxu1  ;;  %v439_v18 = vld [vmem:[%s10570_s25 + $0x358] sm:$0xff] }
 0x3c4   : > { %14144 = vst [vmem:[#allocation36_spill] sm:$0xff] %v11461_v61  ;;  %v11463_v13 = vpop.f32.mrb[44].mxu1  ;;  %v11483_v35 = vpack.c.bf16 %v439_v18, %v438_v23 }
 0x3c6   : > { %14149 = vst [vmem:[#allocation41_spill] sm:$0xff] %v11483_v35 }
 0x3c9   : > { %8284 = vmatmul.mubr.msk.bf16.gmra.mrb[180].mxu0 %vm527_vm1, %v11078_v29  ;;  %v11472_v29 = vpop.f32.mrb[45].mxu1 }
 0x3ca   : > { %3002 = vmatprep.mubr.bf16.mxu0 %v14052_v3  ;;  %14146 = vst [vmem:[#allocation38_spill] sm:$0xff] %v11472_v29  ;;  %v11477_v24 = vpop.f32.mrb[46].mxu1 }
 0x3cb   : > { %14147 = vst [vmem:[#allocation39_spill] sm:$0xff] %v11477_v24  ;;  %v11479_v61 = vpop.f32.mrb[47].mxu1 }
 0x3cc   : > { %14148 = vst [vmem:[#allocation40_spill] sm:$0xff] %v11479_v61  ;;  %v11481_v4 = vpop.f32.mrb[48].mxu1 }
 0x3d1   : > { %8285 = vmatmul.mubr.msk.bf16.gmra.mrb[184].mxu0 %vm527_vm1, %v11465_v32  ;;  %v11490_v32 = vpop.f32.mrb[49].mxu1 }
 0x3d2   : > { %3012 = vmatprep.mubr.bf16.mxu0 %v14052_v3  ;;  %v11493_v29 = vpop.f32.mrb[50].mxu1 }
 0x3d3   : > { %14150 = vst [vmem:[#allocation42_spill] sm:$0xff] %v11493_v29  ;;  %v11495_v24 = vpop.f32.mrb[51].mxu1 }
 0x3d4   : > { %v11497_v61 = vpop.f32.mrb[52].mxu1 }
 0x3d5   : > { %14151 = vst [vmem:[#allocation43_spill] sm:$0xff] %v11497_v61  ;;  %v11504_v23 = vpop.f32.mrb[53].mxu1 }
 0x3d6   : > { %14152 = vst [vmem:[#allocation44_spill] sm:$0xff] %v11504_v23  ;;  %v11507_v18 = vpop.f32.mrb[54].mxu1 }
 0x3d7   : > { %14153 = vst [vmem:[#allocation45_spill] sm:$0xff] %v11507_v18 }
 0x3d9   : > { %8286 = vmatmul.mubr.msk.bf16.gmra.mrb[188].mxu0 %vm527_vm1, %v11483_v35  ;;  %v11509_v35 = vpop.f32.mrb[55].mxu1 }
 0x3da   : > { %3282 = vmatprep.mubr.bf16.mxu0 %v14052_v3  ;;  %v11511_v29 = vpop.f32.mrb[56].mxu1 }
 0x3db   : > { %14154 = vst [vmem:[#allocation46_spill] sm:$0xff] %v11511_v29  ;;  %v11518_v61 = vpop.f32.mrb[57].mxu1 }
 0x3dc   : > { %14155 = vst [vmem:[#allocation47_spill] sm:$0xff] %v11518_v61 }
 0x3e1   : > { %8296 = vmatmul.mubr.msk.bf16.vlgmr.msra.gmra.mrb[0].mxu0 %vm527_vm1, %v10635_v38  ;;  %v11521_v38 = vpop.f32.mrb[58].mxu1 }
 0x3e2   : > { %3292 = vmatprep.mubr.bf16.mxu0 %v14052_v3  ;;  %14156 = vst [vmem:[#allocation48_spill] sm:$0xff] %v11521_v38  ;;  %v11523_v23 = vpop.f32.mrb[59].mxu1 }
 0x3e3   : > { %v11525_v18 = vpop.f32.mrb[60].mxu1 }
 0x3e4   : > { %14157 = vst [vmem:[#allocation49_spill] sm:$0xff] %v11525_v18  ;;  %v11532_v29 = vpop.f32.mrb[61].mxu1 }
 0x3e5   : > { %14158 = vst [vmem:[#allocation50_spill] sm:$0xff] %v11532_v29 }
 0x3e9   : > { %8297 = vmatmul.mubr.msk.bf16.gmra.mrb[4].mxu0 %vm527_vm1, %v10642_v41  ;;  %v11535_v41 = vpop.f32.mrb[62].mxu1 }
 0x3ea   : > { %3302 = vmatprep.mubr.bf16.mxu0 %v14052_v3  ;;  %14159 = vst [vmem:[#allocation51_spill] sm:$0xff] %v11535_v41  ;;  %v11537_v61 = vpop.f32.mrb[63].mxu1 }
 0x3eb   : > { %v11539_v38 = vpop.f32.mrb[64].mxu1 }
 0x3ec   : > { %14160 = vst [vmem:[#allocation52_spill] sm:$0xff] %v11539_v38  ;;  %v11546_v18 = vpop.f32.mrb[65].mxu1 }
 0x3ed   : > { %14161 = vst [vmem:[#allocation53_spill] sm:$0xff] %v11546_v18 }
 0x3f1   : > { %8298 = vmatmul.mubr.msk.bf16.gmra.mrb[8].mxu0 %vm527_vm1, %v10652_v45  ;;  %v11549_v45 = vpop.f32.mrb[66].mxu1 }
 0x3f2   : > { %3312 = vmatprep.mubr.bf16.mxu0 %v14052_v3  ;;  %14162 = vst [vmem:[#allocation54_spill] sm:$0xff] %v11549_v45  ;;  %v11551_v29 = vpop.f32.mrb[67].mxu1 }
 0x3f3   : > { %v11553_v41 = vpop.f32.mrb[68].mxu1 }
 0x3f4   : > { %14163 = vst [vmem:[#allocation55_spill] sm:$0xff] %v11553_v41  ;;  %v11560_v38 = vpop.f32.mrb[69].mxu1 }
 0x3f5   : > { %14164 = vst [vmem:[#allocation56_spill] sm:$0xff] %v11560_v38 }
 0x3f9   : > { %8299 = vmatmul.mubr.msk.bf16.gmra.mrb[12].mxu0 %vm527_vm1, %v10659_v48  ;;  %v11563_v48 = vpop.f32.mrb[70].mxu1 }
 0x3fa   : > { %3322 = vmatprep.mubr.bf16.mxu0 %v14052_v3  ;;  %14165 = vst [vmem:[#allocation57_spill] sm:$0xff] %v11563_v48  ;;  %v11565_v18 = vpop.f32.mrb[71].mxu1 }
 0x3fb   : > { %v11567_v45 = vpop.f32.mrb[72].mxu1 }
 0x3fc   : > { %14166 = vst [vmem:[#allocation58_spill] sm:$0xff] %v11567_v45  ;;  %v11574_v41 = vpop.f32.mrb[73].mxu1 }
 0x3fd   : > { %14167 = vst [vmem:[#allocation59_spill] sm:$0xff] %v11574_v41 }
 0x401   : > { %8300 = vmatmul.mubr.msk.bf16.gmra.mrb[16].mxu0 %vm527_vm1, %v10666_v51  ;;  %v11577_v51 = vpop.f32.mrb[74].mxu1 }
 0x402   : > { %3332 = vmatprep.mubr.bf16.mxu0 %v14052_v3  ;;  %14168 = vst [vmem:[#allocation60_spill] sm:$0xff] %v11577_v51  ;;  %v11579_v38 = vpop.f32.mrb[75].mxu1 }
 0x403   : > { %v11581_v48 = vpop.f32.mrb[76].mxu1 }
 0x404   : > { %14169 = vst [vmem:[#allocation61_spill] sm:$0xff] %v11581_v48  ;;  %v11588_v45 = vpop.f32.mrb[77].mxu1 }
 0x405   : > { %14170 = vst [vmem:[#allocation62_spill] sm:$0xff] %v11588_v45 }
 0x409   : > { %8301 = vmatmul.mubr.msk.bf16.gmra.mrb[20].mxu0 %vm527_vm1, %v10673_v54  ;;  %v11591_v54 = vpop.f32.mrb[78].mxu1 }
 0x40a   : > { %3342 = vmatprep.mubr.bf16.mxu0 %v14052_v3  ;;  %14171 = vst [vmem:[#allocation63_spill] sm:$0xff] %v11591_v54  ;;  %v11593_v41 = vpop.f32.mrb[79].mxu1 }
 0x40b   : > { %14172 = vst [vmem:[#allocation64_spill] sm:$0xff] %v11593_v41  ;;  %v11595_v51 = vpop.f32.mrb[80].mxu1 }
 0x40c   : > { %14173 = vst [vmem:[#allocation65_spill] sm:$0xff] %v11595_v51  ;;  %v11602_v48 = vpop.f32.mrb[81].mxu1 }
 0x40d   : > { %14174 = vst [vmem:[#allocation66_spill] sm:$0xff] %v11602_v48 }
 0x411   : > { %8302 = vmatmul.mubr.msk.bf16.gmra.mrb[24].mxu0 %vm527_vm1, %v10680_v57  ;;  %v11605_v57 = vpop.f32.mrb[82].mxu1 }
 0x412   : > { %3352 = vmatprep.mubr.bf16.mxu0 %v14052_v3  ;;  %v11607_v45 = vpop.f32.mrb[83].mxu1 }
 0x413   : > { %14175 = vst [vmem:[#allocation67_spill] sm:$0xff] %v11607_v45  ;;  %v11609_v54 = vpop.f32.mrb[84].mxu1 }
 0x414   : > { %14176 = vst [vmem:[#allocation68_spill] sm:$0xff] %v11609_v54  ;;  %v11615_v51 = vpop.f32.mrb[85].mxu1 }
 0x415   : > { %14177 = vst [vmem:[#allocation69_spill] sm:$0xff] %v11615_v51 }
 0x419   : > { %8303 = vmatmul.mubr.msk.bf16.gmra.mrb[28].mxu0 %vm527_vm1, %v10687_v60  ;;  %v11618_v60 = vpop.f32.mrb[86].mxu1 }
 0x41a   : > { %3362 = vmatprep.mubr.bf16.mxu0 %v14052_v3  ;;  %14178 = vst [vmem:[#allocation70_spill] sm:$0xff] %v11618_v60  ;;  %v11620_v48 = vpop.f32.mrb[87].mxu1 }
 0x41b   : > { %v11622_v41 = vpop.f32.mrb[88].mxu1 }
 0x41c   : > { %14179 = vst [vmem:[#allocation71_spill] sm:$0xff] %v11622_v41  ;;  %v11626_v54 = vpop.f32.mrb[89].mxu1 }
 0x41d   : > { %14180 = vst [vmem:[#allocation72_spill] sm:$0xff] %v11626_v54  ;;  %v11629_v45 = vpop.f32.mrb[90].mxu1 }
 0x421   : > { %8304 = vmatmul.mubr.msk.bf16.gmra.mrb[32].mxu0 %vm527_vm1, %v10694_v63  ;;  %v11631_v63 = vpop.f32.mrb[91].mxu1 }
 0x422   : > { %3372 = vmatprep.mubr.bf16.mxu0 %v14052_v3  ;;  %14181 = vst [vmem:[#allocation73_spill] sm:$0xff] %v11631_v63  ;;  %v11633_v51 = vpop.f32.mrb[92].mxu1 }
 0x423   : > { %14182 = vst [vmem:[#allocation74_spill] sm:$0xff] %v11633_v51  ;;  %v11637_v60 = vpop.f32.mrb[93].mxu1 }
 0x424   : > { %14183 = vst [vmem:[#allocation75_spill] sm:$0xff] %v11637_v60  ;;  %v11640_v41 = vpop.f32.mrb[94].mxu1 }
 0x429   : > { %8305 = vmatmul.mubr.msk.bf16.gmra.mrb[36].mxu0 %vm527_vm1, %v10701_v2  ;;  %v11642_v2 = vpop.f32.mrb[95].mxu1 }
 0x42a   : > { %3382 = vmatprep.mubr.bf16.mxu0 %v14052_v3  ;;  %14184 = vst [vmem:[#allocation76_spill] sm:$0xff] %v11642_v2  ;;  %v11646_v54 = vpop.f32.mrb[96].mxu1 }
 0x42b   : > { %14185 = vst [vmem:[#allocation77_spill] sm:$0xff] %v11646_v54  ;;  %v11649_v63 = vpop.f32.mrb[97].mxu1 }
 0x42c   : > { %14186 = vst [vmem:[#allocation78_spill] sm:$0xff] %v11649_v63  ;;  %v11651_v51 = vpop.f32.mrb[98].mxu1 }
 0x431   : > { %8306 = vmatmul.mubr.msk.bf16.gmra.mrb[40].mxu0 %vm527_vm1, %v10708_v8  ;;  %v11653_v8 = vpop.f32.mrb[99].mxu1 }
 0x432   : > { %3392 = vmatprep.mubr.bf16.mxu0 %v14052_v3  ;;  %14187 = vst [vmem:[#allocation79_spill] sm:$0xff] %v11653_v8  ;;  %v11657_v60 = vpop.f32.mrb[100].mxu1 }
 0x433   : > { %14188 = vst [vmem:[#allocation80_spill] sm:$0xff] %v11657_v60  ;;  %v11660_v2 = vpop.f32.mrb[101].mxu1 }
 0x434   : > { %14189 = vst [vmem:[#allocation81_spill] sm:$0xff] %v11660_v2 }
 0x439   : > { %8307 = vmatmul.mubr.msk.bf16.gmra.mrb[44].mxu0 %vm527_vm1, %v10715_v11  ;;  %v11662_v11 = vpop.f32.mrb[102].mxu1 }
 0x43a   : > { %3402 = vmatprep.mubr.bf16.mxu0 %v14052_v3  ;;  %v11664_v54 = vpop.f32.mrb[103].mxu1 }
 0x43b   : > { %14190 = vst [vmem:[#allocation82_spill] sm:$0xff] %v11664_v54  ;;  %v11668_v63 = vpop.f32.mrb[104].mxu1 }
 0x43c   : > { %14191 = vst [vmem:[#allocation83_spill] sm:$0xff] %v11668_v63  ;;  %v11671_v8 = vpop.f32.mrb[105].mxu1 }
 0x43d   : > { %14192 = vst [vmem:[#allocation84_spill] sm:$0xff] %v11671_v8 }
 0x441   : > { %8308 = vmatmul.mubr.msk.bf16.gmra.mrb[48].mxu0 %vm527_vm1, %v10722_v14  ;;  %v11673_v14 = vpop.f32.mrb[106].mxu1 }
 0x442   : > { %3412 = vmatprep.mubr.bf16.mxu0 %v14052_v3  ;;  %v11675_v60 = vpop.f32.mrb[107].mxu1 }
 0x443   : > { %14193 = vst [vmem:[#allocation85_spill] sm:$0xff] %v11675_v60  ;;  %v11679_v2 = vpop.f32.mrb[108].mxu1 }
 0x444   : > { %14194 = vst [vmem:[#allocation86_spill] sm:$0xff] %v11679_v2  ;;  %v11682_v54 = vpop.f32.mrb[109].mxu1 }
 0x445   : > { %14195 = vst [vmem:[#allocation87_spill] sm:$0xff] %v11682_v54 }
 0x449   : > { %8309 = vmatmul.mubr.msk.bf16.gmra.mrb[52].mxu0 %vm527_vm1, %v10729_v17  ;;  %v11684_v17 = vpop.f32.mrb[110].mxu1 }
 0x44a   : > { %3422 = vmatprep.mubr.bf16.mxu0 %v14052_v3  ;;  %v11686_v63 = vpop.f32.mrb[111].mxu1 }
 0x44b   : > { %14196 = vst [vmem:[#allocation88_spill] sm:$0xff] %v11686_v63  ;;  %v11690_v8 = vpop.f32.mrb[112].mxu1 }
 0x44c   : > { %14197 = vst [vmem:[#allocation89_spill] sm:$0xff] %v11690_v8  ;;  %v11693_v60 = vpop.f32.mrb[113].mxu1 }
 0x44d   : > { %14198 = vst [vmem:[#allocation90_spill] sm:$0xff] %v11693_v60 }
 0x451   : > { %8310 = vmatmul.mubr.msk.bf16.gmra.mrb[56].mxu0 %vm527_vm1, %v10736_v21  ;;  %v11695_v21 = vpop.f32.mrb[114].mxu1 }
 0x452   : > { %3432 = vmatprep.mubr.bf16.mxu0 %v14052_v3  ;;  %v11697_v2 = vpop.f32.mrb[115].mxu1 }
 0x453   : > { %14199 = vst [vmem:[#allocation91_spill] sm:$0xff] %v11697_v2  ;;  %v11701_v54 = vpop.f32.mrb[116].mxu1 }
 0x454   : > { %14200 = vst [vmem:[#allocation92_spill] sm:$0xff] %v11701_v54  ;;  %v11704_v63 = vpop.f32.mrb[117].mxu1 }
 0x455   : > { %14201 = vst [vmem:[#allocation93_spill] sm:$0xff] %v11704_v63 }
 0x459   : > { %8311 = vmatmul.mubr.msk.bf16.gmra.mrb[60].mxu0 %vm527_vm1, %v10743_v25  ;;  %v11706_v25 = vpop.f32.mrb[118].mxu1 }
 0x45a   : > { %3442 = vmatprep.mubr.bf16.mxu0 %v14052_v3  ;;  %v11708_v8 = vpop.f32.mrb[119].mxu1 }
 0x45b   : > { %14202 = vst [vmem:[#allocation94_spill] sm:$0xff] %v11708_v8  ;;  %v11712_v60 = vpop.f32.mrb[120].mxu1 }
 0x45c   : > { %14203 = vst [vmem:[#allocation95_spill] sm:$0xff] %v11712_v60  ;;  %v11715_v2 = vpop.f32.mrb[121].mxu1 }
 0x45d   : > { %14204 = vst [vmem:[#allocation96_spill] sm:$0xff] %v11715_v2 }
 0x461   : > { %8312 = vmatmul.mubr.msk.bf16.gmra.mrb[64].mxu0 %vm527_vm1, %v10750_v30  ;;  %v11717_v30 = vpop.f32.mrb[122].mxu1 }
 0x462   : > { %3452 = vmatprep.mubr.bf16.mxu0 %v14052_v3  ;;  %v11719_v54 = vpop.f32.mrb[123].mxu1 }
 0x463   : > { %14205 = vst [vmem:[#allocation97_spill] sm:$0xff] %v11719_v54  ;;  %v11723_v63 = vpop.f32.mrb[124].mxu1 }
 0x464   : > { %14206 = vst [vmem:[#allocation98_spill] sm:$0xff] %v11723_v63  ;;  %v11726_v8 = vpop.f32.mrb[125].mxu1 }
 0x465   : > { %14207 = vst [vmem:[#allocation99_spill] sm:$0xff] %v11726_v8 }
 0x469   : > { %8313 = vmatmul.mubr.msk.bf16.gmra.mrb[68].mxu0 %vm527_vm1, %v10831_v40  ;;  %v11728_v40 = vpop.f32.mrb[126].mxu1 }
 0x46a   : > { %3462 = vmatprep.mubr.bf16.mxu0 %v14052_v3  ;;  %v11730_v60 = vpop.f32.mrb[127].mxu1 }
 0x46b   : > { %14208 = vst [vmem:[#allocation100_spill] sm:$0xff] %v11730_v60  ;;  %v11734_v2 = vpop.f32.mrb[128].mxu1 }
 0x46c   : > { %14209 = vst [vmem:[#allocation101_spill] sm:$0xff] %v11734_v2  ;;  %v11737_v54 = vpop.f32.mrb[129].mxu1 }
 0x46d   : > { %14210 = vst [vmem:[#allocation102_spill] sm:$0xff] %v11737_v54 }
 0x471   : > { %8314 = vmatmul.mubr.msk.bf16.gmra.mrb[72].mxu0 %vm527_vm1, %v10838_v44  ;;  %v11739_v44 = vpop.f32.mrb[130].mxu1 }
 0x472   : > { %3472 = vmatprep.mubr.bf16.mxu0 %v14052_v3  ;;  %v11741_v63 = vpop.f32.mrb[131].mxu1 }
 0x473   : > { %14211 = vst [vmem:[#allocation103_spill] sm:$0xff] %v11741_v63  ;;  %v11745_v8 = vpop.f32.mrb[132].mxu1 }
 0x474   : > { %14212 = vst [vmem:[#allocation104_spill] sm:$0xff] %v11745_v8  ;;  %v11748_v60 = vpop.f32.mrb[133].mxu1 }
 0x475   : > { %14213 = vst [vmem:[#allocation105_spill] sm:$0xff] %v11748_v60 }
 0x479   : > { %8315 = vmatmul.mubr.msk.bf16.gmra.mrb[76].mxu0 %vm527_vm1, %v10845_v49  ;;  %v11750_v49 = vpop.f32.mrb[134].mxu1 }
 0x47a   : > { %3482 = vmatprep.mubr.bf16.mxu0 %v14052_v3  ;;  %14214 = vst [vmem:[#allocation106_spill] sm:$0xff] %v11750_v49  ;;  %v11752_v2 = vpop.f32.mrb[135].mxu1 }
 0x47b   : > { %14215 = vst [vmem:[#allocation107_spill] sm:$0xff] %v11752_v2  ;;  %v11756_v54 = vpop.f32.mrb[136].mxu1 }
 0x47c   : > { %14216 = vst [vmem:[#allocation108_spill] sm:$0xff] %v11756_v54  ;;  %v11759_v63 = vpop.f32.mrb[137].mxu1 }
 0x47d   : > { %14217 = vst [vmem:[#allocation109_spill] sm:$0xff] %v11759_v63 }
 0x481   : > { %8316 = vmatmul.mubr.msk.bf16.gmra.mrb[80].mxu0 %vm527_vm1, %v10852_v53  ;;  %v11761_v53 = vpop.f32.mrb[138].mxu1 }
 0x482   : > { %3492 = vmatprep.mubr.bf16.mxu0 %v14052_v3  ;;  %14218 = vst [vmem:[#allocation110_spill] sm:$0xff] %v11761_v53  ;;  %v11763_v8 = vpop.f32.mrb[139].mxu1  ;;  %v10210_v53 = vld [vmem:[%s14039_s3 + $0x10c] ss:$8 sps:$4 sm:$0xff]  }
 0x483   : > { %14219 = vst [vmem:[#allocation111_spill] sm:$0xff] %v11763_v8  ;;  %v11767_v60 = vpop.f32.mrb[140].mxu1 }
 0x484   : > { %14220 = vst [vmem:[#allocation112_spill] sm:$0xff] %v11767_v60  ;;  %v11770_v2 = vpop.f32.mrb[141].mxu1 }
 0x485   : > { %14221 = vst [vmem:[#allocation113_spill] sm:$0xff] %v11770_v2 }
 0x489   : > { %8317 = vmatmul.mubr.msk.bf16.gmra.mrb[84].mxu0 %vm527_vm1, %v10859_v58  ;;  %v11772_v58 = vpop.f32.mrb[142].mxu1 }
 0x48a   : > { %3502 = vmatprep.mubr.bf16.mxu0 %v14052_v3  ;;  %14222 = vst [vmem:[#allocation114_spill] sm:$0xff] %v11772_v58  ;;  %v11774_v54 = vpop.f32.mrb[143].mxu1 }
 0x48b   : > { %14223 = vst [vmem:[#allocation115_spill] sm:$0xff] %v11774_v54  ;;  %v11778_v63 = vpop.f32.mrb[144].mxu1 }
 0x48c   : > { %14224 = vst [vmem:[#allocation116_spill] sm:$0xff] %v11778_v63  ;;  %v11781_v8 = vpop.f32.mrb[145].mxu1 }
 0x48d   : > { %14225 = vst [vmem:[#allocation117_spill] sm:$0xff] %v11781_v8 }
 0x491   : > { %8318 = vmatmul.mubr.msk.bf16.gmra.mrb[88].mxu0 %vm527_vm1, %v10866_v62  ;;  %v11783_v62 = vpop.f32.mrb[146].mxu1 }
 0x492   : > { %3512 = vmatprep.mubr.bf16.mxu0 %v14052_v3  ;;  %14226 = vst [vmem:[#allocation118_spill] sm:$0xff] %v11783_v62  ;;  %v11785_v60 = vpop.f32.mrb[147].mxu1 }
 0x493   : > { %14227 = vst [vmem:[#allocation119_spill] sm:$0xff] %v11785_v60  ;;  %v11789_v2 = vpop.f32.mrb[148].mxu1  ;;  %v10202_v60 = vld [vmem:[%s14039_s3 + $0xe8] ss:$8 sps:$4 sm:$0xff]  }
 0x494   : > { %14228 = vst [vmem:[#allocation120_spill] sm:$0xff] %v11789_v2  ;;  %v11792_v54 = vpop.f32.mrb[149].mxu1 }
 0x495   : > { %14229 = vst [vmem:[#allocation121_spill] sm:$0xff] %v11792_v54 }
 0x499   : > { %8319 = vmatmul.mubr.msk.bf16.gmra.mrb[92].mxu0 %vm527_vm1, %v10873_v5  ;;  %v11794_v5 = vpop.f32.mrb[150].mxu1 }
 0x49a   : > { %3522 = vmatprep.mubr.bf16.mxu0 %v14052_v3  ;;  %14230 = vst [vmem:[#allocation122_spill] sm:$0xff] %v11794_v5  ;;  %v11796_v63 = vpop.f32.mrb[151].mxu1 }
 0x49b   : > { %14231 = vst [vmem:[#allocation123_spill] sm:$0xff] %v11796_v63  ;;  %v11806_v2 = vpop.f32.mrb[152].mxu1 }
 0x49c   : > { %14232 = vst [vmem:[#allocation124_spill] sm:$0xff] %v11806_v2  ;;  %v11809_v54 = vpop.f32.mrb[153].mxu1 }
 0x49d   : > { %14233 = vst [vmem:[#allocation125_spill] sm:$0xff] %v11809_v54  ;;  %v11811_v5 = vpop.f32.mrb[154].mxu1 }
 0x49e   : > { %14234 = vst [vmem:[#allocation126_spill] sm:$0xff] %v11811_v5  ;;  %v11813_v63 = vpop.f32.mrb[155].mxu1 }
 0x49f   : > { %14235 = vst [vmem:[#allocation127_spill] sm:$0xff] %v11813_v63 }
 0x4a1   : > { %8320 = vmatmul.mubr.msk.bf16.gmra.mrb[96].mxu0 %vm527_vm1, %v10880_v10  ;;  %v10204_v10 = vld [vmem:[%s14039_s3 + $0xec] ss:$8 sps:$4 sm:$0xff]  }
 0x4a2   : > { %3532 = vmatprep.mubr.bf16.mxu0 %v14052_v3  ;;  %5188 = vmatprep.subr.bf16.mxu1 %v10204_v10  ;;  %v10205_v10 = vld [vmem:[%s14039_s3 + $0xf8] ss:$8 sps:$4 sm:$0xff]  }
 0x4a3   : > { %5189 = vmatpush1.bf16.msra.mxu1 %v10202_v60  ;;  %v10207_v60 = vld [vmem:[%s14039_s3 + $0xfc] ss:$8 sps:$4 sm:$0xff]  }
 0x4a4   : > { %5190 = vmatprep.subr.bf16.mxu1 %v10207_v60 }
 0x4a7   : > { %5191 = vmatpush1.bf16.msra.mxu1 %v10205_v10 }
 0x4a8   : > { %5192 = vmatprep.subr.bf16.mxu1 %v10210_v53  ;;  %v10211_v53 = vld [vmem:[%s14039_s3 + $0x118] ss:$8 sps:$4 sm:$0xff]  }
 0x4a9   : > { %8321 = vmatmul.mubr.msk.bf16.gmra.mrb[100].mxu0 %vm527_vm1, %v10887_v15  ;;  %v11817_v15 = vpop.f32.mrb[156].mxu1 }
 0x4aa   : > { %3542 = vmatprep.mubr.bf16.mxu0 %v14052_v3  ;;  %14236 = vst [vmem:[#allocation128_spill] sm:$0xff] %v11817_v15  ;;  %v11820_v62 = vpop.f32.mrb[157].mxu1 }
 0x4ab   : > { %14237 = vst [vmem:[#allocation129_spill] sm:$0xff] %v11820_v62  ;;  %v11822_v2 = vpop.f32.mrb[158].mxu1  ;;  %v3957_v62 = vlaneseq }
 0x4ac   : > { %14238 = vst [vmem:[#allocation130_spill] sm:$0xff] %v11822_v2  ;;  %v11830_v63 = vpop.f32.mrb[159].mxu1 }
 0x4ad   : > { %14239 = vst [vmem:[#allocation131_spill] sm:$0xff] %v11830_v63 }
 0x4b1   : > { %8322 = vmatmul.mubr.msk.bf16.gmra.mrb[104].mxu0 %vm527_vm1, %v10894_v19 }
 0x4b2   : > { %3552 = vmatprep.mubr.bf16.mxu0 %v14052_v3 }
 0x4b4   : > { %v3284_v8 = vpop.f32.mrb[0].mxu0 }
 0x4b5   : > { %v8813_v19 = vadd.f32 %v3284_v8, %v11307_v28  ;;  %v3286_v15 = vpop.f32.mrb[1].mxu0  ;;  %v11841_v28 = vpop.f32.mrb[160].mxu1  ;;  %v14241_v8 = vmov 0  }
 0x4b6   : > { %v8814_v3 = vadd.f32 %v3286_v15, %v11314_v34  ;;  %v3288_v5 = vpop.f32.mrb[2].mxu0  ;;  %14240 = vst [vmem:[#allocation132_spill] sm:$0xff] %v11841_v28  ;;  %v10208_v34 = vld [vmem:[%s14039_s3 + $0x108] ss:$8 sps:$4 sm:$0xff]  }
 0x4b7   : > { %v8815_v2 = vadd.f32 %v3288_v5, %v11317_v36  ;;  %v3290_v54 = vpop.f32.mrb[3].mxu0  ;;  %v11847_v36 = vpop.f32.mrb[161].mxu1  ;;  %v11849_v5 = vshrl.u32 %v3957_v62, 7  ;;  %5193 = vmatpush1.bf16.msra.mxu1 %v10208_v34 }
 0x4b8   : > { %v8816_v58 = vadd.f32 %v3290_v54, %v11319_v39  ;;  %14242 = vst [vmem:[#allocation133_spill] sm:$0xff] %v11847_v36  ;;  %v11851_v39 = vpop.f32.mrb[162].mxu1 }
 0x4b9   : > { %8323 = vmatmul.mubr.msk.bf16.gmra.mrb[108].mxu0 %vm527_vm1, %v10901_v27  ;;  %14243 = vst [vmem:[#allocation134_spill] sm:$0xff] %v11849_v5  ;;  %14244 = vst [vmem:[#allocation135_spill] sm:$0xff] %v11851_v39  ;;  %v11853_v15 = vpop.f32.mrb[163].mxu1  ;;  %v10213_v27 = vld [vmem:[%s14039_s3 + $0x11c] ss:$8 sps:$4 sm:$0xff]   ;;  %v11868_v34 = vsub.s32 0, %v11849_v5 }
 0x4ba   : > { %3562 = vmatprep.mubr.bf16.mxu0 %v14241_v8  ;;  %14245 = vst [vmem:[#allocation136_spill] sm:$0xff] %v11853_v15  ;;  %5194 = vmatprep.subr.bf16.mxu1 %v10213_v27 }
 0x4bb   : > { %14246 = vst [vmem:[#allocation137_spill] sm:$0xff] %v11868_v34  ;;  %5195 = vmatpush1.bf16.msra.mxu1 %v10211_v53 }
 0x4bc   : > { %v3294_v54 = vpop.f32.mrb[4].mxu0 }
 0x4bd   : > { %v11859_v10 = vadd.f32 %v3294_v54, %v11321_v42  ;;  %v3296_v60 = vpop.f32.mrb[5].mxu0  ;;  %v3955_v42 = vld [vmem:[%s14038_s2] sm:$0x3]  ;;  %v14056_v54 = vsub.s32 1, %v11849_v5 }
 0x4be   : > { %v11865_v62 = vadd.f32 %v3296_v60, %v11328_v47  ;;  %v3298_v39 = vpop.f32.mrb[6].mxu0  ;;  %v10216_v47 = vld [vmem:[%s14039_s3 + $0x12c] ss:$8 sps:$4 sm:$0xff]  }
 0x4bf   : > { %v11871_v15 = vadd.f32 %v3298_v39, %v11331_v50  ;;  %v3300_v36 = vpop.f32.mrb[7].mxu0  ;;  %v11885_v50 = vpop.f32.mrb[164].mxu1  ;;  %v10214_v39 = vld [vmem:[%s14039_s3 + $0x128] ss:$8 sps:$4 sm:$0xff]   ;;  %5196 = vmatprep.subr.bf16.mxu1 %v10216_v47 }
 0x4c0   : > { %v11878_v28 = vadd.f32 %v3300_v36, %v11333_v55  ;;  %14247 = vst [vmem:[#allocation138_spill] sm:$0xff] %v11885_v50  ;;  %v11891_v27 = vpop.f32.mrb[165].mxu1  ;;  %v11894_v55 = vrot.slane %v3955_v42, %v11868_v34  ;;  %5197 = vmatpush1.bf16.msra.mxu1 %v10214_v39  ;;  %v10219_v50 = vld [vmem:[%s14039_s3 + $0x13c] ss:$8 sps:$4 sm:$0xff]   ;;  %v10217_v34 = vld [vmem:[%s14039_s3 + $0x138] ss:$8 sps:$4 sm:$0xff]  }
 0x4c1   : > { %8324 = vmatmul.mubr.msk.bf16.gmra.mrb[112].mxu0 %vm527_vm1, %v10908_v33  ;;  %14248 = vst [vmem:[#allocation139_spill] sm:$0xff] %v11891_v27  ;;  %v11896_v36 = vpop.f32.mrb[166].mxu1  ;;  %v11900_v33 = vrot.slane %v3955_v42, %v14056_v54  ;;  %5198 = vmatprep.subr.bf16.mxu1 %v10219_v50 }
 0x4c2   : > { %3572 = vmatprep.mubr.bf16.mxu0 %v14241_v8  ;;  %14249 = vst [vmem:[#allocation140_spill] sm:$0xff] %v11896_v36  ;;  %v11902_v53 = vpop.f32.mrb[167].mxu1  ;;  %v3967_v42 = vadd.f32 %v8813_v19, %v11894_v55  ;;  %v3969_v50 = vadd.f32 %v8815_v2, %v11894_v55 }
 0x4c3   : > { %14250 = vst [vmem:[#allocation141_spill] sm:$0xff] %v11902_v53  ;;  %v3968_v63 = vadd.f32 %v8814_v3, %v11900_v33  ;;  %v10220_v3 = vld [vmem:[%s14039_s3 + $0x148] ss:$8 sps:$4 sm:$0xff]  }
 0x4c4   : > { %v3304_v60 = vpop.f32.mrb[8].mxu0  ;;  %5199 = vmatpush1.bf16.msra.mxu1 %v10217_v34 }
 0x4c5   : > { %v8821_v27 = vadd.f32 %v3304_v60, %v11335_v56  ;;  %v3306_v47 = vpop.f32.mrb[9].mxu0 }
 0x4c6   : > { %v8822_v39 = vadd.f32 %v3306_v47, %v11342_v0  ;;  %v3308_v36 = vpop.f32.mrb[10].mxu0  ;;  %v10222_v0 = vld [vmem:[%s14039_s3 + $0x14c] ss:$8 sps:$4 sm:$0xff]  }
 0x4c7   : > { %v3975_v54 = vadd.f32 %v8821_v27, %v11894_v55  ;;  %v8823_v5 = vadd.f32 %v3308_v36, %v11345_v20  ;;  %v3310_v53 = vpop.f32.mrb[11].mxu0  ;;  %v11927_v20 = vpop.f32.mrb[168].mxu1  ;;  %5200 = vmatprep.subr.bf16.mxu1 %v10222_v0 }
 0x4c8   : > { %v3976_v56 = vadd.f32 %v8822_v39, %v11900_v33  ;;  %v8824_v60 = vadd.f32 %v3310_v53, %v11347_v7  ;;  %14252 = vst [vmem:[#allocation143_spill] sm:$0xff] %v11927_v20  ;;  %v3970_v7 = vadd.f32 %v8816_v58, %v11900_v33  ;;  %v11937_v2 = vpop.f32.mrb[169].mxu1  ;;  %5201 = vmatpush1.bf16.msra.mxu1 %v10220_v3  ;;  %v14260_v3 = vld [vmem:[#allocation8_spill] sm:$0xff] }
 0x4c9   : > { %v11922_v47 = vmax.f32 %v3967_v42, %v3975_v54  ;;  %v3977_v19 = vadd.f32 %v8823_v5, %v11894_v55  ;;  %8325 = vmatmul.mubr.msk.bf16.gmra.mrb[116].mxu0 %vm527_vm1, %v10924_v43  ;;  %14254 = vst [vmem:[#allocation145_spill] sm:$0xff] %v11937_v2  ;;  %v11941_v43 = vpop.f32.mrb[170].mxu1  ;;  %v10223_v42 = vld [vmem:[%s14039_s3 + $0x158] ss:$8 sps:$4 sm:$0xff]  }
 0x4ca   : > { %v11933_v34 = vmax.f32 %v3968_v63, %v3976_v56  ;;  %v3978_v27 = vadd.f32 %v8824_v60, %v11900_v33  ;;  %3582 = vmatprep.mubr.bf16.mxu0 %v14241_v8  ;;  %14256 = vst [vmem:[#allocation147_spill] sm:$0xff] %v11941_v43  ;;  %v11945_v53 = vpop.f32.mrb[171].mxu1  ;;  %v10225_v63 = vld [vmem:[%s14039_s3 + $0x15c] ss:$8 sps:$4 sm:$0xff]  }
 0x4cb   : > { %14251 = vst [vmem:[#allocation142_spill] sm:$0xff] %v11922_v47  ;;  %v11939_v5 = vmax.f32 %v3969_v50, %v3977_v19  ;;  %14258 = vst [vmem:[#allocation149_spill] sm:$0xff] %v11945_v53  ;;  %v14259_v56 = vld [vmem:[#allocation7_spill] sm:$0xff]  ;;  %5202 = vmatprep.subr.bf16.mxu1 %v10225_v63  ;;  %v3971_v50 = vadd.f32 %v11859_v10, %v11894_v55  ;;  %v14261_v53 = vld [vmem:[#allocation9_spill] sm:$0xff]  ;;  %v3973_v10 = vadd.f32 %v11871_v15, %v11894_v55 }
 0x4cc   : > { %14253 = vst [vmem:[#allocation144_spill] sm:$0xff] %v11933_v34  ;;  %v11943_v54 = vmax.f32 %v3970_v7, %v3978_v27  ;;  %v3314_v36 = vpop.f32.mrb[12].mxu0  ;;  %5203 = vmatpush1.bf16.msra.mxu1 %v10223_v42  ;;  %v10228_v63 = vld [vmem:[%s14039_s3 + $0x16c] ss:$8 sps:$4 sm:$0xff]   ;;  %v11973_v42 = vpop.f32.mrb[172].mxu1  ;;  %v14287_v2 = vld [vmem:[#allocation19_spill] sm:$0xff] }
 0x4cd   : > { %14255 = vst [vmem:[#allocation146_spill] sm:$0xff] %v11939_v5  ;;  %v8825_v58 = vadd.f32 %v3314_v36, %v11349_v6  ;;  %v3316_v39 = vpop.f32.mrb[13].mxu0  ;;  %v3972_v6 = vadd.f32 %v11865_v62, %v11900_v33  ;;  %14263 = vst [vmem:[#allocation8_spill] sm:$0xff] %v11973_v42  ;;  %v10226_v62 = vld [vmem:[%s14039_s3 + $0x168] ss:$8 sps:$4 sm:$0xff]   ;;  %5204 = vmatprep.subr.bf16.mxu1 %v10228_v63 }
 0x4ce   : > { %14257 = vst [vmem:[#allocation148_spill] sm:$0xff] %v11943_v54  ;;  %v8826_v60 = vadd.f32 %v3316_v39, %v14259_v56  ;;  %v3318_v0 = vpop.f32.mrb[14].mxu0  ;;  %v14338_v47 = vld [vmem:[#allocation59_spill] sm:$0xff] }
 0x4cf   : > { %v3979_v19 = vadd.f32 %v8825_v58, %v11894_v55  ;;  %v8827_v7 = vadd.f32 %v3318_v0, %v14260_v3  ;;  %v3320_v27 = vpop.f32.mrb[15].mxu0 }
 0x4d0   : > { %v3980_v36 = vadd.f32 %v8826_v60, %v11900_v33  ;;  %v8828_v43 = vadd.f32 %v3320_v27, %v14261_v53  ;;  %v3974_v53 = vadd.f32 %v11878_v28, %v11900_v33  ;;  %v11984_v60 = vpop.f32.mrb[173].mxu1  ;;  %5205 = vmatpush1.bf16.msra.mxu1 %v10226_v62  ;;  %v10231_v28 = vld [vmem:[%s14039_s3 + $0x17c] ss:$8 sps:$4 sm:$0xff]  }
 0x4d1   : > { %v11968_v39 = vmax.f32 %v3971_v50, %v3979_v19  ;;  %v3981_v58 = vadd.f32 %v8827_v7, %v11894_v55  ;;  %8326 = vmatmul.mubr.msk.bf16.gmra.mrb[120].mxu0 %vm527_vm1, %v10942_v59  ;;  %14265 = vst [vmem:[#allocation150_spill] sm:$0xff] %v11984_v60  ;;  %v11988_v59 = vpop.f32.mrb[174].mxu1  ;;  %5206 = vmatprep.subr.bf16.mxu1 %v10231_v28  ;;  %v14281_v60 = vld [vmem:[#allocation17_spill] sm:$0xff] }
 0x4d2   : > { %v11980_v56 = vmax.f32 %v3972_v6, %v3980_v36  ;;  %v3982_v15 = vadd.f32 %v8828_v43, %v11900_v33  ;;  %3592 = vmatprep.mubr.bf16.mxu0 %v14241_v8  ;;  %14267 = vst [vmem:[#allocation152_spill] sm:$0xff] %v11988_v59  ;;  %v11992_v3 = vpop.f32.mrb[175].mxu1  ;;  %v14270_v43 = vld [vmem:[#allocation10_spill] sm:$0xff]  ;;  %v14271_v36 = vld [vmem:[#allocation11_spill] sm:$0xff]  ;;  %v10234_v59 = vld [vmem:[%s14039_s3 + $0x18c] ss:$8 sps:$4 sm:$0xff]  }
 0x4d3   : > { %14262 = vst [vmem:[#allocation7_spill] sm:$0xff] %v11968_v39  ;;  %v11986_v0 = vmax.f32 %v3973_v10, %v3981_v58  ;;  %14269 = vst [vmem:[#allocation154_spill] sm:$0xff] %v11992_v3  ;;  %v10229_v6 = vld [vmem:[%s14039_s3 + $0x178] ss:$8 sps:$4 sm:$0xff]   ;;  %v14272_v58 = vld [vmem:[#allocation12_spill] sm:$0xff] }
 0x4d4   : > { %14264 = vst [vmem:[#allocation9_spill] sm:$0xff] %v11980_v56  ;;  %v11990_v50 = vmax.f32 %v3974_v53, %v3982_v15  ;;  %v3324_v19 = vpop.f32.mrb[16].mxu0  ;;  %5207 = vmatpush1.bf16.msra.mxu1 %v10229_v6  ;;  %v14273_v15 = vld [vmem:[#allocation13_spill] sm:$0xff]  ;;  %v14310_v39 = vld [vmem:[#allocation34_spill] sm:$0xff] }
 0x4d5   : > { %14266 = vst [vmem:[#allocation151_spill] sm:$0xff] %v11986_v0  ;;  %v8829_v7 = vadd.f32 %v3324_v19, %v14270_v43  ;;  %v3326_v27 = vpop.f32.mrb[17].mxu0  ;;  %v12009_v19 = vpop.f32.mrb[176].mxu1  ;;  %v10232_v43 = vld [vmem:[%s14039_s3 + $0x188] ss:$8 sps:$4 sm:$0xff]   ;;  %5208 = vmatprep.subr.bf16.mxu1 %v10234_v59 }
 0x4d6   : > { %14268 = vst [vmem:[#allocation153_spill] sm:$0xff] %v11990_v50  ;;  %v8830_v63 = vadd.f32 %v3326_v27, %v14271_v36  ;;  %v3328_v10 = vpop.f32.mrb[18].mxu0  ;;  %14274 = vst [vmem:[#allocation10_spill] sm:$0xff] %v12009_v19  ;;  %v12015_v28 = vpop.f32.mrb[177].mxu1 }
 0x4d7   : > { %v8831_v62 = vadd.f32 %v3328_v10, %v14272_v58  ;;  %v3330_v53 = vpop.f32.mrb[19].mxu0  ;;  %14275 = vst [vmem:[#allocation11_spill] sm:$0xff] %v12015_v28  ;;  %v12017_v27 = vpop.f32.mrb[178].mxu1  ;;  %v14278_v10 = vld [vmem:[#allocation14_spill] sm:$0xff]  ;;  %v14279_v28 = vld [vmem:[#allocation15_spill] sm:$0xff] }
 0x4d8   : > { %v8832_v3 = vadd.f32 %v3330_v53, %v14273_v15  ;;  %14276 = vst [vmem:[#allocation12_spill] sm:$0xff] %v12017_v27  ;;  %5209 = vmatpush1.bf16.msra.mxu1 %v10232_v43  ;;  %v12019_v36 = vpop.f32.mrb[179].mxu1  ;;  %v10235_v15 = vld [vmem:[%s14039_s3 + $0x198] ss:$8 sps:$4 sm:$0xff]   ;;  %v14280_v43 = vld [vmem:[#allocation16_spill] sm:$0xff]  ;;  %v3984_v0 = vadd.f32 %v8830_v63, %v11900_v33 }
 0x4d9   : > { %8327 = vmatmul.mubr.msk.bf16.gmra.mrb[124].mxu0 %vm527_vm1, %v10958_v1  ;;  %14277 = vst [vmem:[#allocation13_spill] sm:$0xff] %v12019_v36  ;;  %v10237_v1 = vld [vmem:[%s14039_s3 + $0x19c] ss:$8 sps:$4 sm:$0xff]  }
 0x4da   : > { %3602 = vmatprep.mubr.bf16.mxu0 %v14241_v8  ;;  %5210 = vmatprep.subr.bf16.mxu1 %v10237_v1  ;;  %v3986_v63 = vadd.f32 %v8832_v3, %v11900_v33 }
 0x4dc   : > { %v3334_v6 = vpop.f32.mrb[20].mxu0  ;;  %5211 = vmatpush1.bf16.msra.mxu1 %v10235_v15 }
 0x4dd   : > { %v12025_v58 = vadd.f32 %v3334_v6, %v14278_v10  ;;  %v3336_v53 = vpop.f32.mrb[21].mxu0  ;;  %v10240_v6 = vld [vmem:[%s14039_s3 + $0x1ac] ss:$8 sps:$4 sm:$0xff]   ;;  %v12044_v10 = vpop.f32.mrb[180].mxu1 }
 0x4de   : > { %v12031_v59 = vadd.f32 %v3336_v53, %v14279_v28  ;;  %v3338_v27 = vpop.f32.mrb[22].mxu0  ;;  %14282 = vst [vmem:[#allocation14_spill] sm:$0xff] %v12044_v10  ;;  %v10238_v28 = vld [vmem:[%s14039_s3 + $0x1a8] ss:$8 sps:$4 sm:$0xff]   ;;  %5212 = vmatprep.subr.bf16.mxu1 %v10240_v6  ;;  %v14286_v53 = vld [vmem:[#allocation18_spill] sm:$0xff] }
 0x4df   : > { %v12034_v19 = vadd.f32 %v3338_v27, %v14280_v43  ;;  %v3340_v36 = vpop.f32.mrb[23].mxu0  ;;  %v12050_v27 = vpop.f32.mrb[181].mxu1  ;;  %v10241_v10 = vld [vmem:[%s14039_s3 + $0x1b8] ss:$8 sps:$4 sm:$0xff]  }
 0x4e0   : > { %v12037_v42 = vadd.f32 %v3340_v36, %v14281_v60  ;;  %14283 = vst [vmem:[#allocation15_spill] sm:$0xff] %v12050_v27  ;;  %v12052_v60 = vpop.f32.mrb[182].mxu1  ;;  %5213 = vmatpush1.bf16.msra.mxu1 %v10238_v28  ;;  %v3983_v28 = vadd.f32 %v8829_v7, %v11894_v55 }
 0x4e1   : > { %8328 = vmatmul.mubr.msk.bf16.gmra.mrb[128].mxu0 %vm527_vm1, %v10968_v9  ;;  %14284 = vst [vmem:[#allocation16_spill] sm:$0xff] %v12052_v60  ;;  %v12054_v1 = vpop.f32.mrb[183].mxu1  ;;  %v10243_v9 = vld [vmem:[%s14039_s3 + $0x1bc] ss:$8 sps:$4 sm:$0xff]  }
 0x4e2   : > { %3612 = vmatprep.mubr.bf16.mxu0 %v14241_v8  ;;  %14285 = vst [vmem:[#allocation17_spill] sm:$0xff] %v12054_v1  ;;  %5214 = vmatprep.subr.bf16.mxu1 %v10243_v9  ;;  %v14288_v1 = vld [vmem:[#allocation20_spill] sm:$0xff] }
 0x4e4   : > { %v3344_v36 = vpop.f32.mrb[24].mxu0  ;;  %5215 = vmatpush1.bf16.msra.mxu1 %v10241_v10 }
 0x4e5   : > { %v8837_v15 = vadd.f32 %v3344_v36, %v14286_v53  ;;  %v3346_v43 = vpop.f32.mrb[25].mxu0  ;;  %v3985_v36 = vadd.f32 %v8831_v62, %v11894_v55 }
 0x4e6   : > { %v8838_v27 = vadd.f32 %v3346_v43, %v14287_v2  ;;  %v3348_v6 = vpop.f32.mrb[26].mxu0  ;;  %v8372_v2 = vld [vmem:[%s14039_s3 + $0x1c8] sm:$0x77] }
 0x4e7   : > { %v3991_v60 = vadd.f32 %v8837_v15, %v11894_v55  ;;  %v8839_v20 = vadd.f32 %v3348_v6, %v14288_v1  ;;  %v3350_v50 = vpop.f32.mrb[27].mxu0  ;;  %v8402_v10 = vcombine.high %v8372_v2, %v8372_v2  ;;  %v8401_v9 = vcombine.low %v8372_v2, %v8372_v2  ;;  %v14292_v15 = vld [vmem:[#allocation21_spill] sm:$0xff] }
 0x4e8   : > { %v3992_v53 = vadd.f32 %v8838_v27, %v11900_v33  ;;  %v8840_v56 = vadd.f32 %v3350_v50, %v11403_v26  ;;  %v12084_v26 = vpop.f32.mrb[184].mxu1 }
 0x4e9   : > { %v3993_v7 = vadd.f32 %v8839_v20, %v11894_v55  ;;  %8329 = vmatmul.mubr.msk.bf16.gmra.mrb[132].mxu0 %vm527_vm1, %v10978_v12  ;;  %v12077_v1 = vmax.f32 %v3983_v28, %v3991_v60  ;;  %14289 = vst [vmem:[#allocation18_spill] sm:$0xff] %v12084_v26  ;;  %v12088_v20 = vpop.f32.mrb[185].mxu1  ;;  %8403 = vmatprep.subr.msk.bf16.mxu1 %vm5181_vm2, %v8402_v10  ;;  %v5183_v12 = vsel %vm5181_vm2, %v8401_v9, 0  ;;  %v14295_v9 = vld [vmem:[#allocation23_spill] sm:$0xff] }
 0x4ea   : > { %v3994_v62 = vadd.f32 %v8840_v56, %v11900_v33  ;;  %v12081_v27 = vmax.f32 %v3984_v0, %v3992_v53  ;;  %3622 = vmatprep.mubr.bf16.mxu0 %v14241_v8  ;;  %14290 = vst [vmem:[#allocation19_spill] sm:$0xff] %v12088_v20  ;;  %v12096_v0 = vpop.f32.mrb[186].mxu1  ;;  %5217 = vmatpush1.bf16.msra.mxu1 %v5183_v12 }
 0x4eb   : > { %v12086_v50 = vmax.f32 %v3985_v36, %v3993_v7  ;;  %14291 = vst [vmem:[#allocation20_spill] sm:$0xff] %v12096_v0  ;;  %v12099_v28 = vpop.f32.mrb[187].mxu1  ;;  %v14294_v36 = vld [vmem:[#allocation22_spill] sm:$0xff]  ;;  %v3987_v7 = vadd.f32 %v12025_v58, %v11894_v55  ;;  %v3988_v12 = vadd.f32 %v12031_v59, %v11900_v33  ;;  %v3990_v59 = vadd.f32 %v12037_v42, %v11900_v33 }
 0x4ec   : > { %v12092_v60 = vmax.f32 %v3986_v63, %v3994_v62  ;;  %v3354_v3 = vpop.f32.mrb[28].mxu0  ;;  %v9851_v56 = vpack.i.bf16 %v12081_v27, %v12077_v1  ;;  %14293 = vst [vmem:[#allocation21_spill] sm:$0xff] %v12099_v28 }
 0x4ed   : > { %v8841_v43 = vadd.f32 %v3354_v3, %v14292_v15  ;;  %v3356_v6 = vpop.f32.mrb[29].mxu0  ;;  %v14296_v15 = vld [vmem:[#allocation24_spill] sm:$0xff] }
 0x4ee   : > { %v8842_v53 = vadd.f32 %v3356_v6, %v14294_v36  ;;  %9852 = vrot.lane.b32.xlu0 %v9851_v56, %s10473_s24  ;;  %v3358_v2 = vpop.f32.mrb[30].mxu0  ;;  %v9856_v6 = vpack.i.bf16 %v12092_v60, %v12086_v50  ;;  %v3989_v56 = vadd.f32 %v12034_v19, %v11894_v55 }
 0x4ef   : > { %v3995_v10 = vadd.f32 %v8841_v43, %v11894_v55  ;;  %v8843_v63 = vadd.f32 %v3358_v2, %v14295_v9  ;;  %v3360_v62 = vpop.f32.mrb[31].mxu0  ;;  %v12127_v2 = vpop.f32.mrb[188].mxu1 }
 0x4f0   : > { %v3996_v3 = vadd.f32 %v8842_v53, %v11900_v33  ;;  %v8844_v28 = vadd.f32 %v3360_v62, %v14296_v15  ;;  %14297 = vst [vmem:[#allocation22_spill] sm:$0xff] %v12127_v2  ;;  %v12131_v9 = vpop.f32.mrb[189].mxu1 }
 0x4f1   : > { %v3997_v58 = vadd.f32 %v8843_v63, %v11894_v55  ;;  %8330 = vmatmul.mubr.msk.bf16.gmra.mrb[136].mxu0 %vm527_vm1, %v10988_v16  ;;  %v12118_v43 = vmax.f32 %v3987_v7, %v3995_v10  ;;  %14298 = vst [vmem:[#allocation23_spill] sm:$0xff] %v12131_v9  ;;  %v12137_v10 = vpop.f32.mrb[190].mxu1 }
 0x4f2   : > { %v3998_v36 = vadd.f32 %v8844_v28, %v11900_v33  ;;  %9857 = vrot.lane.b32.xlu0 %v9856_v6, %s10473_s24  ;;  %v12124_v53 = vmax.f32 %v3988_v12, %v3996_v3  ;;  %3632 = vmatprep.mubr.bf16.mxu0 %v14241_v8  ;;  %14299 = vst [vmem:[#allocation24_spill] sm:$0xff] %v12137_v10  ;;  %v14300_v28 = vld [vmem:[#allocation25_spill] sm:$0xff]  ;;  %v12140_v12 = vpop.f32.mrb[191].mxu1  ;;  %v14302_v3 = vld [vmem:[#allocation26_spill] sm:$0xff] }
 0x4f3   : > { %v12129_v19 = vmax.f32 %v3989_v56, %v3997_v58  ;;  %14301 = vst [vmem:[#allocation25_spill] sm:$0xff] %v12140_v12  ;;  %v14303_v56 = vld [vmem:[#allocation27_spill] sm:$0xff] }
 0x4f4   : > { %v12133_v16 = vmax.f32 %v3990_v59, %v3998_v36  ;;  %v3364_v7 = vpop.f32.mrb[32].mxu0  ;;  %v9861_v42 = vpack.i.bf16 %v12124_v53, %v12118_v43  ;;  %v14304_v36 = vld [vmem:[#allocation28_spill] sm:$0xff] }
 0x4f5   : > { %v8845_v63 = vadd.f32 %v3364_v7, %v14300_v28  ;;  %v3366_v62 = vpop.f32.mrb[33].mxu0  ;;  %v14305_v28 = vld [vmem:[#allocation29_spill] sm:$0xff] }
 0x4f6   : > { %v8846_v15 = vadd.f32 %v3366_v62, %v14302_v3  ;;  %9862 = vrot.lane.b32.xlu1 %v9861_v42, %s10473_s24  ;;  %v3368_v6 = vpop.f32.mrb[34].mxu0  ;;  %v9866_v2 = vpack.i.bf16 %v12133_v16, %v12129_v19  ;;  %v14306_v3 = vld [vmem:[#allocation30_spill] sm:$0xff] }
 0x4f7   : > { %v8847_v58 = vadd.f32 %v3368_v6, %v14303_v56  ;;  %v3370_v59 = vpop.f32.mrb[35].mxu0  ;;  %v14307_v56 = vld [vmem:[#allocation31_spill] sm:$0xff] }
 0x4f8   : > { %v8848_v9 = vadd.f32 %v3370_v59, %v14304_v36  ;;  %v14308_v36 = vld [vmem:[#allocation32_spill] sm:$0xff] }
 0x4f9   : > { %8331 = vmatmul.mubr.msk.bf16.gmra.mrb[140].mxu0 %vm527_vm1, %v10998_v22  ;;  %v4001_v34 = vadd.f32 %v8847_v58, %v11894_v55 }
 0x4fa   : > { %9867 = vrot.lane.b32.xlu1 %v9866_v2, %s10473_s24  ;;  %3642 = vmatprep.mubr.bf16.mxu0 %v14241_v8  ;;  %v14309_v2 = vld [vmem:[#allocation33_spill] sm:$0xff] }
 0x4fc   : > { %v3374_v7 = vpop.f32.mrb[36].mxu0 }
 0x4fd   : > { %v8849_v62 = vadd.f32 %v3374_v7, %v14305_v28  ;;  %v3376_v42 = vpop.f32.mrb[37].mxu0 }
 0x4fe   : > { %v8850_v12 = vadd.f32 %v3376_v42, %v14306_v3  ;;  %v3378_v6 = vpop.f32.mrb[38].mxu0  ;;  %v3999_v42 = vadd.f32 %v8845_v63, %v11894_v55 }
 0x4ff   : > { %v8851_v10 = vadd.f32 %v3378_v6, %v14307_v56  ;;  %v3380_v59 = vpop.f32.mrb[39].mxu0  ;;  %v14311_v6 = vld [vmem:[#allocation35_spill] sm:$0xff] }
 0x500   : > { %v8852_v0 = vadd.f32 %v3380_v59, %v14308_v36  ;;  %v4000_v59 = vadd.f32 %v8846_v15, %v11900_v33  ;;  %v14312_v36 = vld [vmem:[#allocation36_spill] sm:$0xff] }
 0x501   : > { %8332 = vmatmul.mubr.msk.bf16.gmra.mrb[144].mxu0 %vm527_vm1, %v11008_v31 }
 0x502   : > { %3652 = vmatprep.mubr.bf16.mxu0 %v14241_v8 }
 0x504   : > { %v3384_v22 = vpop.f32.mrb[40].mxu0 }
 0x505   : > { %v8853_v20 = vadd.f32 %v3384_v22, %v14309_v2  ;;  %v3386_v26 = vpop.f32.mrb[41].mxu0 }
 0x506   : > { %v8854_v7 = vadd.f32 %v3386_v26, %v14310_v39  ;;  %v3388_v28 = vpop.f32.mrb[42].mxu0  ;;  %v4002_v26 = vadd.f32 %v8848_v9, %v11900_v33 }
 0x507   : > { %v4007_v3 = vadd.f32 %v8853_v20, %v11894_v55  ;;  %v8855_v56 = vadd.f32 %v3388_v28, %v14311_v6  ;;  %v3390_v54 = vpop.f32.mrb[43].mxu0  ;;  %v14314_v6 = vld [vmem:[#allocation39_spill] sm:$0xff] }
 0x508   : > { %v4008_v31 = vadd.f32 %v8854_v7, %v11900_v33  ;;  %v8856_v5 = vadd.f32 %v3390_v54, %v14312_v36  ;;  %v14315_v36 = vld [vmem:[#allocation40_spill] sm:$0xff] }
 0x509   : > { %v12168_v22 = vmax.f32 %v3999_v42, %v4007_v3  ;;  %v4009_v39 = vadd.f32 %v8855_v56, %v11894_v55  ;;  %8333 = vmatmul.mubr.msk.bf16.gmra.mrb[148].mxu0 %vm527_vm1, %v11018_v37  ;;  %v14313_v37 = vld [vmem:[#allocation38_spill] sm:$0xff] }
 0x50a   : > { %v12174_v20 = vmax.f32 %v4000_v59, %v4008_v31  ;;  %v4010_v63 = vadd.f32 %v8856_v5, %v11900_v33  ;;  %3662 = vmatprep.mubr.bf16.mxu0 %v14241_v8  ;;  %v4004_v31 = vadd.f32 %v8850_v12, %v11900_v33 }
 0x50b   : > { %v12178_v15 = vmax.f32 %v4001_v34, %v4009_v39  ;;  %v4003_v34 = vadd.f32 %v8849_v62, %v11894_v55  ;;  %v4006_v62 = vadd.f32 %v8852_v0, %v11900_v33 }
 0x50c   : > { %v12180_v54 = vmax.f32 %v4002_v26, %v4010_v63  ;;  %v3394_v58 = vpop.f32.mrb[44].mxu0  ;;  %v9871_v2 = vpack.i.bf16 %v12174_v20, %v12168_v22  ;;  %v4005_v26 = vadd.f32 %v8851_v10, %v11894_v55 }
 0x50d   : > { %v8857_v7 = vadd.f32 %v3394_v58, %v11463_v13  ;;  %v3396_v28 = vpop.f32.mrb[45].mxu0 }
 0x50e   : > { %v8858_v42 = vadd.f32 %v3396_v28, %v14313_v37  ;;  %9872 = vrot.lane.b32.xlu0 %v9871_v2, %s10473_s24  ;;  %v3398_v9 = vpop.f32.mrb[46].mxu0  ;;  %v9876_v5 = vpack.i.bf16 %v12180_v54, %v12178_v15 }
 0x50f   : > { %v4011_v3 = vadd.f32 %v8857_v7, %v11894_v55  ;;  %v8859_v56 = vadd.f32 %v3398_v9, %v14314_v6  ;;  %v3400_v59 = vpop.f32.mrb[47].mxu0 }
 0x510   : > { %v4012_v13 = vadd.f32 %v8858_v42, %v11900_v33  ;;  %v8860_v39 = vadd.f32 %v3400_v59, %v14315_v36  ;;  %9877 = vrot.lane.b32.xlu1 %v9876_v5, %s10473_s24 }
 0x511   : > { %v12197_v63 = vmax.f32 %v4003_v34, %v4011_v3  ;;  %v4013_v58 = vadd.f32 %v8859_v56, %v11894_v55  ;;  %8334 = vmatmul.mubr.msk.bf16.gmra.mrb[152].mxu0 %vm527_vm1, %v11028_v46  ;;  %v14316_v34 = vld [vmem:[#allocation42_spill] sm:$0xff] }
 0x512   : > { %v12203_v2 = vmax.f32 %v4004_v31, %v4012_v13  ;;  %v4014_v12 = vadd.f32 %v8860_v39, %v11900_v33  ;;  %3672 = vmatprep.mubr.bf16.mxu0 %v14241_v8  ;;  %v14318_v13 = vld [vmem:[#allocation44_spill] sm:$0xff] }
 0x513   : > { %v12207_v7 = vmax.f32 %v4005_v26, %v4013_v58  ;;  %v14319_v26 = vld [vmem:[#allocation45_spill] sm:$0xff] }
 0x514   : > { %v12209_v28 = vmax.f32 %v4006_v62, %v4014_v12  ;;  %v3404_v10 = vpop.f32.mrb[48].mxu0  ;;  %v9881_v37 = vpack.i.bf16 %v12203_v2, %v12197_v63 }
 0x515   : > { %v8861_v42 = vadd.f32 %v3404_v10, %v11481_v4  ;;  %v3406_v9 = vpop.f32.mrb[49].mxu0  ;;  %v14321_v10 = vld [vmem:[#allocation46_spill] sm:$0xff] }
 0x516   : > { %v8862_v46 = vadd.f32 %v3406_v9, %v11490_v32  ;;  %9882 = vrot.lane.b32.xlu0 %v9881_v37, %s10473_s24  ;;  %v3408_v0 = vpop.f32.mrb[50].mxu0  ;;  %v9886_v5 = vpack.i.bf16 %v12209_v28, %v12207_v7  ;;  %v14317_v32 = vld [vmem:[#allocation43_spill] sm:$0xff] }
 0x517   : > { %v8863_v3 = vadd.f32 %v3408_v0, %v14316_v34  ;;  %v3410_v6 = vpop.f32.mrb[51].mxu0  ;;  %v14322_v0 = vld [vmem:[#allocation47_spill] sm:$0xff] }
 0x518   : > { %v8864_v56 = vadd.f32 %v3410_v6, %v11495_v24  ;;  %9887 = vrot.lane.b32.xlu1 %v9886_v5, %s10473_s24  ;;  %v14320_v24 = vld [vmem:[#allocation3_spill] sm:$0xff]  ;;  %v4015_v6 = vadd.f32 %v8861_v42, %v11894_v55 }
 0x519   : > { %8335 = vmatmul.mubr.msk.bf16.gmra.mrb[156].mxu0 %vm527_vm1, %v11038_v52 }
 0x51a   : > { %3682 = vmatprep.mubr.bf16.mxu0 %v14241_v8  ;;  %v4018_v42 = vadd.f32 %v8864_v56, %v11900_v33 }
 0x51c   : > { %v3414_v4 = vpop.f32.mrb[52].mxu0 }
 0x51d   : > { %v8865_v59 = vadd.f32 %v3414_v4, %v14317_v32  ;;  %v3416_v31 = vpop.f32.mrb[53].mxu0  ;;  %v14323_v32 = vld [vmem:[#allocation48_spill] sm:$0xff] }
 0x51e   : > { %v8866_v36 = vadd.f32 %v3416_v31, %v14318_v13  ;;  %v3418_v39 = vpop.f32.mrb[54].mxu0 }
 0x51f   : > { %v8867_v58 = vadd.f32 %v3418_v39, %v14319_v26  ;;  %v3420_v62 = vpop.f32.mrb[55].mxu0 }
 0x520   : > { %v8868_v12 = vadd.f32 %v3420_v62, %v11509_v35  ;;  %v4016_v35 = vadd.f32 %v8862_v46, %v11900_v33  ;;  %v4017_v62 = vadd.f32 %v8863_v3, %v11894_v55 }
 0x521   : > { %8336 = vmatmul.mubr.msk.bf16.gmra.mrb[160].mxu0 %vm527_vm1, %v14320_v24 }
 0x522   : > { %3692 = vmatprep.mubr.bf16.mxu0 %v14241_v8 }
 0x524   : > { %v3424_v52 = vpop.f32.mrb[56].mxu0 }
 0x525   : > { %v8869_v37 = vadd.f32 %v3424_v52, %v14321_v10  ;;  %v3426_v9 = vpop.f32.mrb[57].mxu0  ;;  %v14324_v10 = vld [vmem:[#allocation4_spill] sm:$0xff] }
 0x526   : > { %v8870_v5 = vadd.f32 %v3426_v9, %v14322_v0  ;;  %v3428_v34 = vpop.f32.mrb[58].mxu0 }
 0x527   : > { %v4023_v4 = vadd.f32 %v8869_v37, %v11894_v55  ;;  %v8871_v31 = vadd.f32 %v3428_v34, %v14323_v32  ;;  %v3430_v13 = vpop.f32.mrb[59].mxu0 }
 0x528   : > { %v4024_v39 = vadd.f32 %v8870_v5, %v11900_v33  ;;  %v8872_v26 = vadd.f32 %v3430_v13, %v11523_v23  ;;  %v14325_v5 = vld [vmem:[#allocation49_spill] sm:$0xff]  ;;  %v4019_v13 = vadd.f32 %v8865_v59, %v11894_v55 }
 0x529   : > { %v12240_v24 = vmax.f32 %v4015_v6, %v4023_v4  ;;  %v4025_v52 = vadd.f32 %v8871_v31, %v11894_v55  ;;  %8337 = vmatmul.mubr.msk.bf16.gmra.mrb[164].mxu0 %vm527_vm1, %v14324_v10  ;;  %v14326_v4 = vld [vmem:[#allocation50_spill] sm:$0xff]  ;;  %v14328_v59 = vld [vmem:[#allocation5_spill] sm:$0xff] }
 0x52a   : > { %v12246_v37 = vmax.f32 %v4016_v35, %v4024_v39  ;;  %v4026_v9 = vadd.f32 %v8872_v26, %v11900_v33  ;;  %3702 = vmatprep.mubr.bf16.mxu0 %v14241_v8  ;;  %v14327_v39 = vld [vmem:[#allocation51_spill] sm:$0xff] }
 0x52b   : > { %v12250_v46 = vmax.f32 %v4017_v62, %v4025_v52  ;;  %v4020_v52 = vadd.f32 %v8866_v36, %v11900_v33 }
 0x52c   : > { %v12252_v23 = vmax.f32 %v4018_v42, %v4026_v9  ;;  %v3434_v3 = vpop.f32.mrb[60].mxu0  ;;  %v9891_v0 = vpack.i.bf16 %v12246_v37, %v12240_v24  ;;  %v4021_v9 = vadd.f32 %v8867_v58, %v11894_v55 }
 0x52d   : > { %v8873_v34 = vadd.f32 %v3434_v3, %v14325_v5  ;;  %v3436_v6 = vpop.f32.mrb[61].mxu0  ;;  %v4022_v5 = vadd.f32 %v8868_v12, %v11900_v33 }
 0x52e   : > { %v8874_v32 = vadd.f32 %v3436_v6, %v14326_v4  ;;  %9892 = vrot.lane.b32.xlu0 %v9891_v0, %s10473_s24  ;;  %v3438_v56 = vpop.f32.mrb[62].mxu0  ;;  %v9896_v31 = vpack.i.bf16 %v12252_v23, %v12250_v46 }
 0x52f   : > { %v4027_v35 = vadd.f32 %v8873_v34, %v11894_v55  ;;  %v8875_v26 = vadd.f32 %v3438_v56, %v14327_v39  ;;  %v3440_v62 = vpop.f32.mrb[63].mxu0 }
 0x530   : > { %v4028_v10 = vadd.f32 %v8874_v32, %v11900_v33  ;;  %v8876_v42 = vadd.f32 %v3440_v62, %v11537_v61  ;;  %9897 = vrot.lane.b32.xlu1 %v9896_v31, %s10473_s24  ;;  %v14329_v32 = vld [vmem:[#allocation52_spill] sm:$0xff] }
 0x531   : > { %v12269_v3 = vmax.f32 %v4019_v13, %v4027_v35  ;;  %v4029_v0 = vadd.f32 %v8875_v26, %v11894_v55  ;;  %8338 = vmatmul.mubr.msk.bf16.gmra.mrb[168].mxu0 %vm527_vm1, %v14328_v59  ;;  %v14330_v13 = vld [vmem:[#allocation53_spill] sm:$0xff]  ;;  %v14331_v26 = vld [vmem:[#allocation54_spill] sm:$0xff] }
 0x532   : > { %v12275_v34 = vmax.f32 %v4020_v52, %v4028_v10  ;;  %v4030_v36 = vadd.f32 %v8876_v42, %v11900_v33  ;;  %3712 = vmatprep.mubr.bf16.mxu0 %v14241_v8  ;;  %v14332_v42 = vld [vmem:[#allocation6_spill] sm:$0xff] }
 0x533   : > { %v12279_v61 = vmax.f32 %v4021_v9, %v4029_v0  ;;  %v14333_v0 = vld [vmem:[#allocation55_spill] sm:$0xff] }
 0x534   : > { %v12281_v6 = vmax.f32 %v4022_v5, %v4030_v36  ;;  %v3444_v58 = vpop.f32.mrb[64].mxu0  ;;  %v9901_v4 = vpack.i.bf16 %v12275_v34, %v12269_v3  ;;  %v14334_v36 = vld [vmem:[#allocation56_spill] sm:$0xff] }
 0x535   : > { %v8877_v56 = vadd.f32 %v3444_v58, %v14329_v32  ;;  %v3446_v31 = vpop.f32.mrb[65].mxu0  ;;  %v14335_v32 = vld [vmem:[#allocation57_spill] sm:$0xff] }
 0x536   : > { %v8878_v35 = vadd.f32 %v3446_v31, %v14330_v13  ;;  %9902 = vrot.lane.b32.xlu0 %v9901_v4, %s10473_s24  ;;  %v3448_v12 = vpop.f32.mrb[66].mxu0  ;;  %v9906_v39 = vpack.i.bf16 %v12281_v6, %v12279_v61 }
 0x537   : > { %v8879_v62 = vadd.f32 %v3448_v12, %v14331_v26  ;;  %v3450_v52 = vpop.f32.mrb[67].mxu0  ;;  %v14337_v26 = vld [vmem:[#allocation58_spill] sm:$0xff] }
 0x538   : > { %v8880_v10 = vadd.f32 %v3450_v52, %v11551_v29  ;;  %9907 = vrot.lane.b32.xlu1 %v9906_v39, %s10473_s24  ;;  %v14336_v29 = vld [vmem:[#allocation37_spill] sm:$0xff] }
 0x539   : > { %8339 = vmatmul.mubr.msk.bf16.gmra.mrb[172].mxu0 %vm527_vm1, %v14332_v42 }
 0x53a   : > { %3722 = vmatprep.mubr.bf16.mxu0 %v14241_v8 }
 0x53c   : > { %v3454_v9 = vpop.f32.mrb[68].mxu0 }
 0x53d   : > { %v8881_v59 = vadd.f32 %v3454_v9, %v14333_v0  ;;  %v3456_v5 = vpop.f32.mrb[69].mxu0 }
 0x53e   : > { %v8882_v58 = vadd.f32 %v3456_v5, %v14334_v36  ;;  %v3458_v4 = vpop.f32.mrb[70].mxu0  ;;  %v4031_v5 = vadd.f32 %v8877_v56, %v11894_v55  ;;  %v4034_v56 = vadd.f32 %v8880_v10, %v11900_v33 }
 0x53f   : > { %v8883_v31 = vadd.f32 %v3458_v4, %v14335_v32  ;;  %v3460_v13 = vpop.f32.mrb[71].mxu0  ;;  %v14339_v4 = vld [vmem:[#allocation60_spill] sm:$0xff] }
 0x540   : > { %v8884_v12 = vadd.f32 %v3460_v13, %v11565_v18  ;;  %v4032_v13 = vadd.f32 %v8878_v35, %v11900_v33  ;;  %v440_v35 = vld [vmem:[%s10570_s25 + $0x360] sm:$0xff] }
 0x541   : > { %8340 = vmatmul.mubr.msk.bf16.gmra.mrb[176].mxu0 %vm527_vm1, %v14336_v29 }
 0x542   : > { %3732 = vmatprep.mubr.bf16.mxu0 %v14241_v8 }
 0x544   : > { %v3464_v39 = vpop.f32.mrb[72].mxu0 }
 0x545   : > { %v8885_v52 = vadd.f32 %v3464_v39, %v14337_v26  ;;  %v3466_v42 = vpop.f32.mrb[73].mxu0  ;;  %v4033_v39 = vadd.f32 %v8879_v62, %v11894_v55 }
 0x546   : > { %v8886_v9 = vadd.f32 %v3466_v42, %v14338_v47  ;;  %v3468_v0 = vpop.f32.mrb[74].mxu0  ;;  %v14341_v42 = vld [vmem:[#allocation41_spill] sm:$0xff] }
 0x547   : > { %v4039_v36 = vadd.f32 %v8885_v52, %v11894_v55  ;;  %v8887_v18 = vadd.f32 %v3468_v0, %v14339_v4  ;;  %v3470_v32 = vpop.f32.mrb[75].mxu0  ;;  %v14345_v4 = vld [vmem:[#allocation61_spill] sm:$0xff] }
 0x548   : > { %v4040_v29 = vadd.f32 %v8886_v9, %v11900_v33  ;;  %v8888_v49 = vadd.f32 %v3470_v32, %v11579_v38  ;;  %v441_v9 = vld [vmem:[%s10570_s25 + $0x368] sm:$0xff] }
 0x549   : > { %v12312_v26 = vmax.f32 %v4031_v5, %v4039_v36  ;;  %v4041_v47 = vadd.f32 %v8887_v18, %v11894_v55  ;;  %8341 = vmatmul.mubr.msk.bf16.gmra.mrb[180].mxu0 %vm527_vm1, %v14341_v42  ;;  %v498_v10 = vpack.c.bf16 %v441_v9, %v440_v35  ;;  %v14348_v9 = vld [vmem:[#allocation64_spill] sm:$0xff] }
 0x54a   : > { %v12318_v52 = vmax.f32 %v4032_v13, %v4040_v29  ;;  %v4042_v0 = vadd.f32 %v8888_v49, %v11900_v33  ;;  %3742 = vmatprep.mubr.bf16.mxu0 %v14241_v8  ;;  %v14346_v13 = vld [vmem:[#allocation62_spill] sm:$0xff] }
 0x54b   : > { %14340 = vst [vmem:[#allocation26_spill] sm:$0xff] %v12312_v26  ;;  %v12324_v38 = vmax.f32 %v4033_v39, %v4041_v47  ;;  %v4035_v39 = vadd.f32 %v8881_v59, %v11894_v55 }
 0x54c   : > { %14342 = vst [vmem:[#allocation27_spill] sm:$0xff] %v12318_v52  ;;  %v12326_v62 = vmax.f32 %v4034_v56, %v4042_v0  ;;  %v3474_v5 = vpop.f32.mrb[76].mxu0  ;;  %v9911_v36 = vpack.i.bf16 %v12318_v52, %v12312_v26  ;;  %v14347_v56 = vld [vmem:[#allocation63_spill] sm:$0xff] }
 0x54d   : > { %14343 = vst [vmem:[#allocation28_spill] sm:$0xff] %v12324_v38  ;;  %v8889_v18 = vadd.f32 %v3474_v5, %v14345_v4  ;;  %v3476_v32 = vpop.f32.mrb[77].mxu0  ;;  %v4036_v5 = vadd.f32 %v8882_v58, %v11900_v33 }
 0x54e   : > { %14344 = vst [vmem:[#allocation29_spill] sm:$0xff] %v12326_v62  ;;  %v8890_v29 = vadd.f32 %v3476_v32, %v14346_v13  ;;  %9912 = vrot.lane.b32.xlu0 %v9911_v36, %s10473_s24  ;;  %v3478_v49 = vpop.f32.mrb[78].mxu0  ;;  %v9916_v42 = vpack.i.bf16 %v12326_v62, %v12324_v38  ;;  %v4037_v36 = vadd.f32 %v8883_v31, %v11894_v55 }
 0x54f   : > { %v4043_v47 = vadd.f32 %v8889_v18, %v11894_v55  ;;  %v8891_v0 = vadd.f32 %v3478_v49, %v14347_v56  ;;  %v3480_v26 = vpop.f32.mrb[79].mxu0  ;;  %v4038_v18 = vadd.f32 %v8884_v12, %v11900_v33 }
 0x550   : > { %v4044_v35 = vadd.f32 %v8890_v29, %v11900_v33  ;;  %v8892_v4 = vadd.f32 %v3480_v26, %v14348_v9  ;;  %9917 = vrot.lane.b32.xlu1 %v9916_v42, %s10473_s24  ;;  %v442_v29 = vld [vmem:[%s10570_s25 + $0x370] sm:$0xff]  ;;  %v443_v26 = vld [vmem:[%s10570_s25 + $0x378] sm:$0xff] }
 0x551   : > { %v12343_v32 = vmax.f32 %v4035_v39, %v4043_v47  ;;  %v4045_v59 = vadd.f32 %v8891_v0, %v11894_v55  ;;  %8342 = vmatmul.mubr.msk.bf16.gmra.mrb[184].mxu0 %vm527_vm1, %v498_v10  ;;  %v14353_v47 = vld [vmem:[#allocation65_spill] sm:$0xff]  ;;  %v499_v12 = vpack.c.bf16 %v443_v26, %v442_v29  ;;  %v14354_v0 = vld [vmem:[#allocation66_spill] sm:$0xff]  ;;  %v14356_v26 = vld [vmem:[#allocation68_spill] sm:$0xff] }
 0x552   : > { %v12348_v13 = vmax.f32 %v4036_v5, %v4044_v35  ;;  %v4046_v58 = vadd.f32 %v8892_v4, %v11900_v33  ;;  %3752 = vmatprep.mubr.bf16.mxu0 %v14241_v8 }
 0x553   : > { %14349 = vst [vmem:[#allocation30_spill] sm:$0xff] %v12343_v32  ;;  %v12354_v49 = vmax.f32 %v4037_v36, %v4045_v59  ;;  %v14355_v59 = vld [vmem:[#allocation67_spill] sm:$0xff] }
 0x554   : > { %14350 = vst [vmem:[#allocation31_spill] sm:$0xff] %v12348_v13  ;;  %v12356_v42 = vmax.f32 %v4038_v18, %v4046_v58  ;;  %v3484_v31 = vpop.f32.mrb[80].mxu0  ;;  %v9921_v39 = vpack.i.bf16 %v12348_v13, %v12343_v32  ;;  %v10248_v58 = vld [vmem:[%s14039_s3 + $0x4] ss:$8 sps:$4 sm:$0xff]  }
 0x555   : > { %14351 = vst [vmem:[#allocation32_spill] sm:$0xff] %v12354_v49  ;;  %v8893_v10 = vadd.f32 %v3484_v31, %v14353_v47  ;;  %v3486_v56 = vpop.f32.mrb[81].mxu0  ;;  %5538 = vmatprep.subr.bf16.mxu1 %v10248_v58  ;;  %v14357_v47 = vld [vmem:[#allocation69_spill] sm:$0xff]  ;;  %v14360_v13 = vld [vmem:[#allocation72_spill] sm:$0xff] }
 0x556   : > { %14352 = vst [vmem:[#allocation33_spill] sm:$0xff] %v12356_v42  ;;  %v8894_v5 = vadd.f32 %v3486_v56, %v14354_v0  ;;  %9922 = vrot.lane.b32.xlu0 %v9921_v39, %s10473_s24  ;;  %v3488_v35 = vpop.f32.mrb[82].mxu0  ;;  %v9926_v9 = vpack.i.bf16 %v12356_v42, %v12354_v49 }
 0x557   : > { %v8895_v4 = vadd.f32 %v3488_v35, %v11605_v57  ;;  %v3490_v36 = vpop.f32.mrb[83].mxu0  ;;  %v14358_v57 = vld [vmem:[#allocation70_spill] sm:$0xff]  ;;  %v4047_v58 = vadd.f32 %v8893_v10, %v11894_v55 }
 0x558   : > { %v8896_v18 = vadd.f32 %v3490_v36, %v14355_v59  ;;  %9927 = vrot.lane.b32.xlu1 %v9926_v9, %s10473_s24 }
 0x559   : > { %8343 = vmatmul.mubr.msk.bf16.gmra.mrb[188].mxu0 %vm527_vm1, %v499_v12 }
 0x55c   : > { %v3494_v29 = vpop.f32.mrb[84].mxu0 }
 0x55d   : > { %v8897_v31 = vadd.f32 %v3494_v29, %v14356_v26  ;;  %v3496_v39 = vpop.f32.mrb[85].mxu0  ;;  %v4048_v29 = vadd.f32 %v8894_v5, %v11900_v33  ;;  %v4049_v26 = vadd.f32 %v8895_v4, %v11894_v55 }
 0x55e   : > { %v8898_v56 = vadd.f32 %v3496_v39, %v14357_v47  ;;  %v3498_v0 = vpop.f32.mrb[86].mxu0 }
 0x55f   : > { %v8899_v35 = vadd.f32 %v3498_v0, %v14358_v57  ;;  %v3500_v8 = vpop.f32.mrb[87].mxu0 }
 0x560   : > { %v8900_v36 = vadd.f32 %v3500_v8, %v11620_v48  ;;  %v9853_v9 = vpop.permute.xlu0 %9852  ;;  %v4050_v48 = vadd.f32 %v8896_v18, %v11900_v33 }
 0x561   : > { %v9855_v12 = vunpack.i.h.bf16 %v9853_v9  ;;  %v9854_v59 = vunpack.i.l.bf16 %v9853_v9  ;;  %v14359_v9 = vld [vmem:[#allocation71_spill] sm:$0xff] }
 0x563   : > { %v4697_v49 = vmax.f32 %v12081_v27, %v9855_v12  ;;  %v4548_v42 = vsel %vm4543_vm3, %v9854_v59, %v9855_v12  ;;  %v4051_v12 = vadd.f32 %v8897_v31, %v11894_v55  ;;  %v4052_v59 = vadd.f32 %v8898_v56, %v11900_v33 }
 0x564   : > { %v4696_v39 = vmax.f32 %v12077_v1, %v4548_v42  ;;  %v9858_v47 = vpop.permute.xlu0 %9857  ;;  %v3504_v0 = vpop.f32.mrb[88].mxu0 }
 0x565   : > { %v9860_v8 = vunpack.i.h.bf16 %v9858_v47  ;;  %v9859_v57 = vunpack.i.l.bf16 %v9858_v47  ;;  %v8901_v32 = vadd.f32 %v3504_v0, %v14359_v9  ;;  %v3506_v27 = vpop.f32.mrb[89].mxu0  ;;  %v4793_v10 = vmax.f32 %v4697_v49, 0.0  ;;  %v14361_v9 = vld [vmem:[#allocation73_spill] sm:$0xff] }
 0x566   : > { %v8902_v5 = vadd.f32 %v3506_v27, %v14360_v13  ;;  %v3508_v38 = vpop.f32.mrb[90].mxu0  ;;  %v4792_v62 = vmax.f32 %v4696_v39, 0.0 }
 0x567   : > { %v4699_v4 = vmax.f32 %v12092_v60, %v9860_v8  ;;  %v4549_v1 = vsel %vm4543_vm3, %v9859_v57, %v9860_v8  ;;  %v4055_v42 = vadd.f32 %v8901_v32, %v11894_v55  ;;  %v8903_v18 = vadd.f32 %v3508_v38, %v11629_v45  ;;  %v3510_v47 = vpop.f32.mrb[91].mxu0 }
 0x568   : > { %v4698_v0 = vmax.f32 %v12086_v50, %v4549_v1  ;;  %v4056_v31 = vadd.f32 %v8902_v5, %v11900_v33  ;;  %v8904_v56 = vadd.f32 %v3510_v47, %v14361_v9  ;;  %v9863_v49 = vpop.permute.xlu1 %9862  ;;  %v4053_v32 = vadd.f32 %v8899_v35, %v11894_v55  ;;  %v14364_v47 = vld [vmem:[#allocation74_spill] sm:$0xff] }
 0x569   : > { %v4795_v52 = vmax.f32 %v4699_v4, 0.0  ;;  %v12394_v13 = vmax.f32 %v4047_v58, %v4055_v42  ;;  %v4057_v60 = vadd.f32 %v8903_v18, %v11894_v55  ;;  %v9865_v27 = vunpack.i.h.bf16 %v9863_v49  ;;  %v10246_v58 = vld [vmem:[%s14039_s3] ss:$8 sps:$4 sm:$0xff]  }
 0x56a   : > { %v4794_v8 = vmax.f32 %v4698_v0, 0.0  ;;  %v12397_v57 = vmax.f32 %v4048_v29, %v4056_v31  ;;  %v4058_v45 = vadd.f32 %v8904_v56, %v11900_v33  ;;  %v9864_v38 = vunpack.i.l.bf16 %v9863_v49 }
 0x56b   : > { %v4054_v50 = vadd.f32 %v8900_v36, %v11900_v33  ;;  %v12402_v39 = vpack.c.bf16 %v4795_v52, %v4793_v10  ;;  %v12404_v5 = vmax.f32 %v4049_v26, %v4057_v60  ;;  %v10251_v52 = vld [vmem:[%s14039_s3 + $0x14] ss:$8 sps:$4 sm:$0xff]   ;;  %v4701_v36 = vmax.f32 %v12124_v53, %v9865_v27 }
 0x56c   : > { %v12409_v4 = vpack.c.bf16 %v4794_v8, %v4792_v62  ;;  %v12411_v1 = vmax.f32 %v4050_v48, %v4058_v45  ;;  %v4550_v29 = vsel %vm4543_vm3, %v9864_v38, %v9865_v27  ;;  %v9868_v42 = vpop.permute.xlu1 %9867  ;;  %v3514_v18 = vpop.f32.mrb[92].mxu0  ;;  %v9931_v35 = vpack.i.bf16 %v12397_v57, %v12394_v13  ;;  %v14365_v48 = vld [vmem:[#allocation75_spill] sm:$0xff]  ;;  %v10249_v38 = vld [vmem:[%s14039_s3 + $0x10] ss:$8 sps:$4 sm:$0xff]  }
 0x56d   : > { %14362 = vst [vmem:[#allocation34_spill] sm:$0xff] %v12402_v39  ;;  %v9870_v26 = vunpack.i.h.bf16 %v9868_v42  ;;  %v9869_v10 = vunpack.i.l.bf16 %v9868_v42  ;;  %v8905_v62 = vadd.f32 %v3514_v18, %v14364_v47  ;;  %v3516_v0 = vpop.f32.mrb[93].mxu0  ;;  %8404 = vmatprep.mubr.msk.bf16.mxu1 %vm5132_vm4, %v12402_v39  ;;  %v4700_v53 = vmax.f32 %v12118_v43, %v4550_v29  ;;  %v14366_v18 = vld [vmem:[#allocation76_spill] sm:$0xff] }
 0x56e   : > { %14363 = vst [vmem:[#allocation35_spill] sm:$0xff] %v12409_v4  ;;  %v8906_v31 = vadd.f32 %v3516_v0, %v14365_v48  ;;  %5221 = vmatmul.mubr.bf16.vlgmr.msra.gmra.mrb[192].mxu1 %v12409_v4  ;;  %9932 = vrot.lane.b32.xlu0 %v9931_v35, %s10473_s24  ;;  %v3518_v9 = vpop.f32.mrb[94].mxu0  ;;  %v9936_v56 = vpack.i.bf16 %v12411_v1, %v12404_v5  ;;  %v10254_v0 = vld [vmem:[%s14039_s3 + $0x24] ss:$8 sps:$4 sm:$0xff]  }
 0x56f   : > { %v4703_v49 = vmax.f32 %v12133_v16, %v9870_v26  ;;  %v4551_v60 = vsel %vm4543_vm3, %v9869_v10, %v9870_v26  ;;  %v4059_v27 = vadd.f32 %v8905_v62, %v11894_v55  ;;  %v8907_v8 = vadd.f32 %v3518_v9, %v11640_v41  ;;  %v3520_v45 = vpop.f32.mrb[95].mxu0  ;;  %5539 = vmatpush1.bf16.msra.mxu1 %v10246_v58  ;;  %v14369_v9 = vld [vmem:[#allocation77_spill] sm:$0xff] }
 0x570   : > { %v4060_v42 = vadd.f32 %v8906_v31, %v11900_v33  ;;  %v8908_v35 = vadd.f32 %v3520_v45, %v14366_v18  ;;  %9937 = vrot.lane.b32.xlu1 %v9936_v56, %s10473_s24  ;;  %v4702_v43 = vmax.f32 %v12129_v19, %v4551_v60  ;;  %5540 = vmatprep.subr.bf16.mxu1 %v10251_v52  ;;  %v4797_v16 = vmax.f32 %v4701_v36, 0.0  ;;  %v14371_v45 = vld [vmem:[#allocation79_spill] sm:$0xff]  ;;  %v10257_v18 = vld [vmem:[%s14039_s3 + $0x34] ss:$8 sps:$4 sm:$0xff]  }
 0x571   : > { %v4799_v29 = vmax.f32 %v4703_v49, 0.0  ;;  %v12440_v26 = vmax.f32 %v4051_v12, %v4059_v27  ;;  %v4061_v41 = vadd.f32 %v8907_v8, %v11894_v55  ;;  %v4796_v47 = vmax.f32 %v4700_v53, 0.0  ;;  %v10252_v12 = vld [vmem:[%s14039_s3 + $0x20] ss:$8 sps:$4 sm:$0xff]  }
 0x572   : > { %v12443_v58 = vmax.f32 %v4052_v59, %v4060_v42  ;;  %v4062_v10 = vadd.f32 %v8908_v35, %v11900_v33  ;;  %v4798_v62 = vmax.f32 %v4702_v43, 0.0  ;;  %v10255_v42 = vld [vmem:[%s14039_s3 + $0x30] ss:$8 sps:$4 sm:$0xff]  }
 0x573   : > { %v12449_v48 = vpack.c.bf16 %v4799_v29, %v4797_v16  ;;  %v12451_v19 = vmax.f32 %v4053_v32, %v4061_v41  ;;  %5541 = vmatpush1.bf16.msra.mxu1 %v10249_v38  ;;  %v14370_v32 = vld [vmem:[#allocation78_spill] sm:$0xff]  ;;  %v14372_v43 = vld [vmem:[#allocation80_spill] sm:$0xff]  ;;  %v14373_v29 = vld [vmem:[#allocation81_spill] sm:$0xff] }
 0x574   : > { %v12456_v52 = vmax.f32 %v4054_v50, %v4062_v10  ;;  %v3524_v59 = vpop.f32.mrb[96].mxu0  ;;  %v12458_v36 = vpack.c.bf16 %v4798_v62, %v4796_v47  ;;  %v9941_v31 = vpack.i.bf16 %v12443_v58, %v12440_v26  ;;  %5542 = vmatprep.subr.bf16.mxu1 %v10254_v0  ;;  %v14374_v0 = vld [vmem:[#allocation82_spill] sm:$0xff] }
 0x575   : > { %14367 = vst [vmem:[#allocation36_spill] sm:$0xff] %v12449_v48  ;;  %v8909_v56 = vadd.f32 %v3524_v59, %v14369_v9  ;;  %v3526_v53 = vpop.f32.mrb[97].mxu0  ;;  %8405 = vmatprep.mubr.msk.bf16.mxu1 %vm5132_vm4, %v12449_v48 }
 0x576   : > { %14368 = vst [vmem:[#allocation38_spill] sm:$0xff] %v12458_v36  ;;  %v8910_v49 = vadd.f32 %v3526_v53, %v14370_v32  ;;  %5231 = vmatmul.mubr.bf16.gmra.mrb[196].mxu1 %v12458_v36  ;;  %9942 = vrot.lane.b32.xlu0 %v9941_v31, %s10473_s24  ;;  %v3528_v50 = vpop.f32.mrb[98].mxu0  ;;  %v9946_v60 = vpack.i.bf16 %v12456_v52, %v12451_v19  ;;  %v10258_v32 = vld [vmem:[%s14039_s3 + $0x40] ss:$8 sps:$4 sm:$0xff]  }
 0x577   : > { %v8911_v27 = vadd.f32 %v3528_v50, %v11651_v51  ;;  %v3530_v8 = vpop.f32.mrb[99].mxu0  ;;  %5543 = vmatpush1.bf16.msra.mxu1 %v10252_v12  ;;  %v10260_v50 = vld [vmem:[%s14039_s3 + $0x44] ss:$8 sps:$4 sm:$0xff]  }
 0x578   : > { %v8912_v38 = vadd.f32 %v3530_v8, %v14371_v45  ;;  %9947 = vrot.lane.b32.xlu1 %v9946_v60, %s10473_s24  ;;  %5544 = vmatprep.subr.bf16.mxu1 %v10257_v18 }
 0x57b   : > { %5545 = vmatpush1.bf16.msra.mxu1 %v10255_v42  ;;  %v4063_v42 = vadd.f32 %v8909_v56, %v11894_v55 }
 0x57c   : > { %v3534_v35 = vpop.f32.mrb[100].mxu0  ;;  %5546 = vmatprep.subr.bf16.mxu1 %v10260_v50 }
 0x57d   : > { %v8913_v16 = vadd.f32 %v3534_v35, %v14372_v43  ;;  %v3536_v51 = vpop.f32.mrb[101].mxu0  ;;  %v4064_v43 = vadd.f32 %v8910_v49, %v11900_v33 }
 0x57e   : > { %v8914_v41 = vadd.f32 %v3536_v51, %v14373_v29  ;;  %v3538_v10 = vpop.f32.mrb[102].mxu0 }
 0x57f   : > { %v12482_v47 = vadd.f32 %v3538_v10, %v11662_v11  ;;  %v3540_v62 = vpop.f32.mrb[103].mxu0  ;;  %v14375_v10 = vld [vmem:[#allocation83_spill] sm:$0xff]  ;;  %5547 = vmatpush1.bf16.msra.mxu1 %v10258_v32 }
 0x580   : > { %v12485_v12 = vadd.f32 %v3540_v62, %v14374_v0  ;;  %v9873_v59 = vpop.permute.xlu0 %9872 }
 0x581   : > { %v9875_v31 = vunpack.i.h.bf16 %v9873_v59  ;;  %v9874_v9 = vunpack.i.l.bf16 %v9873_v59  ;;  %v4066_v59 = vadd.f32 %v8912_v38, %v11900_v33 }
 0x582   : > { %v9878_v53 = vpop.permute.xlu1 %9877 }
 0x583   : > { %v4705_v60 = vmax.f32 %v12174_v20, %v9875_v31  ;;  %v4552_v11 = vsel %vm4543_vm3, %v9874_v9, %v9875_v31  ;;  %v9880_v8 = vunpack.i.h.bf16 %v9878_v53  ;;  %v9879_v45 = vunpack.i.l.bf16 %v9878_v53  ;;  %v14376_v31 = vld [vmem:[#allocation84_spill] sm:$0xff] }
 0x584   : > { %v3544_v18 = vpop.f32.mrb[104].mxu0  ;;  %v4704_v35 = vmax.f32 %v12168_v22, %v4552_v11  ;;  %v4065_v20 = vadd.f32 %v8911_v27, %v11894_v55 }
 0x585   : > { %v4707_v51 = vmax.f32 %v12180_v54, %v9880_v8  ;;  %v4553_v29 = vsel %vm4543_vm3, %v9879_v45, %v9880_v8  ;;  %v8917_v62 = vadd.f32 %v3544_v18, %v14375_v10  ;;  %v3546_v0 = vpop.f32.mrb[105].mxu0  ;;  %v4801_v53 = vmax.f32 %v4705_v60, 0.0  ;;  %v14377_v45 = vld [vmem:[#allocation85_spill] sm:$0xff] }
 0x586   : > { %v8918_v56 = vadd.f32 %v3546_v0, %v14376_v31  ;;  %v3548_v9 = vpop.f32.mrb[106].mxu0  ;;  %v4706_v22 = vmax.f32 %v12178_v15, %v4553_v29  ;;  %v4800_v27 = vmax.f32 %v4704_v35, 0.0 }
 0x587   : > { %v4803_v50 = vmax.f32 %v4707_v51, 0.0  ;;  %v4071_v49 = vadd.f32 %v8917_v62, %v11894_v55  ;;  %v8919_v54 = vadd.f32 %v3548_v9, %v11673_v14  ;;  %v3550_v11 = vpop.f32.mrb[107].mxu0 }
 0x588   : > { %v4072_v8 = vadd.f32 %v8918_v56, %v11900_v33  ;;  %v8920_v32 = vadd.f32 %v3550_v11, %v14377_v45  ;;  %v9883_v18 = vpop.permute.xlu0 %9882  ;;  %v4802_v10 = vmax.f32 %v4706_v22, 0.0  ;;  %v14380_v11 = vld [vmem:[#allocation86_spill] sm:$0xff] }
 0x589   : > { %v12509_v38 = vpack.c.bf16 %v4803_v50, %v4801_v53  ;;  %v12511_v0 = vmax.f32 %v4063_v42, %v4071_v49  ;;  %v4073_v15 = vadd.f32 %v8919_v54, %v11894_v55  ;;  %v9885_v60 = vunpack.i.h.bf16 %v9883_v18  ;;  %v10263_v49 = vld [vmem:[%s14039_s3 + $0x54] ss:$8 sps:$4 sm:$0xff]  }
 0x58a   : > { %v12514_v51 = vmax.f32 %v4064_v43, %v4072_v8  ;;  %v4074_v29 = vadd.f32 %v8920_v32, %v11900_v33  ;;  %v9884_v14 = vunpack.i.l.bf16 %v9883_v18  ;;  %v9888_v62 = vpop.permute.xlu1 %9887  ;;  %v12517_v31 = vpack.c.bf16 %v4802_v10, %v4800_v27  ;;  %v14381_v32 = vld [vmem:[#allocation87_spill] sm:$0xff]  ;;  %5548 = vmatprep.subr.bf16.mxu1 %v10263_v49 }
 0x58b   : > { %14378 = vst [vmem:[#allocation39_spill] sm:$0xff] %v12509_v38  ;;  %v12519_v56 = vmax.f32 %v4065_v20, %v4073_v15  ;;  %v4709_v35 = vmax.f32 %v12203_v2, %v9885_v60  ;;  %v9890_v9 = vunpack.i.h.bf16 %v9888_v62  ;;  %v9889_v22 = vunpack.i.l.bf16 %v9888_v62  ;;  %8406 = vmatprep.mubr.msk.bf16.mxu1 %vm5132_vm4, %v12509_v38  ;;  %v10261_v2 = vld [vmem:[%s14039_s3 + $0x50] ss:$8 sps:$4 sm:$0xff]   ;;  %v14443_v38 = vld [vmem:[#allocation123_spill] sm:$0xff] }
 0x58c   : > { %14379 = vst [vmem:[#allocation40_spill] sm:$0xff] %v12517_v31  ;;  %v4067_v42 = vadd.f32 %v8913_v16, %v11894_v55  ;;  %v12525_v53 = vmax.f32 %v4066_v59, %v4074_v29  ;;  %v4554_v43 = vsel %vm4543_vm3, %v9884_v14, %v9885_v60  ;;  %v3554_v50 = vpop.f32.mrb[108].mxu0  ;;  %5241 = vmatmul.mubr.bf16.gmra.mrb[200].mxu1 %v12517_v31 }
 0x58d   : > { %v9951_v20 = vpack.i.bf16 %v12514_v51, %v12511_v0  ;;  %v4068_v16 = vadd.f32 %v8914_v41, %v11900_v33  ;;  %v4711_v59 = vmax.f32 %v12209_v28, %v9890_v9  ;;  %v4555_v54 = vsel %vm4543_vm3, %v9889_v22, %v9890_v9  ;;  %v3556_v45 = vpop.f32.mrb[109].mxu0  ;;  %v14382_v22 = vld [vmem:[#allocation88_spill] sm:$0xff]  ;;  %5549 = vmatpush1.bf16.msra.mxu1 %v10261_v2 }
 0x58e   : > { %v8921_v8 = vadd.f32 %v3554_v50, %v14380_v11  ;;  %v8922_v18 = vadd.f32 %v3556_v45, %v14381_v32  ;;  %v3558_v27 = vpop.f32.mrb[110].mxu0  ;;  %v9956_v10 = vpack.i.bf16 %v12525_v53, %v12519_v56  ;;  %v4708_v15 = vmax.f32 %v12197_v63, %v4554_v43  ;;  %v14385_v45 = vld [vmem:[#allocation89_spill] sm:$0xff] }
 0x58f   : > { %9952 = vrot.lane.b32.xlu0 %v9951_v20, %s10473_s24  ;;  %v4710_v60 = vmax.f32 %v12207_v7, %v4555_v54  ;;  %v4805_v41 = vmax.f32 %v4709_v35, 0.0  ;;  %v4807_v29 = vmax.f32 %v4711_v59, 0.0  ;;  %v8923_v14 = vadd.f32 %v3558_v27, %v11684_v17  ;;  %v3560_v62 = vpop.f32.mrb[111].mxu0  ;;  %v14386_v27 = vld [vmem:[#allocation90_spill] sm:$0xff] }
 0x590   : > { %v4075_v28 = vadd.f32 %v8921_v8, %v11894_v55  ;;  %v4076_v9 = vadd.f32 %v8922_v18, %v11900_v33  ;;  %v8924_v50 = vadd.f32 %v3560_v62, %v14382_v22  ;;  %9957 = vrot.lane.b32.xlu1 %v9956_v10, %s10473_s24  ;;  %v4804_v20 = vmax.f32 %v4708_v15, 0.0  ;;  %v10267_v62 = vld [vmem:[%s14039_s3 + $0x70] ss:$8 sps:$4 sm:$0xff]  }
 0x591   : > { %v4806_v11 = vmax.f32 %v4710_v60, 0.0  ;;  %v4069_v63 = vadd.f32 %v12482_v47, %v11894_v55  ;;  %v12554_v7 = vpack.c.bf16 %v4807_v29, %v4805_v41  ;;  %v4077_v17 = vadd.f32 %v8923_v14, %v11894_v55 }
 0x592   : > { %v12556_v35 = vmax.f32 %v4067_v42, %v4075_v28  ;;  %v4070_v43 = vadd.f32 %v12485_v12, %v11900_v33  ;;  %v12561_v49 = vmax.f32 %v4068_v16, %v4076_v9  ;;  %v4078_v59 = vadd.f32 %v8924_v50, %v11900_v33  ;;  %v10264_v12 = vld [vmem:[%s14039_s3 + $0x60] ss:$8 sps:$4 sm:$0xff]   ;;  %v10266_v16 = vld [vmem:[%s14039_s3 + $0x64] ss:$8 sps:$4 sm:$0xff]   ;;  %v10269_v9 = vld [vmem:[%s14039_s3 + $0x74] ss:$8 sps:$4 sm:$0xff]  }
 0x593   : > { %14383 = vst [vmem:[#allocation42_spill] sm:$0xff] %v12554_v7  ;;  %v12564_v54 = vpack.c.bf16 %v4806_v11, %v4804_v20  ;;  %v12566_v8 = vmax.f32 %v4069_v63, %v4077_v17  ;;  %8407 = vmatprep.mubr.msk.bf16.mxu1 %vm5132_vm4, %v12554_v7  ;;  %5550 = vmatprep.subr.bf16.mxu1 %v10266_v16  ;;  %v14387_v28 = vld [vmem:[#allocation91_spill] sm:$0xff]  ;;  %v14388_v50 = vld [vmem:[#allocation92_spill] sm:$0xff] }
 0x594   : > { %v12570_v47 = vmax.f32 %v4070_v43, %v4078_v59  ;;  %v3564_v42 = vpop.f32.mrb[112].mxu0  ;;  %v9961_v2 = vpack.i.bf16 %v12561_v49, %v12556_v35  ;;  %5551 = vmatpush1.bf16.msra.mxu1 %v10264_v12 }
 0x595   : > { %14384 = vst [vmem:[#allocation43_spill] sm:$0xff] %v12564_v54  ;;  %5251 = vmatmul.mubr.bf16.gmra.mrb[204].mxu1 %v12564_v54  ;;  %v8925_v32 = vadd.f32 %v3564_v42, %v14385_v45  ;;  %v3566_v18 = vpop.f32.mrb[113].mxu0  ;;  %5552 = vmatprep.subr.bf16.mxu1 %v10269_v9  ;;  %v14390_v42 = vld [vmem:[#allocation94_spill] sm:$0xff] }
 0x596   : > { %v8926_v10 = vadd.f32 %v3566_v18, %v14386_v27  ;;  %9962 = vrot.lane.b32.xlu0 %v9961_v2, %s10473_s24  ;;  %v3568_v15 = vpop.f32.mrb[114].mxu0  ;;  %v9966_v60 = vpack.i.bf16 %v12570_v47, %v12566_v8 }
 0x597   : > { %v8927_v41 = vadd.f32 %v3568_v15, %v11695_v21  ;;  %v3570_v29 = vpop.f32.mrb[115].mxu0  ;;  %v14389_v21 = vld [vmem:[#allocation93_spill] sm:$0xff] }
 0x598   : > { %v8928_v14 = vadd.f32 %v3570_v29, %v14387_v28  ;;  %9967 = vrot.lane.b32.xlu1 %v9966_v60, %s10473_s24  ;;  %5553 = vmatpush1.bf16.msra.mxu1 %v10267_v62  ;;  %v4079_v28 = vadd.f32 %v8925_v32, %v11894_v55  ;;  %v4080_v9 = vadd.f32 %v8926_v10, %v11900_v33 }
 0x59c   : > { %v3574_v22 = vpop.f32.mrb[116].mxu0 }
 0x59d   : > { %v8929_v20 = vadd.f32 %v3574_v22, %v14388_v50  ;;  %v3576_v11 = vpop.f32.mrb[117].mxu0 }
 0x59e   : > { %v8930_v63 = vadd.f32 %v3576_v11, %v14389_v21  ;;  %v3578_v17 = vpop.f32.mrb[118].mxu0  ;;  %v14391_v11 = vld [vmem:[#allocation95_spill] sm:$0xff] }
 0x59f   : > { %v12598_v43 = vadd.f32 %v3578_v17, %v11706_v25  ;;  %v3580_v59 = vpop.f32.mrb[119].mxu0 }
 0x5a0   : > { %v12601_v2 = vadd.f32 %v3580_v59, %v14390_v42  ;;  %v9893_v12 = vpop.permute.xlu0 %9892  ;;  %v4082_v59 = vadd.f32 %v8928_v14, %v11900_v33 }
 0x5a1   : > { %v9895_v16 = vunpack.i.h.bf16 %v9893_v12  ;;  %v9894_v45 = vunpack.i.l.bf16 %v9893_v12  ;;  %v14392_v12 = vld [vmem:[#allocation96_spill] sm:$0xff] }
 0x5a2   : > { %v9898_v18 = vpop.permute.xlu1 %9897 }
 0x5a3   : > { %v4713_v27 = vmax.f32 %v12246_v37, %v9895_v16  ;;  %v4556_v15 = vsel %vm4543_vm3, %v9894_v45, %v9895_v16  ;;  %v9900_v60 = vunpack.i.h.bf16 %v9898_v18  ;;  %v9899_v29 = vunpack.i.l.bf16 %v9898_v18 }
 0x5a4   : > { %v4712_v62 = vmax.f32 %v12240_v24, %v4556_v15  ;;  %v3584_v25 = vpop.f32.mrb[120].mxu0  ;;  %v4081_v37 = vadd.f32 %v8927_v41, %v11894_v55  ;;  %v10270_v24 = vld [vmem:[%s14039_s3 + $0x80] ss:$8 sps:$4 sm:$0xff]  }
 0x5a5   : > { %v4715_v22 = vmax.f32 %v12252_v23, %v9900_v60  ;;  %v4557_v50 = vsel %vm4543_vm3, %v9899_v29, %v9900_v60  ;;  %v8933_v21 = vadd.f32 %v3584_v25, %v14391_v11  ;;  %v3586_v17 = vpop.f32.mrb[121].mxu0  ;;  %v10272_v23 = vld [vmem:[%s14039_s3 + $0x84] ss:$8 sps:$4 sm:$0xff]   ;;  %v4809_v10 = vmax.f32 %v4713_v27, 0.0  ;;  %v14393_v29 = vld [vmem:[#allocation97_spill] sm:$0xff] }
 0x5a6   : > { %v4714_v42 = vmax.f32 %v12250_v46, %v4557_v50  ;;  %v8934_v32 = vadd.f32 %v3586_v17, %v14392_v12  ;;  %v3588_v16 = vpop.f32.mrb[122].mxu0  ;;  %v4808_v15 = vmax.f32 %v4712_v62, 0.0  ;;  %5554 = vmatprep.subr.bf16.mxu1 %v10272_v23 }
 0x5a7   : > { %v4811_v45 = vmax.f32 %v4715_v22, 0.0  ;;  %v4087_v18 = vadd.f32 %v8933_v21, %v11894_v55  ;;  %v8935_v41 = vadd.f32 %v3588_v16, %v11717_v30  ;;  %v3590_v14 = vpop.f32.mrb[123].mxu0  ;;  %5555 = vmatpush1.bf16.msra.mxu1 %v10270_v24 }
 0x5a8   : > { %v4810_v46 = vmax.f32 %v4714_v42, 0.0  ;;  %v4088_v60 = vadd.f32 %v8934_v32, %v11900_v33  ;;  %v8936_v25 = vadd.f32 %v3590_v14, %v14393_v29  ;;  %v9903_v50 = vpop.permute.xlu0 %9902 }
 0x5a9   : > { %v12625_v11 = vpack.c.bf16 %v4811_v45, %v4809_v10  ;;  %v12627_v17 = vmax.f32 %v4079_v28, %v4087_v18  ;;  %v4089_v27 = vadd.f32 %v8935_v41, %v11894_v55  ;;  %v9905_v22 = vunpack.i.h.bf16 %v9903_v50 }
 0x5aa   : > { %v12630_v21 = vmax.f32 %v4080_v9, %v4088_v60  ;;  %v4090_v30 = vadd.f32 %v8936_v25, %v11900_v33  ;;  %v9904_v62 = vunpack.i.l.bf16 %v9903_v50  ;;  %v9908_v42 = vpop.permute.xlu1 %9907  ;;  %v12633_v12 = vpack.c.bf16 %v4810_v46, %v4808_v15  ;;  %v14397_v60 = vld [vmem:[#allocation99_spill] sm:$0xff] }
 0x5ab   : > { %14394 = vst [vmem:[#allocation44_spill] sm:$0xff] %v12625_v11  ;;  %v12635_v32 = vmax.f32 %v4081_v37, %v4089_v27  ;;  %v4717_v16 = vmax.f32 %v12275_v34, %v9905_v22  ;;  %v9910_v23 = vunpack.i.h.bf16 %v9908_v42  ;;  %v9909_v10 = vunpack.i.l.bf16 %v9908_v42  ;;  %8408 = vmatprep.mubr.msk.bf16.mxu1 %vm5132_vm4, %v12625_v11  ;;  %v14414_v11 = vld [vmem:[#allocation110_spill] sm:$0xff] }
 0x5ac   : > { %14395 = vst [vmem:[#allocation45_spill] sm:$0xff] %v12633_v12  ;;  %v4083_v28 = vadd.f32 %v8929_v20, %v11894_v55  ;;  %v12641_v24 = vmax.f32 %v4082_v59, %v4090_v30  ;;  %v4558_v9 = vsel %vm4543_vm3, %v9904_v62, %v9905_v22  ;;  %v3594_v45 = vpop.f32.mrb[124].mxu0  ;;  %5261 = vmatmul.mubr.bf16.gmra.mrb[208].mxu1 %v12633_v12  ;;  %v14396_v59 = vld [vmem:[#allocation98_spill] sm:$0xff] }
 0x5ad   : > { %v9971_v37 = vpack.i.bf16 %v12630_v21, %v12627_v17  ;;  %v4084_v18 = vadd.f32 %v8930_v63, %v11900_v33  ;;  %v4716_v34 = vmax.f32 %v12269_v3, %v4558_v9  ;;  %v4719_v41 = vmax.f32 %v12281_v6, %v9910_v23  ;;  %v3596_v15 = vpop.f32.mrb[125].mxu0 }
 0x5ae   : > { %v4559_v14 = vsel %vm4543_vm3, %v9909_v10, %v9910_v23  ;;  %v8937_v46 = vadd.f32 %v3594_v45, %v14396_v59  ;;  %v8938_v29 = vadd.f32 %v3596_v15, %v14397_v60  ;;  %v3598_v25 = vpop.f32.mrb[126].mxu0  ;;  %v9976_v50 = vpack.i.bf16 %v12641_v24, %v12635_v32  ;;  %v14398_v23 = vld [vmem:[#allocation100_spill] sm:$0xff] }
 0x5af   : > { %v4718_v20 = vmax.f32 %v12279_v61, %v4559_v14  ;;  %9972 = vrot.lane.b32.xlu0 %v9971_v37, %s10473_s24  ;;  %v4813_v63 = vmax.f32 %v4717_v16, 0.0  ;;  %v4812_v27 = vmax.f32 %v4716_v34, 0.0  ;;  %v4815_v3 = vmax.f32 %v4719_v41, 0.0  ;;  %v3600_v22 = vpop.f32.mrb[127].mxu0  ;;  %v10273_v61 = vld [vmem:[%s14039_s3 + $0x90] ss:$8 sps:$4 sm:$0xff]  }
 0x5b0   : > { %v8939_v6 = vadd.f32 %v3598_v25, %v11728_v40  ;;  %v4091_v62 = vadd.f32 %v8937_v46, %v11894_v55  ;;  %v4092_v42 = vadd.f32 %v8938_v29, %v11900_v33  ;;  %v8940_v10 = vadd.f32 %v3600_v22, %v14398_v23  ;;  %9977 = vrot.lane.b32.xlu1 %v9976_v50, %s10473_s24  ;;  %v10275_v16 = vld [vmem:[%s14039_s3 + $0x94] ss:$8 sps:$4 sm:$0xff]   ;;  %v10278_v59 = vld [vmem:[%s14039_s3 + $0xa4] ss:$8 sps:$4 sm:$0xff]  }
 0x5b1   : > { %v4814_v30 = vmax.f32 %v4718_v20, 0.0  ;;  %v4085_v40 = vadd.f32 %v12598_v43, %v11894_v55  ;;  %v4086_v9 = vadd.f32 %v12601_v2, %v11900_v33  ;;  %v12672_v45 = vpack.c.bf16 %v4815_v3, %v4813_v63  ;;  %5556 = vmatprep.subr.bf16.mxu1 %v10275_v16  ;;  %v14401_v46 = vld [vmem:[#allocation101_spill] sm:$0xff]  ;;  %v14402_v25 = vld [vmem:[#allocation102_spill] sm:$0xff]  ;;  %v14403_v22 = vld [vmem:[#allocation103_spill] sm:$0xff] }
 0x5b2   : > { %v4093_v37 = vadd.f32 %v8939_v6, %v11894_v55  ;;  %v12675_v34 = vmax.f32 %v4083_v28, %v4091_v62  ;;  %v12677_v41 = vmax.f32 %v4084_v18, %v4092_v42  ;;  %v4094_v14 = vadd.f32 %v8940_v10, %v11900_v33  ;;  %5557 = vmatpush1.bf16.msra.mxu1 %v10273_v61  ;;  %v10276_v18 = vld [vmem:[%s14039_s3 + $0xa0] ss:$8 sps:$4 sm:$0xff]   ;;  %v10281_v62 = vld [vmem:[%s14039_s3 + $0xb4] ss:$8 sps:$4 sm:$0xff]  }
 0x5b3   : > { %14399 = vst [vmem:[#allocation3_spill] sm:$0xff] %v12672_v45  ;;  %v12680_v15 = vpack.c.bf16 %v4814_v30, %v4812_v27  ;;  %8409 = vmatprep.mubr.msk.bf16.mxu1 %vm5132_vm4, %v12672_v45  ;;  %5558 = vmatprep.subr.bf16.mxu1 %v10278_v59  ;;  %v10279_v30 = vld [vmem:[%s14039_s3 + $0xb0] ss:$8 sps:$4 sm:$0xff]  }
 0x5b4   : > { %v12682_v20 = vmax.f32 %v4085_v40, %v4093_v37  ;;  %v12686_v43 = vmax.f32 %v4086_v9, %v4094_v14  ;;  %v3604_v2 = vpop.f32.mrb[128].mxu0  ;;  %v9981_v28 = vpack.i.bf16 %v12677_v41, %v12675_v34  ;;  %v14404_v23 = vld [vmem:[#allocation104_spill] sm:$0xff]  ;;  %v14405_v16 = vld [vmem:[#allocation105_spill] sm:$0xff]  ;;  %v14406_v37 = vld [vmem:[#allocation106_spill] sm:$0xff] }
 0x5b5   : > { %14400 = vst [vmem:[#allocation46_spill] sm:$0xff] %v12680_v15  ;;  %5271 = vmatmul.mubr.bf16.gmra.mrb[212].mxu1 %v12680_v15  ;;  %v8941_v60 = vadd.f32 %v3604_v2, %v14401_v46  ;;  %v3606_v29 = vpop.f32.mrb[129].mxu0  ;;  %v14413_v45 = vld [vmem:[#allocation109_spill] sm:$0xff] }
 0x5b6   : > { %v8942_v50 = vadd.f32 %v3606_v29, %v14402_v25  ;;  %9982 = vrot.lane.b32.xlu0 %v9981_v28, %s10473_s24  ;;  %v3608_v63 = vpop.f32.mrb[130].mxu0  ;;  %v9986_v27 = vpack.i.bf16 %v12686_v43, %v12682_v20  ;;  %5559 = vmatpush1.bf16.msra.mxu1 %v10276_v18  ;;  %v14407_v28 = vld [vmem:[#allocation107_spill] sm:$0xff] }
 0x5b7   : > { %v8943_v3 = vadd.f32 %v3608_v63, %v11739_v44  ;;  %v3610_v6 = vpop.f32.mrb[131].mxu0  ;;  %5560 = vmatprep.subr.bf16.mxu1 %v10281_v62  ;;  %v14408_v63 = vld [vmem:[#allocation27_spill] sm:$0xff]  ;;  %v4095_v62 = vadd.f32 %v8941_v60, %v11894_v55 }
 0x5b8   : > { %v8944_v61 = vadd.f32 %v3610_v6, %v14403_v22  ;;  %9987 = vrot.lane.b32.xlu1 %v9986_v27, %s10473_s24 }
 0x5ba   : > { %5561 = vmatpush1.bf16.msra.mxu1 %v10279_v30 }
 0x5bc   : > { %v3614_v42 = vpop.f32.mrb[132].mxu0 }
 0x5bd   : > { %v8945_v10 = vadd.f32 %v3614_v42, %v14404_v23  ;;  %v3616_v44 = vpop.f32.mrb[133].mxu0  ;;  %v14409_v42 = vld [vmem:[#allocation26_spill] sm:$0xff] }
 0x5be   : > { %v8946_v40 = vadd.f32 %v3616_v44, %v14405_v16  ;;  %v3618_v9 = vpop.f32.mrb[134].mxu0  ;;  %v4096_v16 = vadd.f32 %v8942_v50, %v11900_v33 }
 0x5bf   : > { %v12714_v14 = vadd.f32 %v3618_v9, %v14406_v37  ;;  %v3620_v2 = vpop.f32.mrb[135].mxu0  ;;  %v14410_v9 = vld [vmem:[#allocation29_spill] sm:$0xff] }
 0x5c0   : > { %v12717_v18 = vadd.f32 %v3620_v2, %v14407_v28  ;;  %v9913_v59 = vpop.permute.xlu0 %9912  ;;  %v14411_v28 = vld [vmem:[#allocation108_spill] sm:$0xff] }
 0x5c1   : > { %v9915_v46 = vunpack.i.h.bf16 %v9913_v59  ;;  %v9914_v29 = vunpack.i.l.bf16 %v9913_v59 }
 0x5c2   : > { %v9918_v25 = vpop.permute.xlu1 %9917 }
 0x5c3   : > { %v4721_v27 = vmax.f32 %v14408_v63, %v9915_v46  ;;  %v4560_v6 = vsel %vm4543_vm3, %v9914_v29, %v9915_v46  ;;  %v9920_v22 = vunpack.i.h.bf16 %v9918_v25  ;;  %v9919_v30 = vunpack.i.l.bf16 %v9918_v25  ;;  %v14412_v29 = vld [vmem:[#allocation28_spill] sm:$0xff] }
 0x5c4   : > { %v4720_v23 = vmax.f32 %v14409_v42, %v4560_v6  ;;  %v3624_v44 = vpop.f32.mrb[136].mxu0  ;;  %v4097_v63 = vadd.f32 %v8943_v3, %v11894_v55  ;;  %v4098_v46 = vadd.f32 %v8944_v61, %v11900_v33 }
 0x5c5   : > { %v4723_v37 = vmax.f32 %v14410_v9, %v9920_v22  ;;  %v4561_v2 = vsel %vm4543_vm3, %v9919_v30, %v9920_v22  ;;  %v8949_v59 = vadd.f32 %v3624_v44, %v14411_v28  ;;  %v3626_v15 = vpop.f32.mrb[137].mxu0  ;;  %v4817_v6 = vmax.f32 %v4721_v27, 0.0  ;;  %v14415_v28 = vld [vmem:[#allocation111_spill] sm:$0xff] }
 0x5c6   : > { %v4722_v25 = vmax.f32 %v14412_v29, %v4561_v2  ;;  %v8950_v60 = vadd.f32 %v3626_v15, %v14413_v45  ;;  %v3628_v12 = vpop.f32.mrb[138].mxu0  ;;  %v4816_v22 = vmax.f32 %v4720_v23, 0.0  ;;  %v10282_v27 = vld [vmem:[%s14039_s3 + $0xc0] ss:$8 sps:$4 sm:$0xff]  }
 0x5c7   : > { %v4819_v42 = vmax.f32 %v4723_v37, 0.0  ;;  %v4103_v50 = vadd.f32 %v8949_v59, %v11894_v55  ;;  %v8951_v9 = vadd.f32 %v3628_v12, %v14414_v11  ;;  %v3630_v54 = vpop.f32.mrb[139].mxu0  ;;  %v10284_v11 = vld [vmem:[%s14039_s3 + $0xc4] ss:$8 sps:$4 sm:$0xff]  }
 0x5c8   : > { %v4818_v30 = vmax.f32 %v4722_v25, 0.0  ;;  %v4104_v44 = vadd.f32 %v8950_v60, %v11900_v33  ;;  %v8952_v3 = vadd.f32 %v3630_v54, %v14415_v28  ;;  %v9923_v7 = vpop.permute.xlu0 %9922  ;;  %v14418_v29 = vld [vmem:[#allocation31_spill] sm:$0xff]  ;;  %5562 = vmatprep.subr.bf16.mxu1 %v10284_v11  ;;  %v14422_v11 = vld [vmem:[#allocation112_spill] sm:$0xff] }
 0x5c9   : > { %v12735_v61 = vpack.c.bf16 %v4819_v42, %v4817_v6  ;;  %v12737_v2 = vmax.f32 %v4095_v62, %v4103_v50  ;;  %v4105_v45 = vadd.f32 %v8951_v9, %v11894_v55  ;;  %v9925_v15 = vunpack.i.h.bf16 %v9923_v7  ;;  %5563 = vmatpush1.bf16.msra.mxu1 %v10282_v27 }
 0x5ca   : > { %v12746_v12 = vpack.c.bf16 %v4818_v30, %v4816_v22  ;;  %v12748_v23 = vmax.f32 %v4096_v16, %v4104_v44  ;;  %v4106_v54 = vadd.f32 %v8952_v3, %v11900_v33  ;;  %v9924_v37 = vunpack.i.l.bf16 %v9923_v7  ;;  %v9928_v62 = vpop.permute.xlu1 %9927  ;;  %v14419_v22 = vld [vmem:[#allocation30_spill] sm:$0xff]  ;;  %v14420_v44 = vld [vmem:[#allocation33_spill] sm:$0xff] }
 0x5cb   : > { %14416 = vst [vmem:[#allocation47_spill] sm:$0xff] %v12735_v61  ;;  %v12751_v59 = vmax.f32 %v4097_v63, %v4105_v45  ;;  %v4725_v25 = vmax.f32 %v14418_v29, %v9925_v15  ;;  %v9930_v60 = vunpack.i.h.bf16 %v9928_v62  ;;  %v9929_v6 = vunpack.i.l.bf16 %v9928_v62  ;;  %8410 = vmatprep.mubr.msk.bf16.mxu1 %vm5132_vm4, %v12735_v61 }
 0x5cc   : > { %14417 = vst [vmem:[#allocation48_spill] sm:$0xff] %v12746_v12  ;;  %v4099_v42 = vadd.f32 %v8945_v10, %v11894_v55  ;;  %v12757_v50 = vmax.f32 %v4098_v46, %v4106_v54  ;;  %v4562_v16 = vsel %vm4543_vm3, %v9924_v37, %v9925_v15  ;;  %v3634_v9 = vpop.f32.mrb[140].mxu0  ;;  %5281 = vmatmul.mubr.bf16.gmra.mrb[216].mxu1 %v12746_v12  ;;  %v14421_v10 = vld [vmem:[#allocation32_spill] sm:$0xff]  ;;  %v14423_v54 = vld [vmem:[#allocation113_spill] sm:$0xff] }
 0x5cd   : > { %v9991_v7 = vpack.i.bf16 %v12748_v23, %v12737_v2  ;;  %v4100_v63 = vadd.f32 %v8946_v40, %v11900_v33  ;;  %v4724_v30 = vmax.f32 %v14419_v22, %v4562_v16  ;;  %v4727_v28 = vmax.f32 %v14420_v44, %v9930_v60  ;;  %v3636_v45 = vpop.f32.mrb[141].mxu0  ;;  %v14424_v44 = vld [vmem:[#allocation114_spill] sm:$0xff] }
 0x5ce   : > { %v4563_v3 = vsel %vm4543_vm3, %v9929_v6, %v9930_v60  ;;  %v8953_v15 = vadd.f32 %v3634_v9, %v14422_v11  ;;  %v8954_v37 = vadd.f32 %v3636_v45, %v14423_v54  ;;  %v3638_v62 = vpop.f32.mrb[142].mxu0  ;;  %v9996_v40 = vpack.i.bf16 %v12757_v50, %v12751_v59  ;;  %v14425_v9 = vld [vmem:[#allocation115_spill] sm:$0xff]  ;;  %v10285_v45 = vld [vmem:[%s14039_s3 + $0xd0] ss:$8 sps:$4 sm:$0xff]  }
 0x5cf   : > { %v4726_v46 = vmax.f32 %v14421_v10, %v4563_v3  ;;  %9992 = vrot.lane.b32.xlu0 %v9991_v7, %s10473_s24  ;;  %v4821_v29 = vmax.f32 %v4725_v25, 0.0  ;;  %v4820_v16 = vmax.f32 %v4724_v30, 0.0  ;;  %v4823_v22 = vmax.f32 %v4727_v28, 0.0  ;;  %v3640_v60 = vpop.f32.mrb[143].mxu0 }
 0x5d0   : > { %v8955_v12 = vadd.f32 %v3638_v62, %v14424_v44  ;;  %v4107_v27 = vadd.f32 %v8953_v15, %v11894_v55  ;;  %v4108_v3 = vadd.f32 %v8954_v37, %v11900_v33  ;;  %v8956_v10 = vadd.f32 %v3640_v60, %v14425_v9  ;;  %9997 = vrot.lane.b32.xlu1 %v9996_v40, %s10473_s24  ;;  %v14430_v60 = vld [vmem:[#allocation118_spill] sm:$0xff]  ;;  %v14431_v9 = vld [vmem:[#allocation119_spill] sm:$0xff] }
 0x5d1   : > { %v4822_v6 = vmax.f32 %v4726_v46, 0.0  ;;  %v4101_v7 = vadd.f32 %v12714_v14, %v11894_v55  ;;  %v4102_v25 = vadd.f32 %v12717_v18, %v11900_v33  ;;  %v12782_v30 = vpack.c.bf16 %v4823_v22, %v4821_v29  ;;  %v10287_v46 = vld [vmem:[%s14039_s3 + $0xd4] ss:$8 sps:$4 sm:$0xff]  }
 0x5d2   : > { %v4109_v28 = vadd.f32 %v8955_v12, %v11894_v55  ;;  %v12793_v15 = vmax.f32 %v4099_v42, %v4107_v27  ;;  %v12795_v14 = vmax.f32 %v4100_v63, %v4108_v3  ;;  %v4110_v18 = vadd.f32 %v8956_v10, %v11900_v33  ;;  %5564 = vmatprep.subr.bf16.mxu1 %v10287_v46  ;;  %v14428_v42 = vld [vmem:[#allocation116_spill] sm:$0xff]  ;;  %v14429_v29 = vld [vmem:[#allocation117_spill] sm:$0xff]  ;;  %v4956_v3 = vld [vmem:[%s14039_s3 + $0xe0] sm:$0x77] }
 0x5d3   : > { %14426 = vst [vmem:[#allocation4_spill] sm:$0xff] %v12782_v30  ;;  %v12791_v11 = vpack.c.bf16 %v4822_v6, %v4820_v16  ;;  %8411 = vmatprep.mubr.msk.bf16.mxu1 %vm5132_vm4, %v12782_v30  ;;  %5565 = vmatpush1.bf16.msra.mxu1 %v10285_v45  ;;  %v8449_v45 = vcombine.high %v4956_v3, %v4956_v3 }
 0x5d4   : > { %v12798_v54 = vmax.f32 %v4101_v7, %v4109_v28  ;;  %v12802_v12 = vmax.f32 %v4102_v25, %v4110_v18  ;;  %v3644_v37 = vpop.f32.mrb[144].mxu0  ;;  %v10001_v62 = vpack.i.bf16 %v12795_v14, %v12793_v15  ;;  %v14432_v7 = vld [vmem:[#allocation142_spill] sm:$0xff]  ;;  %v14433_v25 = vld [vmem:[#allocation144_spill] sm:$0xff]  ;;  %v8448_v46 = vcombine.low %v4956_v3, %v4956_v3 }
 0x5d5   : > { %14427 = vst [vmem:[#allocation49_spill] sm:$0xff] %v12791_v11  ;;  %5291 = vmatmul.mubr.bf16.gmra.mrb[220].mxu1 %v12791_v11  ;;  %v8957_v40 = vadd.f32 %v3644_v37, %v14428_v42  ;;  %v3646_v63 = vpop.f32.mrb[145].mxu0  ;;  %v10011_v28 = vpack.i.bf16 %v14433_v25, %v14432_v7  ;;  %v14434_v18 = vld [vmem:[#allocation146_spill] sm:$0xff]  ;;  %v14435_v37 = vld [vmem:[#allocation148_spill] sm:$0xff]  ;;  %8450 = vmatprep.subr.msk.bf16.mxu1 %vm5181_vm2, %v8449_v45 }
 0x5d6   : > { %v8958_v16 = vadd.f32 %v3646_v63, %v14429_v29  ;;  %10002 = vrot.lane.b32.xlu0 %v10001_v62, %s10473_s24  ;;  %v3648_v22 = vpop.f32.mrb[146].mxu0  ;;  %v10006_v44 = vpack.i.bf16 %v12802_v12, %v12798_v54  ;;  %v10016_v62 = vpack.i.bf16 %v14435_v37, %v14434_v18  ;;  %v5533_v42 = vsel %vm5181_vm2, %v8448_v46, 0  ;;  %v14436_v29 = vld [vmem:[#allocation7_spill] sm:$0xff] }
 0x5d7   : > { %v8959_v6 = vadd.f32 %v3648_v22, %v14430_v60  ;;  %v3650_v27 = vpop.f32.mrb[147].mxu0  ;;  %5567 = vmatpush1.bf16.msra.mxu1 %v5533_v42  ;;  %v14437_v22 = vld [vmem:[#allocation9_spill] sm:$0xff]  ;;  %v14440_v46 = vld [vmem:[#allocation151_spill] sm:$0xff] }
 0x5d8   : > { %v8960_v10 = vadd.f32 %v3650_v27, %v14431_v9  ;;  %10007 = vrot.lane.b32.xlu1 %v10006_v44, %s10473_s24  ;;  %v10021_v44 = vpack.i.bf16 %v14437_v22, %v14436_v29  ;;  %v10292_v60 = vld [vmem:[%s14039_s3 + $0x1d4] ss:$8 sps:$4 sm:$0xff]   ;;  %v14438_v27 = vld [vmem:[#allocation120_spill] sm:$0xff] }
 0x5d9   : > { %v14441_v42 = vld [vmem:[#allocation153_spill] sm:$0xff]  ;;  %5918 = vmatprep.subr.bf16.mxu1 %v10292_v60  ;;  %v4111_v60 = vadd.f32 %v8957_v40, %v11894_v55  ;;  %v14444_v29 = vld [vmem:[#allocation124_spill] sm:$0xff]  ;;  %v14446_v22 = vld [vmem:[#allocation126_spill] sm:$0xff] }
 0x5da   : > { %10012 = vrot.lane.b32.xlu0 %v10011_v28, %s10473_s24  ;;  %v14439_v28 = vld [vmem:[#allocation121_spill] sm:$0xff]  ;;  %v10026_v30 = vpack.i.bf16 %v14441_v42, %v14440_v46 }
 0x5dc   : > { %10017 = vrot.lane.b32.xlu1 %v10016_v62, %s10473_s24  ;;  %v3654_v63 = vpop.f32.mrb[148].mxu0  ;;  %v14442_v62 = vld [vmem:[#allocation122_spill] sm:$0xff] }
 0x5dd   : > { %v8961_v3 = vadd.f32 %v3654_v63, %v14438_v27  ;;  %v3656_v9 = vpop.f32.mrb[149].mxu0 }
 0x5de   : > { %v8962_v11 = vadd.f32 %v3656_v9, %v14439_v28  ;;  %10022 = vrot.lane.b32.xlu0 %v10021_v44, %s10473_s24  ;;  %v3658_v45 = vpop.f32.mrb[150].mxu0 }
 0x5df   : > { %v12837_v61 = vadd.f32 %v3658_v45, %v14442_v62  ;;  %v3660_v31 = vpop.f32.mrb[151].mxu0 }
 0x5e0   : > { %v12840_v36 = vadd.f32 %v3660_v31, %v14443_v38  ;;  %v9933_v48 = vpop.permute.xlu0 %9932  ;;  %10027 = vrot.lane.b32.xlu1 %v10026_v30, %s10473_s24  ;;  %v4112_v38 = vadd.f32 %v8958_v16, %v11900_v33 }
 0x5e1   : > { %v9935_v63 = vunpack.i.h.bf16 %v9933_v48  ;;  %v9934_v27 = vunpack.i.l.bf16 %v9933_v48 }
 0x5e2   : > { %v9938_v9 = vpop.permute.xlu1 %9937 }
 0x5e3   : > { %v4729_v44 = vmax.f32 %v12397_v57, %v9935_v63  ;;  %v4564_v28 = vsel %vm4543_vm3, %v9934_v27, %v9935_v63  ;;  %v9940_v4 = vunpack.i.h.bf16 %v9938_v9  ;;  %v9939_v39 = vunpack.i.l.bf16 %v9938_v9  ;;  %v14445_v9 = vld [vmem:[#allocation125_spill] sm:$0xff] }
 0x5e4   : > { %v4728_v45 = vmax.f32 %v12394_v13, %v4564_v28  ;;  %v3664_v62 = vpop.f32.mrb[152].mxu0  ;;  %v4113_v57 = vadd.f32 %v8959_v6, %v11894_v55  ;;  %v4114_v63 = vadd.f32 %v8960_v10, %v11900_v33 }
 0x5e5   : > { %v4731_v31 = vmax.f32 %v12411_v1, %v9940_v4  ;;  %v4565_v30 = vsel %vm4543_vm3, %v9939_v39, %v9940_v4  ;;  %v8965_v48 = vadd.f32 %v3664_v62, %v14444_v29  ;;  %v3666_v46 = vpop.f32.mrb[153].mxu0  ;;  %v4825_v13 = vmax.f32 %v4729_v44, 0.0  ;;  %v14447_v62 = vld [vmem:[#allocation127_spill] sm:$0xff] }
 0x5e6   : > { %v4730_v27 = vmax.f32 %v12404_v5, %v4565_v30  ;;  %v8966_v40 = vadd.f32 %v3666_v46, %v14445_v9  ;;  %v3668_v42 = vpop.f32.mrb[154].mxu0  ;;  %v4824_v39 = vmax.f32 %v4728_v45, 0.0 }
 0x5e7   : > { %v4827_v28 = vmax.f32 %v4731_v31, 0.0  ;;  %v4119_v16 = vadd.f32 %v8965_v48, %v11894_v55  ;;  %v8967_v1 = vadd.f32 %v3668_v42, %v14446_v22  ;;  %v3670_v7 = vpop.f32.mrb[155].mxu0 }
 0x5e8   : > { %v4826_v4 = vmax.f32 %v4730_v27, 0.0  ;;  %v4120_v29 = vadd.f32 %v8966_v40, %v11900_v33  ;;  %v8968_v6 = vadd.f32 %v3670_v7, %v14447_v62  ;;  %v9943_v18 = vpop.permute.xlu0 %9942 }
 0x5e9   : > { %v12859_v10 = vpack.c.bf16 %v4827_v28, %v4825_v13  ;;  %v12861_v5 = vmax.f32 %v4111_v60, %v4119_v16  ;;  %v4121_v46 = vadd.f32 %v8967_v1, %v11894_v55  ;;  %v9945_v44 = vunpack.i.h.bf16 %v9943_v18 }
 0x5ea   : > { %v12864_v31 = vpack.c.bf16 %v4826_v4, %v4824_v39  ;;  %v12866_v30 = vmax.f32 %v4112_v38, %v4120_v29  ;;  %v4122_v22 = vadd.f32 %v8968_v6, %v11900_v33  ;;  %v9944_v42 = vunpack.i.l.bf16 %v9943_v18  ;;  %v9948_v45 = vpop.permute.xlu1 %9947  ;;  %v14450_v4 = vld [vmem:[#allocation129_spill] sm:$0xff] }
 0x5eb   : > { %14448 = vst [vmem:[#allocation50_spill] sm:$0xff] %v12861_v5  ;;  %v12869_v48 = vmax.f32 %v4113_v57, %v4121_v46  ;;  %v4733_v7 = vmax.f32 %v12443_v58, %v9945_v44  ;;  %v9950_v27 = vunpack.i.h.bf16 %v9948_v45  ;;  %v9949_v9 = vunpack.i.l.bf16 %v9948_v45  ;;  %8412 = vmatprep.mubr.msk.bf16.mxu1 %vm5132_vm4, %v12859_v10 }
 0x5ec   : > { %v4115_v60 = vadd.f32 %v8961_v3, %v11894_v55  ;;  %v12875_v40 = vmax.f32 %v4114_v63, %v4122_v22  ;;  %v4566_v38 = vsel %vm4543_vm3, %v9944_v42, %v9945_v44  ;;  %v3674_v13 = vpop.f32.mrb[156].mxu0  ;;  %5301 = vmatmul.mubr.bf16.gmra.mrb[224].mxu1 %v12864_v31  ;;  %v10031_v18 = vpack.i.bf16 %v12866_v30, %v12861_v5  ;;  %v14449_v63 = vld [vmem:[#allocation128_spill] sm:$0xff]  ;;  %v14451_v44 = vld [vmem:[#allocation130_spill] sm:$0xff] }
 0x5ed   : > { %v4116_v57 = vadd.f32 %v8962_v11, %v11900_v33  ;;  %v4732_v58 = vmax.f32 %v12440_v26, %v4566_v38  ;;  %v4735_v28 = vmax.f32 %v12456_v52, %v9950_v27  ;;  %v4567_v16 = vsel %vm4543_vm3, %v9949_v9, %v9950_v27  ;;  %v3676_v1 = vpop.f32.mrb[157].mxu0  ;;  %v14452_v27 = vld [vmem:[#allocation131_spill] sm:$0xff] }
 0x5ee   : > { %v4734_v3 = vmax.f32 %v12451_v19, %v4567_v16  ;;  %v8969_v39 = vadd.f32 %v3674_v13, %v14449_v63  ;;  %v8970_v29 = vadd.f32 %v3676_v1, %v14450_v4  ;;  %10032 = vrot.lane.b32.xlu0 %v10031_v18, %s10473_s24  ;;  %v3678_v62 = vpop.f32.mrb[158].mxu0  ;;  %v10036_v6 = vpack.i.bf16 %v12875_v40, %v12869_v48 }
 0x5ef   : > { %v4829_v11 = vmax.f32 %v4733_v7, 0.0  ;;  %v4828_v46 = vmax.f32 %v4732_v58, 0.0  ;;  %v4831_v26 = vmax.f32 %v4735_v28, 0.0  ;;  %v8971_v52 = vadd.f32 %v3678_v62, %v14451_v44  ;;  %v3680_v22 = vpop.f32.mrb[159].mxu0  ;;  %v14459_v44 = vld [vmem:[#allocation136_spill] sm:$0xff] }
 0x5f0   : > { %v4830_v42 = vmax.f32 %v4734_v3, 0.0  ;;  %v4123_v45 = vadd.f32 %v8969_v39, %v11894_v55  ;;  %v4124_v19 = vadd.f32 %v8970_v29, %v11900_v33  ;;  %v8972_v9 = vadd.f32 %v3680_v22, %v14452_v27  ;;  %10037 = vrot.lane.b32.xlu1 %v10036_v6, %s10473_s24  ;;  %v14456_v39 = vld [vmem:[#allocation132_spill] sm:$0xff]  ;;  %v14461_v27 = vld [vmem:[#allocation139_spill] sm:$0xff] }
 0x5f1   : > { %v4117_v38 = vadd.f32 %v12837_v61, %v11894_v55  ;;  %v4118_v7 = vadd.f32 %v12840_v36, %v11900_v33  ;;  %v12900_v13 = vpack.c.bf16 %v4831_v26, %v4829_v11  ;;  %v4125_v18 = vadd.f32 %v8971_v52, %v11894_v55  ;;  %v14458_v11 = vld [vmem:[#allocation135_spill] sm:$0xff] }
 0x5f2   : > { %v12903_v58 = vpack.c.bf16 %v4830_v42, %v4828_v46  ;;  %v12905_v28 = vmax.f32 %v4115_v60, %v4123_v45  ;;  %v12907_v16 = vmax.f32 %v4116_v57, %v4124_v19  ;;  %v4126_v1 = vadd.f32 %v8972_v9, %v11900_v33  ;;  %v14457_v57 = vld [vmem:[#allocation133_spill] sm:$0xff]  ;;  %v14460_v42 = vld [vmem:[#allocation138_spill] sm:$0xff] }
 0x5f3   : > { %v12910_v3 = vmax.f32 %v4117_v38, %v4125_v18  ;;  %8413 = vmatprep.mubr.msk.bf16.mxu1 %vm5132_vm4, %v12900_v13 }
 0x5f4   : > { %14453 = vst [vmem:[#allocation51_spill] sm:$0xff] %v12905_v28  ;;  %14454 = vst [vmem:[#allocation5_spill] sm:$0xff] %v12907_v16  ;;  %v12914_v61 = vmax.f32 %v4118_v7, %v4126_v1  ;;  %v3684_v36 = vpop.f32.mrb[160].mxu0  ;;  %5311 = vmatmul.mubr.bf16.gmra.mrb[228].mxu1 %v12903_v58  ;;  %v10041_v63 = vpack.i.bf16 %v12907_v16, %v12905_v28  ;;  %v14462_v7 = vld [vmem:[#allocation140_spill] sm:$0xff] }
 0x5f5   : > { %14455 = vst [vmem:[#allocation52_spill] sm:$0xff] %v12910_v3  ;;  %v8973_v60 = vadd.f32 %v3684_v36, %v14456_v39  ;;  %v3686_v4 = vpop.f32.mrb[161].mxu0  ;;  %v14463_v36 = vld [vmem:[#allocation141_spill] sm:$0xff] }
 0x5f6   : > { %v8974_v29 = vadd.f32 %v3686_v4, %v14457_v57  ;;  %10042 = vrot.lane.b32.xlu0 %v10041_v63, %s10473_s24  ;;  %v3688_v62 = vpop.f32.mrb[162].mxu0  ;;  %v10046_v6 = vpack.i.bf16 %v12914_v61, %v12910_v3  ;;  %v14466_v3 = vld [vmem:[#allocation147_spill] sm:$0xff] }
 0x5f7   : > { %v8975_v46 = vadd.f32 %v3688_v62, %v14458_v11  ;;  %v3690_v26 = vpop.f32.mrb[163].mxu0 }
 0x5f8   : > { %v8976_v52 = vadd.f32 %v3690_v26, %v14459_v44  ;;  %10047 = vrot.lane.b32.xlu1 %v10046_v6, %s10473_s24 }
 0x5fc   : > { %v3694_v22 = vpop.f32.mrb[164].mxu0 }
 0x5fd   : > { %v8977_v45 = vadd.f32 %v3694_v22, %v14460_v42  ;;  %v3696_v19 = vpop.f32.mrb[165].mxu0  ;;  %v4127_v22 = vadd.f32 %v8973_v60, %v11894_v55 }
 0x5fe   : > { %v8978_v9 = vadd.f32 %v3696_v19, %v14461_v27  ;;  %v3698_v38 = vpop.f32.mrb[166].mxu0  ;;  %v4128_v27 = vadd.f32 %v8974_v29, %v11900_v33 }
 0x5ff   : > { %v12930_v18 = vadd.f32 %v3698_v38, %v14462_v7  ;;  %v3700_v1 = vpop.f32.mrb[167].mxu0 }
 0x600   : > { %v12933_v63 = vadd.f32 %v3700_v1, %v14463_v36  ;;  %v14464_v1 = vld [vmem:[#allocation143_spill] sm:$0xff] }
 0x601   : > { %v9953_v39 = vpop.permute.xlu0 %9952 }
 0x602   : > { %v9955_v4 = vunpack.i.h.bf16 %v9953_v39  ;;  %v9954_v57 = vunpack.i.l.bf16 %v9953_v39  ;;  %v9958_v62 = vpop.permute.xlu1 %9957 }
 0x603   : > { %v9960_v26 = vunpack.i.h.bf16 %v9958_v62  ;;  %v9959_v44 = vunpack.i.l.bf16 %v9958_v62  ;;  %v14465_v62 = vld [vmem:[#allocation145_spill] sm:$0xff] }
 0x604   : > { %v4737_v6 = vmax.f32 %v12514_v51, %v9955_v4  ;;  %v4568_v11 = vsel %vm4543_vm3, %v9954_v57, %v9955_v4  ;;  %v3704_v19 = vpop.f32.mrb[168].mxu0  ;;  %v4129_v51 = vadd.f32 %v8975_v46, %v11894_v55  ;;  %v4130_v4 = vadd.f32 %v8976_v52, %v11900_v33 }
 0x605   : > { %v4736_v42 = vmax.f32 %v12511_v0, %v4568_v11  ;;  %v4739_v38 = vmax.f32 %v12525_v53, %v9960_v26  ;;  %v4569_v7 = vsel %vm4543_vm3, %v9959_v44, %v9960_v26  ;;  %v8981_v36 = vadd.f32 %v3704_v19, %v14464_v1  ;;  %v3706_v39 = vpop.f32.mrb[169].mxu0  ;;  %v14467_v1 = vld [vmem:[#allocation149_spill] sm:$0xff] }
 0x606   : > { %v4738_v57 = vmax.f32 %v12519_v56, %v4569_v7  ;;  %v8982_v60 = vadd.f32 %v3706_v39, %v14465_v62  ;;  %v3708_v28 = vpop.f32.mrb[170].mxu0  ;;  %v4833_v0 = vmax.f32 %v4737_v6, 0.0 }
 0x607   : > { %v4835_v11 = vmax.f32 %v4739_v38, 0.0  ;;  %v4135_v29 = vadd.f32 %v8981_v36, %v11894_v55  ;;  %v8983_v53 = vadd.f32 %v3708_v28, %v14466_v3  ;;  %v3710_v16 = vpop.f32.mrb[171].mxu0  ;;  %v4832_v26 = vmax.f32 %v4736_v42, 0.0 }
 0x608   : > { %v4834_v44 = vmax.f32 %v4738_v57, 0.0  ;;  %v4136_v19 = vadd.f32 %v8982_v60, %v11900_v33  ;;  %v8984_v46 = vadd.f32 %v3710_v16, %v14467_v1  ;;  %v9963_v5 = vpop.permute.xlu0 %9962 }
 0x609   : > { %v12951_v52 = vpack.c.bf16 %v4835_v11, %v4833_v0  ;;  %v12953_v56 = vmax.f32 %v4127_v22, %v4135_v29  ;;  %v4137_v7 = vadd.f32 %v8983_v53, %v11894_v55  ;;  %v9965_v6 = vunpack.i.h.bf16 %v9963_v5 }
 0x60a   : > { %v12956_v38 = vpack.c.bf16 %v4834_v44, %v4832_v26  ;;  %v12958_v36 = vmax.f32 %v4128_v27, %v4136_v19  ;;  %v4138_v28 = vadd.f32 %v8984_v46, %v11900_v33  ;;  %v9964_v3 = vunpack.i.l.bf16 %v9963_v5  ;;  %v9968_v42 = vpop.permute.xlu1 %9967  ;;  %v14470_v44 = vld [vmem:[#allocation150_spill] sm:$0xff] }
 0x60b   : > { %14468 = vst [vmem:[#allocation53_spill] sm:$0xff] %v12953_v56  ;;  %v12961_v39 = vmax.f32 %v4129_v51, %v4137_v7  ;;  %v4741_v16 = vmax.f32 %v12561_v49, %v9965_v6  ;;  %v9970_v57 = vunpack.i.h.bf16 %v9968_v42  ;;  %v9969_v62 = vunpack.i.l.bf16 %v9968_v42  ;;  %8414 = vmatprep.mubr.msk.bf16.mxu1 %vm5132_vm4, %v12951_v52 }
 0x60c   : > { %v4131_v22 = vadd.f32 %v8977_v45, %v11894_v55  ;;  %v12967_v60 = vmax.f32 %v4130_v4, %v4138_v28  ;;  %v4570_v27 = vsel %vm4543_vm3, %v9964_v3, %v9965_v6  ;;  %v3714_v0 = vpop.f32.mrb[172].mxu0  ;;  %5321 = vmatmul.mubr.bf16.gmra.mrb[232].mxu1 %v12956_v38  ;;  %v10051_v5 = vpack.i.bf16 %v12958_v36, %v12953_v56  ;;  %v14469_v4 = vld [vmem:[#allocation8_spill] sm:$0xff] }
 0x60d   : > { %v4132_v51 = vadd.f32 %v8978_v9, %v11900_v33  ;;  %v4740_v49 = vmax.f32 %v12556_v35, %v4570_v27  ;;  %v4743_v11 = vmax.f32 %v12570_v47, %v9970_v57  ;;  %v4571_v29 = vsel %vm4543_vm3, %v9969_v62, %v9970_v57  ;;  %v3716_v53 = vpop.f32.mrb[173].mxu0  ;;  %v14471_v6 = vld [vmem:[#allocation152_spill] sm:$0xff]  ;;  %v14472_v57 = vld [vmem:[#allocation154_spill] sm:$0xff] }
 0x60e   : > { %v4742_v45 = vmax.f32 %v12566_v8, %v4571_v29  ;;  %v8985_v26 = vadd.f32 %v3714_v0, %v14469_v4  ;;  %v8986_v19 = vadd.f32 %v3716_v53, %v14470_v44  ;;  %10052 = vrot.lane.b32.xlu0 %v10051_v5, %s10473_s24  ;;  %v3718_v1 = vpop.f32.mrb[174].mxu0  ;;  %v10056_v46 = vpack.i.bf16 %v12967_v60, %v12961_v39 }
 0x60f   : > { %v4837_v9 = vmax.f32 %v4741_v16, 0.0  ;;  %v4836_v7 = vmax.f32 %v4740_v49, 0.0  ;;  %v4839_v35 = vmax.f32 %v4743_v11, 0.0  ;;  %v8987_v47 = vadd.f32 %v3718_v1, %v14471_v6  ;;  %v3720_v28 = vpop.f32.mrb[175].mxu0  ;;  %v14479_v6 = vld [vmem:[#allocation13_spill] sm:$0xff] }
 0x610   : > { %v4838_v3 = vmax.f32 %v4742_v45, 0.0  ;;  %v4139_v42 = vadd.f32 %v8985_v26, %v11894_v55  ;;  %v4140_v8 = vadd.f32 %v8986_v19, %v11900_v33  ;;  %v8988_v62 = vadd.f32 %v3720_v28, %v14472_v57  ;;  %10057 = vrot.lane.b32.xlu1 %v10056_v46, %s10473_s24  ;;  %v14476_v26 = vld [vmem:[#allocation10_spill] sm:$0xff]  ;;  %v14481_v57 = vld [vmem:[#allocation15_spill] sm:$0xff] }
 0x611   : > { %v4133_v27 = vadd.f32 %v12930_v18, %v11894_v55  ;;  %v4134_v16 = vadd.f32 %v12933_v63, %v11900_v33  ;;  %v12992_v0 = vpack.c.bf16 %v4839_v35, %v4837_v9  ;;  %v4141_v5 = vadd.f32 %v8987_v47, %v11894_v55  ;;  %v14478_v9 = vld [vmem:[#allocation12_spill] sm:$0xff] }
 0x612   : > { %v12995_v49 = vpack.c.bf16 %v4838_v3, %v4836_v7  ;;  %v12997_v11 = vmax.f32 %v4131_v22, %v4139_v42  ;;  %v12999_v29 = vmax.f32 %v4132_v51, %v4140_v8  ;;  %v4142_v53 = vadd.f32 %v8988_v62, %v11900_v33  ;;  %v14477_v51 = vld [vmem:[#allocation11_spill] sm:$0xff]  ;;  %v14480_v3 = vld [vmem:[#allocation14_spill] sm:$0xff] }
 0x613   : > { %v13002_v45 = vmax.f32 %v4133_v27, %v4141_v5  ;;  %8415 = vmatprep.mubr.msk.bf16.mxu1 %vm5132_vm4, %v12992_v0 }
 0x614   : > { %14473 = vst [vmem:[#allocation54_spill] sm:$0xff] %v12997_v11  ;;  %14474 = vst [vmem:[#allocation6_spill] sm:$0xff] %v12999_v29  ;;  %v13006_v18 = vmax.f32 %v4134_v16, %v4142_v53  ;;  %v3724_v63 = vpop.f32.mrb[176].mxu0  ;;  %5331 = vmatmul.mubr.bf16.gmra.mrb[236].mxu1 %v12995_v49  ;;  %v10061_v4 = vpack.i.bf16 %v12999_v29, %v12997_v11  ;;  %v14482_v16 = vld [vmem:[#allocation16_spill] sm:$0xff] }
 0x615   : > { %14475 = vst [vmem:[#allocation55_spill] sm:$0xff] %v13002_v45  ;;  %v8989_v22 = vadd.f32 %v3724_v63, %v14476_v26  ;;  %v3726_v44 = vpop.f32.mrb[177].mxu0  ;;  %v14483_v63 = vld [vmem:[#allocation17_spill] sm:$0xff] }
 0x616   : > { %v8990_v19 = vadd.f32 %v3726_v44, %v14477_v51  ;;  %10062 = vrot.lane.b32.xlu0 %v10061_v4, %s10473_s24  ;;  %v3728_v1 = vpop.f32.mrb[178].mxu0  ;;  %v10066_v46 = vpack.i.bf16 %v13006_v18, %v13002_v45  ;;  %v14486_v45 = vld [vmem:[#allocation20_spill] sm:$0xff] }
 0x617   : > { %v8991_v7 = vadd.f32 %v3728_v1, %v14478_v9  ;;  %v3730_v35 = vpop.f32.mrb[179].mxu0 }
 0x618   : > { %v8992_v47 = vadd.f32 %v3730_v35, %v14479_v6  ;;  %10067 = vrot.lane.b32.xlu1 %v10066_v46, %s10473_s24 }
 0x61c   : > { %v3734_v28 = vpop.f32.mrb[180].mxu0 }
 0x61d   : > { %v8993_v42 = vadd.f32 %v3734_v28, %v14480_v3  ;;  %v3736_v8 = vpop.f32.mrb[181].mxu0  ;;  %v4143_v28 = vadd.f32 %v8989_v22, %v11894_v55 }
 0x61e   : > { %v8994_v62 = vadd.f32 %v3736_v8, %v14481_v57  ;;  %v3738_v27 = vpop.f32.mrb[182].mxu0  ;;  %v4144_v57 = vadd.f32 %v8990_v19, %v11900_v33 }
 0x61f   : > { %v13022_v5 = vadd.f32 %v3738_v27, %v14482_v16  ;;  %v3740_v53 = vpop.f32.mrb[183].mxu0 }
 0x620   : > { %v13025_v4 = vadd.f32 %v3740_v53, %v14483_v63  ;;  %v14484_v53 = vld [vmem:[#allocation18_spill] sm:$0xff] }
 0x621   : > { %v9973_v26 = vpop.permute.xlu0 %9972 }
 0x622   : > { %v9975_v44 = vunpack.i.h.bf16 %v9973_v26  ;;  %v9974_v51 = vunpack.i.l.bf16 %v9973_v26  ;;  %v9978_v1 = vpop.permute.xlu1 %9977 }
 0x623   : > { %v9980_v35 = vunpack.i.h.bf16 %v9978_v1  ;;  %v9979_v6 = vunpack.i.l.bf16 %v9978_v1  ;;  %v14485_v1 = vld [vmem:[#allocation19_spill] sm:$0xff] }
 0x624   : > { %v4745_v46 = vmax.f32 %v12630_v21, %v9975_v44  ;;  %v4572_v9 = vsel %vm4543_vm3, %v9974_v51, %v9975_v44  ;;  %v3744_v8 = vpop.f32.mrb[184].mxu0  ;;  %v4145_v21 = vadd.f32 %v8991_v7, %v11894_v55  ;;  %v4146_v44 = vadd.f32 %v8992_v47, %v11900_v33 }
 0x625   : > { %v4744_v3 = vmax.f32 %v12627_v17, %v4572_v9  ;;  %v4747_v27 = vmax.f32 %v12641_v24, %v9980_v35  ;;  %v4573_v16 = vsel %vm4543_vm3, %v9979_v6, %v9980_v35  ;;  %v8997_v63 = vadd.f32 %v3744_v8, %v14484_v53  ;;  %v3746_v26 = vpop.f32.mrb[185].mxu0  ;;  %v14487_v53 = vld [vmem:[#allocation21_spill] sm:$0xff] }
 0x626   : > { %v4746_v51 = vmax.f32 %v12635_v32, %v4573_v16  ;;  %v8998_v22 = vadd.f32 %v3746_v26, %v14485_v1  ;;  %v3748_v11 = vpop.f32.mrb[186].mxu0  ;;  %v4841_v17 = vmax.f32 %v4745_v46, 0.0 }
 0x627   : > { %v4843_v9 = vmax.f32 %v4747_v27, 0.0  ;;  %v4151_v19 = vadd.f32 %v8997_v63, %v11894_v55  ;;  %v8999_v24 = vadd.f32 %v3748_v11, %v14486_v45  ;;  %v3750_v29 = vpop.f32.mrb[187].mxu0  ;;  %v4840_v35 = vmax.f32 %v4744_v3, 0.0 }
 0x628   : > { %v4842_v6 = vmax.f32 %v4746_v51, 0.0  ;;  %v4152_v8 = vadd.f32 %v8998_v22, %v11900_v33  ;;  %v9000_v7 = vadd.f32 %v3750_v29, %v14487_v53  ;;  %v9983_v56 = vpop.permute.xlu0 %9982 }
 0x629   : > { %v13043_v47 = vpack.c.bf16 %v4843_v9, %v4841_v17  ;;  %v13045_v32 = vmax.f32 %v4143_v28, %v4151_v19  ;;  %v4153_v16 = vadd.f32 %v8999_v24, %v11894_v55  ;;  %v9985_v46 = vunpack.i.h.bf16 %v9983_v56 }
 0x62a   : > { %v13048_v27 = vpack.c.bf16 %v4842_v6, %v4840_v35  ;;  %v13050_v63 = vmax.f32 %v4144_v57, %v4152_v8  ;;  %v4154_v11 = vadd.f32 %v9000_v7, %v11900_v33  ;;  %v9984_v45 = vunpack.i.l.bf16 %v9983_v56  ;;  %v9988_v3 = vpop.permute.xlu1 %9987  ;;  %v14489_v6 = vld [vmem:[#allocation23_spill] sm:$0xff] }
 0x62b   : > { %v13053_v26 = vmax.f32 %v4145_v21, %v4153_v16  ;;  %v4749_v29 = vmax.f32 %v12677_v41, %v9985_v46  ;;  %v9990_v51 = vunpack.i.h.bf16 %v9988_v3  ;;  %v9989_v1 = vunpack.i.l.bf16 %v9988_v3  ;;  %8416 = vmatprep.mubr.msk.bf16.mxu1 %vm5132_vm4, %v13043_v47 }
 0x62c   : > { %v4147_v28 = vadd.f32 %v8993_v42, %v11894_v55  ;;  %v13059_v22 = vmax.f32 %v4146_v44, %v4154_v11  ;;  %v4574_v57 = vsel %vm4543_vm3, %v9984_v45, %v9985_v46  ;;  %v3754_v17 = vpop.f32.mrb[188].mxu0  ;;  %5341 = vmatmul.mubr.bf16.gmra.mrb[240].mxu1 %v13048_v27  ;;  %v10071_v56 = vpack.i.bf16 %v13050_v63, %v13045_v32  ;;  %v14488_v44 = vld [vmem:[#allocation22_spill] sm:$0xff]  ;;  %v14490_v46 = vld [vmem:[#allocation24_spill] sm:$0xff] }
 0x62d   : > { %v4148_v21 = vadd.f32 %v8994_v62, %v11900_v33  ;;  %v4748_v41 = vmax.f32 %v12675_v34, %v4574_v57  ;;  %v4751_v9 = vmax.f32 %v12686_v43, %v9990_v51  ;;  %v4575_v19 = vsel %vm4543_vm3, %v9989_v1, %v9990_v51  ;;  %v3756_v24 = vpop.f32.mrb[189].mxu0  ;;  %v14491_v51 = vld [vmem:[#allocation25_spill] sm:$0xff] }
 0x62e   : > { %v4750_v42 = vmax.f32 %v12682_v20, %v4575_v19  ;;  %v9001_v35 = vadd.f32 %v3754_v17, %v14488_v44  ;;  %v9002_v8 = vadd.f32 %v3756_v24, %v14489_v6  ;;  %10072 = vrot.lane.b32.xlu0 %v10071_v56, %s10473_s24  ;;  %v3758_v53 = vpop.f32.mrb[190].mxu0  ;;  %v10076_v7 = vpack.i.bf16 %v13059_v22, %v13053_v26 }
 0x62f   : > { %v4845_v62 = vmax.f32 %v4749_v29, 0.0  ;;  %v4844_v16 = vmax.f32 %v4748_v41, 0.0  ;;  %v4847_v34 = vmax.f32 %v4751_v9, 0.0  ;;  %v9003_v43 = vadd.f32 %v3758_v53, %v14490_v46  ;;  %v3760_v11 = vpop.f32.mrb[191].mxu0 }
 0x630   : > { %v4846_v45 = vmax.f32 %v4750_v42, 0.0  ;;  %v4155_v3 = vadd.f32 %v9001_v35, %v11894_v55  ;;  %v4156_v20 = vadd.f32 %v9002_v8, %v11900_v33  ;;  %v9004_v1 = vadd.f32 %v3760_v11, %v14491_v51  ;;  %10077 = vrot.lane.b32.xlu1 %v10076_v7, %s10473_s24 }
 0x631   : > { %v4149_v57 = vadd.f32 %v13022_v5, %v11894_v55  ;;  %v4150_v29 = vadd.f32 %v13025_v4, %v11900_v33  ;;  %v13084_v17 = vpack.c.bf16 %v4847_v34, %v4845_v62  ;;  %v4157_v56 = vadd.f32 %v9003_v43, %v11894_v55 }
 0x632   : > { %v13087_v41 = vpack.c.bf16 %v4846_v45, %v4844_v16  ;;  %v13089_v9 = vmax.f32 %v4147_v28, %v4155_v3  ;;  %v13091_v19 = vmax.f32 %v4148_v21, %v4156_v20  ;;  %v4158_v24 = vadd.f32 %v9004_v1, %v11900_v33 }
 0x633   : > { %v13094_v42 = vmax.f32 %v4149_v57, %v4157_v56  ;;  %8417 = vmatprep.mubr.msk.bf16.mxu1 %vm5132_vm4, %v13084_v17 }
 0x634   : > { %v13098_v5 = vmax.f32 %v4150_v29, %v4158_v24  ;;  %5351 = vmatmul.mubr.bf16.gmra.mrb[244].mxu1 %v13087_v41  ;;  %v10081_v55 = vpack.i.bf16 %v13091_v19, %v13089_v9 }
 0x636   : > { %10082 = vrot.lane.b32.xlu0 %v10081_v55, %s10473_s24  ;;  %v10086_v4 = vpack.i.bf16 %v13098_v5, %v13094_v42 }
 0x638   : > { %10087 = vrot.lane.b32.xlu1 %v10086_v4, %s10473_s24 }
 0x641   : > { %v9993_v33 = vpop.permute.xlu0 %9992 }
 0x642   : > { %v9995_v28 = vunpack.i.h.bf16 %v9993_v33  ;;  %v9994_v21 = vunpack.i.l.bf16 %v9993_v33  ;;  %v9998_v44 = vpop.permute.xlu1 %9997 }
 0x643   : > { %v10000_v8 = vunpack.i.h.bf16 %v9998_v44  ;;  %v9999_v53 = vunpack.i.l.bf16 %v9998_v44 }
 0x644   : > { %v4753_v35 = vmax.f32 %v12748_v23, %v9995_v28  ;;  %v4576_v6 = vsel %vm4543_vm3, %v9994_v21, %v9995_v28 }
 0x645   : > { %v4752_v7 = vmax.f32 %v12737_v2, %v4576_v6  ;;  %v4755_v62 = vmax.f32 %v12757_v50, %v10000_v8  ;;  %v4577_v16 = vsel %vm4543_vm3, %v9999_v53, %v10000_v8 }
 0x646   : > { %v4754_v34 = vmax.f32 %v12751_v59, %v4577_v16  ;;  %v4849_v46 = vmax.f32 %v4753_v35, 0.0 }
 0x647   : > { %v4851_v43 = vmax.f32 %v4755_v62, 0.0  ;;  %v4848_v11 = vmax.f32 %v4752_v7, 0.0 }
 0x648   : > { %v4850_v45 = vmax.f32 %v4754_v34, 0.0  ;;  %v10003_v3 = vpop.permute.xlu0 %10002 }
 0x649   : > { %v13113_v20 = vpack.c.bf16 %v4851_v43, %v4849_v46  ;;  %v10005_v23 = vunpack.i.h.bf16 %v10003_v3  ;;  %v10004_v51 = vunpack.i.l.bf16 %v10003_v3 }
 0x64a   : > { %v10008_v1 = vpop.permute.xlu1 %10007  ;;  %v13115_v57 = vpack.c.bf16 %v4850_v45, %v4848_v11 }
 0x64b   : > { %v4757_v2 = vmax.f32 %v12795_v14, %v10005_v23  ;;  %v4578_v50 = vsel %vm4543_vm3, %v10004_v51, %v10005_v23  ;;  %v10010_v29 = vunpack.i.h.bf16 %v10008_v1  ;;  %v10009_v56 = vunpack.i.l.bf16 %v10008_v1  ;;  %8418 = vmatprep.mubr.msk.bf16.mxu1 %vm5132_vm4, %v13113_v20  ;;  %v14493_v1 = vld [vmem:[#allocation142_spill] sm:$0xff] }
 0x64c   : > { %v4756_v59 = vmax.f32 %v12793_v15, %v4578_v50  ;;  %5361 = vmatmul.mubr.bf16.gmra.mrb[248].mxu1 %v13115_v57  ;;  %v10013_v24 = vpop.permute.xlu0 %10012 }
 0x64d   : > { %v4759_v55 = vmax.f32 %v12802_v12, %v10010_v29  ;;  %v4579_v4 = vsel %vm4543_vm3, %v10009_v56, %v10010_v29  ;;  %v10015_v33 = vunpack.i.h.bf16 %v10013_v24  ;;  %v4853_v28 = vmax.f32 %v4757_v2, 0.0  ;;  %v14494_v29 = vld [vmem:[#allocation9_spill] sm:$0xff] }
 0x64e   : > { %v4758_v14 = vmax.f32 %v12798_v54, %v4579_v4  ;;  %v10014_v21 = vunpack.i.l.bf16 %v10013_v24  ;;  %v10018_v44 = vpop.permute.xlu1 %10017  ;;  %v4852_v7 = vmax.f32 %v4756_v59, 0.0  ;;  %v14495_v24 = vld [vmem:[#allocation153_spill] sm:$0xff] }
 0x64f   : > { %v4855_v35 = vmax.f32 %v4759_v55, 0.0  ;;  %v4689_v6 = vmax.f32 %v14433_v25, %v10015_v33  ;;  %v10020_v8 = vunpack.i.h.bf16 %v10018_v44  ;;  %v10019_v53 = vunpack.i.l.bf16 %v10018_v44  ;;  %v14492_v25 = vld [vmem:[#allocation146_spill] sm:$0xff] }
 0x650   : > { %v4854_v15 = vmax.f32 %v4758_v14, 0.0  ;;  %v10023_v62 = vpop.permute.xlu0 %10022  ;;  %v4544_v12 = vsel %vm4543_vm3, %v10014_v21, %v10015_v33 }
 0x651   : > { %v13127_v16 = vpack.c.bf16 %v4855_v35, %v4853_v28  ;;  %v4691_v34 = vmax.f32 %v14435_v37, %v10020_v8  ;;  %v4545_v46 = vsel %vm4543_vm3, %v10019_v53, %v10020_v8  ;;  %v10025_v43 = vunpack.i.h.bf16 %v10023_v62  ;;  %v10290_v35 = vld [vmem:[%s14039_s3 + $0x1d0] ss:$8 sps:$4 sm:$0xff]   ;;  %v14496_v8 = vld [vmem:[#allocation151_spill] sm:$0xff] }
 0x652   : > { %v10028_v54 = vpop.permute.xlu1 %10027  ;;  %v13132_v11 = vpack.c.bf16 %v4854_v15, %v4852_v7  ;;  %v4785_v45 = vmax.f32 %v4689_v6, 0.0  ;;  %v4690_v23 = vmax.f32 %v14492_v25, %v4545_v46  ;;  %v4688_v2 = vmax.f32 %v14493_v1, %v4544_v12  ;;  %v10295_v7 = vld [vmem:[%s14039_s3 + $0x1e4] ss:$8 sps:$4 sm:$0xff]   ;;  %v10304_v1 = vld [vmem:[%s14039_s3 + $0x214] ss:$8 sps:$4 sm:$0xff]  }
 0x653   : > { %v4787_v3 = vmax.f32 %v4691_v34, 0.0  ;;  %v10030_v51 = vunpack.i.h.bf16 %v10028_v54  ;;  %8419 = vmatprep.mubr.msk.bf16.mxu1 %vm5132_vm4, %v13127_v16  ;;  %v10029_v50 = vunpack.i.l.bf16 %v10028_v54  ;;  %v4693_v56 = vmax.f32 %v14494_v29, %v10025_v43  ;;  %v10293_v34 = vld [vmem:[%s14039_s3 + $0x1e0] ss:$8 sps:$4 sm:$0xff]   ;;  %v10301_v25 = vld [vmem:[%s14039_s3 + $0x204] ss:$8 sps:$4 sm:$0xff]  }
 0x654   : > { %5371 = vmatmul.mubr.bf16.gmra.mrb[252].mxu1 %v13132_v11  ;;  %v10024_v59 = vunpack.i.l.bf16 %v10023_v62  ;;  %v4786_v4 = vmax.f32 %v4690_v23, 0.0  ;;  %v4784_v14 = vmax.f32 %v4688_v2, 0.0  ;;  %v14497_v62 = vld [vmem:[#allocation7_spill] sm:$0xff]  ;;  %v14498_v23 = vld [vmem:[#allocation34_spill] sm:$0xff]  ;;  %v14500_v29 = vld [vmem:[#allocation36_spill] sm:$0xff] }
 0x655   : > { %v4881_v37 = vpack.c.bf16 %v4787_v3, %v4785_v45  ;;  %v4695_v55 = vmax.f32 %v14495_v24, %v10030_v51  ;;  %v4547_v28 = vsel %vm4543_vm3, %v10029_v50, %v10030_v51  ;;  %v4789_v21 = vmax.f32 %v4693_v56, 0.0  ;;  %v10296_v45 = vld [vmem:[%s14039_s3 + $0x1f0] ss:$8 sps:$4 sm:$0xff]   ;;  %v10299_v51 = vld [vmem:[%s14039_s3 + $0x200] ss:$8 sps:$4 sm:$0xff]  }
 0x656   : > { %v4546_v44 = vsel %vm4543_vm3, %v10024_v59, %v10025_v43  ;;  %v4880_v6 = vpack.c.bf16 %v4786_v4, %v4784_v14  ;;  %v4694_v53 = vmax.f32 %v14496_v8, %v4547_v28  ;;  %v10298_v43 = vld [vmem:[%s14039_s3 + $0x1f4] ss:$8 sps:$4 sm:$0xff]   ;;  %v10302_v2 = vld [vmem:[%s14039_s3 + $0x210] ss:$8 sps:$4 sm:$0xff]   ;;  %v10307_v50 = vld [vmem:[%s14039_s3 + $0x224] ss:$8 sps:$4 sm:$0xff]  }
 0x657   : > { %v4791_v33 = vmax.f32 %v4695_v55, 0.0  ;;  %8451 = vmatprep.mubr.msk.bf16.mxu1 %vm5132_vm4, %v4881_v37  ;;  %v4692_v12 = vmax.f32 %v14497_v62, %v4546_v44  ;;  %v14499_v37 = vld [vmem:[#allocation35_spill] sm:$0xff]  ;;  %v10310_v59 = vld [vmem:[%s14039_s3 + $0x234] ss:$8 sps:$4 sm:$0xff]   ;;  %v10308_v24 = vld [vmem:[%s14039_s3 + $0x230] ss:$8 sps:$4 sm:$0xff]  }
 0x658   : > { %v4790_v46 = vmax.f32 %v4694_v53, 0.0  ;;  %v10305_v56 = vld [vmem:[%s14039_s3 + $0x220] ss:$8 sps:$4 sm:$0xff]   ;;  %v10313_v55 = vld [vmem:[%s14039_s3 + $0x244] ss:$8 sps:$4 sm:$0xff]  }
 0x659   : > { %v4883_v15 = vpack.c.bf16 %v4791_v33, %v4789_v21  ;;  %v4788_v54 = vmax.f32 %v4692_v12, 0.0  ;;  %v14501_v4 = vld [vmem:[#allocation38_spill] sm:$0xff]  ;;  %v14502_v33 = vld [vmem:[#allocation39_spill] sm:$0xff]  ;;  %v14506_v12 = vld [vmem:[#allocation44_spill] sm:$0xff] }
 0x65a   : > { %v10311_v28 = vld [vmem:[%s14039_s3 + $0x240] ss:$8 sps:$4 sm:$0xff]   ;;  %v10316_v14 = vld [vmem:[%s14039_s3 + $0x254] ss:$8 sps:$4 sm:$0xff]   ;;  %v10314_v21 = vld [vmem:[%s14039_s3 + $0x250] ss:$8 sps:$4 sm:$0xff]  }
 0x65b   : > { %v4882_v3 = vpack.c.bf16 %v4790_v46, %v4788_v54  ;;  %v10319_v44 = vld [vmem:[%s14039_s3 + $0x264] ss:$8 sps:$4 sm:$0xff]   ;;  %v10317_v8 = vld [vmem:[%s14039_s3 + $0x260] ss:$8 sps:$4 sm:$0xff]   ;;  %v10322_v53 = vld [vmem:[%s14039_s3 + $0x274] ss:$8 sps:$4 sm:$0xff]  }
 0x65c   : > { %5571 = vmatmul.mubr.bf16.vlgmr.msra.gmra.mrb[192].mxu1 %v4880_v6  ;;  %v14504_v6 = vld [vmem:[#allocation42_spill] sm:$0xff]  ;;  %v14505_v62 = vld [vmem:[#allocation43_spill] sm:$0xff] }
 0x65d   : > { %8452 = vmatprep.mubr.msk.bf16.mxu1 %vm5132_vm4, %v4883_v15  ;;  %5919 = vmatpush1.bf16.msra.mxu1 %v10290_v35  ;;  %v14503_v35 = vld [vmem:[#allocation40_spill] sm:$0xff]  ;;  %v10328_v46 = vld [vmem:[%s14039_s3 + $0x294] ss:$8 sps:$4 sm:$0xff]  }
 0x65e   : > { %5920 = vmatprep.subr.bf16.mxu1 %v10295_v7  ;;  %v10320_v7 = vld [vmem:[%s14039_s3 + $0x270] ss:$8 sps:$4 sm:$0xff]   ;;  %v10325_v15 = vld [vmem:[%s14039_s3 + $0x284] ss:$8 sps:$4 sm:$0xff]  }
 0x65f   : > { %v10331_v54 = vld [vmem:[%s14039_s3 + $0x2a4] ss:$8 sps:$4 sm:$0xff]  }
 0x661   : > { %5921 = vmatpush1.bf16.msra.mxu1 %v10293_v34  ;;  %v10323_v34 = vld [vmem:[%s14039_s3 + $0x280] ss:$8 sps:$4 sm:$0xff]  }
 0x662   : > { %5922 = vmatprep.subr.bf16.mxu1 %v10298_v43  ;;  %v10326_v43 = vld [vmem:[%s14039_s3 + $0x290] ss:$8 sps:$4 sm:$0xff]  }
 0x664   : > { %5581 = vmatmul.mubr.bf16.gmra.mrb[196].mxu1 %v4882_v3  ;;  %v14507_v3 = vld [vmem:[#allocation45_spill] sm:$0xff] }
 0x665   : > { %8453 = vmatprep.mubr.msk.bf16.mxu1 %vm5132_vm4, %v14498_v23  ;;  %5923 = vmatpush1.bf16.msra.mxu1 %v10296_v45  ;;  %v8495_v45 = vld [vmem:[%s14039_s3 + $0x2b0] sm:$0x77]  ;;  %v10329_v23 = vld [vmem:[%s14039_s3 + $0x2a0] ss:$8 sps:$4 sm:$0xff]  }
 0x666   : > { %5924 = vmatprep.subr.bf16.mxu1 %v10301_v25  ;;  %v14508_v25 = vld [vmem:[#allocation3_spill] sm:$0xff] }
 0x669   : > { %5925 = vmatpush1.bf16.msra.mxu1 %v10299_v51  ;;  %v8525_v51 = vcombine.high %v8495_v45, %v8495_v45 }
 0x66a   : > { %5926 = vmatprep.subr.bf16.mxu1 %v10304_v1  ;;  %v8524_v1 = vcombine.low %v8495_v45, %v8495_v45  ;;  %v10361_v45 = vld [vmem:[%s14039_s3 + $0x348] ss:$8 sps:$4 sm:$0xff]  }
 0x66c   : > { %5591 = vmatmul.mubr.bf16.gmra.mrb[200].mxu1 %v14499_v37  ;;  %v14509_v37 = vld [vmem:[#allocation46_spill] sm:$0xff] }
 0x66d   : > { %8454 = vmatprep.mubr.msk.bf16.mxu1 %vm5132_vm4, %v14500_v29  ;;  %5927 = vmatpush1.bf16.msra.mxu1 %v10302_v2  ;;  %v5913_v2 = vsel %vm5181_vm2, %v8524_v1, 0  ;;  %v14510_v29 = vld [vmem:[#allocation47_spill] sm:$0xff]  ;;  %v10369_v1 = vld [vmem:[%s14039_s3 + $0x36c] ss:$8 sps:$4 sm:$0xff]  }
 0x66e   : > { %5928 = vmatprep.subr.bf16.mxu1 %v10307_v50  ;;  %v10336_v50 = vld [vmem:[%s14039_s3 + $0x2bc] ss:$8 sps:$4 sm:$0xff]  }
 0x671   : > { %5929 = vmatpush1.bf16.msra.mxu1 %v10305_v56  ;;  %v14511_v56 = vld [vmem:[#allocation48_spill] sm:$0xff] }
 0x672   : > { %5930 = vmatprep.subr.bf16.mxu1 %v10310_v59  ;;  %v14512_v59 = vld [vmem:[#allocation4_spill] sm:$0xff] }
 0x674   : > { %5601 = vmatmul.mubr.bf16.gmra.mrb[204].mxu1 %v14501_v4  ;;  %v10339_v4 = vld [vmem:[%s14039_s3 + $0x2cc] ss:$8 sps:$4 sm:$0xff]  }
 0x675   : > { %8455 = vmatprep.mubr.msk.bf16.mxu1 %vm5132_vm4, %v14502_v33  ;;  %5931 = vmatpush1.bf16.msra.mxu1 %v10308_v24  ;;  %v14513_v24 = vld [vmem:[#allocation49_spill] sm:$0xff] }
 0x676   : > { %5932 = vmatprep.subr.bf16.mxu1 %v10313_v55  ;;  %v10334_v55 = vld [vmem:[%s14039_s3 + $0x2b8] ss:$8 sps:$4 sm:$0xff]  }
 0x679   : > { %5933 = vmatpush1.bf16.msra.mxu1 %v10311_v28  ;;  %v10337_v28 = vld [vmem:[%s14039_s3 + $0x2c8] ss:$8 sps:$4 sm:$0xff]  }
 0x67a   : > { %5934 = vmatprep.subr.bf16.mxu1 %v10316_v14  ;;  %v10340_v14 = vld [vmem:[%s14039_s3 + $0x2d8] ss:$8 sps:$4 sm:$0xff]  }
 0x67c   : > { %5611 = vmatmul.mubr.bf16.gmra.mrb[208].mxu1 %v14503_v35 }
 0x67d   : > { %8456 = vmatprep.mubr.msk.bf16.mxu1 %vm5132_vm4, %v14504_v6  ;;  %5935 = vmatpush1.bf16.msra.mxu1 %v10314_v21  ;;  %v10345_v21 = vld [vmem:[%s14039_s3 + $0x2ec] ss:$8 sps:$4 sm:$0xff]  }
 0x67e   : > { %5936 = vmatprep.subr.bf16.mxu1 %v10319_v44  ;;  %v10343_v44 = vld [vmem:[%s14039_s3 + $0x2e8] ss:$8 sps:$4 sm:$0xff]  }
 0x681   : > { %5937 = vmatpush1.bf16.msra.mxu1 %v10317_v8  ;;  %v10351_v8 = vld [vmem:[%s14039_s3 + $0x30c] ss:$8 sps:$4 sm:$0xff]  }
 0x682   : > { %5938 = vmatprep.subr.bf16.mxu1 %v10322_v53  ;;  %v10349_v53 = vld [vmem:[%s14039_s3 + $0x308] ss:$8 sps:$4 sm:$0xff]  }
 0x684   : > { %5621 = vmatmul.mubr.bf16.gmra.mrb[212].mxu1 %v14505_v62 }
 0x685   : > { %8457 = vmatprep.mubr.msk.bf16.mxu1 %vm5132_vm4, %v14506_v12  ;;  %5939 = vmatpush1.bf16.msra.mxu1 %v10320_v7  ;;  %v10354_v7 = vld [vmem:[%s14039_s3 + $0x31c] ss:$8 sps:$4 sm:$0xff]  }
 0x686   : > { %5940 = vmatprep.subr.bf16.mxu1 %v10325_v15  ;;  %v10352_v15 = vld [vmem:[%s14039_s3 + $0x318] ss:$8 sps:$4 sm:$0xff]  }
 0x689   : > { %5941 = vmatpush1.bf16.msra.mxu1 %v10323_v34  ;;  %v10355_v34 = vld [vmem:[%s14039_s3 + $0x328] ss:$8 sps:$4 sm:$0xff]  }
 0x68a   : > { %5942 = vmatprep.subr.bf16.mxu1 %v10328_v46  ;;  %v10360_v46 = vld [vmem:[%s14039_s3 + $0x33c] ss:$8 sps:$4 sm:$0xff]  }
 0x68c   : > { %5631 = vmatmul.mubr.bf16.gmra.mrb[216].mxu1 %v14507_v3 }
 0x68d   : > { %8458 = vmatprep.mubr.msk.bf16.mxu1 %vm5132_vm4, %v14508_v25  ;;  %5943 = vmatpush1.bf16.msra.mxu1 %v10326_v43  ;;  %v10358_v43 = vld [vmem:[%s14039_s3 + $0x338] ss:$8 sps:$4 sm:$0xff]  }
 0x68e   : > { %5944 = vmatprep.subr.bf16.mxu1 %v10331_v54  ;;  %v10363_v54 = vld [vmem:[%s14039_s3 + $0x34c] ss:$8 sps:$4 sm:$0xff]  }
 0x691   : > { %5945 = vmatpush1.bf16.msra.mxu1 %v10329_v23  ;;  %v10366_v23 = vld [vmem:[%s14039_s3 + $0x35c] ss:$8 sps:$4 sm:$0xff]  }
 0x692   : > { %8526 = vmatprep.subr.msk.bf16.mxu1 %vm5181_vm2, %v8525_v51  ;;  %v10364_v51 = vld [vmem:[%s14039_s3 + $0x358] ss:$8 sps:$4 sm:$0xff]  }
 0x694   : > { %5641 = vmatmul.mubr.bf16.gmra.mrb[220].mxu1 %v14509_v37 }
 0x695   : > { %8459 = vmatprep.mubr.msk.bf16.mxu1 %vm5132_vm4, %v14510_v29  ;;  %5947 = vmatpush1.bf16.msra.mxu1 %v5913_v2  ;;  %v10367_v2 = vld [vmem:[%s14039_s3 + $0x368] ss:$8 sps:$4 sm:$0xff]  }
 0x696   : > { %6362 = vmatprep.subr.bf16.mxu1 %v10336_v50  ;;  %v10372_v50 = vld [vmem:[%s14039_s3 + $0x37c] ss:$8 sps:$4 sm:$0xff]  }
 0x69c   : > { %5651 = vmatmul.mubr.bf16.gmra.mrb[224].mxu1 %v14511_v56 }
 0x69d   : > { %8460 = vmatprep.mubr.msk.bf16.mxu1 %vm5132_vm4, %v14512_v59 }
 0x6a4   : > { %5661 = vmatmul.mubr.bf16.gmra.mrb[228].mxu1 %v14513_v24 }
 0x6a5   : > { %8461 = vmatprep.mubr.msk.bf16.mxu1 %vm5132_vm4, %v12859_v10 }
 0x6ac   : > { %5671 = vmatmul.mubr.bf16.gmra.mrb[232].mxu1 %v12864_v31 }
 0x6ad   : > { %8462 = vmatprep.mubr.msk.bf16.mxu1 %vm5132_vm4, %v12900_v13 }
 0x6b4   : > { %5681 = vmatmul.mubr.bf16.gmra.mrb[236].mxu1 %v12903_v58 }
 0x6b5   : > { %8463 = vmatprep.mubr.msk.bf16.mxu1 %vm5132_vm4, %v12951_v52 }
 0x6bc   : > { %5691 = vmatmul.mubr.bf16.gmra.mrb[240].mxu1 %v12956_v38 }
 0x6bd   : > { %8464 = vmatprep.mubr.msk.bf16.mxu1 %vm5132_vm4, %v12992_v0 }
 0x6c4   : > { %5701 = vmatmul.mubr.bf16.gmra.mrb[244].mxu1 %v12995_v49 }
 0x6c5   : > { %8465 = vmatprep.mubr.msk.bf16.mxu1 %vm5132_vm4, %v13043_v47 }
 0x6cc   : > { %5711 = vmatmul.mubr.bf16.gmra.mrb[248].mxu1 %v13048_v27 }
 0x6cd   : > { %8466 = vmatprep.mubr.msk.bf16.mxu1 %vm5132_vm4, %v13084_v17 }
 0x6d4   : > { %5721 = vmatmul.mubr.bf16.gmra.mrb[252].mxu1 %v13087_v41 }
 0x6d5   : > { %8527 = vmatprep.mubr.msk.bf16.mxu1 %vm5132_vm4, %v14502_v33  ;;  %v10342_v33 = vld [vmem:[%s14039_s3 + $0x2dc] ss:$8 sps:$4 sm:$0xff]  }
 0x6dc   : > { %5951 = vmatmul.mubr.bf16.vlgmr.msra.gmra.mrb[192].mxu1 %v14503_v35  ;;  %v10348_v35 = vld [vmem:[%s14039_s3 + $0x2fc] ss:$8 sps:$4 sm:$0xff]  }
 0x6dd   : > { %8528 = vmatprep.mubr.msk.bf16.mxu1 %vm5132_vm4, %v14504_v6  ;;  %6363 = vmatpush1.bf16.msra.mxu1 %v10334_v55  ;;  %v10346_v6 = vld [vmem:[%s14039_s3 + $0x2f8] ss:$8 sps:$4 sm:$0xff]  }
 0x6de   : > { %6364 = vmatprep.subr.bf16.mxu1 %v10339_v4  ;;  %v10370_v55 = vld [vmem:[%s14039_s3 + $0x378] ss:$8 sps:$4 sm:$0xff]   ;;  %v10375_v4 = vld [vmem:[%s14039_s3 + $0x38c] ss:$8 sps:$4 sm:$0xff]  }
 0x6e1   : > { %6365 = vmatpush1.bf16.msra.mxu1 %v10337_v28  ;;  %v8571_v28 = vld [vmem:[%s14039_s3 + $0x398] sm:$0x77] }
 0x6e2   : > { %6366 = vmatprep.subr.bf16.mxu1 %v10342_v33  ;;  %v10373_v33 = vld [vmem:[%s14039_s3 + $0x388] ss:$8 sps:$4 sm:$0xff]  }
 0x6e4   : > { %5961 = vmatmul.mubr.bf16.gmra.mrb[196].mxu1 %v14505_v62  ;;  %v10357_v62 = vld [vmem:[%s14039_s3 + $0x32c] ss:$8 sps:$4 sm:$0xff]  }
 0x6e5   : > { %8529 = vmatprep.mubr.msk.bf16.mxu1 %vm5132_vm4, %v14506_v12  ;;  %6367 = vmatpush1.bf16.msra.mxu1 %v10340_v14  ;;  %v8601_v14 = vcombine.high %v8571_v28, %v8571_v28 }
 0x6e6   : > { %6368 = vmatprep.subr.bf16.mxu1 %v10345_v21  ;;  %v8600_v21 = vcombine.low %v8571_v28, %v8571_v28  ;;  %v14514_v28 = vld [vmem:[#allocation50_spill] sm:$0xff] }
 0x6e9   : > { %6369 = vmatpush1.bf16.msra.mxu1 %v10343_v44  ;;  %v6357_v44 = vsel %vm5181_vm2, %v8600_v21, 0 }
 0x6ea   : > { %6370 = vmatprep.subr.bf16.mxu1 %v10348_v35  ;;  %v10380_v35 = vld [vmem:[%s14039_s3 + $0x3a4] ss:$8 sps:$4 sm:$0xff]  }
 0x6ec   : > { %5971 = vmatmul.mubr.bf16.gmra.mrb[200].mxu1 %v14507_v3 }
 0x6ed   : > { %8530 = vmatprep.mubr.msk.bf16.mxu1 %vm5132_vm4, %v14508_v25  ;;  %6371 = vmatpush1.bf16.msra.mxu1 %v10346_v6  ;;  %v10038_v6 = vpop.permute.xlu1 %10037 }
 0x6ee   : > { %6372 = vmatprep.subr.bf16.mxu1 %v10351_v8  ;;  %v10033_v8 = vpop.permute.xlu0 %10032 }
 0x6f1   : > { %6373 = vmatpush1.bf16.msra.mxu1 %v10349_v53  ;;  %v10040_v53 = vunpack.i.h.bf16 %v10038_v6 }
 0x6f2   : > { %6374 = vmatprep.subr.bf16.mxu1 %v10354_v7  ;;  %v10035_v7 = vunpack.i.h.bf16 %v10033_v8 }
 0x6f4   : > { %5981 = vmatmul.mubr.bf16.gmra.mrb[204].mxu1 %v14509_v37 }
 0x6f5   : > { %8531 = vmatprep.mubr.msk.bf16.mxu1 %vm5132_vm4, %v14510_v29  ;;  %6375 = vmatpush1.bf16.msra.mxu1 %v10352_v15  ;;  %v4763_v15 = vmax.f32 %v12875_v40, %v10040_v53 }
 0x6f6   : > { %6376 = vmatprep.subr.bf16.mxu1 %v10357_v62  ;;  %v10039_v62 = vunpack.i.l.bf16 %v10038_v6 }
 0x6f9   : > { %6377 = vmatpush1.bf16.msra.mxu1 %v10355_v34  ;;  %v10048_v34 = vpop.permute.xlu1 %10047 }
 0x6fa   : > { %6378 = vmatprep.subr.bf16.mxu1 %v10360_v46  ;;  %v4761_v46 = vmax.f32 %v12866_v30, %v10035_v7  ;;  %v10049_v30 = vunpack.i.l.bf16 %v10048_v34 }
 0x6fc   : > { %5991 = vmatmul.mubr.bf16.gmra.mrb[208].mxu1 %v14511_v56 }
 0x6fd   : > { %8532 = vmatprep.mubr.msk.bf16.mxu1 %vm5132_vm4, %v14512_v59  ;;  %6379 = vmatpush1.bf16.msra.mxu1 %v10358_v43  ;;  %v10034_v43 = vunpack.i.l.bf16 %v10033_v8 }
 0x6fe   : > { %6380 = vmatprep.subr.bf16.mxu1 %v10363_v54  ;;  %v10043_v54 = vpop.permute.xlu0 %10042 }
 0x701   : > { %6381 = vmatpush1.bf16.msra.mxu1 %v10361_v45  ;;  %v4859_v45 = vmax.f32 %v4763_v15, 0.0  ;;  %v14516_v15 = vld [vmem:[#allocation52_spill] sm:$0xff] }
 0x702   : > { %6382 = vmatprep.subr.bf16.mxu1 %v10366_v23  ;;  %v4581_v23 = vsel %vm4543_vm3, %v10039_v62, %v10040_v53 }
 0x703   : > { %v4762_v40 = vmax.f32 %v12869_v48, %v4581_v23 }
 0x704   : > { %6001 = vmatmul.mubr.bf16.gmra.mrb[212].mxu1 %v14513_v24 }
 0x705   : > { %8533 = vmatprep.mubr.msk.bf16.mxu1 %vm5132_vm4, %v12859_v10  ;;  %6383 = vmatpush1.bf16.msra.mxu1 %v10364_v51  ;;  %v10050_v51 = vunpack.i.h.bf16 %v10048_v34 }
 0x706   : > { %6384 = vmatprep.subr.bf16.mxu1 %v10369_v1  ;;  %v4857_v1 = vmax.f32 %v4761_v46, 0.0  ;;  %v14517_v46 = vld [vmem:[#allocation51_spill] sm:$0xff] }
 0x707   : > { %v4583_v8 = vsel %vm4543_vm3, %v10049_v30, %v10050_v51  ;;  %v10393_v30 = vld [vmem:[%s14039_s3 + $0x3f0] ss:$8 sps:$4 sm:$0xff]  }
 0x708   : > { %v4766_v62 = vmax.f32 %v14516_v15, %v4583_v8  ;;  %v10405_v8 = vld [vmem:[%s14039_s3 + $0x430] ss:$8 sps:$4 sm:$0xff]  }
 0x709   : > { %6385 = vmatpush1.bf16.msra.mxu1 %v10367_v2  ;;  %v4580_v2 = vsel %vm4543_vm3, %v10034_v43, %v10035_v7  ;;  %v10411_v15 = vld [vmem:[%s14039_s3 + $0x450] ss:$8 sps:$4 sm:$0xff]  }
 0x70a   : > { %6386 = vmatprep.subr.bf16.mxu1 %v10372_v50  ;;  %v10045_v50 = vunpack.i.h.bf16 %v10043_v54 }
 0x70c   : > { %6011 = vmatmul.mubr.bf16.gmra.mrb[216].mxu1 %v12864_v31 }
 0x70d   : > { %8534 = vmatprep.mubr.msk.bf16.mxu1 %vm5132_vm4, %v12900_v13  ;;  %6387 = vmatpush1.bf16.msra.mxu1 %v10370_v55  ;;  %v13413_v55 = vpack.c.bf16 %v4859_v45, %v4857_v1  ;;  %v10383_v1 = vld [vmem:[%s14039_s3 + $0x3b4] ss:$8 sps:$4 sm:$0xff]  }
 0x70e   : > { %6388 = vmatprep.subr.bf16.mxu1 %v10375_v4  ;;  %v4767_v4 = vmax.f32 %v12914_v61, %v10050_v51  ;;  %v10378_v51 = vld [vmem:[%s14039_s3 + $0x3a0] ss:$8 sps:$4 sm:$0xff]  }
 0x710   : > { %v4863_v6 = vmax.f32 %v4767_v4, 0.0  ;;  %v10390_v4 = vld [vmem:[%s14039_s3 + $0x3e0] ss:$8 sps:$4 sm:$0xff]  }
 0x711   : > { %6389 = vmatpush1.bf16.msra.mxu1 %v10373_v33  ;;  %v4760_v33 = vmax.f32 %v14514_v28, %v4580_v2  ;;  %v10381_v2 = vld [vmem:[%s14039_s3 + $0x3b0] ss:$8 sps:$4 sm:$0xff]   ;;  %v10398_v28 = vld [vmem:[%s14039_s3 + $0x404] ss:$8 sps:$4 sm:$0xff]  }
 0x712   : > { %8602 = vmatprep.subr.msk.bf16.mxu1 %vm5181_vm2, %v8601_v14  ;;  %v14515_v14 = vld [vmem:[#allocation5_spill] sm:$0xff] }
 0x713   : > { %v4765_v21 = vmax.f32 %v14515_v14, %v10045_v50  ;;  %v4856_v48 = vmax.f32 %v4760_v33, 0.0  ;;  %v10396_v33 = vld [vmem:[%s14039_s3 + $0x400] ss:$8 sps:$4 sm:$0xff]   ;;  %v10401_v14 = vld [vmem:[%s14039_s3 + $0x414] ss:$8 sps:$4 sm:$0xff]  }
 0x714   : > { %6021 = vmatmul.mubr.bf16.gmra.mrb[220].mxu1 %v12903_v58 }
 0x715   : > { %8535 = vmatprep.mubr.msk.bf16.mxu1 %vm5132_vm4, %v12951_v52  ;;  %6391 = vmatpush1.bf16.msra.mxu1 %v6357_v44  ;;  %v10044_v44 = vunpack.i.l.bf16 %v10043_v54  ;;  %v4861_v53 = vmax.f32 %v4765_v21, 0.0  ;;  %v4862_v54 = vmax.f32 %v4766_v62, 0.0  ;;  %v10399_v21 = vld [vmem:[%s14039_s3 + $0x410] ss:$8 sps:$4 sm:$0xff]   ;;  %v10416_v62 = vld [vmem:[%s14039_s3 + $0x464] ss:$8 sps:$4 sm:$0xff]  }
 0x716   : > { %6806 = vmatprep.subr.bf16.mxu1 %v10380_v35  ;;  %v4858_v35 = vmax.f32 %v4762_v40, 0.0  ;;  %v10392_v40 = vld [vmem:[%s14039_s3 + $0x3e4] ss:$8 sps:$4 sm:$0xff]  }
 0x717   : > { %v4582_v7 = vsel %vm4543_vm3, %v10044_v44, %v10045_v50  ;;  %v13426_v34 = vpack.c.bf16 %v4863_v6, %v4861_v53  ;;  %v10384_v50 = vld [vmem:[%s14039_s3 + $0x3c0] ss:$8 sps:$4 sm:$0xff]   ;;  %v10404_v44 = vld [vmem:[%s14039_s3 + $0x424] ss:$8 sps:$4 sm:$0xff]   ;;  %v10407_v6 = vld [vmem:[%s14039_s3 + $0x434] ss:$8 sps:$4 sm:$0xff]  }
 0x718   : > { %v13423_v61 = vpack.c.bf16 %v4858_v35, %v4856_v48  ;;  %v4764_v43 = vmax.f32 %v14517_v46, %v4582_v7  ;;  %v10402_v35 = vld [vmem:[%s14039_s3 + $0x420] ss:$8 sps:$4 sm:$0xff]   ;;  %v10410_v48 = vld [vmem:[%s14039_s3 + $0x444] ss:$8 sps:$4 sm:$0xff]   ;;  %v10413_v7 = vld [vmem:[%s14039_s3 + $0x454] ss:$8 sps:$4 sm:$0xff]  }
 0x719   : > { %v10408_v53 = vld [vmem:[%s14039_s3 + $0x440] ss:$8 sps:$4 sm:$0xff]  }
 0x71a   : > { %v4860_v45 = vmax.f32 %v4764_v43, 0.0  ;;  %v10414_v46 = vld [vmem:[%s14039_s3 + $0x460] ss:$8 sps:$4 sm:$0xff]   ;;  %v10419_v43 = vld [vmem:[%s14039_s3 + $0x474] ss:$8 sps:$4 sm:$0xff]  }
 0x71c   : > { %6031 = vmatmul.mubr.bf16.gmra.mrb[224].mxu1 %v12956_v38  ;;  %v13432_v23 = vpack.c.bf16 %v4862_v54, %v4860_v45  ;;  %v8647_v54 = vld [vmem:[%s14039_s3 + $0x480] sm:$0x77]  ;;  %v10417_v45 = vld [vmem:[%s14039_s3 + $0x470] ss:$8 sps:$4 sm:$0xff]  }
 0x71d   : > { %8536 = vmatprep.mubr.msk.bf16.mxu1 %vm5132_vm4, %v12992_v0 }
 0x724   : > { %6041 = vmatmul.mubr.bf16.gmra.mrb[228].mxu1 %v12995_v49 }
 0x725   : > { %8537 = vmatprep.mubr.msk.bf16.mxu1 %vm5132_vm4, %v13043_v47 }
 0x72c   : > { %6051 = vmatmul.mubr.bf16.gmra.mrb[232].mxu1 %v13048_v27 }
 0x72d   : > { %8538 = vmatprep.mubr.msk.bf16.mxu1 %vm5132_vm4, %v13084_v17 }
 0x734   : > { %6061 = vmatmul.mubr.bf16.gmra.mrb[236].mxu1 %v13087_v41 }
 0x735   : > { %8539 = vmatprep.mubr.msk.bf16.mxu1 %vm5132_vm4, %v13113_v20 }
 0x73c   : > { %6071 = vmatmul.mubr.bf16.gmra.mrb[240].mxu1 %v13115_v57 }
 0x73d   : > { %8540 = vmatprep.mubr.msk.bf16.mxu1 %vm5132_vm4, %v13127_v16 }
 0x744   : > { %6081 = vmatmul.mubr.bf16.gmra.mrb[244].mxu1 %v13132_v11 }
 0x745   : > { %8541 = vmatprep.mubr.msk.bf16.mxu1 %vm5132_vm4, %v13413_v55 }
 0x74c   : > { %6091 = vmatmul.mubr.bf16.gmra.mrb[248].mxu1 %v13423_v61 }
 0x74d   : > { %8542 = vmatprep.mubr.msk.bf16.mxu1 %vm5132_vm4, %v13426_v34 }
 0x754   : > { %6101 = vmatmul.mubr.bf16.gmra.mrb[252].mxu1 %v13432_v23 }
 0x755   : > { %8603 = vmatprep.mubr.msk.bf16.mxu1 %vm5132_vm4, %v14506_v12  ;;  %v10386_v12 = vld [vmem:[%s14039_s3 + $0x3c4] ss:$8 sps:$4 sm:$0xff]  }
 0x75c   : > { %6395 = vmatmul.mubr.bf16.vlgmr.msra.gmra.mrb[192].mxu1 %v14507_v3  ;;  %v10389_v3 = vld [vmem:[%s14039_s3 + $0x3d4] ss:$8 sps:$4 sm:$0xff]  }
 0x75d   : > { %8604 = vmatprep.mubr.msk.bf16.mxu1 %vm5132_vm4, %v14508_v25  ;;  %6807 = vmatpush1.bf16.msra.mxu1 %v10378_v51  ;;  %v10387_v25 = vld [vmem:[%s14039_s3 + $0x3d0] ss:$8 sps:$4 sm:$0xff]   ;;  %v8677_v51 = vcombine.high %v8647_v54, %v8647_v54 }
 0x75e   : > { %6808 = vmatprep.subr.bf16.mxu1 %v10383_v1  ;;  %v8676_v1 = vcombine.low %v8647_v54, %v8647_v54 }
 0x761   : > { %6809 = vmatpush1.bf16.msra.mxu1 %v10381_v2  ;;  %v6801_v2 = vsel %vm5181_vm2, %v8676_v1, 0 }
 0x762   : > { %6810 = vmatprep.subr.bf16.mxu1 %v10386_v12  ;;  %v14518_v12 = vmov 0  }
 0x764   : > { %6405 = vmatmul.mubr.bf16.gmra.mrb[196].mxu1 %v14509_v37  ;;  %v10395_v37 = vld [vmem:[%s14039_s3 + $0x3f4] ss:$8 sps:$4 sm:$0xff]  }
 0x765   : > { %8605 = vmatprep.mubr.msk.bf16.mxu1 %vm5132_vm4, %v14510_v29  ;;  %6811 = vmatpush1.bf16.msra.mxu1 %v10384_v50  ;;  %v10058_v50 = vpop.permute.xlu1 %10057 }
 0x766   : > { %6812 = vmatprep.subr.bf16.mxu1 %v10389_v3  ;;  %v10053_v3 = vpop.permute.xlu0 %10052 }
 0x769   : > { %6813 = vmatpush1.bf16.msra.mxu1 %v10387_v25  ;;  %v10060_v25 = vunpack.i.h.bf16 %v10058_v50 }
 0x76a   : > { %6814 = vmatprep.subr.bf16.mxu1 %v10392_v40  ;;  %v10055_v40 = vunpack.i.h.bf16 %v10053_v3 }
 0x76c   : > { %6415 = vmatmul.mubr.bf16.gmra.mrb[200].mxu1 %v14511_v56 }
 0x76d   : > { %8606 = vmatprep.mubr.msk.bf16.mxu1 %vm5132_vm4, %v14512_v59  ;;  %6815 = vmatpush1.bf16.msra.mxu1 %v10390_v4  ;;  %v4771_v4 = vmax.f32 %v12967_v60, %v10060_v25 }
 0x76e   : > { %6816 = vmatprep.subr.bf16.mxu1 %v10395_v37  ;;  %v10059_v37 = vunpack.i.l.bf16 %v10058_v50 }
 0x771   : > { %6817 = vmatpush1.bf16.msra.mxu1 %v10393_v30  ;;  %v10068_v30 = vpop.permute.xlu1 %10067 }
 0x772   : > { %6818 = vmatprep.subr.bf16.mxu1 %v10398_v28  ;;  %v4769_v28 = vmax.f32 %v12958_v36, %v10055_v40  ;;  %v14519_v36 = vld [vmem:[#allocation53_spill] sm:$0xff] }
 0x774   : > { %6425 = vmatmul.mubr.bf16.gmra.mrb[204].mxu1 %v14513_v24 }
 0x775   : > { %8607 = vmatprep.mubr.msk.bf16.mxu1 %vm5132_vm4, %v12859_v10  ;;  %6819 = vmatpush1.bf16.msra.mxu1 %v10396_v33  ;;  %v10054_v33 = vunpack.i.l.bf16 %v10053_v3 }
 0x776   : > { %6820 = vmatprep.subr.bf16.mxu1 %v10401_v14  ;;  %v10063_v14 = vpop.permute.xlu0 %10062 }
 0x777   : > { %v10064_v54 = vunpack.i.l.bf16 %v10063_v14 }
 0x779   : > { %6821 = vmatpush1.bf16.msra.mxu1 %v10399_v21  ;;  %v4867_v21 = vmax.f32 %v4771_v4, 0.0  ;;  %v14522_v4 = vld [vmem:[#allocation54_spill] sm:$0xff] }
 0x77a   : > { %6822 = vmatprep.subr.bf16.mxu1 %v10404_v44  ;;  %v4585_v44 = vsel %vm4543_vm3, %v10059_v37, %v10060_v25 }
 0x77b   : > { %v4770_v60 = vmax.f32 %v12961_v39, %v4585_v44 }
 0x77c   : > { %6435 = vmatmul.mubr.bf16.gmra.mrb[208].mxu1 %v12864_v31 }
 0x77d   : > { %8608 = vmatprep.mubr.msk.bf16.mxu1 %vm5132_vm4, %v12900_v13  ;;  %6823 = vmatpush1.bf16.msra.mxu1 %v10402_v35  ;;  %v10070_v35 = vunpack.i.h.bf16 %v10068_v30 }
 0x77e   : > { %6824 = vmatprep.subr.bf16.mxu1 %v10407_v6  ;;  %v4865_v6 = vmax.f32 %v4769_v28, 0.0 }
 0x781   : > { %6825 = vmatpush1.bf16.msra.mxu1 %v10405_v8  ;;  %v4584_v8 = vsel %vm4543_vm3, %v10054_v33, %v10055_v40 }
 0x782   : > { %6826 = vmatprep.subr.bf16.mxu1 %v10410_v48  ;;  %v10065_v48 = vunpack.i.h.bf16 %v10063_v14 }
 0x784   : > { %6445 = vmatmul.mubr.bf16.gmra.mrb[212].mxu1 %v12903_v58  ;;  %v4586_v39 = vsel %vm4543_vm3, %v10064_v54, %v10065_v48  ;;  %v10429_v54 = vld [vmem:[%s14041_s5 + $0x80] sm:$0xff]  }
 0x785   : > { %8609 = vmatprep.mubr.msk.bf16.mxu1 %vm5132_vm4, %v12951_v52  ;;  %6827 = vmatpush1.bf16.msra.mxu1 %v10408_v53  ;;  %v4921_v53 = vpack.c.bf16 %v4867_v21, %v4865_v6  ;;  %v4772_v37 = vmax.f32 %v14522_v4, %v4586_v39 }
 0x786   : > { %6828 = vmatprep.subr.bf16.mxu1 %v10413_v7  ;;  %v4775_v7 = vmax.f32 %v13006_v18, %v10070_v35  ;;  %v14521_v18 = vld [vmem:[#allocation55_spill] sm:$0xff] }
 0x787   : > { %v4868_v28 = vmax.f32 %v4772_v37, 0.0 }
 0x789   : > { %6829 = vmatpush1.bf16.msra.mxu1 %v10411_v15  ;;  %v10069_v15 = vunpack.i.l.bf16 %v10068_v30 }
 0x78a   : > { %6830 = vmatprep.subr.bf16.mxu1 %v10416_v62  ;;  %v4768_v62 = vmax.f32 %v14519_v36, %v4584_v8 }
 0x78b   : > { %v4587_v1 = vsel %vm4543_vm3, %v10069_v15, %v10070_v35 }
 0x78c   : > { %6455 = vmatmul.mubr.bf16.gmra.mrb[216].mxu1 %v12956_v38  ;;  %v4774_v25 = vmax.f32 %v14521_v18, %v4587_v1  ;;  %v14523_v18 = vld [vmem:[#allocation137_spill] sm:$0xff] }
 0x78d   : > { %8610 = vmatprep.mubr.msk.bf16.mxu1 %vm5132_vm4, %v12992_v0  ;;  %6831 = vmatpush1.bf16.msra.mxu1 %v10414_v46  ;;  %v14520_v46 = vld [vmem:[#allocation6_spill] sm:$0xff] }
 0x78e   : > { %6832 = vmatprep.subr.bf16.mxu1 %v10419_v43  ;;  %v4773_v43 = vmax.f32 %v14520_v46, %v10065_v48  ;;  %v4870_v30 = vmax.f32 %v4774_v25, 0.0  ;;  %v10422_v48 = vld [vmem:[%s14041_s5 + $0x48] sm:$0xff]   ;;  %v10428_v46 = vld [vmem:[%s14041_s5 + $0x78] sm:$0xff]  }
 0x790   : > { %v4869_v50 = vmax.f32 %v4773_v43, 0.0  ;;  %v4922_v33 = vpack.c.bf16 %v4870_v30, %v4868_v28 }
 0x791   : > { %6833 = vmatpush1.bf16.msra.mxu1 %v10417_v45  ;;  %v4866_v45 = vmax.f32 %v4770_v60, 0.0  ;;  %v10425_v60 = vld [vmem:[%s14041_s5 + $0x60] sm:$0xff]  }
 0x792   : > { %8678 = vmatprep.subr.msk.bf16.mxu1 %vm5181_vm2, %v8677_v51  ;;  %v4871_v51 = vmax.f32 %v4775_v7, 0.0  ;;  %v10427_v7 = vld [vmem:[%s14041_s5 + $0x70] sm:$0xff]  }
 0x794   : > { %6465 = vmatmul.mubr.bf16.gmra.mrb[220].mxu1 %v12995_v49  ;;  %v4923_v40 = vpack.c.bf16 %v4871_v51, %v4869_v50  ;;  %v7063_v50 = vld [vmem:[%s14040_s4] sm:$0x3] }
 0x795   : > { %8611 = vmatprep.mubr.msk.bf16.mxu1 %vm5132_vm4, %v13043_v47  ;;  %6835 = vmatpush1.bf16.msra.mxu1 %v6801_v2  ;;  %v4864_v2 = vmax.f32 %v4768_v62, 0.0  ;;  %v13670_v25 = vrot.slane %v7063_v50, %v14523_v18 }
 0x796   : > { %7496 = vmatprep.subr.bf16.mxu1 %v14518_v12 }
 0x797   : > { %v4920_v3 = vpack.c.bf16 %v4866_v45, %v4864_v2  ;;  %v10430_v45 = vld [vmem:[%s14041_s5 + $0x88] sm:$0x3f]  }
 0x798   : > { %v7494_v2 = vsel %vm672_vm0, %v10430_v45, 0 }
 0x79c   : > { %6475 = vmatmul.mubr.bf16.gmra.mrb[224].mxu1 %v13048_v27 }
 0x79d   : > { %8612 = vmatprep.mubr.msk.bf16.mxu1 %vm5132_vm4, %v13084_v17 }
 0x7a4   : > { %6485 = vmatmul.mubr.bf16.gmra.mrb[228].mxu1 %v13087_v41 }
 0x7a5   : > { %8613 = vmatprep.mubr.msk.bf16.mxu1 %vm5132_vm4, %v13113_v20 }
 0x7ac   : > { %6495 = vmatmul.mubr.bf16.gmra.mrb[232].mxu1 %v13115_v57 }
 0x7ad   : > { %8614 = vmatprep.mubr.msk.bf16.mxu1 %vm5132_vm4, %v13127_v16 }
 0x7b4   : > { %6505 = vmatmul.mubr.bf16.gmra.mrb[236].mxu1 %v13132_v11 }
 0x7b5   : > { %8615 = vmatprep.mubr.msk.bf16.mxu1 %vm5132_vm4, %v13413_v55 }
 0x7bc   : > { %6515 = vmatmul.mubr.bf16.gmra.mrb[240].mxu1 %v13423_v61 }
 0x7bd   : > { %8616 = vmatprep.mubr.msk.bf16.mxu1 %vm5132_vm4, %v13426_v34 }
 0x7c4   : > { %6525 = vmatmul.mubr.bf16.gmra.mrb[244].mxu1 %v13432_v23 }
 0x7c5   : > { %8617 = vmatprep.mubr.msk.bf16.mxu1 %vm5132_vm4, %v4921_v53 }
 0x7cc   : > { %6535 = vmatmul.mubr.bf16.gmra.mrb[248].mxu1 %v4920_v3 }
 0x7cd   : > { %8618 = vmatprep.mubr.msk.bf16.mxu1 %vm5132_vm4, %v4923_v40 }
 0x7d4   : > { %6545 = vmatmul.mubr.bf16.gmra.mrb[252].mxu1 %v4922_v33 }
 0x7d5   : > { %8679 = vmatprep.mubr.msk.bf16.mxu1 %vm5132_vm4, %v14510_v29 }
 0x7dc   : > { %6839 = vmatmul.mubr.bf16.vlgmr.msra.gmra.mrb[192].mxu1 %v14511_v56 }
 0x7dd   : > { %8680 = vmatprep.mubr.msk.bf16.mxu1 %vm5132_vm4, %v14512_v59  ;;  %7497 = vmatpush1.bf16.msra.mxu1 %v10422_v48 }
 0x7de   : > { %7498 = vmatprep.subr.bf16.mxu1 %v14518_v12 }
 0x7e4   : > { %6849 = vmatmul.mubr.bf16.gmra.mrb[196].mxu1 %v14513_v24 }
 0x7e5   : > { %8681 = vmatprep.mubr.msk.bf16.mxu1 %vm5132_vm4, %v12859_v10  ;;  %v10078_v10 = vpop.permute.xlu1 %10077 }
 0x7ec   : > { %6859 = vmatmul.mubr.bf16.gmra.mrb[200].mxu1 %v12864_v31  ;;  %v10073_v31 = vpop.permute.xlu0 %10072 }
 0x7ed   : > { %8682 = vmatprep.mubr.msk.bf16.mxu1 %vm5132_vm4, %v12900_v13  ;;  %v10080_v13 = vunpack.i.h.bf16 %v10078_v10 }
 0x7f4   : > { %6869 = vmatmul.mubr.bf16.gmra.mrb[204].mxu1 %v12903_v58  ;;  %v10075_v58 = vunpack.i.h.bf16 %v10073_v31 }
 0x7f5   : > { %8683 = vmatprep.mubr.msk.bf16.mxu1 %vm5132_vm4, %v12951_v52  ;;  %v4779_v52 = vmax.f32 %v13059_v22, %v10080_v13 }
 0x7fc   : > { %6879 = vmatmul.mubr.bf16.gmra.mrb[208].mxu1 %v12956_v38  ;;  %v10079_v38 = vunpack.i.l.bf16 %v10078_v10 }
 0x7fd   : > { %8684 = vmatprep.mubr.msk.bf16.mxu1 %vm5132_vm4, %v12992_v0  ;;  %v10088_v0 = vpop.permute.xlu1 %10087 }
 0x7fe   : > { %v10089_v59 = vunpack.i.l.bf16 %v10088_v0 }
 0x804   : > { %6889 = vmatmul.mubr.bf16.gmra.mrb[212].mxu1 %v12995_v49  ;;  %v4777_v49 = vmax.f32 %v13050_v63, %v10075_v58 }
 0x805   : > { %8685 = vmatprep.mubr.msk.bf16.mxu1 %vm5132_vm4, %v13043_v47  ;;  %v10074_v47 = vunpack.i.l.bf16 %v10073_v31 }
 0x80c   : > { %6899 = vmatmul.mubr.bf16.gmra.mrb[216].mxu1 %v13048_v27  ;;  %v10083_v27 = vpop.permute.xlu0 %10082 }
 0x80d   : > { %8686 = vmatprep.mubr.msk.bf16.mxu1 %vm5132_vm4, %v13084_v17  ;;  %v4875_v17 = vmax.f32 %v4779_v52, 0.0 }
 0x814   : > { %6909 = vmatmul.mubr.bf16.gmra.mrb[220].mxu1 %v13087_v41  ;;  %v4589_v41 = vsel %vm4543_vm3, %v10079_v38, %v10080_v13 }
 0x815   : > { %8687 = vmatprep.mubr.msk.bf16.mxu1 %vm5132_vm4, %v13113_v20  ;;  %v10090_v20 = vunpack.i.h.bf16 %v10088_v0  ;;  %v4778_v29 = vmax.f32 %v13053_v26, %v4589_v41 }
 0x817   : > { %v4783_v56 = vmax.f32 %v13098_v5, %v10090_v20 }
 0x81c   : > { %6919 = vmatmul.mubr.bf16.gmra.mrb[224].mxu1 %v13115_v57  ;;  %v4873_v57 = vmax.f32 %v4777_v49, 0.0 }
 0x81d   : > { %8688 = vmatprep.mubr.msk.bf16.mxu1 %vm5132_vm4, %v13127_v16  ;;  %v4588_v16 = vsel %vm4543_vm3, %v10074_v47, %v10075_v58 }
 0x81e   : > { %v4925_v22 = vpack.c.bf16 %v4875_v17, %v4873_v57  ;;  %v4776_v63 = vmax.f32 %v13045_v32, %v4588_v16 }
 0x820   : > { %v4872_v14 = vmax.f32 %v4776_v63, 0.0 }
 0x824   : > { %6929 = vmatmul.mubr.bf16.gmra.mrb[228].mxu1 %v13132_v11  ;;  %v10085_v11 = vunpack.i.h.bf16 %v10083_v27 }
 0x825   : > { %8689 = vmatprep.mubr.msk.bf16.mxu1 %vm5132_vm4, %v13413_v55  ;;  %v10084_v55 = vunpack.i.l.bf16 %v10083_v27 }
 0x826   : > { %v4781_v24 = vmax.f32 %v13091_v19, %v10085_v11 }
 0x827   : > { %v4590_v26 = vsel %vm4543_vm3, %v10084_v55, %v10085_v11 }
 0x828   : > { %v4877_v21 = vmax.f32 %v4781_v24, 0.0  ;;  %v4780_v32 = vmax.f32 %v13089_v9, %v4590_v26  ;;  %v10424_v9 = vld [vmem:[%s14041_s5 + $0x58] sm:$0xff]  }
 0x82a   : > { %v4876_v6 = vmax.f32 %v4780_v32, 0.0 }
 0x82c   : > { %6939 = vmatmul.mubr.bf16.gmra.mrb[232].mxu1 %v13423_v61  ;;  %v4874_v61 = vmax.f32 %v4778_v29, 0.0 }
 0x82d   : > { %8690 = vmatprep.mubr.msk.bf16.mxu1 %vm5132_vm4, %v13426_v34  ;;  %v4879_v34 = vmax.f32 %v4783_v56, 0.0 }
 0x82e   : > { %v4924_v44 = vpack.c.bf16 %v4874_v61, %v4872_v14 }
 0x82f   : > { %v4927_v35 = vpack.c.bf16 %v4879_v34, %v4877_v21 }
 0x834   : > { %6949 = vmatmul.mubr.bf16.gmra.mrb[236].mxu1 %v13432_v23  ;;  %v4591_v23 = vsel %vm4543_vm3, %v10089_v59, %v10090_v20 }
 0x835   : > { %8691 = vmatprep.mubr.msk.bf16.mxu1 %vm5132_vm4, %v4921_v53  ;;  %v4782_v5 = vmax.f32 %v13094_v42, %v4591_v23  ;;  %v10423_v42 = vld [vmem:[%s14041_s5 + $0x50] sm:$0xff]   ;;  %v10426_v53 = vld [vmem:[%s14041_s5 + $0x68] sm:$0xff]  }
 0x836   : > { %7499 = vmatpush1.bf16.msra.mxu1 %v10423_v42 }
 0x837   : > { %v4878_v19 = vmax.f32 %v4782_v5, 0.0  ;;  %7500 = vmatprep.subr.bf16.mxu1 %v14518_v12 }
 0x839   : > { %v4926_v8 = vpack.c.bf16 %v4878_v19, %v4876_v6 }
 0x83a   : > { %7501 = vmatpush1.bf16.msra.mxu1 %v10424_v9 }
 0x83b   : > { %7502 = vmatprep.subr.bf16.mxu1 %v14518_v12 }
 0x83c   : > { %6959 = vmatmul.mubr.bf16.gmra.mrb[240].mxu1 %v4920_v3 }
 0x83d   : > { %8692 = vmatprep.mubr.msk.bf16.mxu1 %vm5132_vm4, %v4923_v40  ;;  %v14524_v40 = vld [vmem:[#allocation134_spill] sm:$0xff] }
 0x83e   : > { %7503 = vmatpush1.bf16.msra.mxu1 %v10425_v60  ;;  %v14525_v4 = vsub.s32 1, %v14524_v40 }
 0x83f   : > { %7504 = vmatprep.subr.bf16.mxu1 %v14518_v12 }
 0x840   : > { %v13675_v37 = vrot.slane %v7063_v50, %v14525_v4 }
 0x842   : > { %7505 = vmatpush1.bf16.msra.mxu1 %v10426_v53 }
 0x843   : > { %7506 = vmatprep.subr.bf16.mxu1 %v14518_v12 }
 0x844   : > { %6969 = vmatmul.mubr.bf16.gmra.mrb[244].mxu1 %v4922_v33 }
 0x845   : > { %8693 = vmatprep.mubr.msk.bf16.mxu1 %vm5132_vm4, %v4925_v22 }
 0x846   : > { %7507 = vmatpush1.bf16.msra.mxu1 %v10427_v7 }
 0x847   : > { %7508 = vmatprep.subr.bf16.mxu1 %v14518_v12 }
 0x84a   : > { %7509 = vmatpush1.bf16.msra.mxu1 %v10428_v46 }
 0x84b   : > { %7510 = vmatprep.subr.bf16.mxu1 %v14518_v12 }
 0x84c   : > { %6979 = vmatmul.mubr.bf16.gmra.mrb[248].mxu1 %v4924_v44 }
 0x84d   : > { %8694 = vmatprep.mubr.msk.bf16.mxu1 %vm5132_vm4, %v4927_v35 }
 0x84e   : > { %7511 = vmatpush1.bf16.msra.mxu1 %v10429_v54 }
 0x84f   : > { %7512 = vmatprep.subr.bf16.mxu1 %v14518_v12 }
 0x852   : > { %7513 = vmatpush1.bf16.msra.mxu1 %v7494_v2 }
 0x853   : > { %7607 = vmatprep.subr.bf16.mxu1 %v14518_v12 }
 0x854   : > { %6989 = vmatmul.mubr.bf16.gmra.mrb[252].mxu1 %v4926_v8 }
 0x8af   : > { %v6840_v15 = vpop.f32.mrb[192].mxu1 }
 0x8b0   : > { %v6842_v36 = vpop.f32.mrb[193].mxu1  ;;  %v7075_v28 = vadd.f32 %v13670_v25, %v6840_v15 }
 0x8b1   : > { %v6844_v62 = vpop.f32.mrb[194].mxu1  ;;  %v7076_v31 = vadd.f32 %v13675_v37, %v6842_v36 }
 0x8b2   : > { %v6846_v43 = vpop.f32.mrb[195].mxu1  ;;  %v7077_v52 = vadd.f32 %v13670_v25, %v6844_v62 }
 0x8b3   : > { %v7078_v47 = vadd.f32 %v13675_v37, %v6846_v43 }
 0x8b7   : > { %v6850_v51 = vpop.f32.mrb[196].mxu1 }
 0x8b8   : > { %v6852_v1 = vpop.f32.mrb[197].mxu1  ;;  %v7079_v16 = vadd.f32 %v13670_v25, %v6850_v51 }
 0x8b9   : > { %v6854_v39 = vpop.f32.mrb[198].mxu1  ;;  %v7080_v22 = vadd.f32 %v13675_v37, %v6852_v1 }
 0x8ba   : > { %v6856_v3 = vpop.f32.mrb[199].mxu1  ;;  %v7081_v63 = vadd.f32 %v13670_v25, %v6854_v39 }
 0x8bb   : > { %v7082_v34 = vadd.f32 %v13675_v37, %v6856_v3 }
 0x8bf   : > { %v6860_v30 = vpop.f32.mrb[200].mxu1 }
 0x8c0   : > { %v7083_v33 = vadd.f32 %v13670_v25, %v6860_v30  ;;  %v6862_v10 = vpop.f32.mrb[201].mxu1 }
 0x8c1   : > { %v7084_v13 = vadd.f32 %v13675_v37, %v6862_v10  ;;  %v6864_v58 = vpop.f32.mrb[202].mxu1 }
 0x8c2   : > { %v13682_v38 = vmax.f32 %v7075_v28, %v7083_v33  ;;  %v7085_v0 = vadd.f32 %v13670_v25, %v6864_v58  ;;  %v6866_v49 = vpop.f32.mrb[203].mxu1 }
 0x8c3   : > { %v13686_v27 = vmax.f32 %v7076_v31, %v7084_v13  ;;  %v7086_v17 = vadd.f32 %v13675_v37, %v6866_v49 }
 0x8c4   : > { %v13689_v41 = vmax.f32 %v7077_v52, %v7085_v0 }
 0x8c5   : > { %v13691_v20 = vmax.f32 %v7078_v47, %v7086_v17 }
 0x8c7   : > { %v6870_v57 = vpop.f32.mrb[204].mxu1 }
 0x8c8   : > { %v7087_v11 = vadd.f32 %v13670_v25, %v6870_v57  ;;  %v6872_v29 = vpop.f32.mrb[205].mxu1 }
 0x8c9   : > { %v7088_v56 = vadd.f32 %v13675_v37, %v6872_v29  ;;  %v6874_v59 = vpop.f32.mrb[206].mxu1 }
 0x8ca   : > { %v13698_v24 = vmax.f32 %v7079_v16, %v7087_v11  ;;  %v7089_v55 = vadd.f32 %v13670_v25, %v6874_v59  ;;  %v6876_v61 = vpop.f32.mrb[207].mxu1 }
 0x8cb   : > { %v13702_v23 = vmax.f32 %v7080_v22, %v7088_v56  ;;  %v7090_v14 = vadd.f32 %v13675_v37, %v6876_v61  ;;  %v10116_v61 = vpack.i.bf16 %v13691_v20, %v13689_v41 }
 0x8cc   : > { %v13705_v21 = vmax.f32 %v7081_v63, %v7089_v55  ;;  %v10111_v63 = vpack.i.bf16 %v13686_v27, %v13682_v38 }
 0x8cd   : > { %v13707_v26 = vmax.f32 %v7082_v34, %v7090_v14  ;;  %v10121_v34 = vpack.i.bf16 %v13702_v23, %v13698_v24 }
 0x8cf   : > { %v6880_v44 = vpop.f32.mrb[208].mxu1 }
 0x8d0   : > { %v6882_v5 = vpop.f32.mrb[209].mxu1  ;;  %v7091_v9 = vadd.f32 %v13670_v25, %v6880_v44  ;;  %v10126_v44 = vpack.i.bf16 %v13707_v26, %v13705_v21 }
 0x8d1   : > { %v6884_v35 = vpop.f32.mrb[210].mxu1  ;;  %v7092_v7 = vadd.f32 %v13675_v37, %v6882_v5 }
 0x8d2   : > { %v6886_v32 = vpop.f32.mrb[211].mxu1  ;;  %v7093_v62 = vadd.f32 %v13670_v25, %v6884_v35 }
 0x8d3   : > { %v7094_v45 = vadd.f32 %v13675_v37, %v6886_v32 }
 0x8d7   : > { %v6890_v19 = vpop.f32.mrb[212].mxu1 }
 0x8d8   : > { %v6892_v6 = vpop.f32.mrb[213].mxu1  ;;  %v7095_v4 = vadd.f32 %v13670_v25, %v6890_v19 }
 0x8d9   : > { %v6894_v8 = vpop.f32.mrb[214].mxu1  ;;  %v7096_v33 = vadd.f32 %v13675_v37, %v6892_v6 }
 0x8da   : > { %v6896_v48 = vpop.f32.mrb[215].mxu1  ;;  %v7097_v13 = vadd.f32 %v13670_v25, %v6894_v8 }
 0x8db   : > { %v7098_v49 = vadd.f32 %v13675_v37, %v6896_v48 }
 0x8df   : > { %v6900_v42 = vpop.f32.mrb[216].mxu1 }
 0x8e0   : > { %v7099_v60 = vadd.f32 %v13670_v25, %v6900_v42  ;;  %v6902_v53 = vpop.f32.mrb[217].mxu1 }
 0x8e1   : > { %v7100_v15 = vadd.f32 %v13675_v37, %v6902_v53  ;;  %v6904_v36 = vpop.f32.mrb[218].mxu1 }
 0x8e2   : > { %v13714_v46 = vmax.f32 %v7091_v9, %v7099_v60  ;;  %v7101_v43 = vadd.f32 %v13670_v25, %v6904_v36  ;;  %v6906_v54 = vpop.f32.mrb[219].mxu1 }
 0x8e3   : > { %v13718_v51 = vmax.f32 %v7092_v7, %v7100_v15  ;;  %v7102_v1 = vadd.f32 %v13675_v37, %v6906_v54 }
 0x8e4   : > { %v13721_v2 = vmax.f32 %v7093_v62, %v7101_v43 }
 0x8e5   : > { %v13723_v50 = vmax.f32 %v7094_v45, %v7102_v1  ;;  %v10091_v39 = vpack.i.bf16 %v13718_v51, %v13714_v46 }
 0x8e7   : > { %v6910_v3 = vpop.f32.mrb[220].mxu1  ;;  %10092 = vrot.lane.b32.xlu0 %v10091_v39, %s10474_s19  ;;  %v10096_v40 = vpack.i.bf16 %v13723_v50, %v13721_v2 }
 0x8e8   : > { %v7103_v30 = vadd.f32 %v13670_v25, %v6910_v3  ;;  %v6912_v28 = vpop.f32.mrb[221].mxu1 }
 0x8e9   : > { %v7104_v10 = vadd.f32 %v13675_v37, %v6912_v28  ;;  %v6914_v31 = vpop.f32.mrb[222].mxu1  ;;  %10097 = vrot.lane.b32.xlu1 %v10096_v40, %s10474_s19 }
 0x8ea   : > { %v13736_v58 = vmax.f32 %v7095_v4, %v7103_v30  ;;  %v7105_v52 = vadd.f32 %v13670_v25, %v6914_v31  ;;  %v6916_v0 = vpop.f32.mrb[223].mxu1 }
 0x8eb   : > { %v13740_v47 = vmax.f32 %v7096_v33, %v7104_v10  ;;  %v7106_v17 = vadd.f32 %v13675_v37, %v6916_v0 }
 0x8ec   : > { %v13743_v57 = vmax.f32 %v7097_v13, %v7105_v52 }
 0x8ed   : > { %v13745_v16 = vmax.f32 %v7098_v49, %v7106_v17  ;;  %v10101_v11 = vpack.i.bf16 %v13740_v47, %v13736_v58 }
 0x8ef   : > { %v6920_v29 = vpop.f32.mrb[224].mxu1  ;;  %10102 = vrot.lane.b32.xlu0 %v10101_v11, %s10474_s19  ;;  %v10106_v22 = vpack.i.bf16 %v13745_v16, %v13743_v57 }
 0x8f0   : > { %v6922_v56 = vpop.f32.mrb[225].mxu1  ;;  %v7107_v6 = vadd.f32 %v13670_v25, %v6920_v29 }
 0x8f1   : > { %v6924_v59 = vpop.f32.mrb[226].mxu1  ;;  %10107 = vrot.lane.b32.xlu1 %v10106_v22, %s10474_s19  ;;  %v7108_v42 = vadd.f32 %v13675_v37, %v6922_v56 }
 0x8f2   : > { %v6926_v55 = vpop.f32.mrb[227].mxu1  ;;  %v7109_v53 = vadd.f32 %v13670_v25, %v6924_v59 }
 0x8f3   : > { %10112 = vrot.lane.b32.xlu0 %v10111_v63, %s10474_s19  ;;  %v7110_v62 = vadd.f32 %v13675_v37, %v6926_v55 }
 0x8f5   : > { %10117 = vrot.lane.b32.xlu1 %v10116_v61, %s10474_s19 }
 0x8f7   : > { %v6930_v14 = vpop.f32.mrb[228].mxu1  ;;  %10122 = vrot.lane.b32.xlu0 %v10121_v34, %s10474_s19 }
 0x8f8   : > { %v6932_v5 = vpop.f32.mrb[229].mxu1  ;;  %v7111_v4 = vadd.f32 %v13670_v25, %v6930_v14 }
 0x8f9   : > { %v6934_v35 = vpop.f32.mrb[230].mxu1  ;;  %10127 = vrot.lane.b32.xlu1 %v10126_v44, %s10474_s19  ;;  %v7112_v33 = vadd.f32 %v13675_v37, %v6932_v5 }
 0x8fa   : > { %v6936_v32 = vpop.f32.mrb[231].mxu1  ;;  %v7113_v13 = vadd.f32 %v13670_v25, %v6934_v35 }
 0x8fb   : > { %v7114_v17 = vadd.f32 %v13675_v37, %v6936_v32 }
 0x8ff   : > { %v6940_v19 = vpop.f32.mrb[232].mxu1 }
 0x900   : > { %v7115_v8 = vadd.f32 %v13670_v25, %v6940_v19  ;;  %v6942_v48 = vpop.f32.mrb[233].mxu1 }
 0x901   : > { %v7116_v9 = vadd.f32 %v13675_v37, %v6942_v48  ;;  %v6944_v60 = vpop.f32.mrb[234].mxu1 }
 0x902   : > { %v13770_v7 = vmax.f32 %v7107_v6, %v7115_v8  ;;  %v7117_v15 = vadd.f32 %v13670_v25, %v6944_v60  ;;  %v6946_v36 = vpop.f32.mrb[235].mxu1 }
 0x903   : > { %v13774_v43 = vmax.f32 %v7108_v42, %v7116_v9  ;;  %v7118_v54 = vadd.f32 %v13675_v37, %v6946_v36 }
 0x904   : > { %v13777_v45 = vmax.f32 %v7109_v53, %v7117_v15 }
 0x905   : > { %v13779_v1 = vmax.f32 %v7110_v62, %v7118_v54  ;;  %v10131_v39 = vpack.i.bf16 %v13774_v43, %v13770_v7 }
 0x907   : > { %v6950_v3 = vpop.f32.mrb[236].mxu1  ;;  %10132 = vrot.lane.b32.xlu0 %v10131_v39, %s10474_s19  ;;  %v10136_v40 = vpack.i.bf16 %v13779_v1, %v13777_v45 }
 0x908   : > { %v7119_v30 = vadd.f32 %v13670_v25, %v6950_v3  ;;  %v6952_v28 = vpop.f32.mrb[237].mxu1 }
 0x909   : > { %v7120_v10 = vadd.f32 %v13675_v37, %v6952_v28  ;;  %v6954_v31 = vpop.f32.mrb[238].mxu1  ;;  %10137 = vrot.lane.b32.xlu1 %v10136_v40, %s10474_s19 }
 0x90a   : > { %v13792_v52 = vmax.f32 %v7111_v4, %v7119_v30  ;;  %v7121_v0 = vadd.f32 %v13670_v25, %v6954_v31  ;;  %v6956_v49 = vpop.f32.mrb[239].mxu1 }
 0x90b   : > { %v13796_v11 = vmax.f32 %v7112_v33, %v7120_v10  ;;  %v7122_v29 = vadd.f32 %v13675_v37, %v6956_v49 }
 0x90c   : > { %v13799_v22 = vmax.f32 %v7113_v13, %v7121_v0 }
 0x90d   : > { %v13801_v56 = vmax.f32 %v7114_v17, %v7122_v29  ;;  %v10141_v59 = vpack.i.bf16 %v13796_v11, %v13792_v52 }
 0x90f   : > { %v6960_v63 = vpop.f32.mrb[240].mxu1  ;;  %10142 = vrot.lane.b32.xlu0 %v10141_v59, %s10474_s19  ;;  %v10146_v55 = vpack.i.bf16 %v13801_v56, %v13799_v22 }
 0x910   : > { %v6962_v61 = vpop.f32.mrb[241].mxu1  ;;  %v7123_v6 = vadd.f32 %v13670_v25, %v6960_v63 }
 0x911   : > { %v6964_v34 = vpop.f32.mrb[242].mxu1  ;;  %10147 = vrot.lane.b32.xlu1 %v10146_v55, %s10474_s19  ;;  %v7124_v42 = vadd.f32 %v13675_v37, %v6962_v61 }
 0x912   : > { %v6966_v14 = vpop.f32.mrb[243].mxu1  ;;  %v7125_v53 = vadd.f32 %v13670_v25, %v6964_v34 }
 0x913   : > { %v7126_v54 = vadd.f32 %v13675_v37, %v6966_v14 }
 0x917   : > { %v6970_v44 = vpop.f32.mrb[244].mxu1 }
 0x918   : > { %v6972_v5 = vpop.f32.mrb[245].mxu1  ;;  %v7127_v10 = vadd.f32 %v13670_v25, %v6970_v44 }
 0x919   : > { %v6974_v35 = vpop.f32.mrb[246].mxu1  ;;  %v7128_v0 = vadd.f32 %v13675_v37, %v6972_v5 }
 0x91a   : > { %v6976_v32 = vpop.f32.mrb[247].mxu1  ;;  %v7129_v29 = vadd.f32 %v13670_v25, %v6974_v35 }
 0x91b   : > { %v7130_v61 = vadd.f32 %v13675_v37, %v6976_v32 }
 0x91f   : > { %v6980_v19 = vpop.f32.mrb[248].mxu1 }
 0x920   : > { %v7131_v8 = vadd.f32 %v13670_v25, %v6980_v19  ;;  %v6982_v48 = vpop.f32.mrb[249].mxu1 }
 0x921   : > { %v7132_v9 = vadd.f32 %v13675_v37, %v6982_v48  ;;  %v6984_v60 = vpop.f32.mrb[250].mxu1 }
 0x922   : > { %v13814_v15 = vmax.f32 %v7123_v6, %v7131_v8  ;;  %v7133_v36 = vadd.f32 %v13670_v25, %v6984_v60  ;;  %v6986_v62 = vpop.f32.mrb[251].mxu1 }
 0x923   : > { %v13818_v39 = vmax.f32 %v7124_v42, %v7132_v9  ;;  %v7134_v3 = vadd.f32 %v13675_v37, %v6986_v62 }
 0x924   : > { %v13821_v40 = vmax.f32 %v7125_v53, %v7133_v36 }
 0x925   : > { %v13823_v4 = vmax.f32 %v7126_v54, %v7134_v3  ;;  %v10151_v30 = vpack.i.bf16 %v13818_v39, %v13814_v15 }
 0x927   : > { %10152 = vrot.lane.b32.xlu0 %v10151_v30, %s10474_s19  ;;  %v6990_v28 = vpop.f32.mrb[252].mxu1  ;;  %v10156_v33 = vpack.i.bf16 %v13823_v4, %v13821_v40 }
 0x928   : > { %v7135_v31 = vadd.f32 %v13670_v25, %v6990_v28  ;;  %v6992_v13 = vpop.f32.mrb[253].mxu1 }
 0x929   : > { %v7136_v49 = vadd.f32 %v13675_v37, %v6992_v13  ;;  %10157 = vrot.lane.b32.xlu1 %v10156_v33, %s10474_s19  ;;  %v6994_v17 = vpop.f32.mrb[254].mxu1  ;;  %v10431_v13 = vld [vmem:[%s14041_s5] sm:$0xff]  }
 0x92a   : > { %v13836_v59 = vmax.f32 %v7127_v10, %v7135_v31  ;;  %v7137_v63 = vadd.f32 %v13670_v25, %v6994_v17  ;;  %v6996_v55 = vpop.f32.mrb[255].mxu1 }
 0x92b   : > { %v13840_v34 = vmax.f32 %v7128_v0, %v7136_v49  ;;  %v7138_v14 = vadd.f32 %v13675_v37, %v6996_v55 }
 0x92c   : > { %v13843_v44 = vmax.f32 %v7129_v29, %v7137_v63 }
 0x92d   : > { %v13845_v5 = vmax.f32 %v7130_v61, %v7138_v14  ;;  %v10161_v19 = vpack.i.bf16 %v13840_v34, %v13836_v59 }
 0x92f   : > { %10162 = vrot.lane.b32.xlu0 %v10161_v19, %s10474_s19  ;;  %v10166_v35 = vpack.i.bf16 %v13845_v5, %v13843_v44 }
 0x931   : > { %10167 = vrot.lane.b32.xlu1 %v10166_v35, %s10474_s19 }
 0x959   : > { %v10093_v25 = vpop.permute.xlu0 %10092 }
 0x95a   : > { %v10095_v32 = vunpack.i.h.bf16 %v10093_v25  ;;  %v10094_v6 = vunpack.i.l.bf16 %v10093_v25 }
 0x95b   : > { %v10098_v8 = vpop.permute.xlu1 %10097 }
 0x95c   : > { %v7325_v37 = vmax.f32 %v13718_v51, %v10095_v32  ;;  %v7272_v48 = vsel %vm7267_vm5, %v10094_v6, %v10095_v32  ;;  %v10100_v42 = vunpack.i.h.bf16 %v10098_v8  ;;  %v10099_v9 = vunpack.i.l.bf16 %v10098_v8 }
 0x95d   : > { %v7324_v60 = vmax.f32 %v13714_v46, %v7272_v48 }
 0x95e   : > { %v7327_v53 = vmax.f32 %v13723_v50, %v10100_v42  ;;  %v7273_v36 = vsel %vm7267_vm5, %v10099_v9, %v10100_v42  ;;  %v7357_v54 = vmax.f32 %v7325_v37, 0.0  ;;  %v10433_v42 = vld [vmem:[%s14041_s5 + $0x10] sm:$0xff]  }
 0x95f   : > { %v7326_v62 = vmax.f32 %v13721_v2, %v7273_v36  ;;  %v7356_v30 = vmax.f32 %v7324_v60, 0.0  ;;  %v10436_v36 = vld [vmem:[%s14041_s5 + $0x28] sm:$0xff]  }
 0x960   : > { %v7359_v3 = vmax.f32 %v7327_v53, 0.0  ;;  %v10434_v53 = vld [vmem:[%s14041_s5 + $0x18] sm:$0xff]  }
 0x961   : > { %v7358_v28 = vmax.f32 %v7326_v62, 0.0  ;;  %v10103_v33 = vpop.permute.xlu0 %10102 }
 0x962   : > { %v7385_v10 = vpack.c.bf16 %v7359_v3, %v7357_v54  ;;  %v10105_v51 = vunpack.i.h.bf16 %v10103_v33  ;;  %v10104_v31 = vunpack.i.l.bf16 %v10103_v33 }
 0x963   : > { %v7384_v46 = vpack.c.bf16 %v7358_v28, %v7356_v30  ;;  %v10108_v0 = vpop.permute.xlu1 %10107  ;;  %v10437_v30 = vld [vmem:[%s14041_s5 + $0x30] sm:$0xff]  }
 0x964   : > { %v7329_v50 = vmax.f32 %v13740_v47, %v10105_v51  ;;  %v7274_v49 = vsel %vm7267_vm5, %v10104_v31, %v10105_v51  ;;  %v10110_v2 = vunpack.i.h.bf16 %v10108_v0  ;;  %v10109_v17 = vunpack.i.l.bf16 %v10108_v0  ;;  %8722 = vmatprep.mubr.msk.bf16.mxu1 %vm7486_vm6, %v7385_v10  ;;  %v10432_v47 = vld [vmem:[%s14041_s5 + $0x8] sm:$0xff]   ;;  %v10439_v0 = vld [vmem:[%s14041_s5 + $0x40] sm:$0x3f]  }
 0x965   : > { %v7328_v29 = vmax.f32 %v13736_v58, %v7274_v49  ;;  %v10113_v63 = vpop.permute.xlu0 %10112  ;;  %7529 = vmatmul.mubr.bf16.vlgmr.msra.gmra.mrb[0].mxu1 %v7384_v46 }
 0x966   : > { %v7331_v55 = vmax.f32 %v13745_v16, %v10110_v2  ;;  %v7275_v61 = vsel %vm7267_vm5, %v10109_v17, %v10110_v2  ;;  %v10115_v14 = vunpack.i.h.bf16 %v10113_v63  ;;  %7608 = vmatpush1.bf16.msra.mxu1 %v10431_v13  ;;  %v7361_v25 = vmax.f32 %v7329_v50, 0.0  ;;  %v10438_v13 = vld [vmem:[%s14041_s5 + $0x38] sm:$0xff]  }
 0x967   : > { %v7330_v19 = vmax.f32 %v13743_v57, %v7275_v61  ;;  %v10118_v35 = vpop.permute.xlu1 %10117  ;;  %7609 = vmatprep.subr.bf16.mxu1 %v14518_v12  ;;  %v7360_v8 = vmax.f32 %v7328_v29, 0.0  ;;  %v10114_v3 = vunpack.i.l.bf16 %v10113_v63 }
 0x968   : > { %v7363_v32 = vmax.f32 %v7331_v55, 0.0  ;;  %v7317_v58 = vmax.f32 %v13686_v27, %v10115_v14  ;;  %v10120_v6 = vunpack.i.h.bf16 %v10118_v35  ;;  %v10119_v62 = vunpack.i.l.bf16 %v10118_v35 }
 0x969   : > { %v7362_v16 = vmax.f32 %v7330_v19, 0.0  ;;  %v10123_v28 = vpop.permute.xlu0 %10122  ;;  %v7268_v51 = vsel %vm7267_vm5, %v10114_v3, %v10115_v14 }
 0x96a   : > { %v7387_v37 = vpack.c.bf16 %v7363_v32, %v7361_v25  ;;  %v7319_v48 = vmax.f32 %v13691_v20, %v10120_v6  ;;  %7610 = vmatpush1.bf16.msra.mxu1 %v10432_v47  ;;  %v7349_v57 = vmax.f32 %v7317_v58, 0.0  ;;  %v10435_v20 = vld [vmem:[%s14041_s5 + $0x20] sm:$0xff]   ;;  %v7269_v33 = vsel %vm7267_vm5, %v10119_v62, %v10120_v6 }
 0x96b   : > { %v7386_v9 = vpack.c.bf16 %v7362_v16, %v7360_v8  ;;  %7611 = vmatprep.subr.bf16.mxu1 %v14518_v12  ;;  %v10128_v54 = vpop.permute.xlu1 %10127  ;;  %v10125_v31 = vunpack.i.h.bf16 %v10123_v28  ;;  %v7318_v46 = vmax.f32 %v13689_v41, %v7269_v33  ;;  %v7316_v2 = vmax.f32 %v13682_v38, %v7268_v51  ;;  %v10447_v51 = vld [vmem:[%s14041_s5 + $0xc8] sm:$0xff]  }
 0x96c   : > { %v7351_v60 = vmax.f32 %v7319_v48, 0.0  ;;  %8723 = vmatprep.mubr.msk.bf16.mxu1 %vm7486_vm6, %v7387_v37  ;;  %v10130_v10 = vunpack.i.h.bf16 %v10128_v54  ;;  %v10129_v49 = vunpack.i.l.bf16 %v10128_v54  ;;  %v10124_v63 = vunpack.i.l.bf16 %v10123_v28  ;;  %v10441_v48 = vld [vmem:[%s14041_s5 + $0x98] sm:$0xff]   ;;  %v10446_v54 = vld [vmem:[%s14041_s5 + $0xc0] sm:$0xff]  }
 0x96d   : > { %7537 = vmatmul.mubr.bf16.gmra.mrb[4].mxu1 %v7386_v9  ;;  %v7321_v29 = vmax.f32 %v13702_v23, %v10125_v31  ;;  %v7350_v55 = vmax.f32 %v7318_v46, 0.0  ;;  %v7605_v41 = vsel %vm672_vm0, %v10439_v0, 0  ;;  %v7348_v35 = vmax.f32 %v7316_v2, 0.0  ;;  %v10440_v23 = vld [vmem:[%s14041_s5 + $0x90] sm:$0xff]  }
 0x96e   : > { %v7381_v27 = vpack.c.bf16 %v7351_v60, %v7349_v57  ;;  %7612 = vmatpush1.bf16.msra.mxu1 %v10433_v42  ;;  %v7323_v50 = vmax.f32 %v13707_v26, %v10130_v10  ;;  %v7271_v47 = vsel %vm7267_vm5, %v10129_v49, %v10130_v10  ;;  %v7270_v25 = vsel %vm7267_vm5, %v10124_v63, %v10125_v31  ;;  %v10443_v60 = vld [vmem:[%s14041_s5 + $0xa8] sm:$0xff]  }
 0x96f   : > { %7613 = vmatprep.subr.bf16.mxu1 %v14518_v12  ;;  %v7353_v26 = vmax.f32 %v7321_v29, 0.0  ;;  %v7380_v32 = vpack.c.bf16 %v7350_v55, %v7348_v35  ;;  %v7322_v58 = vmax.f32 %v13705_v21, %v7271_v47  ;;  %v7320_v16 = vmax.f32 %v13698_v24, %v7270_v25  ;;  %v10442_v24 = vld [vmem:[%s14041_s5 + $0xa0] sm:$0xff]  }
 0x970   : > { %8733 = vmatprep.mubr.msk.bf16.mxu1 %vm7486_vm6, %v7381_v27  ;;  %v7355_v14 = vmax.f32 %v7323_v50, 0.0  ;;  %v10444_v27 = vld [vmem:[%s14041_s5 + $0xb0] sm:$0xff]  }
 0x971   : > { %v7354_v42 = vmax.f32 %v7322_v58, 0.0  ;;  %v7352_v9 = vmax.f32 %v7320_v16, 0.0  ;;  %v10452_v16 = vld [vmem:[%s14041_s5 + $0xf0] sm:$0xff]  }
 0x972   : > { %7614 = vmatpush1.bf16.msra.mxu1 %v10434_v53  ;;  %v7383_v6 = vpack.c.bf16 %v7355_v14, %v7353_v26  ;;  %v10445_v53 = vld [vmem:[%s14041_s5 + $0xb8] sm:$0xff]  }
 0x973   : > { %7615 = vmatprep.subr.bf16.mxu1 %v14518_v12 }
 0x976   : > { %7616 = vmatpush1.bf16.msra.mxu1 %v10435_v20 }
 0x977   : > { %7617 = vmatprep.subr.bf16.mxu1 %v14518_v12 }
 0x979   : > { %v10133_v61 = vpop.permute.xlu0 %10132 }
 0x97a   : > { %7618 = vmatpush1.bf16.msra.mxu1 %v10436_v36  ;;  %v10135_v38 = vunpack.i.h.bf16 %v10133_v61  ;;  %v10134_v62 = vunpack.i.l.bf16 %v10133_v61 }
 0x97b   : > { %7619 = vmatprep.subr.bf16.mxu1 %v14518_v12  ;;  %v10138_v17 = vpop.permute.xlu1 %10137 }
 0x97c   : > { %v10140_v19 = vunpack.i.h.bf16 %v10138_v17  ;;  %v7333_v37 = vmax.f32 %v13774_v43, %v10135_v38  ;;  %v10139_v20 = vunpack.i.l.bf16 %v10138_v17  ;;  %v7276_v33 = vsel %vm7267_vm5, %v10134_v62, %v10135_v38 }
 0x97d   : > { %v7332_v50 = vmax.f32 %v13770_v7, %v7276_v33 }
 0x97e   : > { %7620 = vmatpush1.bf16.msra.mxu1 %v10437_v30  ;;  %v7335_v8 = vmax.f32 %v13779_v1, %v10140_v19  ;;  %v7365_v57 = vmax.f32 %v7333_v37, 0.0  ;;  %v7382_v1 = vpack.c.bf16 %v7354_v42, %v7352_v9  ;;  %v7277_v30 = vsel %vm7267_vm5, %v10139_v20, %v10140_v19  ;;  %v10453_v37 = vld [vmem:[%s14041_s5 + $0xf8] sm:$0xff]  }
 0x97f   : > { %7621 = vmatprep.subr.bf16.mxu1 %v14518_v12  ;;  %v7334_v31 = vmax.f32 %v13777_v45, %v7277_v30  ;;  %v7364_v14 = vmax.f32 %v7332_v50, 0.0 }
 0x980   : > { %v7367_v21 = vmax.f32 %v7335_v8, 0.0 }
 0x981   : > { %v10143_v3 = vpop.permute.xlu0 %10142  ;;  %v7366_v29 = vmax.f32 %v7334_v31, 0.0 }
 0x982   : > { %7622 = vmatpush1.bf16.msra.mxu1 %v10438_v13  ;;  %v7389_v43 = vpack.c.bf16 %v7367_v21, %v7365_v57  ;;  %v10145_v10 = vunpack.i.h.bf16 %v10143_v3  ;;  %v10448_v13 = vld [vmem:[%s14041_s5 + $0xd0] sm:$0x3f]   ;;  %v10144_v17 = vunpack.i.l.bf16 %v10143_v3  ;;  %v10455_v57 = vld [vmem:[%s14041_s5 + $0x108] sm:$0xff]  }
 0x983   : > { %7623 = vmatprep.subr.bf16.mxu1 %v14518_v12  ;;  %v10148_v36 = vpop.permute.xlu1 %10147  ;;  %v7735_v45 = vsel %vm672_vm0, %v10448_v13, 0  ;;  %v7388_v19 = vpack.c.bf16 %v7366_v29, %v7364_v14 }
 0x984   : > { %v10150_v28 = vunpack.i.h.bf16 %v10148_v36  ;;  %v10149_v0 = vunpack.i.l.bf16 %v10148_v36  ;;  %v7337_v2 = vmax.f32 %v13796_v11, %v10145_v10  ;;  %v7278_v47 = vsel %vm7267_vm5, %v10144_v17, %v10145_v10  ;;  %v10449_v11 = vld [vmem:[%s14041_s5 + $0xd8] sm:$0xff]  }
 0x985   : > { %v7336_v38 = vmax.f32 %v13792_v52, %v7278_v47  ;;  %v10451_v52 = vld [vmem:[%s14041_s5 + $0xe8] sm:$0xff]   ;;  %v10457_v36 = vld [vmem:[%s14041_s5 + $0x118] sm:$0x3f]  }
 0x986   : > { %7624 = vmatpush1.bf16.msra.mxu1 %v7605_v41  ;;  %v7339_v46 = vmax.f32 %v13801_v56, %v10150_v28  ;;  %v7279_v61 = vsel %vm7267_vm5, %v10149_v0, %v10150_v28  ;;  %v7369_v56 = vmax.f32 %v7337_v2, 0.0  ;;  %v10475_v2 = vmov 0.0  }
 0x987   : > { %7737 = vmatprep.subr.bf16.mxu1 %v14518_v12  ;;  %v7338_v35 = vmax.f32 %v13799_v22, %v7279_v61 }
 0x988   : > { %v7371_v55 = vmax.f32 %v7339_v46, 0.0 }
 0x989   : > { %7640 = vmatmul.mubr.bf16.vlgmr.msra.gmra.mrb[8].mxu1 %v7380_v32  ;;  %v10450_v32 = vld [vmem:[%s14041_s5 + $0xe0] sm:$0xff]   ;;  %v7370_v58 = vmax.f32 %v7338_v35, 0.0 }
 0x98a   : > { %8734 = vmatprep.mubr.msk.bf16.mxu1 %vm7486_vm6, %v7383_v6  ;;  %7738 = vmatpush1.bf16.msra.mxu1 %v10440_v23  ;;  %v7391_v26 = vpack.c.bf16 %v7371_v55, %v7369_v56  ;;  %v7368_v6 = vmax.f32 %v7336_v38, 0.0  ;;  %v7942_v55 = vld [vmem:[#allocation2] sm:$0x1] }
 0x98b   : > { %7739 = vmatprep.subr.bf16.mxu1 %v14518_v12  ;;  %7945 = vperm.xlu0 %10171, %v7942_v55  }
 0x98e   : > { %7740 = vmatpush1.bf16.msra.mxu1 %v10441_v48  ;;  %v10454_v48 = vld [vmem:[%s14041_s5 + $0x100] sm:$0xff]  }
 0x98f   : > { %7741 = vmatprep.subr.bf16.mxu1 %v14518_v12 }
 0x991   : > { %7648 = vmatmul.mubr.bf16.gmra.mrb[12].mxu1 %v7382_v1 }
 0x992   : > { %7742 = vmatpush1.bf16.msra.mxu1 %v10442_v24  ;;  %8762 = vmatprep.mubr.msk.bf16.mxu1 %vm7486_vm6, %v7389_v43 }
 0x993   : > { %7743 = vmatprep.subr.bf16.mxu1 %v14518_v12 }
 0x996   : > { %7744 = vmatpush1.bf16.msra.mxu1 %v10443_v60 }
 0x997   : > { %7745 = vmatprep.subr.bf16.mxu1 %v14518_v12 }
 0x999   : > { %v10153_v63 = vpop.permute.xlu0 %10152 }
 0x99a   : > { %7746 = vmatpush1.bf16.msra.mxu1 %v10444_v27  ;;  %v10155_v7 = vunpack.i.h.bf16 %v10153_v63  ;;  %v10154_v9 = vunpack.i.l.bf16 %v10153_v63 }
 0x99b   : > { %7747 = vmatprep.subr.bf16.mxu1 %v14518_v12  ;;  %v10158_v49 = vpop.permute.xlu1 %10157 }
 0x99c   : > { %v10160_v41 = vunpack.i.h.bf16 %v10158_v49  ;;  %v7341_v23 = vmax.f32 %v13818_v39, %v10155_v7  ;;  %v10159_v42 = vunpack.i.l.bf16 %v10158_v49  ;;  %v7280_v60 = vsel %vm7267_vm5, %v10154_v9, %v10155_v7 }
 0x99d   : > { %v7340_v3 = vmax.f32 %v13814_v15, %v7280_v60 }
 0x99e   : > { %7748 = vmatpush1.bf16.msra.mxu1 %v10445_v53  ;;  %v7343_v25 = vmax.f32 %v13823_v4, %v10160_v41  ;;  %v7373_v8 = vmax.f32 %v7341_v23, 0.0  ;;  %v7390_v4 = vpack.c.bf16 %v7370_v58, %v7368_v6  ;;  %v7281_v1 = vsel %vm7267_vm5, %v10159_v42, %v10160_v41  ;;  %v10456_v53 = vld [vmem:[%s14041_s5 + $0x110] sm:$0xff]  }
 0x99f   : > { %7749 = vmatprep.subr.bf16.mxu1 %v14518_v12  ;;  %v7342_v20 = vmax.f32 %v13821_v40, %v7281_v1  ;;  %v7869_v40 = vsel %vm672_vm0, %v10457_v36, 0  ;;  %v7372_v31 = vmax.f32 %v7340_v3, 0.0 }
 0x9a0   : > { %v7375_v22 = vmax.f32 %v7343_v25, 0.0 }
 0x9a1   : > { %v10163_v24 = vpop.permute.xlu0 %10162  ;;  %v7374_v33 = vmax.f32 %v7342_v20, 0.0 }
 0x9a2   : > { %7750 = vmatpush1.bf16.msra.mxu1 %v10446_v54  ;;  %v7393_v39 = vpack.c.bf16 %v7375_v22, %v7373_v8  ;;  %v10165_v27 = vunpack.i.h.bf16 %v10163_v24  ;;  %v10164_v28 = vunpack.i.l.bf16 %v10163_v24 }
 0x9a3   : > { %7751 = vmatprep.subr.bf16.mxu1 %v14518_v12  ;;  %v10168_v21 = vpop.permute.xlu1 %10167 }
 0x9a4   : > { %v10170_v43 = vunpack.i.h.bf16 %v10168_v21  ;;  %v10169_v54 = vunpack.i.l.bf16 %v10168_v21  ;;  %v7345_v30 = vmax.f32 %v13840_v34, %v10165_v27  ;;  %v7282_v46 = vsel %vm7267_vm5, %v10164_v28, %v10165_v27 }
 0x9a5   : > { %v7344_v34 = vmax.f32 %v13836_v59, %v7282_v46 }
 0x9a6   : > { %7752 = vmatpush1.bf16.msra.mxu1 %v10447_v51  ;;  %v7347_v62 = vmax.f32 %v13845_v5, %v10170_v43  ;;  %v7283_v51 = vsel %vm7267_vm5, %v10169_v54, %v10170_v43  ;;  %v7377_v13 = vmax.f32 %v7345_v30, 0.0  ;;  %v7392_v5 = vpack.c.bf16 %v7374_v33, %v7372_v31 }
 0x9a7   : > { %7753 = vmatprep.subr.bf16.mxu1 %v14518_v12  ;;  %v7346_v15 = vmax.f32 %v13843_v44, %v7283_v51  ;;  %v7376_v50 = vmax.f32 %v7344_v34, 0.0  ;;  %v7939_v34 = vld [vmem:[%s14043_s7] sm:$0x1] }
 0x9a8   : > { %v7379_v10 = vmax.f32 %v7347_v62, 0.0 }
 0x9aa   : > { %7754 = vmatpush1.bf16.msra.mxu1 %v7735_v45  ;;  %v7395_v0 = vpack.c.bf16 %v7379_v10, %v7377_v13 }
 0x9ab   : > { %7871 = vmatprep.subr.bf16.mxu1 %v14518_v12 }
 0x9ad   : > { %7770 = vmatmul.mubr.bf16.vlgmr.msra.gmra.mrb[16].mxu1 %v7388_v19 }
 0x9ae   : > { %8763 = vmatprep.mubr.msk.bf16.mxu1 %vm7486_vm6, %v7391_v26  ;;  %7872 = vmatpush1.bf16.msra.mxu1 %v10449_v11 }
 0x9af   : > { %7873 = vmatprep.subr.bf16.mxu1 %v14518_v12 }
 0x9b2   : > { %7874 = vmatpush1.bf16.msra.mxu1 %v10450_v32 }
 0x9b3   : > { %7875 = vmatprep.subr.bf16.mxu1 %v14518_v12 }
 0x9b5   : > { %7778 = vmatmul.mubr.bf16.gmra.mrb[20].mxu1 %v7390_v4 }
 0x9b6   : > { %7876 = vmatpush1.bf16.msra.mxu1 %v10451_v52  ;;  %8791 = vmatprep.mubr.msk.bf16.mxu1 %vm7486_vm6, %v7393_v39 }
 0x9b7   : > { %7877 = vmatprep.subr.bf16.mxu1 %v14518_v12 }
 0x9ba   : > { %7878 = vmatpush1.bf16.msra.mxu1 %v10452_v16 }
 0x9bb   : > { %7879 = vmatprep.subr.bf16.mxu1 %v14518_v12 }
 0x9be   : > { %7880 = vmatpush1.bf16.msra.mxu1 %v10453_v37 }
 0x9bf   : > { %7881 = vmatprep.subr.bf16.mxu1 %v14518_v12 }
 0x9c2   : > { %7882 = vmatpush1.bf16.msra.mxu1 %v10454_v48 }
 0x9c3   : > { %7883 = vmatprep.subr.bf16.mxu1 %v14518_v12 }
 0x9c6   : > { %7884 = vmatpush1.bf16.msra.mxu1 %v10455_v57  ;;  %v8793_v57 = vld [vmem:[%s14042_s6] ss:$0 sm:$0xff] }
 0x9c7   : > { %7885 = vmatprep.subr.bf16.mxu1 %v14518_v12 }
 0x9ca   : > { %7886 = vmatpush1.bf16.msra.mxu1 %v10456_v53 }
 0x9cb   : > { %7887 = vmatprep.subr.bf16.mxu1 %v14518_v12  ;;  %v7378_v12 = vmax.f32 %v7346_v15, 0.0 }
 0x9cd   : > { %v7394_v49 = vpack.c.bf16 %v7378_v12, %v7376_v50 }
 0x9ce   : > { %7888 = vmatpush1.bf16.msra.mxu1 %v7869_v40 }
 0x9cf   : > { %8801 = vmatprep.subr.bf16.mxu1 %v10475_v2 }
 0x9d1   : > { %7904 = vmatmul.mubr.bf16.vlgmr.msra.gmra.mrb[24].mxu1 %v7392_v5 }
 0x9d2   : > { %8792 = vmatprep.mubr.msk.bf16.mxu1 %vm7486_vm6, %v7395_v0 }
 0x9d9   : > { %7912 = vmatmul.mubr.bf16.gmra.mrb[28].mxu1 %v7394_v49 }
 0x9da   : > { %8805 = vmatprep.mubr.msk.bf16.mxu1 %vm10476_vm7, %v10475_v2 }
 0xa0a   : > { %v7946_v12 = vpop.permute.xlu0 %7945 }
 0xa0b   : > { %v7951_v50 = vrot.slane %v7946_v12, %v14523_v18 }
 0xa38   : > { %v7530_v17 = vpop.f32.mrb[0].mxu1 }
 0xa39   : > { %v7532_v29 = vpop.f32.mrb[1].mxu1 }
 0xa3a   : > { %v7533_v63 = vpop.f32.mrb[2].mxu1 }
 0xa3b   : > { %v7535_v45 = vpop.f32.mrb[3].mxu1 }
 0xa40   : > { %v7538_v44 = vpop.f32.mrb[4].mxu1 }
 0xa41   : > { %v7540_v61 = vpop.f32.mrb[5].mxu1 }
 0xa42   : > { %v7541_v59 = vpop.f32.mrb[6].mxu1 }
 0xa43   : > { %v7543_v41 = vpop.f32.mrb[7].mxu1 }
 0xa5c   : > { %v7641_v14 = vpop.f32.mrb[8].mxu1 }
 0xa5d   : > { %v7642_v56 = vadd.f32 %v7641_v14, %v7530_v17  ;;  %v7643_v47 = vpop.f32.mrb[9].mxu1 }
 0xa5e   : > { %v7644_v7 = vpop.f32.mrb[10].mxu1 }
 0xa5f   : > { %v7645_v11 = vadd.f32 %v7644_v7, %v7533_v63  ;;  %v7646_v19 = vpop.f32.mrb[11].mxu1 }
 0xa64   : > { %v7649_v35 = vpop.f32.mrb[12].mxu1 }
 0xa65   : > { %v7650_v26 = vadd.f32 %v7649_v35, %v7538_v44  ;;  %v7651_v25 = vpop.f32.mrb[13].mxu1 }
 0xa66   : > { %v7652_v38 = vpop.f32.mrb[14].mxu1 }
 0xa67   : > { %v7653_v23 = vadd.f32 %v7652_v38, %v7541_v59  ;;  %v7654_v32 = vpop.f32.mrb[15].mxu1 }
 0xa80   : > { %v7771_v58 = vpop.f32.mrb[16].mxu1 }
 0xa81   : > { %v7786_v22 = vadd.f32 %v7771_v58, %v7642_v56  ;;  %v7773_v6 = vpop.f32.mrb[17].mxu1 }
 0xa82   : > { %v7774_v8 = vpop.f32.mrb[18].mxu1 }
 0xa83   : > { %v7787_v52 = vadd.f32 %v7774_v8, %v7645_v11  ;;  %v7776_v4 = vpop.f32.mrb[19].mxu1 }
 0xa88   : > { %v7779_v39 = vpop.f32.mrb[20].mxu1 }
 0xa89   : > { %v7788_v16 = vadd.f32 %v7779_v39, %v7650_v26  ;;  %v7781_v37 = vpop.f32.mrb[21].mxu1 }
 0xa8a   : > { %v7782_v48 = vpop.f32.mrb[22].mxu1 }
 0xa8b   : > { %v7789_v42 = vadd.f32 %v7782_v48, %v7653_v23  ;;  %v7784_v21 = vpop.f32.mrb[23].mxu1 }
 0xaa4   : > { %v7905_v9 = vpop.f32.mrb[24].mxu1 }
 0xaa5   : > { %v7920_v24 = vadd.f32 %v7905_v9, %v7786_v22  ;;  %v7907_v1 = vpop.f32.mrb[25].mxu1 }
 0xaa6   : > { %v7908_v43 = vpop.f32.mrb[26].mxu1 }
 0xaa7   : > { %v7931_v60 = vadd.f32 %v8793_v57, %v7920_v24  ;;  %v7921_v27 = vadd.f32 %v7908_v43, %v7787_v52  ;;  %v7910_v53 = vpop.f32.mrb[27].mxu1 }
 0xaa9   : > { %v7932_v20 = vadd.f32 %v8793_v57, %v7921_v27  ;;  %v7935_v36 = vmax.f32 %v7931_v60, 0.0 }
 0xaab   : > { %v7936_v62 = vmax.f32 %v7932_v20, 0.0 }
 0xaac   : > { %v7913_v54 = vpop.f32.mrb[28].mxu1 }
 0xaad   : > { %v7940_v3 = vpack.c.bf16 %v7936_v62, %v7935_v36  ;;  %v7922_v30 = vadd.f32 %v7913_v54, %v7788_v16  ;;  %v7915_v28 = vpop.f32.mrb[29].mxu1 }
 0xaae   : > { %v7916_v33 = vpop.f32.mrb[30].mxu1 }
 0xaaf   : > { %v7933_v40 = vadd.f32 %v8793_v57, %v7922_v30  ;;  %v7923_v10 = vadd.f32 %v7916_v33, %v7789_v42  ;;  %v7918_v51 = vpop.f32.mrb[31].mxu1  ;;  %v7957_v31 = vsel %vm7952_vm8, %v7940_v3, 0 }
 0xab0   : > { %8802 = vmatpush3.bf16.xpose.msra.mxu1 %v7957_v31 }
 0xab1   : > { %v7934_v13 = vadd.f32 %v8793_v57, %v7923_v10  ;;  %8803 = vmatprep.subr.bf16.mxu1 %v10475_v2  ;;  %v7937_v46 = vmax.f32 %v7933_v40, 0.0 }
 0xab3   : > { %v7938_v5 = vmax.f32 %v7934_v13, 0.0 }
 0xab5   : > { %v7941_v15 = vpack.c.bf16 %v7938_v5, %v7937_v46 }
 0xab7   : > { %v7960_v0 = vsel %vm7952_vm8, %v7941_v15, 0 }
 0xab8   : > { %8804 = vmatpush3.bf16.xpose.msra.mxu1 %v7960_v0 }
 0xabf   : > { %8806 = vmatmul.mubr.msk.bf16.vlgmr.msra.gmra.mrb[32].mxu1 %vm7952_vm8, %v7939_v34 }
 0xb92   : > { %v7996_v49 = vpop.f32.mrb[32].mxu1 }
 0xb93   : > { %v7997_v17 = vadd.f32 %v7996_v49, %v7951_v50  ;;  %v8807_v29 = vpop.f32.mrb[33].mxu1 }
 0xb94   : > { %v7999_v2 = vpop.f32.mrb[34].mxu1 }
 0xb95   : > { %v8795_v63 = vmul.f32 -1.442695, %v7997_v17  ;;  %v8808_v45 = vpop.f32.mrb[35].mxu1 }
 0xb97   : > { %10458 = vpow2.f32 %v8795_v63 }
 0xba1   : > { %v10459_v55 = vpop.eup %10458 }
 0xba2   : > { %v8005_v44 = vadd.f32 1.0, %v10459_v55 }
 0xba4   : > { %10460 = vrcp.f32 %v8005_v44 }
 0xbae   : > { %v10461_v61 = vpop.eup %10460 }
 0xbaf   : > { %8009 = vst.msk [vmem:[%s330_s20] sm:$0x1] %vm8008_vm9, %v10461_v61 }
 0xbb0 PF: > { %s21_s11 = sadd.s32 1, %s10470_s11  }
 0xbb1   : > { %p18_p4 = scmp.ge.s32.totalorder %s21_s11, 4  }
 0xbb3   :  { %20 = sbr.rel (!%p18_p4) target bundleno = 3 (0x3), region = 97 }

</bundles_post_ra>
